<compile_context>
chip_gen: v7x
topology: tpu7x:2x2x1
jax: 0.10.0
libtpu: 0.0.40
codegen_flags: <defaults>
</compile_context>

<pallas_src>
import functools

import jax
import jax.numpy as jnp
from jax.experimental import pallas as pl
from jax.experimental.pallas import tpu as pltpu


# ----------------------------- Pallas kernels ------------------------------ #

def _conv_bias_leaky_kernel(x_ref, w_ref, b_ref, o_ref):
    """One M-tile of conv1-as-matmul (bf16 in, f32 acc) + bias + LeakyReLU(0.2) -> bf16."""
    y = jnp.dot(x_ref[...], w_ref[...], preferred_element_type=jnp.float32)
    y = y + b_ref[...]
    o_ref[...] = jnp.where(y > 0, y, 0.2 * y).astype(o_ref.dtype)


def conv_bias_leaky(x, w, b, *, tm):
    """x: [M, K] bf16, w: [K, N] bf16, b: [1, N] f32 -> [M, N] bf16 (N lane-dense)."""
    M, K = x.shape
    _, N = w.shape
    return pl.pallas_call(
        _conv_bias_leaky_kernel,
        out_shape=jax.ShapeDtypeStruct((M, N), jnp.bfloat16),
        grid_spec=pltpu.PrefetchScalarGridSpec(
            num_scalar_prefetch=0,
            grid=(M // tm,),
            in_specs=[
                pl.BlockSpec((tm, K), lambda i: (i, 0)),
                pl.BlockSpec((K, N), lambda i: (0, 0)),
                pl.BlockSpec((1, N), lambda i: (0, 0)),
            ],
            out_specs=pl.BlockSpec((tm, N), lambda i: (i, 0)),
        ),
        compiler_params=pltpu.CompilerParams(
            dimension_semantics=("parallel",)),
    )(x, w, b)


def _conv_bn_leaky_kernel(x_ref, w_ref, gamma_ref, beta_ref, o_ref, *, eps):
    """One C-tile: matmul (bf16->f32) + BatchNorm(batch stats) + LeakyReLU -> bf16.

    X block is the full [M, K] patch matrix, so the per-channel batch stats below use the
    true batch (inv_m = 1/M) and the C-tiling stays numerically exact.
    """
    y = jnp.dot(x_ref[...], w_ref[...], preferred_element_type=jnp.float32)  # [M, tc]
    inv_m = jnp.float32(1.0 / y.shape[0])
    mean = jnp.sum(y, axis=0, keepdims=True) * inv_m                     # [1, tc]
    centered = y - mean
    var = jnp.sum(centered * centered, axis=0, keepdims=True) * inv_m    # biased var
    z = centered * (gamma_ref[...] * jax.lax.rsqrt(var + eps)) + beta_ref[...]
    o_ref[...] = jnp.where(z > 0, z, 0.2 * z).astype(o_ref.dtype)


def conv_bn_leaky(x, w, gamma, beta, *, tc=128, eps=1e-5):
    """x: [M, K] bf16, w: [K, C] bf16, gamma/beta: [1, C] f32 -> [M, C] bf16."""
    M, K = x.shape
    _, C = w.shape
    kernel = functools.partial(_conv_bn_leaky_kernel, eps=eps)
    return pl.pallas_call(
        kernel,
        out_shape=jax.ShapeDtypeStruct((M, C), jnp.bfloat16),
        grid_spec=pltpu.PrefetchScalarGridSpec(
            num_scalar_prefetch=0,
            grid=(C // tc,),
            in_specs=[
                pl.BlockSpec((M, K), lambda j: (0, 0)),   # resident patch matrix
                pl.BlockSpec((K, tc), lambda j: (0, j)),  # streamed weight columns
                pl.BlockSpec((1, tc), lambda j: (0, j)),
                pl.BlockSpec((1, tc), lambda j: (0, j)),
            ],
            out_specs=pl.BlockSpec((M, tc), lambda j: (0, j)),
        ),
        compiler_params=pltpu.CompilerParams(
            dimension_semantics=("parallel",),
            vmem_limit_bytes=32 * 1024 * 1024),
    )(x, w, gamma, beta)


def _conv4_conv5_kernel(x_ref, w_ref, gamma_ref, beta_ref, w5_ref, b5_ref,
                        o_ref, acc_ref, *, eps, batch):
    """conv4 C-tile (matmul + BN + LeakyReLU) fused with the conv5 dot, bias and sigmoid.

    Per C step the post-activation tile z [M, tc] is immediately contracted against the
    matching conv5 weight columns (w5_ref, already tiled per image row) and accumulated
    into acc_ref [M, 1].  The conv4 activation is never written to HBM.  The last step
    reduces the 4x4 spatial rows of each image, adds the conv5 bias and applies sigmoid.
    """
    j = pl.program_id(0)
    y = jnp.dot(x_ref[...], w_ref[...], preferred_element_type=jnp.float32)  # [M, tc]
    inv_m = jnp.float32(1.0 / y.shape[0])
    mean = jnp.sum(y, axis=0, keepdims=True) * inv_m
    centered = y - mean
    var = jnp.sum(centered * centered, axis=0, keepdims=True) * inv_m
    z = centered * (gamma_ref[...] * jax.lax.rsqrt(var + eps)) + beta_ref[...]
    z = jnp.where(z > 0, z, 0.2 * z)                                         # [M, tc] f32

    partial = jnp.sum(z * w5_ref[...], axis=1, keepdims=True)                # [M, 1]

    @pl.when(j == 0)
    def _():
        acc_ref[...] = jnp.zeros_like(acc_ref)

    acc_ref[...] += partial

    @pl.when(j == pl.num_programs(0) - 1)
    def _():
        spatial = acc_ref.shape[0] // batch          # 16 spatial positions per image
        for n in range(batch):                       # static, tiny
            s = jnp.sum(acc_ref[n * spatial:(n + 1) * spatial, :],
                        axis=0, keepdims=True)       # [1, 1]
            y5 = s + b5_ref[...]
            o_ref[n:n + 1, :] = 1.0 / (1.0 + jnp.exp(-y5))


def conv4_bn_leaky_conv5_sigmoid(x, w, gamma, beta, w5_tiled, b5, *, batch,
                                 tc=128, eps=1e-5):
    """x: [M, K] bf16, w: [K, C] bf16, w5_tiled: [M, C] f32, b5: [1,1] f32 -> [batch, 1] f32."""
    M, K = x.shape
    _, C = w.shape
    kernel = functools.partial(_conv4_conv5_kernel, eps=eps, batch=batch)
    return pl.pallas_call(
        kernel,
        out_shape=jax.ShapeDtypeStruct((batch, 1), jnp.float32),
        grid_spec=pltpu.PrefetchScalarGridSpec(
            num_scalar_prefetch=0,
            grid=(C // tc,),
            in_specs=[
                pl.BlockSpec((M, K), lambda j: (0, 0)),
                pl.BlockSpec((K, tc), lambda j: (0, j)),
                pl.BlockSpec((1, tc), lambda j: (0, j)),
                pl.BlockSpec((1, tc), lambda j: (0, j)),
                pl.BlockSpec((M, tc), lambda j: (0, j)),
                pl.BlockSpec((1, 1), lambda j: (0, 0)),
            ],
            out_specs=pl.BlockSpec((batch, 1), lambda j: (0, 0)),
            scratch_shapes=[pltpu.VMEM((M, 1), jnp.float32)],
        ),
        compiler_params=pltpu.CompilerParams(
            dimension_semantics=("arbitrary",),   # accumulator across the C axis
            vmem_limit_bytes=32 * 1024 * 1024),
    )(x, w, gamma, beta, w5_tiled, b5)


# ----------------------------- JAX glue ------------------------------------ #

def im2col(x_nhwc, k, stride, pad):
    # Runs on bf16 activations, so the duplicated patch matrix is half the bytes of the
    # previous f32 version and no separate astype is needed before the matmul.
    # TODO(synk): move patch extraction into the kernels (memory_space=pl.ANY + strided
    # DMA per output tile) to avoid materializing the k*k-duplicated matrix in HBM at all.
    N, H, W, C = x_nhwc.shape
    xp = jnp.pad(x_nhwc, ((0, 0), (pad, pad), (pad, pad), (0, 0)))
    Ho = (H + 2 * pad - k) // stride + 1
    Wo = (W + 2 * pad - k) // stride + 1
    cols = []
    for dh in range(k):
        for dw in range(k):
            cols.append(xp[:, dh:dh + stride * Ho:stride,
                           dw:dw + stride * Wo:stride, :])
    p = jnp.stack(cols, axis=3)                 # [N, Ho, Wo, k*k, C]
    return p.reshape(N * Ho * Wo, k * k * C), (N, Ho, Wo)


def _pick_m_tile(M):
    """Largest tile dividing M that still leaves >=4 (else >=2) grid steps for pipelining."""
    for min_blocks in (4, 2):
        for t in (512, 256, 128, 64, 32, 16, 8):
            if M % t == 0 and M // t >= min_blocks:
                return t
    return M   # tiny / odd M: single full-extent block (always a legal block shape)


def init_params(key):
    conv_shapes = [(4, 4, 3, 64), (4, 4, 64, 128), (4, 4, 128, 256),
                   (4, 4, 256, 512), (4, 4, 512, 1)]
    params = {}
    for i, s in enumerate(conv_shapes, 1):
        key, k1, k2 = jax.random.split(key, 3)
        fan_in = s[0] * s[1] * s[2]
        params[f"w{i}"] = (jax.random.normal(k1, s, jnp.float32)
                           / jnp.sqrt(jnp.float32(fan_in)))
        params[f"b{i}"] = jax.random.normal(k2, (s[3],), jnp.float32) * 0.01
    for i, c in [(2, 128), (3, 256), (4, 512)]:      # PyTorch BN default init
        params[f"gamma{i}"] = jnp.ones((c,), jnp.float32)
        params[f"beta{i}"] = jnp.zeros((c,), jnp.float32)
    return params


def discriminator_forward(params, x_nchw):
    x = jnp.transpose(x_nchw, (0, 2, 3, 1)).astype(jnp.bfloat16)   # NCHW -> NHWC, bf16 once

    # conv1 + LeakyReLU.  Pixel-pair trick: two adjacent output pixels per matmul row via a
    # block-diagonal [96, 128] weight -> lane-dense 128-wide bf16 output (unmasked stores),
    # byte-identical row-major to the [M, 64] layout, so a plain reshape recovers NHWC.
    X, (N, Ho, Wo) = im2col(x, 4, 2, 1)                  # [M, 48] bf16
    Xp = X.reshape(X.shape[0] // 2, 2 * X.shape[1])      # [M/2, 96]
    W1 = params["w1"].reshape(-1, 64)
    z48 = jnp.zeros_like(W1)
    W1p = jnp.concatenate(
        [jnp.concatenate([W1, z48], axis=1),
         jnp.concatenate([z48, W1], axis=1)], axis=0).astype(jnp.bfloat16)   # [96, 128]
    b1p = jnp.concatenate([params["b1"], params["b1"]]).reshape(1, -1)
    Yp = conv_bias_leaky(Xp, W1p, b1p, tm=_pick_m_tile(Xp.shape[0]))         # [M/2, 128] bf16
    x = Yp.reshape(N, Ho, Wo, 64)

    # conv{2,3} + BatchNorm (training-mode batch stats) + LeakyReLU, C-tiled (tc=128).
    # Conv bias (b2/b3) is skipped — BN's mean subtraction cancels a per-channel constant.
    for i in (2, 3):
        X, (N, Ho, Wo) = im2col(x, 4, 2, 1)
        Wm = params[f"w{i}"].reshape(-1, params[f"w{i}"].shape[-1]).astype(jnp.bfloat16)
        Y = conv_bn_leaky(X, Wm,
                          params[f"gamma{i}"].reshape(1, -1),
                          params[f"beta{i}"].reshape(1, -1))
        x = Y.reshape(N, Ho, Wo, -1)

    # conv4 + BN + LeakyReLU fused with conv5 + bias + Sigmoid.  conv5 over a 4x4 map with
    # k=4/stride 1/no pad is one 8192-length dot per image, so its weight is presented as
    # [spatial=16, 512] tiled per image row; the kernel accumulates the partial dot across
    # C tiles and finalizes on the last step.  conv4's [M, 512] activation never hits HBM.
    X, (N, Ho, Wo) = im2col(x, 4, 2, 1)                  # [N*16, 4096] bf16
    W4 = params["w4"].reshape(-1, 512).astype(jnp.bfloat16)
    w5_sp = params["w5"].reshape(16, 512)                # (kh*kw, cin) order, Cout=1
    w5_tiled = jnp.tile(w5_sp, (N, 1))                   # [N*16, 512] f32
    out = conv4_bn_leaky_conv5_sigmoid(
        X, W4,
        params["gamma4"].reshape(1, -1), params["beta4"].reshape(1, -1),
        w5_tiled, params["b5"].reshape(1, 1), batch=N)   # [N, 1] f32
    return out.reshape(N, 1, 1, 1)                       # NCHW (N, 1, 1, 1)


if __name__ == "__main__":
    key = jax.random.PRNGKey(0)
    pkey, xkey = jax.random.split(key)
    params = init_params(pkey)
    # DCGAN discriminator requires 64x64 spatial input (conv5: k=4, stride=1, no pad).
    x = jax.random.normal(xkey, (2, 3, 64, 64), jnp.float32)

    out = jax.jit(discriminator_forward)(params, x)
    out = jax.block_until_ready(out)

    assert out.shape == (2, 1, 1, 1), out.shape
    assert out.dtype == jnp.float32
    assert bool(jnp.all((out >= 0.0) & (out <= 1.0)))
    print("KERNEL_OK")
</pallas_src>

<mosaic_0001>
module attributes {stable_mosaic.version = 11 : i64} {
  func.func @_conv_bias_leaky_kernel(%arg0: i32, %arg1: memref<256x96xbf16, #tpu.memory_space<vmem>>, %arg2: memref<96x128xbf16, #tpu.memory_space<vmem>>, %arg3: memref<1x128xf32, #tpu.memory_space<vmem>>, %arg4: memref<256x128xbf16, #tpu.memory_space<vmem>>) attributes {dimension_semantics = [#tpu.dimension_semantics<parallel>], iteration_bounds = array<i64: 4>, scalar_prefetch = 0 : i64, scratch_operands = 0 : i64, tpu.core_type = #tpu.core_type<tc>, window_params = [{transform_indices = @transform_0, window_bounds = array<i64: 256, 96>}, {pipeline_mode = #tpu.pipeline_mode<synchronous>, transform_indices = @transform_1, window_bounds = array<i64: 96, 128>}, {pipeline_mode = #tpu.pipeline_mode<synchronous>, transform_indices = @transform_2, window_bounds = array<i64: 1, 128>}, {transform_indices = @transform_3, window_bounds = array<i64: 256, 128>}]} {
    %c0 = arith.constant 0 : index
    %c0_0 = arith.constant 0 : index
    %0 = vector.load %arg1[%c0, %c0_0] : memref<256x96xbf16, #tpu.memory_space<vmem>>, vector<256x96xbf16>
    %c0_1 = arith.constant 0 : index
    %c0_2 = arith.constant 0 : index
    %1 = vector.load %arg2[%c0_1, %c0_2] : memref<96x128xbf16, #tpu.memory_space<vmem>>, vector<96x128xbf16>
    %cst = arith.constant dense<0.000000e+00> : vector<256x128xf32>
    %2 = tpu.matmul %0, %1, %cst {dimension_numbers = #tpu.dot_dimension_numbers<[1], [0], [0], [1], [0, 0, 1, 1], [], []>} : vector<256x96xbf16>, vector<96x128xbf16>, vector<256x128xf32> -> vector<256x128xf32>
    %c0_3 = arith.constant 0 : index
    %c0_4 = arith.constant 0 : index
    %3 = vector.load %arg3[%c0_3, %c0_4] : memref<1x128xf32, #tpu.memory_space<vmem>>, vector<1x128xf32>
    %4 = vector.broadcast %3 : vector<1x128xf32> to vector<256x128xf32>
    %5 = arith.addf %2, %4 : vector<256x128xf32>
    %cst_5 = arith.constant 0.000000e+00 : f32
    %6 = vector.broadcast %cst_5 : f32 to vector<256x128xf32>
    %7 = arith.cmpf ogt, %5, %6 : vector<256x128xf32>
    %cst_6 = arith.constant 2.000000e-01 : f32
    %8 = vector.broadcast %cst_6 : f32 to vector<256x128xf32>
    %9 = arith.mulf %8, %5 : vector<256x128xf32>
    %10 = arith.select %7, %5, %9 : vector<256x128xi1>, vector<256x128xf32>
    %11 = arith.truncf %10 : vector<256x128xf32> to vector<256x128xbf16>
    %c0_7 = arith.constant 0 : index
    %c0_8 = arith.constant 0 : index
    %12 = vector.load %arg4[%c0_7, %c0_8] : memref<256x128xbf16, #tpu.memory_space<vmem>>, vector<256x128xbf16>
    tpu.vector_store %arg4[%c0_7, %c0_8], %11 {strides = array<i32>} : memref<256x128xbf16, #tpu.memory_space<vmem>>, vector<256x128xbf16>,
    return
  }
  func.func @transform_0(%arg0: i32) -> (i32, i32) {
    %c0_i32 = arith.constant 0 : i32
    %c0_i32_0 = arith.constant 0 : i32
    return %arg0, %c0_i32 : i32, i32
  }
  func.func @transform_1(%arg0: i32) -> (i32, i32) {
    %c0_i32 = arith.constant 0 : i32
    %c0_i32_0 = arith.constant 0 : i32
    %c0_i32_1 = arith.constant 0 : i32
    return %c0_i32, %c0_i32_0 : i32, i32
  }
  func.func @transform_2(%arg0: i32) -> (i32, i32) {
    %c0_i32 = arith.constant 0 : i32
    %c0_i32_0 = arith.constant 0 : i32
    %c0_i32_1 = arith.constant 0 : i32
    return %c0_i32, %c0_i32_0 : i32, i32
  }
  func.func @transform_3(%arg0: i32) -> (i32, i32) {
    %c0_i32 = arith.constant 0 : i32
    %c0_i32_0 = arith.constant 0 : i32
    return %arg0, %c0_i32 : i32, i32
  }
}

module attributes {stable_mosaic.version = 11 : i64} {
  func.func @_conv_bn_leaky_kernel(%arg0: i32, %arg1: memref<512x1024xbf16, #tpu.memory_space<vmem>>, %arg2: memref<1024x128xbf16, #tpu.memory_space<vmem>>, %arg3: memref<1x128xf32, #tpu.memory_space<vmem>>, %arg4: memref<1x128xf32, #tpu.memory_space<vmem>>, %arg5: memref<512x128xbf16, #tpu.memory_space<vmem>>) attributes {dimension_semantics = [#tpu.dimension_semantics<parallel>], iteration_bounds = array<i64: 1>, scalar_prefetch = 0 : i64, scratch_operands = 0 : i64, tpu.core_type = #tpu.core_type<tc>, window_params = [{pipeline_mode = #tpu.pipeline_mode<synchronous>, transform_indices = @transform_0, window_bounds = array<i64: 512, 1024>}, {transform_indices = @transform_1, window_bounds = array<i64: 1024, 128>}, {transform_indices = @transform_2, window_bounds = array<i64: 1, 128>}, {transform_indices = @transform_3, window_bounds = array<i64: 1, 128>}, {transform_indices = @transform_4, window_bounds = array<i64: 512, 128>}]} {
    %c0 = arith.constant 0 : index
    %c0_0 = arith.constant 0 : index
    %0 = vector.load %arg1[%c0, %c0_0] : memref<512x1024xbf16, #tpu.memory_space<vmem>>, vector<512x1024xbf16>
    %c0_1 = arith.constant 0 : index
    %c0_2 = arith.constant 0 : index
    %1 = vector.load %arg2[%c0_1, %c0_2] : memref<1024x128xbf16, #tpu.memory_space<vmem>>, vector<1024x128xbf16>
    %cst = arith.constant dense<0.000000e+00> : vector<512x128xf32>
    %2 = tpu.matmul %0, %1, %cst {dimension_numbers = #tpu.dot_dimension_numbers<[1], [0], [0], [1], [0, 0, 1, 1], [], []>} : vector<512x1024xbf16>, vector<1024x128xbf16>, vector<512x128xf32> -> vector<512x128xf32>
    %cst_3 = arith.constant dense<0.000000e+00> : vector<128xf32>
    %3 = vector.multi_reduction <add>, %2, %cst_3 [0] : vector<512x128xf32> to vector<128xf32>
    %4 = vector.shape_cast %3 : vector<128xf32> to vector<1x128xf32>
    %cst_4 = arith.constant 0.001953125 : f32
    %5 = vector.broadcast %cst_4 : f32 to vector<1x128xf32>
    %6 = arith.mulf %4, %5 : vector<1x128xf32>
    %7 = vector.broadcast %6 : vector<1x128xf32> to vector<512x128xf32>
    %8 = arith.subf %2, %7 : vector<512x128xf32>
    %9 = arith.mulf %8, %8 : vector<512x128xf32>
    %cst_5 = arith.constant dense<0.000000e+00> : vector<128xf32>
    %10 = vector.multi_reduction <add>, %9, %cst_5 [0] : vector<512x128xf32> to vector<128xf32>
    %11 = vector.shape_cast %10 : vector<128xf32> to vector<1x128xf32>
    %cst_6 = arith.constant 0.001953125 : f32
    %12 = vector.broadcast %cst_6 : f32 to vector<1x128xf32>
    %13 = arith.mulf %11, %12 : vector<1x128xf32>
    %c0_7 = arith.constant 0 : index
    %c0_8 = arith.constant 0 : index
    %14 = vector.load %arg3[%c0_7, %c0_8] : memref<1x128xf32, #tpu.memory_space<vmem>>, vector<1x128xf32>
    %cst_9 = arith.constant 9.99999974E-6 : f32
    %15 = vector.broadcast %cst_9 : f32 to vector<1x128xf32>
    %16 = arith.addf %13, %15 : vector<1x128xf32>
    %17 = math.rsqrt %16 : vector<1x128xf32>
    %18 = arith.mulf %14, %17 : vector<1x128xf32>
    %19 = vector.broadcast %18 : vector<1x128xf32> to vector<512x128xf32>
    %20 = arith.mulf %8, %19 : vector<512x128xf32>
    %c0_10 = arith.constant 0 : index
    %c0_11 = arith.constant 0 : index
    %21 = vector.load %arg4[%c0_10, %c0_11] : memref<1x128xf32, #tpu.memory_space<vmem>>, vector<1x128xf32>
    %22 = vector.broadcast %21 : vector<1x128xf32> to vector<512x128xf32>
    %23 = arith.addf %20, %22 : vector<512x128xf32>
    %cst_12 = arith.constant 0.000000e+00 : f32
    %24 = vector.broadcast %cst_12 : f32 to vector<512x128xf32>
    %25 = arith.cmpf ogt, %23, %24 : vector<512x128xf32>
    %cst_13 = arith.constant 2.000000e-01 : f32
    %26 = vector.broadcast %cst_13 : f32 to vector<512x128xf32>
    %27 = arith.mulf %26, %23 : vector<512x128xf32>
    %28 = arith.select %25, %23, %27 : vector<512x128xi1>, vector<512x128xf32>
    %29 = arith.truncf %28 : vector<512x128xf32> to vector<512x128xbf16>
    %c0_14 = arith.constant 0 : index
    %c0_15 = arith.constant 0 : index
    %30 = vector.load %arg5[%c0_14, %c0_15] : memref<512x128xbf16, #tpu.memory_space<vmem>>, vector<512x128xbf16>
    tpu.vector_store %arg5[%c0_14, %c0_15], %29 {strides = array<i32>} : memref<512x128xbf16, #tpu.memory_space<vmem>>, vector<512x128xbf16>,
    return
  }
  func.func @transform_0(%arg0: i32) -> (i32, i32) {
    %c0_i32 = arith.constant 0 : i32
    %c0_i32_0 = arith.constant 0 : i32
    %c0_i32_1 = arith.constant 0 : i32
    return %c0_i32, %c0_i32_0 : i32, i32
  }
  func.func @transform_1(%arg0: i32) -> (i32, i32) {
    %c0_i32 = arith.constant 0 : i32
    %c0_i32_0 = arith.constant 0 : i32
    return %c0_i32, %arg0 : i32, i32
  }
  func.func @transform_2(%arg0: i32) -> (i32, i32) {
    %c0_i32 = arith.constant 0 : i32
    %c0_i32_0 = arith.constant 0 : i32
    return %c0_i32, %arg0 : i32, i32
  }
  func.func @transform_3(%arg0: i32) -> (i32, i32) {
    %c0_i32 = arith.constant 0 : i32
    %c0_i32_0 = arith.constant 0 : i32
    return %c0_i32, %arg0 : i32, i32
  }
  func.func @transform_4(%arg0: i32) -> (i32, i32) {
    %c0_i32 = arith.constant 0 : i32
    %c0_i32_0 = arith.constant 0 : i32
    return %c0_i32, %arg0 : i32, i32
  }
}

module attributes {stable_mosaic.version = 11 : i64} {
  func.func @_conv_bn_leaky_kernel(%arg0: i32, %arg1: memref<128x2048xbf16, #tpu.memory_space<vmem>>, %arg2: memref<2048x128xbf16, #tpu.memory_space<vmem>>, %arg3: memref<1x128xf32, #tpu.memory_space<vmem>>, %arg4: memref<1x128xf32, #tpu.memory_space<vmem>>, %arg5: memref<128x128xbf16, #tpu.memory_space<vmem>>) attributes {dimension_semantics = [#tpu.dimension_semantics<parallel>], iteration_bounds = array<i64: 2>, scalar_prefetch = 0 : i64, scratch_operands = 0 : i64, tpu.core_type = #tpu.core_type<tc>, window_params = [{pipeline_mode = #tpu.pipeline_mode<synchronous>, transform_indices = @transform_0, window_bounds = array<i64: 128, 2048>}, {transform_indices = @transform_1, window_bounds = array<i64: 2048, 128>}, {transform_indices = @transform_2, window_bounds = array<i64: 1, 128>}, {transform_indices = @transform_3, window_bounds = array<i64: 1, 128>}, {transform_indices = @transform_4, window_bounds = array<i64: 128, 128>}]} {
    %c0 = arith.constant 0 : index
    %c0_0 = arith.constant 0 : index
    %0 = vector.load %arg1[%c0, %c0_0] : memref<128x2048xbf16, #tpu.memory_space<vmem>>, vector<128x2048xbf16>
    %c0_1 = arith.constant 0 : index
    %c0_2 = arith.constant 0 : index
    %1 = vector.load %arg2[%c0_1, %c0_2] : memref<2048x128xbf16, #tpu.memory_space<vmem>>, vector<2048x128xbf16>
    %cst = arith.constant dense<0.000000e+00> : vector<128x128xf32>
    %2 = tpu.matmul %0, %1, %cst {dimension_numbers = #tpu.dot_dimension_numbers<[1], [0], [0], [1], [0, 0, 1, 1], [], []>} : vector<128x2048xbf16>, vector<2048x128xbf16>, vector<128x128xf32> -> vector<128x128xf32>
    %cst_3 = arith.constant dense<0.000000e+00> : vector<128xf32>
    %3 = vector.multi_reduction <add>, %2, %cst_3 [0] : vector<128x128xf32> to vector<128xf32>
    %4 = vector.shape_cast %3 : vector<128xf32> to vector<1x128xf32>
    %cst_4 = arith.constant 7.812500e-03 : f32
    %5 = vector.broadcast %cst_4 : f32 to vector<1x128xf32>
    %6 = arith.mulf %4, %5 : vector<1x128xf32>
    %7 = vector.broadcast %6 : vector<1x128xf32> to vector<128x128xf32>
    %8 = arith.subf %2, %7 : vector<128x128xf32>
    %9 = arith.mulf %8, %8 : vector<128x128xf32>
    %cst_5 = arith.constant dense<0.000000e+00> : vector<128xf32>
    %10 = vector.multi_reduction <add>, %9, %cst_5 [0] : vector<128x128xf32> to vector<128xf32>
    %11 = vector.shape_cast %10 : vector<128xf32> to vector<1x128xf32>
    %cst_6 = arith.constant 7.812500e-03 : f32
    %12 = vector.broadcast %cst_6 : f32 to vector<1x128xf32>
    %13 = arith.mulf %11, %12 : vector<1x128xf32>
    %c0_7 = arith.constant 0 : index
    %c0_8 = arith.constant 0 : index
    %14 = vector.load %arg3[%c0_7, %c0_8] : memref<1x128xf32, #tpu.memory_space<vmem>>, vector<1x128xf32>
    %cst_9 = arith.constant 9.99999974E-6 : f32
    %15 = vector.broadcast %cst_9 : f32 to vector<1x128xf32>
    %16 = arith.addf %13, %15 : vector<1x128xf32>
    %17 = math.rsqrt %16 : vector<1x128xf32>
    %18 = arith.mulf %14, %17 : vector<1x128xf32>
    %19 = vector.broadcast %18 : vector<1x128xf32> to vector<128x128xf32>
    %20 = arith.mulf %8, %19 : vector<128x128xf32>
    %c0_10 = arith.constant 0 : index
    %c0_11 = arith.constant 0 : index
    %21 = vector.load %arg4[%c0_10, %c0_11] : memref<1x128xf32, #tpu.memory_space<vmem>>, vector<1x128xf32>
    %22 = vector.broadcast %21 : vector<1x128xf32> to vector<128x128xf32>
    %23 = arith.addf %20, %22 : vector<128x128xf32>
    %cst_12 = arith.constant 0.000000e+00 : f32
    %24 = vector.broadcast %cst_12 : f32 to vector<128x128xf32>
    %25 = arith.cmpf ogt, %23, %24 : vector<128x128xf32>
    %cst_13 = arith.constant 2.000000e-01 : f32
    %26 = vector.broadcast %cst_13 : f32 to vector<128x128xf32>
    %27 = arith.mulf %26, %23 : vector<128x128xf32>
    %28 = arith.select %25, %23, %27 : vector<128x128xi1>, vector<128x128xf32>
    %29 = arith.truncf %28 : vector<128x128xf32> to vector<128x128xbf16>
    %c0_14 = arith.constant 0 : index
    %c0_15 = arith.constant 0 : index
    %30 = vector.load %arg5[%c0_14, %c0_15] : memref<128x128xbf16, #tpu.memory_space<vmem>>, vector<128x128xbf16>
    tpu.vector_store %arg5[%c0_14, %c0_15], %29 {strides = array<i32>} : memref<128x128xbf16, #tpu.memory_space<vmem>>, vector<128x128xbf16>,
    return
  }
  func.func @transform_0(%arg0: i32) -> (i32, i32) {
    %c0_i32 = arith.constant 0 : i32
    %c0_i32_0 = arith.constant 0 : i32
    %c0_i32_1 = arith.constant 0 : i32
    return %c0_i32, %c0_i32_0 : i32, i32
  }
  func.func @transform_1(%arg0: i32) -> (i32, i32) {
    %c0_i32 = arith.constant 0 : i32
    %c0_i32_0 = arith.constant 0 : i32
    return %c0_i32, %arg0 : i32, i32
  }
  func.func @transform_2(%arg0: i32) -> (i32, i32) {
    %c0_i32 = arith.constant 0 : i32
    %c0_i32_0 = arith.constant 0 : i32
    return %c0_i32, %arg0 : i32, i32
  }
  func.func @transform_3(%arg0: i32) -> (i32, i32) {
    %c0_i32 = arith.constant 0 : i32
    %c0_i32_0 = arith.constant 0 : i32
    return %c0_i32, %arg0 : i32, i32
  }
  func.func @transform_4(%arg0: i32) -> (i32, i32) {
    %c0_i32 = arith.constant 0 : i32
    %c0_i32_0 = arith.constant 0 : i32
    return %c0_i32, %arg0 : i32, i32
  }
}

module attributes {stable_mosaic.version = 11 : i64} {
  func.func @_conv4_conv5_kernel(%arg0: i32, %arg1: memref<32x4096xbf16, #tpu.memory_space<vmem>>, %arg2: memref<4096x128xbf16, #tpu.memory_space<vmem>>, %arg3: memref<1x128xf32, #tpu.memory_space<vmem>>, %arg4: memref<1x128xf32, #tpu.memory_space<vmem>>, %arg5: memref<32x128xf32, #tpu.memory_space<vmem>>, %arg6: memref<1x1xf32, #tpu.memory_space<vmem>>, %arg7: memref<2x1xf32, #tpu.memory_space<vmem>>, %arg8: memref<32x1xf32, #tpu.memory_space<vmem>>) attributes {dimension_semantics = [#tpu.dimension_semantics<arbitrary>], iteration_bounds = array<i64: 4>, scalar_prefetch = 0 : i64, scratch_operands = 1 : i64, tpu.core_type = #tpu.core_type<tc>, window_params = [{pipeline_mode = #tpu.pipeline_mode<synchronous>, transform_indices = @transform_0, window_bounds = array<i64: 32, 4096>}, {transform_indices = @transform_1, window_bounds = array<i64: 4096, 128>}, {transform_indices = @transform_2, window_bounds = array<i64: 1, 128>}, {transform_indices = @transform_3, window_bounds = array<i64: 1, 128>}, {transform_indices = @transform_4, window_bounds = array<i64: 32, 128>}, {pipeline_mode = #tpu.pipeline_mode<synchronous>, transform_indices = @transform_5, window_bounds = array<i64: 1, 1>}, {pipeline_mode = #tpu.pipeline_mode<synchronous>, transform_indices = @transform_6, window_bounds = array<i64: 2, 1>}]} {
    %c0 = arith.constant 0 : index
    %c0_0 = arith.constant 0 : index
    %0 = vector.load %arg1[%c0, %c0_0] : memref<32x4096xbf16, #tpu.memory_space<vmem>>, vector<32x4096xbf16>
    %c0_1 = arith.constant 0 : index
    %c0_2 = arith.constant 0 : index
    %1 = vector.load %arg2[%c0_1, %c0_2] : memref<4096x128xbf16, #tpu.memory_space<vmem>>, vector<4096x128xbf16>
    %cst = arith.constant dense<0.000000e+00> : vector<32x128xf32>
    %2 = tpu.matmul %0, %1, %cst {dimension_numbers = #tpu.dot_dimension_numbers<[1], [0], [0], [1], [0, 0, 1, 1], [], []>} : vector<32x4096xbf16>, vector<4096x128xbf16>, vector<32x128xf32> -> vector<32x128xf32>
    %cst_3 = arith.constant dense<0.000000e+00> : vector<128xf32>
    %3 = vector.multi_reduction <add>, %2, %cst_3 [0] : vector<32x128xf32> to vector<128xf32>
    %4 = vector.shape_cast %3 : vector<128xf32> to vector<1x128xf32>
    %cst_4 = arith.constant 3.125000e-02 : f32
    %5 = vector.broadcast %cst_4 : f32 to vector<1x128xf32>
    %6 = arith.mulf %4, %5 : vector<1x128xf32>
    %7 = vector.broadcast %6 : vector<1x128xf32> to vector<32x128xf32>
    %8 = arith.subf %2, %7 : vector<32x128xf32>
    %9 = arith.mulf %8, %8 : vector<32x128xf32>
    %cst_5 = arith.constant dense<0.000000e+00> : vector<128xf32>
    %10 = vector.multi_reduction <add>, %9, %cst_5 [0] : vector<32x128xf32> to vector<128xf32>
    %11 = vector.shape_cast %10 : vector<128xf32> to vector<1x128xf32>
    %cst_6 = arith.constant 3.125000e-02 : f32
    %12 = vector.broadcast %cst_6 : f32 to vector<1x128xf32>
    %13 = arith.mulf %11, %12 : vector<1x128xf32>
    %c0_7 = arith.constant 0 : index
    %c0_8 = arith.constant 0 : index
    %14 = vector.load %arg3[%c0_7, %c0_8] : memref<1x128xf32, #tpu.memory_space<vmem>>, vector<1x128xf32>
    %cst_9 = arith.constant 9.99999974E-6 : f32
    %15 = vector.broadcast %cst_9 : f32 to vector<1x128xf32>
    %16 = arith.addf %13, %15 : vector<1x128xf32>
    %17 = math.rsqrt %16 : vector<1x128xf32>
    %18 = arith.mulf %14, %17 : vector<1x128xf32>
    %19 = vector.broadcast %18 : vector<1x128xf32> to vector<32x128xf32>
    %20 = arith.mulf %8, %19 : vector<32x128xf32>
    %c0_10 = arith.constant 0 : index
    %c0_11 = arith.constant 0 : index
    %21 = vector.load %arg4[%c0_10, %c0_11] : memref<1x128xf32, #tpu.memory_space<vmem>>, vector<1x128xf32>
    %22 = vector.broadcast %21 : vector<1x128xf32> to vector<32x128xf32>
    %23 = arith.addf %20, %22 : vector<32x128xf32>
    %cst_12 = arith.constant 0.000000e+00 : f32
    %24 = vector.broadcast %cst_12 : f32 to vector<32x128xf32>
    %25 = arith.cmpf ogt, %23, %24 : vector<32x128xf32>
    %cst_13 = arith.constant 2.000000e-01 : f32
    %26 = vector.broadcast %cst_13 : f32 to vector<32x128xf32>
    %27 = arith.mulf %26, %23 : vector<32x128xf32>
    %28 = arith.select %25, %23, %27 : vector<32x128xi1>, vector<32x128xf32>
    %c0_14 = arith.constant 0 : index
    %c0_15 = arith.constant 0 : index
    %29 = vector.load %arg5[%c0_14, %c0_15] : memref<32x128xf32, #tpu.memory_space<vmem>>, vector<32x128xf32>
    %30 = arith.mulf %28, %29 : vector<32x128xf32>
    %cst_16 = arith.constant dense<0.000000e+00> : vector<32xf32>
    %31 = vector.multi_reduction <add>, %30, %cst_16 [1] : vector<32x128xf32> to vector<32xf32>
    %32 = vector.shape_cast %31 : vector<32xf32> to vector<32x1xf32>
    %c0_i32 = arith.constant 0 : i32
    %33 = arith.cmpi eq, %arg0, %c0_i32 : i32
    %34 = arith.extui %33 : i1 to i32
    %c0_i32_17 = arith.constant 0 : i32
    %35 = arith.cmpi ne, %34, %c0_i32_17 : i32
    scf.if %35 {
      %cst_23 = arith.constant 0.000000e+00 : f32
      %42 = vector.broadcast %cst_23 : f32 to vector<32x1xf32>
      %c0_24 = arith.constant 0 : index
      %c0_25 = arith.constant 0 : index
      %43 = vector.load %arg8[%c0_24, %c0_25] : memref<32x1xf32, #tpu.memory_space<vmem>>, vector<32x1xf32>
      tpu.vector_store %arg8[%c0_24, %c0_25], %42 {strides = array<i32>} : memref<32x1xf32, #tpu.memory_space<vmem>>, vector<32x1xf32>,
    } else {
    }
    %c0_18 = arith.constant 0 : index
    %c0_19 = arith.constant 0 : index
    %36 = vector.load %arg8[%c0_18, %c0_19] : memref<32x1xf32, #tpu.memory_space<vmem>>, vector<32x1xf32>
    %37 = arith.addf %36, %32 : vector<32x1xf32>
    %c0_20 = arith.constant 0 : index
    %c0_21 = arith.constant 0 : index
    %38 = vector.load %arg8[%c0_20, %c0_21] : memref<32x1xf32, #tpu.memory_space<vmem>>, vector<32x1xf32>
    tpu.vector_store %arg8[%c0_20, %c0_21], %37 {strides = array<i32>} : memref<32x1xf32, #tpu.memory_space<vmem>>, vector<32x1xf32>,
    %c3_i32 = arith.constant 3 : i32
    %39 = arith.cmpi eq, %arg0, %c3_i32 : i32
    %40 = arith.extui %39 : i1 to i32
    %c0_i32_22 = arith.constant 0 : i32
    %41 = arith.cmpi ne, %40, %c0_i32_22 : i32
    scf.if %41 {
      %c0_23 = arith.constant 0 : index
      %c0_24 = arith.constant 0 : index
      %42 = vector.load %arg8[%c0_23, %c0_24] : memref<32x1xf32, #tpu.memory_space<vmem>>, vector<16x1xf32>
      %cst_25 = arith.constant dense<0.000000e+00> : vector<1xf32>
      %43 = vector.multi_reduction <add>, %42, %cst_25 [0] : vector<16x1xf32> to vector<1xf32>
      %44 = vector.shape_cast %43 : vector<1xf32> to vector<1x1xf32>
      %c0_26 = arith.constant 0 : index
      %c0_27 = arith.constant 0 : index
      %45 = vector.load %arg6[%c0_26, %c0_27] : memref<1x1xf32, #tpu.memory_space<vmem>>, vector<1x1xf32>
      %46 = arith.addf %44, %45 : vector<1x1xf32>
      %cst_28 = arith.constant 0.000000e+00 : f32
      %47 = vector.broadcast %cst_28 : f32 to vector<1x1xf32>
      %48 = arith.subf %47, %46 : vector<1x1xf32>
      %49 = math.exp %48 : vector<1x1xf32>
      %cst_29 = arith.constant 1.000000e+00 : f32
      %50 = vector.broadcast %cst_29 : f32 to vector<1x1xf32>
      %51 = arith.addf %50, %49 : vector<1x1xf32>
      %cst_30 = arith.constant 1.000000e+00 : f32
      %52 = vector.broadcast %cst_30 : f32 to vector<1x1xf32>
      %53 = arith.divf %52, %51 : vector<1x1xf32>
      %c0_31 = arith.constant 0 : index
      %c0_32 = arith.constant 0 : index
      %54 = vector.load %arg7[%c0_31, %c0_32] : memref<2x1xf32, #tpu.memory_space<vmem>>, vector<1x1xf32>
      tpu.vector_store %arg7[%c0_31, %c0_32], %53 {strides = array<i32>} : memref<2x1xf32, #tpu.memory_space<vmem>>, vector<1x1xf32>,
      %c16 = arith.constant 16 : index
      %c0_33 = arith.constant 0 : index
      %55 = vector.load %arg8[%c16, %c0_33] : memref<32x1xf32, #tpu.memory_space<vmem>>, vector<16x1xf32>
      %cst_34 = arith.constant dense<0.000000e+00> : vector<1xf32>
      %56 = vector.multi_reduction <add>, %55, %cst_34 [0] : vector<16x1xf32> to vector<1xf32>
      %57 = vector.shape_cast %56 : vector<1xf32> to vector<1x1xf32>
      %c0_35 = arith.constant 0 : index
      %c0_36 = arith.constant 0 : index
      %58 = vector.load %arg6[%c0_35, %c0_36] : memref<1x1xf32, #tpu.memory_space<vmem>>, vector<1x1xf32>
      %59 = arith.addf %57, %58 : vector<1x1xf32>
      %cst_37 = arith.constant 0.000000e+00 : f32
      %60 = vector.broadcast %cst_37 : f32 to vector<1x1xf32>
      %61 = arith.subf %60, %59 : vector<1x1xf32>
      %62 = math.exp %61 : vector<1x1xf32>
      %cst_38 = arith.constant 1.000000e+00 : f32
      %63 = vector.broadcast %cst_38 : f32 to vector<1x1xf32>
      %64 = arith.addf %63, %62 : vector<1x1xf32>
      %cst_39 = arith.constant 1.000000e+00 : f32
      %65 = vector.broadcast %cst_39 : f32 to vector<1x1xf32>
      %66 = arith.divf %65, %64 : vector<1x1xf32>
      %c1 = arith.constant 1 : index
      %c0_40 = arith.constant 0 : index
      %67 = vector.load %arg7[%c1, %c0_40] : memref<2x1xf32, #tpu.memory_space<vmem>>, vector<1x1xf32>
      tpu.vector_store %arg7[%c1, %c0_40], %66 {strides = array<i32>} : memref<2x1xf32, #tpu.memory_space<vmem>>, vector<1x1xf32>,
    } else {
    }
    return
  }
  func.func @transform_0(%arg0: i32) -> (i32, i32) {
    %c0_i32 = arith.constant 0 : i32
    %c0_i32_0 = arith.constant 0 : i32
    %c0_i32_1 = arith.constant 0 : i32
    return %c0_i32, %c0_i32_0 : i32, i32
  }
  func.func @transform_1(%arg0: i32) -> (i32, i32) {
    %c0_i32 = arith.constant 0 : i32
    %c0_i32_0 = arith.constant 0 : i32
    return %c0_i32, %arg0 : i32, i32
  }
  func.func @transform_2(%arg0: i32) -> (i32, i32) {
    %c0_i32 = arith.constant 0 : i32
    %c0_i32_0 = arith.constant 0 : i32
    return %c0_i32, %arg0 : i32, i32
  }
  func.func @transform_3(%arg0: i32) -> (i32, i32) {
    %c0_i32 = arith.constant 0 : i32
    %c0_i32_0 = arith.constant 0 : i32
    return %c0_i32, %arg0 : i32, i32
  }
  func.func @transform_4(%arg0: i32) -> (i32, i32) {
    %c0_i32 = arith.constant 0 : i32
    %c0_i32_0 = arith.constant 0 : i32
    return %c0_i32, %arg0 : i32, i32
  }
  func.func @transform_5(%arg0: i32) -> (i32, i32) {
    %c0_i32 = arith.constant 0 : i32
    %c0_i32_0 = arith.constant 0 : i32
    %c0_i32_1 = arith.constant 0 : i32
    return %c0_i32, %c0_i32_0 : i32, i32
  }
  func.func @transform_6(%arg0: i32) -> (i32, i32) {
    %c0_i32 = arith.constant 0 : i32
    %c0_i32_0 = arith.constant 0 : i32
    %c0_i32_1 = arith.constant 0 : i32
    return %c0_i32, %c0_i32_0 : i32, i32
  }
}

</mosaic_0001>

<bundles_post_ra>
// kernel: discriminator_forward.4
= control target key start
LH: loop header
LB: loop body
LE: loop exit
PB: predicated region body
PF: predicated region fallthrough
CT: control target
= control target key end

     0   :  { %s1209_s12 = smov 0   ;;  %s1346_s0 = inlined_call_operand.vmem [shape: bf16[1024,96], index: 0, kind: input, shape index: {}]   ;;  %s1347_s1 = inlined_call_operand.vmem [shape: bf16[96,128], index: 1, kind: input, shape index: {}]   ;;  %s1348_s2 = inlined_call_operand.vmem [shape: f32[1,128], index: 2, kind: input, shape index: {}]   ;;  %s1349_s3 = inlined_call_operand.vmem [shape: bf16[1024,128], index: 3, kind: output, shape index: {}]  }
   0x1 LB: > { %s864_s13 = sadd.s32 4294967295, %s1187_s12   ;;  %p868_p0 = scmp.ge.s32.totalorder %s1187_s12, 1  ;;  %s1187_s12 = sphi %s1209_s12, %s13_s12  }
   0x2   : > { %p138_p1 = scmp.lt.s32.totalorder %s1187_s12, 5 }
   0x4   : > { %p139_p2 = pnand %p868_p0, %p138_p1 }
   0x5   : > { %v1159_v0 = vld [vmem:[%s1347_s1] sm:$0xff] (!%p139_p2)   ;;  %s869_s16 = sshll.u32 (!%p139_p2), %s864_s13, 5  ;;  %v1160_v1 = vld [vmem:[%s1347_s1 + $0x8] sm:$0xff] (!%p139_p2)   ;;  %v1161_v2 = vld [vmem:[%s1347_s1 + $0x10] sm:$0xff] (!%p139_p2)   ;;  %vm342_vm0 = vcmask (!%p139_p2), 785408  }
   0x6   : > { %142 = sbr.rel (%p139_p2) target bundleno = 285 (0x11d), region = 32  ;;  %p163_p3 = scmp.lt.s32.totalorder (!%p139_p2), %s869_s16, 127  ;;  %1095 = vmatprep.subr.bf16.mxu0 (!%p139_p2), %v1159_v0  ;;  %1139 = vmatprep.subr.bf16.mxu1 (!%p139_p2), %v1159_v0  ;;  %v1162_v3 = vld [vmem:[%s1347_s1 + $0x18] sm:$0xff] (!%p139_p2)   ;;  %v1163_v6 = vld [vmem:[%s1347_s1 + $0x20] sm:$0xff] (!%p139_p2)   ;;  %v1164_v7 = vld [vmem:[%s1347_s1 + $0x28] sm:$0xff] (!%p139_p2)  }
   0x7   : > { %1096 = vmatpush3.bf16.msra.mxu0 (!%p139_p2), %v1159_v0  ;;  %1145 = vmatpush3.bf16.msra.mxu1 (!%p139_p2), %v1159_v0  ;;  %v1280_v22 = vld [vmem:[%s1348_s2] ss:$0 sm:$0xff] (!%p139_p2) }
   0x8   : > { %1097 = vmatprep.subr.bf16.mxu0 (!%p139_p2), %v1160_v1  ;;  %1140 = vmatprep.subr.bf16.mxu1 (!%p139_p2), %v1160_v1 }
   0xb   : > { %1098 = vmatpush3.bf16.msra.mxu0 (!%p139_p2), %v1160_v1  ;;  %1146 = vmatpush3.bf16.msra.mxu1 (!%p139_p2), %v1160_v1 }
   0xc   : > { %1099 = vmatprep.subr.bf16.mxu0 (!%p139_p2), %v1161_v2  ;;  %1141 = vmatprep.subr.bf16.mxu1 (!%p139_p2), %v1161_v2 }
   0xd   : > { %s1351_s16 = smov (!%p163_p3, %s869_s16), 127 }
   0xe   : > { %s870_s21 = sshll.u32 %s1351_s16, 2 }
   0xf   : > { %s1237_s26 = scalar_lea.vmem %s1346_s0, %s870_s21  ;;  %1100 = vmatpush3.bf16.msra.mxu0 %v1161_v2  ;;  %1147 = vmatpush3.bf16.msra.mxu1 %v1161_v2  ;;  %s1297_s8 = scalar_lea.vmem %s1349_s3, %s870_s21 }
  0x10   : > { %v1165_v4 = vld [vmem:[%s1237_s26] sm:$0xff]   ;;  %1101 = vmatprep.subr.bf16.mxu0 %v1162_v3  ;;  %1142 = vmatprep.subr.bf16.mxu1 %v1162_v3  ;;  %v1167_v8 = vld [vmem:[%s1237_s26 + $0x8] sm:$0xff]   ;;  %v1169_v10 = vld [vmem:[%s1237_s26 + $0x10] sm:$0xff]  }
  0x11   : > { %v1166_v5 = vld [vmem:[%s1237_s26 + $0x40] sm:$0xff]   ;;  %1107 = vmatprep.mubr.msk.bf16.mxu0 %vm342_vm0, %v1165_v4  ;;  %v1168_v9 = vld [vmem:[%s1237_s26 + $0x48] sm:$0xff]   ;;  %v1170_v11 = vld [vmem:[%s1237_s26 + $0x50] sm:$0xff]  }
  0x12   : > { %1123 = vmatprep.mubr.msk.bf16.mxu1 %vm342_vm0, %v1166_v5  ;;  %v1171_v12 = vld [vmem:[%s1237_s26 + $0x18] sm:$0xff]   ;;  %v1173_v14 = vld [vmem:[%s1237_s26 + $0x20] sm:$0xff]   ;;  %v1175_v16 = vld [vmem:[%s1237_s26 + $0x28] sm:$0xff]  }
  0x13   : > { %1102 = vmatpush3.bf16.msra.mxu0 %v1162_v3  ;;  %1148 = vmatpush3.bf16.msra.mxu1 %v1162_v3  ;;  %v1172_v13 = vld [vmem:[%s1237_s26 + $0x58] sm:$0xff]   ;;  %v1174_v15 = vld [vmem:[%s1237_s26 + $0x60] sm:$0xff]   ;;  %v1176_v17 = vld [vmem:[%s1237_s26 + $0x68] sm:$0xff]  }
  0x14   : > { %1103 = vmatprep.subr.bf16.mxu0 %v1163_v6  ;;  %1143 = vmatprep.subr.bf16.mxu1 %v1163_v6  ;;  %v1177_v18 = vld [vmem:[%s1237_s26 + $0x30] sm:$0xff]   ;;  %v1179_v20 = vld [vmem:[%s1237_s26 + $0x38] sm:$0xff]  }
  0x15   : > { %v1178_v19 = vld [vmem:[%s1237_s26 + $0x70] sm:$0xff]   ;;  %v1180_v21 = vld [vmem:[%s1237_s26 + $0x78] sm:$0xff]  }
  0x17   : > { %1104 = vmatpush3.bf16.msra.mxu0 %v1163_v6  ;;  %1149 = vmatpush3.bf16.msra.mxu1 %v1163_v6 }
  0x18   : > { %1105 = vmatprep.subr.bf16.mxu0 %v1164_v7  ;;  %1144 = vmatprep.subr.bf16.mxu1 %v1164_v7 }
  0x1b   : > { %1106 = vmatpush3.bf16.msra.mxu0 %v1164_v7  ;;  %1150 = vmatpush3.bf16.msra.mxu1 %v1164_v7 }
  0x1e   : > { %1108 = vmatmul.mubr.msk.bf16.vlgmr.msra.gmra.mrb[0].mxu0 %vm342_vm0, %v1167_v8  ;;  %1124 = vmatmul.mubr.msk.bf16.vlgmr.msra.gmra.mrb[0].mxu1 %vm342_vm0, %v1168_v9 }
  0x1f   : > { %1111 = vmatprep.mubr.msk.bf16.mxu0 %vm342_vm0, %v1169_v10  ;;  %1127 = vmatprep.mubr.msk.bf16.mxu1 %vm342_vm0, %v1170_v11 }
  0x26   : > { %1112 = vmatmul.mubr.msk.bf16.gmra.mrb[4].mxu0 %vm342_vm0, %v1171_v12  ;;  %1128 = vmatmul.mubr.msk.bf16.gmra.mrb[4].mxu1 %vm342_vm0, %v1172_v13 }
  0x27   : > { %1115 = vmatprep.mubr.msk.bf16.mxu0 %vm342_vm0, %v1173_v14  ;;  %1131 = vmatprep.mubr.msk.bf16.mxu1 %vm342_vm0, %v1174_v15 }
  0x2e   : > { %1116 = vmatmul.mubr.msk.bf16.gmra.mrb[8].mxu0 %vm342_vm0, %v1175_v16  ;;  %1132 = vmatmul.mubr.msk.bf16.gmra.mrb[8].mxu1 %vm342_vm0, %v1176_v17 }
  0x2f   : > { %1119 = vmatprep.mubr.msk.bf16.mxu0 %vm342_vm0, %v1177_v18  ;;  %1135 = vmatprep.mubr.msk.bf16.mxu1 %vm342_vm0, %v1178_v19 }
  0x36   : > { %1120 = vmatmul.mubr.msk.bf16.gmra.mrb[12].mxu0 %vm342_vm0, %v1179_v20  ;;  %1136 = vmatmul.mubr.msk.bf16.gmra.mrb[12].mxu1 %vm342_vm0, %v1180_v21 }
  0xf1   : > { %v1109_v23 = vpop.f32.mrb[0].mxu0  ;;  %v1125_v24 = vpop.f32.mrb[0].mxu1 }
  0xf2   : > { %v434_v25 = vadd.f32 %v1109_v23, %v1280_v22  ;;  %v498_v26 = vadd.f32 %v1125_v24, %v1280_v22  ;;  %v425_v27 = vpop.f32.mrb[1].mxu0  ;;  %v489_v28 = vpop.f32.mrb[1].mxu1 }
  0xf3   : > { %v426_v29 = vadd.f32 %v1280_v22, %v425_v27  ;;  %v490_v30 = vadd.f32 %v1280_v22, %v489_v28  ;;  %v1110_v31 = vpop.f32.mrb[2].mxu0  ;;  %v1126_v32 = vpop.f32.mrb[2].mxu1 }
  0xf4   : > { %vm554_vm1 = vcmp.gt.f32.partialorder %v434_v25, 0.0  ;;  %v586_v33 = vmul.f32 0.2, %v434_v25  ;;  %vm570_vm2 = vcmp.gt.f32.partialorder %v498_v26, 0.0  ;;  %v602_v34 = vmul.f32 0.2, %v498_v26 }
  0xf5   : > { %vm552_vm3 = vcmp.gt.f32.partialorder %v426_v29, 0.0  ;;  %v584_v35 = vmul.f32 0.2, %v426_v29  ;;  %vm568_vm4 = vcmp.gt.f32.partialorder %v490_v30, 0.0  ;;  %v600_v36 = vmul.f32 0.2, %v490_v30 }
  0xf6   : > { %v437_v37 = vadd.f32 %v1110_v31, %v1280_v22  ;;  %v501_v38 = vadd.f32 %v1126_v32, %v1280_v22  ;;  %v428_v39 = vpop.f32.mrb[3].mxu0  ;;  %v492_v40 = vpop.f32.mrb[3].mxu1  ;;  %v618_v41 = vsel %vm554_vm1, %v434_v25, %v586_v33  ;;  %v634_v42 = vsel %vm570_vm2, %v498_v26, %v602_v34 }
  0xf7   : > { %v429_v43 = vadd.f32 %v1280_v22, %v428_v39  ;;  %v493_v44 = vadd.f32 %v1280_v22, %v492_v40  ;;  %v616_v49 = vsel %vm552_vm3, %v426_v29, %v584_v35  ;;  %v632_v50 = vsel %vm568_vm4, %v490_v30, %v600_v36 }
  0xf8   : > { %vm555_vm5 = vcmp.gt.f32.partialorder %v437_v37, 0.0  ;;  %v587_v45 = vmul.f32 0.2, %v437_v37  ;;  %vm571_vm6 = vcmp.gt.f32.partialorder %v501_v38, 0.0  ;;  %v603_v46 = vmul.f32 0.2, %v501_v38 }
  0xf9   : > { %vm553_vm7 = vcmp.gt.f32.partialorder %v429_v43, 0.0  ;;  %v585_v47 = vmul.f32 0.2, %v429_v43  ;;  %vm569_vm8 = vcmp.gt.f32.partialorder %v493_v44, 0.0  ;;  %v601_v48 = vmul.f32 0.2, %v493_v44 }
  0xfa   : > { %v619_v51 = vsel %vm555_vm5, %v437_v37, %v587_v45  ;;  %v635_v52 = vsel %vm571_vm6, %v501_v38, %v603_v46  ;;  %v1113_v53 = vpop.f32.mrb[4].mxu0  ;;  %v1129_v54 = vpop.f32.mrb[4].mxu1 }
  0xfb   : > { %v986_v55 = vpack.c.bf16 %v619_v51, %v618_v41  ;;  %v1026_v56 = vpack.c.bf16 %v635_v52, %v634_v42  ;;  %v617_v57 = vsel %vm553_vm7, %v429_v43, %v585_v47  ;;  %v633_v58 = vsel %vm569_vm8, %v493_v44, %v601_v48  ;;  %v441_v59 = vpop.f32.mrb[5].mxu0  ;;  %v505_v60 = vpop.f32.mrb[5].mxu1 }
  0xfc   : > { %v981_v61 = vpack.c.bf16 %v617_v57, %v616_v49  ;;  %v1021_v62 = vpack.c.bf16 %v633_v58, %v632_v50  ;;  %v450_v63 = vadd.f32 %v1113_v53, %v1280_v22  ;;  %v514_v0 = vadd.f32 %v1129_v54, %v1280_v22  ;;  %v1114_v1 = vpop.f32.mrb[6].mxu0  ;;  %v1130_v2 = vpop.f32.mrb[6].mxu1 }
  0xfd   : > { %1058 = vst [vmem:[%s1297_s8 + $0x8] sm:$0xff] %v986_v55   ;;  %1066 = vst [vmem:[%s1297_s8 + $0x48] sm:$0xff] %v1026_v56   ;;  %v442_v3 = vadd.f32 %v1280_v22, %v441_v59  ;;  %v506_v4 = vadd.f32 %v1280_v22, %v505_v60  ;;  %v453_v5 = vadd.f32 %v1114_v1, %v1280_v22  ;;  %v444_v7 = vpop.f32.mrb[7].mxu0  ;;  %v508_v8 = vpop.f32.mrb[7].mxu1 }
  0xfe   : > { %v517_v6 = vadd.f32 %v1130_v2, %v1280_v22  ;;  %982 = vst [vmem:[%s1297_s8] sm:$0xff] %v981_v61   ;;  %1065 = vst [vmem:[%s1297_s8 + $0x40] sm:$0xff] %v1021_v62   ;;  %vm558_vm9 = vcmp.gt.f32.partialorder %v450_v63, 0.0  ;;  %v590_v9 = vmul.f32 0.2, %v450_v63  ;;  %vm574_vm10 = vcmp.gt.f32.partialorder %v514_v0, 0.0 }
  0xff   : > { %v606_v10 = vmul.f32 0.2, %v514_v0  ;;  %vm556_vm11 = vcmp.gt.f32.partialorder %v442_v3, 0.0  ;;  %v588_v11 = vmul.f32 0.2, %v442_v3  ;;  %vm572_vm12 = vcmp.gt.f32.partialorder %v506_v4, 0.0 }
 0x100   : > { %v622_v12 = vsel %vm558_vm9, %v450_v63, %v590_v9  ;;  %v604_v13 = vmul.f32 0.2, %v506_v4  ;;  %vm559_vm13 = vcmp.gt.f32.partialorder %v453_v5, 0.0  ;;  %v591_v14 = vmul.f32 0.2, %v453_v5 }
 0x101   : > { %v638_v15 = vsel %vm574_vm10, %v514_v0, %v606_v10  ;;  %v620_v16 = vsel %vm556_vm11, %v442_v3, %v588_v11  ;;  %vm575_vm14 = vcmp.gt.f32.partialorder %v517_v6, 0.0  ;;  %v607_v17 = vmul.f32 0.2, %v517_v6  ;;  %v1117_v18 = vpop.f32.mrb[8].mxu0  ;;  %v1133_v19 = vpop.f32.mrb[8].mxu1 }
 0x102   : > { %v623_v20 = vsel %vm559_vm13, %v453_v5, %v591_v14  ;;  %v445_v21 = vadd.f32 %v1280_v22, %v444_v7  ;;  %v509_v23 = vadd.f32 %v1280_v22, %v508_v8  ;;  %v466_v24 = vadd.f32 %v1117_v18, %v1280_v22  ;;  %v457_v25 = vpop.f32.mrb[9].mxu0  ;;  %v521_v26 = vpop.f32.mrb[9].mxu1 }
 0x103   : > { %v996_v27 = vpack.c.bf16 %v623_v20, %v622_v12  ;;  %v639_v28 = vsel %vm575_vm14, %v517_v6, %v607_v17  ;;  %v530_v29 = vadd.f32 %v1133_v19, %v1280_v22  ;;  %v458_v30 = vadd.f32 %v1280_v22, %v457_v25  ;;  %v1118_v31 = vpop.f32.mrb[10].mxu0  ;;  %v1134_v32 = vpop.f32.mrb[10].mxu1 }
 0x104   : > { %v1036_v33 = vpack.c.bf16 %v639_v28, %v638_v15  ;;  %vm557_vm15 = vcmp.gt.f32.partialorder %v445_v21, 0.0  ;;  %v589_v34 = vmul.f32 0.2, %v445_v21  ;;  %vm573_vm0 = vcmp.gt.f32.partialorder %v509_v23, 0.0  ;;  %v460_v35 = vpop.f32.mrb[11].mxu0  ;;  %v524_v36 = vpop.f32.mrb[11].mxu1 }
 0x105   : > { %1060 = vst [vmem:[%s1297_s8 + $0x18] sm:$0xff] %v996_v27   ;;  %v605_v37 = vmul.f32 0.2, %v509_v23  ;;  %vm562_vm1 = vcmp.gt.f32.partialorder %v466_v24, 0.0  ;;  %v594_v38 = vmul.f32 0.2, %v466_v24  ;;  %v636_v39 = vsel %vm572_vm12, %v506_v4, %v604_v13 }
 0x106   : > { %vm578_vm2 = vcmp.gt.f32.partialorder %v530_v29, 0.0  ;;  %1068 = vst [vmem:[%s1297_s8 + $0x58] sm:$0xff] %v1036_v33   ;;  %v621_v40 = vsel %vm557_vm15, %v445_v21, %v589_v34  ;;  %v610_v41 = vmul.f32 0.2, %v530_v29  ;;  %vm560_vm3 = vcmp.gt.f32.partialorder %v458_v30, 0.0 }
 0x107   : > { %v991_v42 = vpack.c.bf16 %v621_v40, %v620_v16  ;;  %v637_v43 = vsel %vm573_vm0, %v509_v23, %v605_v37  ;;  %v592_v44 = vmul.f32 0.2, %v458_v30  ;;  %v522_v45 = vadd.f32 %v1280_v22, %v521_v26 }
 0x108   : > { %v1031_v46 = vpack.c.bf16 %v637_v43, %v636_v39  ;;  %v626_v47 = vsel %vm562_vm1, %v466_v24, %v594_v38  ;;  %v642_v48 = vsel %vm578_vm2, %v530_v29, %v610_v41  ;;  %v469_v49 = vadd.f32 %v1118_v31, %v1280_v22 }
 0x109   : > { %1059 = vst [vmem:[%s1297_s8 + $0x10] sm:$0xff] %v991_v42   ;;  %vm576_vm4 = vcmp.gt.f32.partialorder %v522_v45, 0.0  ;;  %v608_v50 = vmul.f32 0.2, %v522_v45  ;;  %v533_v51 = vadd.f32 %v1134_v32, %v1280_v22  ;;  %v461_v52 = vadd.f32 %v1280_v22, %v460_v35  ;;  %v1121_v53 = vpop.f32.mrb[12].mxu0  ;;  %v1137_v54 = vpop.f32.mrb[12].mxu1 }
 0x10a   : > { %1067 = vst [vmem:[%s1297_s8 + $0x50] sm:$0xff] %v1031_v46   ;;  %vm563_vm5 = vcmp.gt.f32.partialorder %v469_v49, 0.0  ;;  %v595_v55 = vmul.f32 0.2, %v469_v49  ;;  %v525_v56 = vadd.f32 %v1280_v22, %v524_v36  ;;  %v482_v57 = vadd.f32 %v1121_v53, %v1280_v22  ;;  %v473_v58 = vpop.f32.mrb[13].mxu0  ;;  %v537_v59 = vpop.f32.mrb[13].mxu1 }
 0x10b   : > { %v624_v60 = vsel %vm560_vm3, %v458_v30, %v592_v44  ;;  %vm579_vm6 = vcmp.gt.f32.partialorder %v533_v51, 0.0  ;;  %v611_v61 = vmul.f32 0.2, %v533_v51  ;;  %vm561_vm7 = vcmp.gt.f32.partialorder %v461_v52, 0.0  ;;  %v1122_v62 = vpop.f32.mrb[14].mxu0  ;;  %v1138_v63 = vpop.f32.mrb[14].mxu1 }
 0x10c   : > { %v627_v0 = vsel %vm563_vm5, %v469_v49, %v595_v55  ;;  %v593_v1 = vmul.f32 0.2, %v461_v52  ;;  %vm577_vm8 = vcmp.gt.f32.partialorder %v525_v56, 0.0  ;;  %v609_v2 = vmul.f32 0.2, %v525_v56  ;;  %v476_v3 = vpop.f32.mrb[15].mxu0 }
 0x10d   : > { %v640_v4 = vsel %vm576_vm4, %v522_v45, %v608_v50  ;;  %v1006_v5 = vpack.c.bf16 %v627_v0, %v626_v47  ;;  %v643_v6 = vsel %vm579_vm6, %v533_v51, %v611_v61  ;;  %v598_v7 = vmul.f32 0.2, %v482_v57  ;;  %v540_v8 = vpop.f32.mrb[15].mxu1 }
 0x10e   : > { %v1046_v9 = vpack.c.bf16 %v643_v6, %v642_v48  ;;  %v625_v10 = vsel %vm561_vm7, %v461_v52, %v593_v1  ;;  %v641_v11 = vsel %vm577_vm8, %v525_v56, %v609_v2  ;;  %v546_v12 = vadd.f32 %v1137_v54, %v1280_v22 }
 0x10f   : > { %1062 = vst [vmem:[%s1297_s8 + $0x28] sm:$0xff] %v1006_v5   ;;  %v1001_v13 = vpack.c.bf16 %v625_v10, %v624_v60  ;;  %v1041_v14 = vpack.c.bf16 %v641_v11, %v640_v4  ;;  %vm566_vm9 = vcmp.gt.f32.partialorder %v482_v57, 0.0  ;;  %v474_v15 = vadd.f32 %v1280_v22, %v473_v58 }
 0x110   : > { %1070 = vst [vmem:[%s1297_s8 + $0x68] sm:$0xff] %v1046_v9   ;;  %vm582_vm10 = vcmp.gt.f32.partialorder %v546_v12, 0.0  ;;  %v614_v16 = vmul.f32 0.2, %v546_v12  ;;  %v538_v17 = vadd.f32 %v1280_v22, %v537_v59  ;;  %v485_v18 = vadd.f32 %v1122_v62, %v1280_v22 }
 0x111   : > { %1061 = vst [vmem:[%s1297_s8 + $0x20] sm:$0xff] %v1001_v13   ;;  %1069 = vst [vmem:[%s1297_s8 + $0x60] sm:$0xff] %v1041_v14   ;;  %v596_v19 = vmul.f32 0.2, %v474_v15  ;;  %v549_v20 = vadd.f32 %v1138_v63, %v1280_v22  ;;  %v477_v21 = vadd.f32 %v1280_v22, %v476_v3  ;;  %v630_v23 = vsel %vm566_vm9, %v482_v57, %v598_v7 }
 0x112   : > { %vm564_vm11 = vcmp.gt.f32.partialorder %v474_v15, 0.0  ;;  %vm567_vm12 = vcmp.gt.f32.partialorder %v485_v18, 0.0  ;;  %v646_v24 = vsel %vm582_vm10, %v546_v12, %v614_v16  ;;  %v599_v25 = vmul.f32 0.2, %v485_v18 }
 0x113   : > { %vm583_vm13 = vcmp.gt.f32.partialorder %v549_v20, 0.0  ;;  %v615_v26 = vmul.f32 0.2, %v549_v20  ;;  %vm580_vm14 = vcmp.gt.f32.partialorder %v538_v17, 0.0  ;;  %vm565_vm15 = vcmp.gt.f32.partialorder %v477_v21, 0.0 }
 0x114   : > { %v597_v27 = vmul.f32 0.2, %v477_v21  ;;  %v541_v28 = vadd.f32 %v1280_v22, %v540_v8  ;;  %v628_v29 = vsel %vm564_vm11, %v474_v15, %v596_v19  ;;  %v612_v30 = vmul.f32 0.2, %v538_v17 }
 0x115   : > { %v631_v31 = vsel %vm567_vm12, %v485_v18, %v599_v25  ;;  %v647_v32 = vsel %vm583_vm13, %v549_v20, %v615_v26 }
 0x116   : > { %v1016_v33 = vpack.c.bf16 %v631_v31, %v630_v23  ;;  %v1056_v34 = vpack.c.bf16 %v647_v32, %v646_v24  ;;  %v629_v35 = vsel %vm565_vm15, %v477_v21, %v597_v27  ;;  %vm581_vm0 = vcmp.gt.f32.partialorder %v541_v28, 0.0 }
 0x117   : > { %v1011_v36 = vpack.c.bf16 %v629_v35, %v628_v29  ;;  %v613_v37 = vmul.f32 0.2, %v541_v28  ;;  %v644_v38 = vsel %vm580_vm14, %v538_v17, %v612_v30 }
 0x118   : > { %1064 = vst [vmem:[%s1297_s8 + $0x38] sm:$0xff] %v1016_v33   ;;  %1072 = vst [vmem:[%s1297_s8 + $0x78] sm:$0xff] %v1056_v34  }
 0x119   : > { %1063 = vst [vmem:[%s1297_s8 + $0x30] sm:$0xff] %v1011_v36   ;;  %v645_v39 = vsel %vm581_vm0, %v541_v28, %v613_v37 }
 0x11a   : > { %v1051_v40 = vpack.c.bf16 %v645_v39, %v644_v38 }
 0x11c   : > { %1071 = vst [vmem:[%s1297_s8 + $0x70] sm:$0xff] %v1051_v40  }
 0x11d PF: > { %s13_s12 = sadd.s32 1, %s1187_s12  }
 0x11e   : > { %p10_p4 = scmp.ge.s32.totalorder %s13_s12, 6  }
 0x120   :  { %12 = sbr.rel (!%p10_p4) target bundleno = 1 (0x1), region = 62 }

// kernel: discriminator_forward.5
= control target key start
LH: loop header
LB: loop body
LE: loop exit
PB: predicated region body
PF: predicated region fallthrough
CT: control target
= control target key end

     0   :  { %v5178_v0 = vmov 0   ;;  %s7879_s1 = inlined_call_operand.vmem [shape: bf16[1024,128], index: 1, kind: input, shape index: {}]   ;;  %s7880_s0 = inlined_call_operand.vmem [shape: bf16[512,1024], index: 0, kind: input, shape index: {}]   ;;  %s7881_s2 = inlined_call_operand.vmem [shape: f32[1,128], index: 2, kind: input, shape index: {}]   ;;  %s7882_s3 = inlined_call_operand.vmem [shape: f32[1,128], index: 3, kind: input, shape index: {}]   ;;  %s7883_s4 = inlined_call_operand.vmem [shape: bf16[512,128], index: 4, kind: output, shape index: {}]  }
   0x1   :  { %2066 = vmatprep.subr.bf16.mxu1 %v5178_v0  ;;  %2644 = vmatprep.subr.bf16.mxu0 %v5178_v0  ;;  %v5112_v1 = vld [vmem:[%s7879_s1] sm:$0xff]   ;;  %v5114_v3 = vld [vmem:[%s7879_s1 + $0x8] sm:$0xff]   ;;  %v5116_v5 = vld [vmem:[%s7879_s1 + $0x10] sm:$0xff]  }
   0x2   :  { %v5113_v2 = vld [vmem:[%s7879_s1 + $0x100] sm:$0xff]   ;;  %2067 = vmatpush1.bf16.msra.mxu1 %v5112_v1  ;;  %v5115_v4 = vld [vmem:[%s7879_s1 + $0x108] sm:$0xff]   ;;  %v5117_v6 = vld [vmem:[%s7879_s1 + $0x110] sm:$0xff]  }
   0x3   :  { %2645 = vmatpush1.bf16.msra.mxu0 %v5113_v2  ;;  %2068 = vmatprep.subr.bf16.mxu1 %v5178_v0  ;;  %v5118_v7 = vld [vmem:[%s7879_s1 + $0x18] sm:$0xff]   ;;  %v5120_v9 = vld [vmem:[%s7879_s1 + $0x20] sm:$0xff]   ;;  %v5122_v11 = vld [vmem:[%s7879_s1 + $0x28] sm:$0xff]  }
   0x4   :  { %2646 = vmatprep.subr.bf16.mxu0 %v5178_v0  ;;  %v5119_v8 = vld [vmem:[%s7879_s1 + $0x118] sm:$0xff]   ;;  %v5121_v10 = vld [vmem:[%s7879_s1 + $0x120] sm:$0xff]   ;;  %v5123_v12 = vld [vmem:[%s7879_s1 + $0x128] sm:$0xff]  }
   0x5   :  { %v5124_v13 = vld [vmem:[%s7879_s1 + $0x30] sm:$0xff]   ;;  %v5126_v15 = vld [vmem:[%s7879_s1 + $0x38] sm:$0xff]   ;;  %v5128_v17 = vld [vmem:[%s7879_s1 + $0x40] sm:$0xff]  }
   0x6   :  { %2069 = vmatpush1.bf16.msra.mxu1 %v5114_v3  ;;  %v5125_v14 = vld [vmem:[%s7879_s1 + $0x130] sm:$0xff]   ;;  %v5127_v16 = vld [vmem:[%s7879_s1 + $0x138] sm:$0xff]   ;;  %v5129_v18 = vld [vmem:[%s7879_s1 + $0x140] sm:$0xff]  }
   0x7   :  { %2647 = vmatpush1.bf16.msra.mxu0 %v5115_v4  ;;  %2070 = vmatprep.subr.bf16.mxu1 %v5178_v0  ;;  %v5279_v19 = vld [vmem:[%s7880_s0] sm:$0xff]  ;;  %v5289_v21 = vld [vmem:[%s7880_s0 + $0x10] sm:$0xff]  ;;  %v5130_v24 = vld [vmem:[%s7879_s1 + $0x48] sm:$0xff]  }
   0x8   :  { %2648 = vmatprep.subr.bf16.mxu0 %v5178_v0  ;;  %v5284_v20 = vld [vmem:[%s7880_s0 + $0x20] sm:$0xff]  ;;  %v5296_v23 = vld [vmem:[%s7880_s0 + $0x30] sm:$0xff]  ;;  %v5131_v26 = vld [vmem:[%s7879_s1 + $0x148] sm:$0xff]  }
   0x9   :  { %v4152_v22 = vcombine.high %v5279_v19, %v5284_v20  ;;  %v4156_v25 = vcombine.high %v5289_v21, %v5296_v23  ;;  %v5132_v27 = vld [vmem:[%s7879_s1 + $0x50] sm:$0xff]   ;;  %v5134_v29 = vld [vmem:[%s7879_s1 + $0x58] sm:$0xff]   ;;  %v5136_v31 = vld [vmem:[%s7879_s1 + $0x60] sm:$0xff]   ;;  %v4151_v42 = vcombine.low %v5279_v19, %v5284_v20  ;;  %v4155_v44 = vcombine.low %v5289_v21, %v5296_v23 }
   0xa   :  { %2071 = vmatpush1.bf16.msra.mxu1 %v5116_v5  ;;  %v5133_v28 = vld [vmem:[%s7879_s1 + $0x150] sm:$0xff]   ;;  %v5135_v30 = vld [vmem:[%s7879_s1 + $0x158] sm:$0xff]   ;;  %v5137_v32 = vld [vmem:[%s7879_s1 + $0x160] sm:$0xff]  }
   0xb   :  { %2649 = vmatpush1.bf16.msra.mxu0 %v5117_v6  ;;  %2072 = vmatprep.subr.bf16.mxu1 %v5178_v0  ;;  %v5138_v33 = vld [vmem:[%s7879_s1 + $0x68] sm:$0xff]   ;;  %v5140_v35 = vld [vmem:[%s7879_s1 + $0x70] sm:$0xff]   ;;  %v5142_v37 = vld [vmem:[%s7879_s1 + $0x78] sm:$0xff]  }
   0xc   :  { %2650 = vmatprep.subr.bf16.mxu0 %v5178_v0  ;;  %2098 = vmatprep.mubr.bf16.mxu1 %v4152_v22  ;;  %v5139_v34 = vld [vmem:[%s7879_s1 + $0x168] sm:$0xff]   ;;  %v5141_v36 = vld [vmem:[%s7879_s1 + $0x170] sm:$0xff]   ;;  %v5143_v38 = vld [vmem:[%s7879_s1 + $0x178] sm:$0xff]  }
   0xd   :  { %2676 = vmatprep.mubr.bf16.mxu0 %v4156_v25  ;;  %v26_v39 = vld [vmem:[%s7880_s0 + $0x40] sm:$0xff]  ;;  %v28_v41 = vld [vmem:[%s7880_s0 + $0x50] sm:$0xff]  ;;  %v5146_v51 = vld [vmem:[%s7879_s1 + $0x88] sm:$0xff]  }
   0xe   :  { %2073 = vmatpush1.bf16.msra.mxu1 %v5118_v7  ;;  %v30_v40 = vld [vmem:[%s7880_s0 + $0x60] sm:$0xff]  ;;  %v32_v43 = vld [vmem:[%s7880_s0 + $0x70] sm:$0xff]  ;;  %v5147_v52 = vld [vmem:[%s7879_s1 + $0x188] sm:$0xff]  }
   0xf   :  { %2651 = vmatpush1.bf16.msra.mxu0 %v5119_v8  ;;  %2074 = vmatprep.subr.bf16.mxu1 %v5178_v0  ;;  %v5144_v45 = vld [vmem:[%s7879_s1 + $0x80] sm:$0xff]   ;;  %v4160_v47 = vcombine.high %v26_v39, %v30_v40  ;;  %v4164_v48 = vcombine.high %v28_v41, %v32_v43  ;;  %v36_v53 = vld [vmem:[%s7880_s0 + $0x90] sm:$0xff]  ;;  %v4159_v55 = vcombine.low %v26_v39, %v30_v40  ;;  %v5150_v2 = vld [vmem:[%s7879_s1 + $0x98] sm:$0xff]  }
  0x10   :  { %2652 = vmatprep.subr.bf16.mxu0 %v5178_v0  ;;  %v5145_v46 = vld [vmem:[%s7879_s1 + $0x180] sm:$0xff]   ;;  %v40_v54 = vld [vmem:[%s7880_s0 + $0xb0] sm:$0xff]  ;;  %v4163_v56 = vcombine.low %v28_v41, %v32_v43  ;;  %v5151_v3 = vld [vmem:[%s7879_s1 + $0x198] sm:$0xff]  }
  0x11   :  { %v34_v49 = vld [vmem:[%s7880_s0 + $0x80] sm:$0xff]  ;;  %v4172_v58 = vcombine.high %v36_v53, %v40_v54  ;;  %v5148_v59 = vld [vmem:[%s7879_s1 + $0x90] sm:$0xff]   ;;  %v4171_v6 = vcombine.low %v36_v53, %v40_v54  ;;  %v5163_v39 = vld [vmem:[%s7879_s1 + $0x1c8] sm:$0xff]  }
  0x12   :  { %2075 = vmatpush1.bf16.msra.mxu1 %v5120_v9  ;;  %v38_v50 = vld [vmem:[%s7880_s0 + $0xa0] sm:$0xff]  ;;  %v5149_v60 = vld [vmem:[%s7879_s1 + $0x190] sm:$0xff]   ;;  %v5166_v54 = vld [vmem:[%s7879_s1 + $0xd8] sm:$0xff]  }
  0x13   :  { %2653 = vmatpush1.bf16.msra.mxu0 %v5121_v10  ;;  %2076 = vmatprep.subr.bf16.mxu1 %v5178_v0  ;;  %v4168_v57 = vcombine.high %v34_v49, %v38_v50  ;;  %v42_v61 = vld [vmem:[%s7880_s0 + $0xc0] sm:$0xff]  ;;  %v44_v63 = vld [vmem:[%s7880_s0 + $0xd0] sm:$0xff]  ;;  %v4167_v4 = vcombine.low %v34_v49, %v38_v50 }
  0x14   :  { %2654 = vmatprep.subr.bf16.mxu0 %v5178_v0  ;;  %v46_v62 = vld [vmem:[%s7880_s0 + $0xe0] sm:$0xff]  ;;  %v48_v1 = vld [vmem:[%s7880_s0 + $0xf0] sm:$0xff] }
  0x15   :  { %v5152_v5 = vld [vmem:[%s7879_s1 + $0xa0] sm:$0xff]   ;;  %v4176_v7 = vcombine.high %v42_v61, %v46_v62  ;;  %v4180_v9 = vcombine.high %v44_v63, %v48_v1  ;;  %v5156_v20 = vld [vmem:[%s7879_s1 + $0xb0] sm:$0xff]  }
  0x16   :  { %2077 = vmatpush1.bf16.msra.mxu1 %v5122_v11  ;;  %v5153_v8 = vld [vmem:[%s7879_s1 + $0x1a0] sm:$0xff]   ;;  %v5157_v21 = vld [vmem:[%s7879_s1 + $0x1b0] sm:$0xff]  }
  0x17   :  { %2655 = vmatpush1.bf16.msra.mxu0 %v5123_v12  ;;  %2078 = vmatprep.subr.bf16.mxu1 %v5178_v0  ;;  %v50_v10 = vld [vmem:[%s7880_s0 + $0x100] sm:$0xff]  ;;  %v52_v12 = vld [vmem:[%s7880_s0 + $0x110] sm:$0xff] }
  0x18   :  { %2656 = vmatprep.subr.bf16.mxu0 %v5178_v0  ;;  %v54_v11 = vld [vmem:[%s7880_s0 + $0x120] sm:$0xff]  ;;  %v60_v25 = vld [vmem:[%s7880_s0 + $0x150] sm:$0xff] }
  0x19   :  { %v58_v22 = vld [vmem:[%s7880_s0 + $0x140] sm:$0xff]  ;;  %v80_v49 = vld [vmem:[%s7880_s0 + $0x1f0] sm:$0xff] }
  0x1a   :  { %2079 = vmatpush1.bf16.msra.mxu1 %v5124_v13  ;;  %v56_v13 = vld [vmem:[%s7880_s0 + $0x130] sm:$0xff]  ;;  %v62_v23 = vld [vmem:[%s7880_s0 + $0x160] sm:$0xff] }
  0x1b   :  { %2657 = vmatpush1.bf16.msra.mxu0 %v5125_v14  ;;  %2080 = vmatprep.subr.bf16.mxu1 %v5178_v0  ;;  %v5154_v14 = vld [vmem:[%s7879_s1 + $0xa8] sm:$0xff]   ;;  %v4188_v19 = vcombine.high %v52_v12, %v56_v13  ;;  %v4191_v40 = vcombine.low %v58_v22, %v62_v23 }
  0x1c   :  { %2658 = vmatprep.subr.bf16.mxu0 %v5178_v0 }
  0x1e   :  { %2081 = vmatpush1.bf16.msra.mxu1 %v5126_v15  ;;  %v5155_v15 = vld [vmem:[%s7879_s1 + $0x1a8] sm:$0xff]  }
  0x1f   :  { %2659 = vmatpush1.bf16.msra.mxu0 %v5127_v16  ;;  %2082 = vmatprep.subr.bf16.mxu1 %v5178_v0  ;;  %v4175_v16 = vcombine.low %v42_v61, %v46_v62 }
  0x20   :  { %2660 = vmatprep.subr.bf16.mxu0 %v5178_v0 }
  0x22   :  { %2083 = vmatpush1.bf16.msra.mxu1 %v5128_v17  ;;  %v4179_v17 = vcombine.low %v44_v63, %v48_v1  ;;  %v90_v1 = vld [vmem:[%s7880_s0 + $0x240] sm:$0xff] }
  0x23   :  { %2661 = vmatpush1.bf16.msra.mxu0 %v5129_v18  ;;  %2084 = vmatprep.subr.bf16.mxu1 %v5178_v0  ;;  %v4184_v18 = vcombine.high %v50_v10, %v54_v11 }
  0x24   :  { %2662 = vmatprep.subr.bf16.mxu0 %v5178_v0 }
  0x26   :  { %2085 = vmatpush1.bf16.msra.mxu1 %v5130_v24  ;;  %v5158_v24 = vld [vmem:[%s7879_s1 + $0xb8] sm:$0xff]  }
  0x27   :  { %2663 = vmatpush1.bf16.msra.mxu0 %v5131_v26  ;;  %2086 = vmatprep.subr.bf16.mxu1 %v5178_v0  ;;  %v64_v26 = vld [vmem:[%s7880_s0 + $0x170] sm:$0xff] }
  0x28   :  { %2664 = vmatprep.subr.bf16.mxu0 %v5178_v0  ;;  %v4195_v41 = vcombine.low %v60_v25, %v64_v26 }
  0x2a   :  { %2087 = vmatpush1.bf16.msra.mxu1 %v5132_v27  ;;  %v5159_v27 = vld [vmem:[%s7879_s1 + $0x1b8] sm:$0xff]  }
  0x2b   :  { %2665 = vmatpush1.bf16.msra.mxu0 %v5133_v28  ;;  %2088 = vmatprep.subr.bf16.mxu1 %v5178_v0  ;;  %v4183_v28 = vcombine.low %v50_v10, %v54_v11  ;;  %v5169_v10 = vld [vmem:[%s7879_s1 + $0x1e0] sm:$0xff]  }
  0x2c   :  { %2666 = vmatprep.subr.bf16.mxu0 %v5178_v0  ;;  %v98_v11 = vld [vmem:[%s7880_s0 + $0x280] sm:$0xff] }
  0x2e   :  { %2089 = vmatpush1.bf16.msra.mxu1 %v5134_v29  ;;  %v4187_v29 = vcombine.low %v52_v12, %v56_v13  ;;  %v102_v12 = vld [vmem:[%s7880_s0 + $0x2a0] sm:$0xff]  ;;  %v100_v13 = vld [vmem:[%s7880_s0 + $0x290] sm:$0xff] }
  0x2f   :  { %2667 = vmatpush1.bf16.msra.mxu0 %v5135_v30  ;;  %2090 = vmatprep.subr.bf16.mxu1 %v5178_v0  ;;  %v4192_v30 = vcombine.high %v58_v22, %v62_v23  ;;  %v112_v22 = vld [vmem:[%s7880_s0 + $0x2f0] sm:$0xff]  ;;  %v4231_v23 = vcombine.low %v98_v11, %v102_v12 }
  0x30   :  { %2668 = vmatprep.subr.bf16.mxu0 %v5178_v0 }
  0x32   :  { %2091 = vmatpush1.bf16.msra.mxu1 %v5136_v31  ;;  %v4196_v31 = vcombine.high %v60_v25, %v64_v26 }
  0x33   :  { %2669 = vmatpush1.bf16.msra.mxu0 %v5137_v32  ;;  %2092 = vmatprep.subr.bf16.mxu1 %v5178_v0  ;;  %v5160_v32 = vld [vmem:[%s7879_s1 + $0xc0] sm:$0xff]  }
  0x34   :  { %2670 = vmatprep.subr.bf16.mxu0 %v5178_v0 }
  0x36   :  { %2093 = vmatpush1.bf16.msra.mxu1 %v5138_v33  ;;  %v5161_v33 = vld [vmem:[%s7879_s1 + $0x1c0] sm:$0xff]  }
  0x37   :  { %2671 = vmatpush1.bf16.msra.mxu0 %v5139_v34  ;;  %2094 = vmatprep.subr.bf16.mxu1 %v5178_v0  ;;  %v66_v34 = vld [vmem:[%s7880_s0 + $0x180] sm:$0xff] }
  0x38   :  { %2672 = vmatprep.subr.bf16.mxu0 %v5178_v0 }
  0x3a   :  { %2095 = vmatpush1.bf16.msra.mxu1 %v5140_v35  ;;  %v70_v35 = vld [vmem:[%s7880_s0 + $0x1a0] sm:$0xff] }
  0x3b   :  { %2673 = vmatpush1.bf16.msra.mxu0 %v5141_v36  ;;  %2096 = vmatprep.subr.bf16.mxu1 %v5178_v0  ;;  %v5162_v36 = vld [vmem:[%s7879_s1 + $0xc8] sm:$0xff]   ;;  %v4199_v50 = vcombine.low %v66_v34, %v70_v35 }
  0x3c   :  { %2674 = vmatprep.subr.bf16.mxu0 %v5178_v0 }
  0x3e   :  { %2097 = vmatpush1.bf16.msra.mxu1 %v5142_v37  ;;  %v68_v37 = vld [vmem:[%s7880_s0 + $0x190] sm:$0xff] }
  0x3f   :  { %2675 = vmatpush1.bf16.msra.mxu0 %v5143_v38  ;;  %2355 = vmatprep.subr.bf16.mxu1 %v5178_v0  ;;  %v72_v38 = vld [vmem:[%s7880_s0 + $0x1b0] sm:$0xff] }
  0x40   :  { %2933 = vmatprep.subr.bf16.mxu0 %v5178_v0  ;;  %v4204_v43 = vcombine.high %v68_v37, %v72_v38 }
  0x41   :  { %2099 = vmatmul.mubr.bf16.vlgmr.msra.gmra.mrb[0].mxu1 %v4151_v42  ;;  %v4200_v42 = vcombine.high %v66_v34, %v70_v35 }
  0x42   :  { %2677 = vmatmul.mubr.bf16.vlgmr.msra.gmra.mrb[0].mxu0 %v4155_v44  ;;  %2356 = vmatpush1.bf16.msra.mxu1 %v5144_v45  ;;  %v5164_v44 = vld [vmem:[%s7879_s1 + $0xd0] sm:$0xff]  }
  0x43   :  { %2934 = vmatpush1.bf16.msra.mxu0 %v5145_v46  ;;  %2106 = vmatprep.mubr.bf16.mxu1 %v4160_v47  ;;  %v5165_v45 = vld [vmem:[%s7879_s1 + $0x1d0] sm:$0xff]   ;;  %v74_v46 = vld [vmem:[%s7880_s0 + $0x1c0] sm:$0xff] }
  0x44   :  { %2684 = vmatprep.mubr.bf16.mxu0 %v4164_v48  ;;  %2357 = vmatprep.subr.bf16.mxu1 %v5178_v0  ;;  %v78_v47 = vld [vmem:[%s7880_s0 + $0x1e0] sm:$0xff]  ;;  %v76_v48 = vld [vmem:[%s7880_s0 + $0x1d0] sm:$0xff] }
  0x45   :  { %2935 = vmatprep.subr.bf16.mxu0 %v5178_v0  ;;  %v4212_v53 = vcombine.high %v76_v48, %v80_v49  ;;  %v4211_v61 = vcombine.low %v76_v48, %v80_v49  ;;  %v134_v48 = vld [vmem:[%s7880_s0 + $0x3a0] sm:$0xff]  ;;  %v132_v49 = vld [vmem:[%s7880_s0 + $0x390] sm:$0xff] }
  0x46   :  { %2358 = vmatpush1.bf16.msra.mxu1 %v5146_v51  ;;  %v4203_v51 = vcombine.low %v68_v37, %v72_v38  ;;  %v122_v37 = vld [vmem:[%s7880_s0 + $0x340] sm:$0xff] }
  0x47   :  { %2936 = vmatpush1.bf16.msra.mxu0 %v5147_v52  ;;  %2359 = vmatprep.subr.bf16.mxu1 %v5178_v0  ;;  %v4208_v52 = vcombine.high %v74_v46, %v78_v47  ;;  %v126_v38 = vld [vmem:[%s7880_s0 + $0x360] sm:$0xff] }
  0x48   :  { %2937 = vmatprep.subr.bf16.mxu0 %v5178_v0 }
  0x49   :  { %2107 = vmatmul.mubr.bf16.gmra.mrb[4].mxu1 %v4159_v55  ;;  %v5167_v55 = vld [vmem:[%s7879_s1 + $0x1d8] sm:$0xff]  }
  0x4a   :  { %2685 = vmatmul.mubr.bf16.gmra.mrb[4].mxu0 %v4163_v56  ;;  %2114 = vmatprep.mubr.bf16.mxu1 %v4168_v57  ;;  %v82_v56 = vld [vmem:[%s7880_s0 + $0x200] sm:$0xff] }
  0x4b   :  { %2692 = vmatprep.mubr.bf16.mxu0 %v4172_v58  ;;  %2360 = vmatpush1.bf16.msra.mxu1 %v5148_v59  ;;  %v86_v57 = vld [vmem:[%s7880_s0 + $0x220] sm:$0xff]  ;;  %v84_v58 = vld [vmem:[%s7880_s0 + $0x210] sm:$0xff] }
  0x4c   :  { %2938 = vmatpush1.bf16.msra.mxu0 %v5149_v60  ;;  %2361 = vmatprep.subr.bf16.mxu1 %v5178_v0  ;;  %v88_v59 = vld [vmem:[%s7880_s0 + $0x230] sm:$0xff]  ;;  %v4207_v60 = vcombine.low %v74_v46, %v78_v47  ;;  %v4216_v62 = vcombine.high %v82_v56, %v86_v57  ;;  %v130_v47 = vld [vmem:[%s7880_s0 + $0x380] sm:$0xff] }
  0x4d   :  { %2939 = vmatprep.subr.bf16.mxu0 %v5178_v0  ;;  %v4220_v63 = vcombine.high %v84_v58, %v88_v59  ;;  %v5173_v46 = vld [vmem:[%s7879_s1 + $0x1f0] sm:$0xff]  }
  0x4f   :  { %2362 = vmatpush1.bf16.msra.mxu1 %v5150_v2  ;;  %v94_v2 = vld [vmem:[%s7880_s0 + $0x260] sm:$0xff] }
  0x50   :  { %2940 = vmatpush1.bf16.msra.mxu0 %v5151_v3  ;;  %2363 = vmatprep.subr.bf16.mxu1 %v5178_v0  ;;  %v92_v3 = vld [vmem:[%s7880_s0 + $0x250] sm:$0xff] }
  0x51   :  { %2115 = vmatmul.mubr.bf16.gmra.mrb[8].mxu1 %v4167_v4  ;;  %2941 = vmatprep.subr.bf16.mxu0 %v5178_v0  ;;  %v96_v4 = vld [vmem:[%s7880_s0 + $0x270] sm:$0xff] }
  0x52   :  { %2693 = vmatmul.mubr.bf16.gmra.mrb[8].mxu0 %v4171_v6  ;;  %2122 = vmatprep.mubr.bf16.mxu1 %v4176_v7  ;;  %v4219_v6 = vcombine.low %v84_v58, %v88_v59  ;;  %v4224_v7 = vcombine.high %v90_v1, %v94_v2  ;;  %v4263_v58 = vcombine.low %v130_v47, %v134_v48 }
  0x53   :  { %2700 = vmatprep.mubr.bf16.mxu0 %v4180_v9  ;;  %2364 = vmatpush1.bf16.msra.mxu1 %v5152_v5  ;;  %v4215_v5 = vcombine.low %v82_v56, %v86_v57  ;;  %v5168_v9 = vld [vmem:[%s7879_s1 + $0xe0] sm:$0xff]   ;;  %v140_v57 = vld [vmem:[%s7880_s0 + $0x3d0] sm:$0xff] }
  0x54   :  { %2942 = vmatpush1.bf16.msra.mxu0 %v5153_v8  ;;  %2365 = vmatprep.subr.bf16.mxu1 %v5178_v0  ;;  %v4228_v8 = vcombine.high %v92_v3, %v96_v4  ;;  %v142_v56 = vld [vmem:[%s7880_s0 + $0x3e0] sm:$0xff] }
  0x55   :  { %2943 = vmatprep.subr.bf16.mxu0 %v5178_v0 }
  0x57   :  { %2366 = vmatpush1.bf16.msra.mxu1 %v5154_v14  ;;  %v104_v14 = vld [vmem:[%s7880_s0 + $0x2b0] sm:$0xff] }
  0x58   :  { %2944 = vmatpush1.bf16.msra.mxu0 %v5155_v15  ;;  %2367 = vmatprep.subr.bf16.mxu1 %v5178_v0  ;;  %v4223_v15 = vcombine.low %v90_v1, %v94_v2  ;;  %v146_v1 = vld [vmem:[%s7880_s0 + $0x400] sm:$0xff] }
  0x59   :  { %2123 = vmatmul.mubr.bf16.gmra.mrb[12].mxu1 %v4175_v16  ;;  %2945 = vmatprep.subr.bf16.mxu0 %v5178_v0  ;;  %v4227_v16 = vcombine.low %v92_v3, %v96_v4  ;;  %v150_v2 = vld [vmem:[%s7880_s0 + $0x420] sm:$0xff]  ;;  %v148_v3 = vld [vmem:[%s7880_s0 + $0x410] sm:$0xff] }
  0x5a   :  { %2701 = vmatmul.mubr.bf16.gmra.mrb[12].mxu0 %v4179_v17  ;;  %2130 = vmatprep.mubr.bf16.mxu1 %v4184_v18  ;;  %v4232_v17 = vcombine.high %v98_v11, %v102_v12  ;;  %v4236_v18 = vcombine.high %v100_v13, %v104_v14  ;;  %v152_v4 = vld [vmem:[%s7880_s0 + $0x430] sm:$0xff] }
  0x5b   :  { %2708 = vmatprep.mubr.bf16.mxu0 %v4188_v19  ;;  %2368 = vmatpush1.bf16.msra.mxu1 %v5156_v20  ;;  %v106_v19 = vld [vmem:[%s7880_s0 + $0x2c0] sm:$0xff]  ;;  %v156_v11 = vld [vmem:[%s7880_s0 + $0x450] sm:$0xff] }
  0x5c   :  { %2946 = vmatpush1.bf16.msra.mxu0 %v5157_v21  ;;  %2369 = vmatprep.subr.bf16.mxu1 %v5178_v0  ;;  %v110_v20 = vld [vmem:[%s7880_s0 + $0x2e0] sm:$0xff]  ;;  %v108_v21 = vld [vmem:[%s7880_s0 + $0x2d0] sm:$0xff] }
  0x5d   :  { %2947 = vmatprep.subr.bf16.mxu0 %v5178_v0  ;;  %v4240_v25 = vcombine.high %v106_v19, %v110_v20  ;;  %v4244_v26 = vcombine.high %v108_v21, %v112_v22  ;;  %v4243_v34 = vcombine.low %v108_v21, %v112_v22  ;;  %v160_v12 = vld [vmem:[%s7880_s0 + $0x470] sm:$0xff] }
  0x5e   :  { %v4291_v22 = vcombine.low %v156_v11, %v160_v12 }
  0x5f   :  { %2370 = vmatpush1.bf16.msra.mxu1 %v5158_v24  ;;  %v4235_v24 = vcombine.low %v100_v13, %v104_v14  ;;  %v4279_v13 = vcombine.low %v146_v1, %v150_v2  ;;  %v4283_v14 = vcombine.low %v148_v3, %v152_v4 }
  0x60   :  { %2948 = vmatpush1.bf16.msra.mxu0 %v5159_v27  ;;  %2371 = vmatprep.subr.bf16.mxu1 %v5178_v0  ;;  %v5170_v27 = vld [vmem:[%s7879_s1 + $0xe8] sm:$0xff]  }
  0x61   :  { %2131 = vmatmul.mubr.bf16.gmra.mrb[16].mxu1 %v4183_v28  ;;  %2949 = vmatprep.subr.bf16.mxu0 %v5178_v0  ;;  %v5171_v28 = vld [vmem:[%s7879_s1 + $0x1e8] sm:$0xff]  }
  0x62   :  { %2709 = vmatmul.mubr.bf16.gmra.mrb[16].mxu0 %v4187_v29  ;;  %2138 = vmatprep.mubr.bf16.mxu1 %v4192_v30  ;;  %v114_v29 = vld [vmem:[%s7880_s0 + $0x300] sm:$0xff] }
  0x63   :  { %2716 = vmatprep.mubr.bf16.mxu0 %v4196_v31  ;;  %2372 = vmatpush1.bf16.msra.mxu1 %v5160_v32  ;;  %v118_v30 = vld [vmem:[%s7880_s0 + $0x320] sm:$0xff]  ;;  %v116_v31 = vld [vmem:[%s7880_s0 + $0x310] sm:$0xff] }
  0x64   :  { %2950 = vmatpush1.bf16.msra.mxu0 %v5161_v33  ;;  %2373 = vmatprep.subr.bf16.mxu1 %v5178_v0  ;;  %v120_v32 = vld [vmem:[%s7880_s0 + $0x330] sm:$0xff]  ;;  %v4239_v33 = vcombine.low %v106_v19, %v110_v20  ;;  %v4248_v35 = vcombine.high %v114_v29, %v118_v30 }
  0x65   :  { %2951 = vmatprep.subr.bf16.mxu0 %v5178_v0  ;;  %v164_v19 = vld [vmem:[%s7880_s0 + $0x490] sm:$0xff] }
  0x66   :  { %v168_v20 = vld [vmem:[%s7880_s0 + $0x4b0] sm:$0xff] }
  0x67   :  { %2374 = vmatpush1.bf16.msra.mxu1 %v5162_v36  ;;  %v4252_v36 = vcombine.high %v116_v31, %v120_v32 }
  0x68   :  { %2952 = vmatpush1.bf16.msra.mxu0 %v5163_v39  ;;  %2375 = vmatprep.subr.bf16.mxu1 %v5178_v0  ;;  %v124_v39 = vld [vmem:[%s7880_s0 + $0x350] sm:$0xff] }
  0x69   :  { %2139 = vmatmul.mubr.bf16.gmra.mrb[20].mxu1 %v4191_v40  ;;  %2953 = vmatprep.subr.bf16.mxu0 %v5178_v0  ;;  %v128_v40 = vld [vmem:[%s7880_s0 + $0x370] sm:$0xff] }
  0x6a   :  { %2717 = vmatmul.mubr.bf16.gmra.mrb[20].mxu0 %v4195_v41  ;;  %2146 = vmatprep.mubr.bf16.mxu1 %v4200_v42  ;;  %v4247_v41 = vcombine.low %v114_v29, %v118_v30  ;;  %v4251_v42 = vcombine.low %v116_v31, %v120_v32  ;;  %v4299_v30 = vcombine.low %v164_v19, %v168_v20 }
  0x6b   :  { %2724 = vmatprep.mubr.bf16.mxu0 %v4204_v43  ;;  %2376 = vmatpush1.bf16.msra.mxu1 %v5164_v44  ;;  %v4256_v43 = vcombine.high %v122_v37, %v126_v38  ;;  %v4260_v44 = vcombine.high %v124_v39, %v128_v40 }
  0x6c   :  { %2954 = vmatpush1.bf16.msra.mxu0 %v5165_v45  ;;  %2377 = vmatprep.subr.bf16.mxu1 %v5178_v0  ;;  %v5172_v45 = vld [vmem:[%s7879_s1 + $0xf0] sm:$0xff]  }
  0x6d   :  { %2955 = vmatprep.subr.bf16.mxu0 %v5178_v0 }
  0x6f   :  { %2378 = vmatpush1.bf16.msra.mxu1 %v5166_v54 }
  0x70   :  { %2956 = vmatpush1.bf16.msra.mxu0 %v5167_v55  ;;  %2379 = vmatprep.subr.bf16.mxu1 %v5178_v0  ;;  %v138_v55 = vld [vmem:[%s7880_s0 + $0x3c0] sm:$0xff] }
  0x71   :  { %2147 = vmatmul.mubr.bf16.gmra.mrb[24].mxu1 %v4199_v50  ;;  %2957 = vmatprep.subr.bf16.mxu0 %v5178_v0  ;;  %v136_v50 = vld [vmem:[%s7880_s0 + $0x3b0] sm:$0xff] }
  0x72   :  { %2725 = vmatmul.mubr.bf16.gmra.mrb[24].mxu0 %v4203_v51  ;;  %2154 = vmatprep.mubr.bf16.mxu1 %v4208_v52  ;;  %v4255_v51 = vcombine.low %v122_v37, %v126_v38  ;;  %v4259_v52 = vcombine.low %v124_v39, %v128_v40  ;;  %v4268_v54 = vcombine.high %v132_v49, %v136_v50 }
  0x73   :  { %2732 = vmatprep.mubr.bf16.mxu0 %v4212_v53  ;;  %2380 = vmatpush1.bf16.msra.mxu1 %v5168_v9  ;;  %v4264_v53 = vcombine.high %v130_v47, %v134_v48  ;;  %v4267_v59 = vcombine.low %v132_v49, %v136_v50  ;;  %v154_v9 = vld [vmem:[%s7880_s0 + $0x440] sm:$0xff] }
  0x74   :  { %2958 = vmatpush1.bf16.msra.mxu0 %v5169_v10  ;;  %2381 = vmatprep.subr.bf16.mxu1 %v5178_v0  ;;  %v158_v10 = vld [vmem:[%s7880_s0 + $0x460] sm:$0xff] }
  0x75   :  { %2959 = vmatprep.subr.bf16.mxu0 %v5178_v0  ;;  %v4287_v21 = vcombine.low %v154_v9, %v158_v10  ;;  %v194_v49 = vld [vmem:[%s7880_s0 + $0x580] sm:$0xff] }
  0x76   :  { %v198_v50 = vld [vmem:[%s7880_s0 + $0x5a0] sm:$0xff] }
  0x77   :  { %2382 = vmatpush1.bf16.msra.mxu1 %v5170_v27  ;;  %v172_v27 = vld [vmem:[%s7880_s0 + $0x4d0] sm:$0xff] }
  0x78   :  { %2960 = vmatpush1.bf16.msra.mxu0 %v5171_v28  ;;  %2383 = vmatprep.subr.bf16.mxu1 %v5178_v0  ;;  %v176_v28 = vld [vmem:[%s7880_s0 + $0x4f0] sm:$0xff] }
  0x79   :  { %2155 = vmatmul.mubr.bf16.gmra.mrb[28].mxu1 %v4207_v60  ;;  %2961 = vmatprep.subr.bf16.mxu0 %v5178_v0  ;;  %v4272_v60 = vcombine.high %v138_v55, %v142_v56  ;;  %v4308_v32 = vcombine.high %v172_v27, %v176_v28  ;;  %v4307_v38 = vcombine.low %v172_v27, %v176_v28  ;;  %v236_v27 = vld [vmem:[%s7880_s0 + $0x6d0] sm:$0xff] }
  0x7a   :  { %2733 = vmatmul.mubr.bf16.gmra.mrb[28].mxu0 %v4211_v61  ;;  %2162 = vmatprep.mubr.bf16.mxu1 %v4216_v62  ;;  %v5174_v62 = vld [vmem:[%s7879_s1 + $0xf8] sm:$0xff]   ;;  %v240_v28 = vld [vmem:[%s7880_s0 + $0x6f0] sm:$0xff] }
  0x7b   :  { %2740 = vmatprep.mubr.bf16.mxu0 %v4220_v63  ;;  %2384 = vmatpush1.bf16.msra.mxu1 %v5172_v45  ;;  %v5175_v63 = vld [vmem:[%s7879_s1 + $0x1f8] sm:$0xff]  }
  0x7c   :  { %2962 = vmatpush1.bf16.msra.mxu0 %v5173_v46  ;;  %2385 = vmatprep.subr.bf16.mxu1 %v5178_v0 }
  0x7d   :  { %2963 = vmatprep.subr.bf16.mxu0 %v5178_v0  ;;  %v144_v0 = vld [vmem:[%s7880_s0 + $0x3f0] sm:$0xff] }
  0x7e   :  { %v4276_v61 = vcombine.high %v140_v57, %v144_v0 }
  0x7f   :  { %2386 = vmatpush1.bf16.msra.mxu1 %v5174_v62 }
  0x80   :  { %2964 = vmatpush1.bf16.msra.mxu0 %v5175_v63 }
  0x81   :  { %2163 = vmatmul.mubr.bf16.gmra.mrb[32].mxu1 %v4215_v5  ;;  %v4271_v5 = vcombine.low %v138_v55, %v142_v56  ;;  %v4328_v55 = vcombine.high %v194_v49, %v198_v50 }
  0x82   :  { %2741 = vmatmul.mubr.bf16.gmra.mrb[32].mxu0 %v4219_v6  ;;  %2170 = vmatprep.mubr.bf16.mxu1 %v4224_v7  ;;  %v4275_v6 = vcombine.low %v140_v57, %v144_v0  ;;  %v4280_v7 = vcombine.high %v146_v1, %v150_v2  ;;  %v202_v57 = vld [vmem:[%s7880_s0 + $0x5c0] sm:$0xff] }
  0x83   :  { %2748 = vmatprep.mubr.bf16.mxu0 %v4228_v8  ;;  %v4284_v8 = vcombine.high %v148_v3, %v152_v4  ;;  %v206_v0 = vld [vmem:[%s7880_s0 + $0x5e0] sm:$0xff]  ;;  %v212_v3 = vld [vmem:[%s7880_s0 + $0x610] sm:$0xff] }
  0x84   :  { %v4336_v62 = vcombine.high %v202_v57, %v206_v0  ;;  %v210_v1 = vld [vmem:[%s7880_s0 + $0x600] sm:$0xff]  ;;  %v216_v4 = vld [vmem:[%s7880_s0 + $0x630] sm:$0xff] }
  0x85   :  { %v214_v2 = vld [vmem:[%s7880_s0 + $0x620] sm:$0xff] }
  0x89   :  { %2171 = vmatmul.mubr.bf16.gmra.mrb[36].mxu1 %v4223_v15  ;;  %v4288_v15 = vcombine.high %v154_v9, %v158_v10  ;;  %v218_v9 = vld [vmem:[%s7880_s0 + $0x640] sm:$0xff] }
  0x8a   :  { %2749 = vmatmul.mubr.bf16.gmra.mrb[36].mxu0 %v4227_v16  ;;  %2178 = vmatprep.mubr.bf16.mxu1 %v4232_v17  ;;  %v4292_v16 = vcombine.high %v156_v11, %v160_v12  ;;  %v162_v17 = vld [vmem:[%s7880_s0 + $0x480] sm:$0xff]  ;;  %v220_v11 = vld [vmem:[%s7880_s0 + $0x650] sm:$0xff] }
  0x8b   :  { %2756 = vmatprep.mubr.bf16.mxu0 %v4236_v18  ;;  %v166_v18 = vld [vmem:[%s7880_s0 + $0x4a0] sm:$0xff]  ;;  %v224_v12 = vld [vmem:[%s7880_s0 + $0x670] sm:$0xff] }
  0x8c   :  { %v4295_v29 = vcombine.low %v162_v17, %v166_v18  ;;  %v222_v10 = vld [vmem:[%s7880_s0 + $0x660] sm:$0xff] }
  0x91   :  { %2179 = vmatmul.mubr.bf16.gmra.mrb[40].mxu1 %v4231_v23  ;;  %v4296_v23 = vcombine.high %v162_v17, %v166_v18  ;;  %v226_v17 = vld [vmem:[%s7880_s0 + $0x680] sm:$0xff] }
  0x92   :  { %2757 = vmatmul.mubr.bf16.gmra.mrb[40].mxu0 %v4235_v24  ;;  %2186 = vmatprep.mubr.bf16.mxu1 %v4240_v25  ;;  %v4300_v24 = vcombine.high %v164_v19, %v168_v20  ;;  %v170_v25 = vld [vmem:[%s7880_s0 + $0x4c0] sm:$0xff]  ;;  %v228_v19 = vld [vmem:[%s7880_s0 + $0x690] sm:$0xff] }
  0x93   :  { %2764 = vmatprep.mubr.bf16.mxu0 %v4244_v26  ;;  %v174_v26 = vld [vmem:[%s7880_s0 + $0x4e0] sm:$0xff]  ;;  %v232_v20 = vld [vmem:[%s7880_s0 + $0x6b0] sm:$0xff] }
  0x94   :  { %v4304_v31 = vcombine.high %v170_v25, %v174_v26  ;;  %v4303_v37 = vcombine.low %v170_v25, %v174_v26  ;;  %v230_v18 = vld [vmem:[%s7880_s0 + $0x6a0] sm:$0xff] }
  0x95   :  { %v234_v25 = vld [vmem:[%s7880_s0 + $0x6c0] sm:$0xff] }
  0x96   :  { %v238_v26 = vld [vmem:[%s7880_s0 + $0x6e0] sm:$0xff] }
  0x99   :  { %2187 = vmatmul.mubr.bf16.gmra.mrb[44].mxu1 %v4239_v33  ;;  %v178_v33 = vld [vmem:[%s7880_s0 + $0x500] sm:$0xff] }
  0x9a   :  { %2765 = vmatmul.mubr.bf16.gmra.mrb[44].mxu0 %v4243_v34  ;;  %2194 = vmatprep.mubr.bf16.mxu1 %v4248_v35  ;;  %v182_v34 = vld [vmem:[%s7880_s0 + $0x520] sm:$0xff]  ;;  %v180_v35 = vld [vmem:[%s7880_s0 + $0x510] sm:$0xff] }
  0x9b   :  { %2772 = vmatprep.mubr.bf16.mxu0 %v4252_v36  ;;  %v184_v36 = vld [vmem:[%s7880_s0 + $0x530] sm:$0xff]  ;;  %v4312_v39 = vcombine.high %v178_v33, %v182_v34  ;;  %v4311_v45 = vcombine.low %v178_v33, %v182_v34  ;;  %v242_v33 = vld [vmem:[%s7880_s0 + $0x700] sm:$0xff] }
  0x9c   :  { %v4316_v40 = vcombine.high %v180_v35, %v184_v36  ;;  %v4315_v46 = vcombine.low %v180_v35, %v184_v36  ;;  %v246_v34 = vld [vmem:[%s7880_s0 + $0x720] sm:$0xff]  ;;  %v244_v35 = vld [vmem:[%s7880_s0 + $0x710] sm:$0xff] }
  0x9d   :  { %v248_v36 = vld [vmem:[%s7880_s0 + $0x730] sm:$0xff] }
  0xa1   :  { %2195 = vmatmul.mubr.bf16.gmra.mrb[48].mxu1 %v4247_v41  ;;  %v186_v41 = vld [vmem:[%s7880_s0 + $0x540] sm:$0xff] }
  0xa2   :  { %2773 = vmatmul.mubr.bf16.gmra.mrb[48].mxu0 %v4251_v42  ;;  %2202 = vmatprep.mubr.bf16.mxu1 %v4256_v43  ;;  %v190_v42 = vld [vmem:[%s7880_s0 + $0x560] sm:$0xff]  ;;  %v188_v43 = vld [vmem:[%s7880_s0 + $0x550] sm:$0xff] }
  0xa3   :  { %2780 = vmatprep.mubr.bf16.mxu0 %v4260_v44  ;;  %v192_v44 = vld [vmem:[%s7880_s0 + $0x570] sm:$0xff]  ;;  %v4320_v47 = vcombine.high %v186_v41, %v190_v42 }
  0xa4   :  { %v4324_v48 = vcombine.high %v188_v43, %v192_v44 }
  0xa9   :  { %2203 = vmatmul.mubr.bf16.gmra.mrb[52].mxu1 %v4255_v51  ;;  %v196_v51 = vld [vmem:[%s7880_s0 + $0x590] sm:$0xff] }
  0xaa   :  { %2781 = vmatmul.mubr.bf16.gmra.mrb[52].mxu0 %v4259_v52  ;;  %2210 = vmatprep.mubr.bf16.mxu1 %v4264_v53  ;;  %v200_v52 = vld [vmem:[%s7880_s0 + $0x5b0] sm:$0xff]  ;;  %v4319_v53 = vcombine.low %v186_v41, %v190_v42  ;;  %v250_v41 = vld [vmem:[%s7880_s0 + $0x740] sm:$0xff] }
  0xab   :  { %2788 = vmatprep.mubr.bf16.mxu0 %v4268_v54  ;;  %v4323_v54 = vcombine.low %v188_v43, %v192_v44  ;;  %v4332_v56 = vcombine.high %v196_v51, %v200_v52  ;;  %v254_v42 = vld [vmem:[%s7880_s0 + $0x760] sm:$0xff]  ;;  %v252_v43 = vld [vmem:[%s7880_s0 + $0x750] sm:$0xff] }
  0xac   :  { %v256_v44 = vld [vmem:[%s7880_s0 + $0x770] sm:$0xff] }
  0xb1   :  { %2211 = vmatmul.mubr.bf16.gmra.mrb[56].mxu1 %v4263_v58  ;;  %v204_v58 = vld [vmem:[%s7880_s0 + $0x5d0] sm:$0xff] }
  0xb2   :  { %2789 = vmatmul.mubr.bf16.gmra.mrb[56].mxu0 %v4267_v59  ;;  %2218 = vmatprep.mubr.bf16.mxu1 %v4272_v60  ;;  %v208_v59 = vld [vmem:[%s7880_s0 + $0x5f0] sm:$0xff]  ;;  %v4327_v60 = vcombine.low %v194_v49, %v198_v50  ;;  %v258_v49 = vld [vmem:[%s7880_s0 + $0x780] sm:$0xff] }
  0xb3   :  { %2796 = vmatprep.mubr.bf16.mxu0 %v4276_v61  ;;  %v4331_v61 = vcombine.low %v196_v51, %v200_v52  ;;  %v4340_v63 = vcombine.high %v204_v58, %v208_v59  ;;  %v262_v50 = vld [vmem:[%s7880_s0 + $0x7a0] sm:$0xff]  ;;  %v260_v51 = vld [vmem:[%s7880_s0 + $0x790] sm:$0xff] }
  0xb4   :  { %v264_v52 = vld [vmem:[%s7880_s0 + $0x7b0] sm:$0xff] }
  0xb9   :  { %2219 = vmatmul.mubr.bf16.gmra.mrb[60].mxu1 %v4271_v5  ;;  %v4335_v5 = vcombine.low %v202_v57, %v206_v0  ;;  %v266_v57 = vld [vmem:[%s7880_s0 + $0x7c0] sm:$0xff] }
  0xba   :  { %2797 = vmatmul.mubr.bf16.gmra.mrb[60].mxu0 %v4275_v6  ;;  %2226 = vmatprep.mubr.bf16.mxu1 %v4280_v7  ;;  %v4339_v6 = vcombine.low %v204_v58, %v208_v59  ;;  %v4344_v7 = vcombine.high %v210_v1, %v214_v2  ;;  %v270_v0 = vld [vmem:[%s7880_s0 + $0x7e0] sm:$0xff]  ;;  %v268_v58 = vld [vmem:[%s7880_s0 + $0x7d0] sm:$0xff] }
  0xbb   :  { %2804 = vmatprep.mubr.bf16.mxu0 %v4284_v8  ;;  %v4348_v8 = vcombine.high %v212_v3, %v216_v4  ;;  %v272_v59 = vld [vmem:[%s7880_s0 + $0x7f0] sm:$0xff] }
  0xc1   :  { %2227 = vmatmul.mubr.bf16.gmra.mrb[64].mxu1 %v4279_v13  ;;  %v4343_v13 = vcombine.low %v210_v1, %v214_v2  ;;  %v19_v1 = vld [vmem:[%s7880_s0 + $0x8] sm:$0xff] }
  0xc2   :  { %2805 = vmatmul.mubr.bf16.gmra.mrb[64].mxu0 %v4283_v14  ;;  %2234 = vmatprep.mubr.bf16.mxu1 %v4288_v15  ;;  %v4347_v14 = vcombine.low %v212_v3, %v216_v4  ;;  %v4352_v15 = vcombine.high %v218_v9, %v222_v10  ;;  %v23_v2 = vld [vmem:[%s7880_s0 + $0x28] sm:$0xff]  ;;  %v21_v3 = vld [vmem:[%s7880_s0 + $0x18] sm:$0xff] }
  0xc3   :  { %2812 = vmatprep.mubr.bf16.mxu0 %v4292_v16  ;;  %v4356_v16 = vcombine.high %v220_v11, %v224_v12  ;;  %v25_v4 = vld [vmem:[%s7880_s0 + $0x38] sm:$0xff] }
  0xc9   :  { %2235 = vmatmul.mubr.bf16.gmra.mrb[68].mxu1 %v4287_v21  ;;  %v4351_v21 = vcombine.low %v218_v9, %v222_v10  ;;  %v27_v9 = vld [vmem:[%s7880_s0 + $0x48] sm:$0xff] }
  0xca   :  { %2813 = vmatmul.mubr.bf16.gmra.mrb[68].mxu0 %v4291_v22  ;;  %2242 = vmatprep.mubr.bf16.mxu1 %v4296_v23  ;;  %v4355_v22 = vcombine.low %v220_v11, %v224_v12  ;;  %v4360_v23 = vcombine.high %v226_v17, %v230_v18  ;;  %v31_v10 = vld [vmem:[%s7880_s0 + $0x68] sm:$0xff]  ;;  %v29_v11 = vld [vmem:[%s7880_s0 + $0x58] sm:$0xff] }
  0xcb   :  { %2820 = vmatprep.mubr.bf16.mxu0 %v4300_v24  ;;  %v4364_v24 = vcombine.high %v228_v19, %v232_v20  ;;  %v33_v12 = vld [vmem:[%s7880_s0 + $0x78] sm:$0xff] }
  0xd1   :  { %2243 = vmatmul.mubr.bf16.gmra.mrb[72].mxu1 %v4295_v29  ;;  %v4359_v29 = vcombine.low %v226_v17, %v230_v18  ;;  %v35_v17 = vld [vmem:[%s7880_s0 + $0x88] sm:$0xff] }
  0xd2   :  { %2821 = vmatmul.mubr.bf16.gmra.mrb[72].mxu0 %v4299_v30  ;;  %2250 = vmatprep.mubr.bf16.mxu1 %v4304_v31  ;;  %v4363_v30 = vcombine.low %v228_v19, %v232_v20  ;;  %v4368_v31 = vcombine.high %v234_v25, %v238_v26  ;;  %v39_v18 = vld [vmem:[%s7880_s0 + $0xa8] sm:$0xff]  ;;  %v37_v19 = vld [vmem:[%s7880_s0 + $0x98] sm:$0xff] }
  0xd3   :  { %2828 = vmatprep.mubr.bf16.mxu0 %v4308_v32  ;;  %v4372_v32 = vcombine.high %v236_v27, %v240_v28  ;;  %v41_v20 = vld [vmem:[%s7880_s0 + $0xb8] sm:$0xff] }
  0xd9   :  { %2251 = vmatmul.mubr.bf16.gmra.mrb[76].mxu1 %v4303_v37  ;;  %v4367_v37 = vcombine.low %v234_v25, %v238_v26  ;;  %v43_v25 = vld [vmem:[%s7880_s0 + $0xc8] sm:$0xff] }
  0xda   :  { %2829 = vmatmul.mubr.bf16.gmra.mrb[76].mxu0 %v4307_v38  ;;  %2258 = vmatprep.mubr.bf16.mxu1 %v4312_v39  ;;  %v4371_v38 = vcombine.low %v236_v27, %v240_v28  ;;  %v4376_v39 = vcombine.high %v242_v33, %v246_v34  ;;  %v47_v26 = vld [vmem:[%s7880_s0 + $0xe8] sm:$0xff]  ;;  %v45_v27 = vld [vmem:[%s7880_s0 + $0xd8] sm:$0xff] }
  0xdb   :  { %2836 = vmatprep.mubr.bf16.mxu0 %v4316_v40  ;;  %v4380_v40 = vcombine.high %v244_v35, %v248_v36  ;;  %v49_v28 = vld [vmem:[%s7880_s0 + $0xf8] sm:$0xff] }
  0xe1   :  { %2259 = vmatmul.mubr.bf16.gmra.mrb[80].mxu1 %v4311_v45  ;;  %v4375_v45 = vcombine.low %v242_v33, %v246_v34  ;;  %v51_v33 = vld [vmem:[%s7880_s0 + $0x108] sm:$0xff] }
  0xe2   :  { %2837 = vmatmul.mubr.bf16.gmra.mrb[80].mxu0 %v4315_v46  ;;  %2266 = vmatprep.mubr.bf16.mxu1 %v4320_v47  ;;  %v4379_v46 = vcombine.low %v244_v35, %v248_v36  ;;  %v4384_v47 = vcombine.high %v250_v41, %v254_v42  ;;  %v55_v34 = vld [vmem:[%s7880_s0 + $0x128] sm:$0xff]  ;;  %v53_v35 = vld [vmem:[%s7880_s0 + $0x118] sm:$0xff] }
  0xe3   :  { %2844 = vmatprep.mubr.bf16.mxu0 %v4324_v48  ;;  %v4388_v48 = vcombine.high %v252_v43, %v256_v44  ;;  %v57_v36 = vld [vmem:[%s7880_s0 + $0x138] sm:$0xff] }
  0xe9   :  { %2267 = vmatmul.mubr.bf16.gmra.mrb[84].mxu1 %v4319_v53  ;;  %v4383_v53 = vcombine.low %v250_v41, %v254_v42  ;;  %v59_v41 = vld [vmem:[%s7880_s0 + $0x148] sm:$0xff] }
  0xea   :  { %2845 = vmatmul.mubr.bf16.gmra.mrb[84].mxu0 %v4323_v54  ;;  %2274 = vmatprep.mubr.bf16.mxu1 %v4328_v55  ;;  %v4387_v54 = vcombine.low %v252_v43, %v256_v44  ;;  %v4392_v55 = vcombine.high %v258_v49, %v262_v50  ;;  %v63_v42 = vld [vmem:[%s7880_s0 + $0x168] sm:$0xff]  ;;  %v61_v43 = vld [vmem:[%s7880_s0 + $0x158] sm:$0xff] }
  0xeb   :  { %2852 = vmatprep.mubr.bf16.mxu0 %v4332_v56  ;;  %v4396_v56 = vcombine.high %v260_v51, %v264_v52  ;;  %v65_v44 = vld [vmem:[%s7880_s0 + $0x178] sm:$0xff] }
  0xf1   :  { %2275 = vmatmul.mubr.bf16.gmra.mrb[88].mxu1 %v4327_v60  ;;  %v4391_v60 = vcombine.low %v258_v49, %v262_v50  ;;  %v67_v49 = vld [vmem:[%s7880_s0 + $0x188] sm:$0xff] }
  0xf2   :  { %2853 = vmatmul.mubr.bf16.gmra.mrb[88].mxu0 %v4331_v61  ;;  %2282 = vmatprep.mubr.bf16.mxu1 %v4336_v62  ;;  %v4395_v61 = vcombine.low %v260_v51, %v264_v52  ;;  %v4400_v62 = vcombine.high %v266_v57, %v270_v0  ;;  %v71_v50 = vld [vmem:[%s7880_s0 + $0x1a8] sm:$0xff]  ;;  %v69_v51 = vld [vmem:[%s7880_s0 + $0x198] sm:$0xff] }
  0xf3   :  { %2860 = vmatprep.mubr.bf16.mxu0 %v4340_v63  ;;  %v4404_v63 = vcombine.high %v268_v58, %v272_v59  ;;  %v73_v52 = vld [vmem:[%s7880_s0 + $0x1b8] sm:$0xff] }
  0xf9   :  { %2283 = vmatmul.mubr.bf16.gmra.mrb[92].mxu1 %v4335_v5  ;;  %v4399_v5 = vcombine.low %v266_v57, %v270_v0  ;;  %v75_v57 = vld [vmem:[%s7880_s0 + $0x1c8] sm:$0xff] }
  0xfa   :  { %2861 = vmatmul.mubr.bf16.gmra.mrb[92].mxu0 %v4339_v6  ;;  %2290 = vmatprep.mubr.bf16.mxu1 %v4344_v7  ;;  %v4403_v6 = vcombine.low %v268_v58, %v272_v59  ;;  %v4154_v7 = vcombine.high %v19_v1, %v23_v2  ;;  %v79_v0 = vld [vmem:[%s7880_s0 + $0x1e8] sm:$0xff]  ;;  %v77_v58 = vld [vmem:[%s7880_s0 + $0x1d8] sm:$0xff] }
  0xfb   :  { %2868 = vmatprep.mubr.bf16.mxu0 %v4348_v8  ;;  %v4158_v8 = vcombine.high %v21_v3, %v25_v4  ;;  %v81_v59 = vld [vmem:[%s7880_s0 + $0x1f8] sm:$0xff] }
 0x101   :  { %2291 = vmatmul.mubr.bf16.gmra.mrb[96].mxu1 %v4343_v13  ;;  %v4153_v13 = vcombine.low %v19_v1, %v23_v2  ;;  %v83_v1 = vld [vmem:[%s7880_s0 + $0x208] sm:$0xff] }
 0x102   :  { %2869 = vmatmul.mubr.bf16.gmra.mrb[96].mxu0 %v4347_v14  ;;  %2298 = vmatprep.mubr.bf16.mxu1 %v4352_v15  ;;  %v4157_v14 = vcombine.low %v21_v3, %v25_v4  ;;  %v4162_v15 = vcombine.high %v27_v9, %v31_v10  ;;  %v87_v2 = vld [vmem:[%s7880_s0 + $0x228] sm:$0xff]  ;;  %v85_v3 = vld [vmem:[%s7880_s0 + $0x218] sm:$0xff] }
 0x103   :  { %2876 = vmatprep.mubr.bf16.mxu0 %v4356_v16  ;;  %v4166_v16 = vcombine.high %v29_v11, %v33_v12  ;;  %v89_v4 = vld [vmem:[%s7880_s0 + $0x238] sm:$0xff] }
 0x109   :  { %2299 = vmatmul.mubr.bf16.gmra.mrb[100].mxu1 %v4351_v21  ;;  %v4161_v21 = vcombine.low %v27_v9, %v31_v10  ;;  %v91_v9 = vld [vmem:[%s7880_s0 + $0x248] sm:$0xff] }
 0x10a   :  { %2877 = vmatmul.mubr.bf16.gmra.mrb[100].mxu0 %v4355_v22  ;;  %2306 = vmatprep.mubr.bf16.mxu1 %v4360_v23  ;;  %v4165_v22 = vcombine.low %v29_v11, %v33_v12  ;;  %v4170_v23 = vcombine.high %v35_v17, %v39_v18  ;;  %v95_v10 = vld [vmem:[%s7880_s0 + $0x268] sm:$0xff]  ;;  %v93_v11 = vld [vmem:[%s7880_s0 + $0x258] sm:$0xff] }
 0x10b   :  { %2884 = vmatprep.mubr.bf16.mxu0 %v4364_v24  ;;  %v4174_v24 = vcombine.high %v37_v19, %v41_v20  ;;  %v97_v12 = vld [vmem:[%s7880_s0 + $0x278] sm:$0xff] }
 0x111   :  { %2307 = vmatmul.mubr.bf16.gmra.mrb[104].mxu1 %v4359_v29  ;;  %v4169_v29 = vcombine.low %v35_v17, %v39_v18  ;;  %v99_v17 = vld [vmem:[%s7880_s0 + $0x288] sm:$0xff] }
 0x112   :  { %2885 = vmatmul.mubr.bf16.gmra.mrb[104].mxu0 %v4363_v30  ;;  %2314 = vmatprep.mubr.bf16.mxu1 %v4368_v31  ;;  %v4173_v30 = vcombine.low %v37_v19, %v41_v20  ;;  %v4178_v31 = vcombine.high %v43_v25, %v47_v26  ;;  %v103_v18 = vld [vmem:[%s7880_s0 + $0x2a8] sm:$0xff]  ;;  %v101_v19 = vld [vmem:[%s7880_s0 + $0x298] sm:$0xff] }
 0x113   :  { %2892 = vmatprep.mubr.bf16.mxu0 %v4372_v32  ;;  %v4182_v32 = vcombine.high %v45_v27, %v49_v28  ;;  %v105_v20 = vld [vmem:[%s7880_s0 + $0x2b8] sm:$0xff] }
 0x119   :  { %2315 = vmatmul.mubr.bf16.gmra.mrb[108].mxu1 %v4367_v37  ;;  %v4177_v37 = vcombine.low %v43_v25, %v47_v26  ;;  %v107_v25 = vld [vmem:[%s7880_s0 + $0x2c8] sm:$0xff] }
 0x11a   :  { %2893 = vmatmul.mubr.bf16.gmra.mrb[108].mxu0 %v4371_v38  ;;  %2322 = vmatprep.mubr.bf16.mxu1 %v4376_v39  ;;  %v4181_v38 = vcombine.low %v45_v27, %v49_v28  ;;  %v4186_v39 = vcombine.high %v51_v33, %v55_v34  ;;  %v111_v26 = vld [vmem:[%s7880_s0 + $0x2e8] sm:$0xff]  ;;  %v109_v27 = vld [vmem:[%s7880_s0 + $0x2d8] sm:$0xff] }
 0x11b   :  { %2900 = vmatprep.mubr.bf16.mxu0 %v4380_v40  ;;  %v4190_v40 = vcombine.high %v53_v35, %v57_v36  ;;  %v113_v28 = vld [vmem:[%s7880_s0 + $0x2f8] sm:$0xff] }
 0x121   :  { %2323 = vmatmul.mubr.bf16.gmra.mrb[112].mxu1 %v4375_v45  ;;  %v4185_v45 = vcombine.low %v51_v33, %v55_v34  ;;  %v115_v33 = vld [vmem:[%s7880_s0 + $0x308] sm:$0xff] }
 0x122   :  { %2901 = vmatmul.mubr.bf16.gmra.mrb[112].mxu0 %v4379_v46  ;;  %2330 = vmatprep.mubr.bf16.mxu1 %v4384_v47  ;;  %v4189_v46 = vcombine.low %v53_v35, %v57_v36  ;;  %v4194_v47 = vcombine.high %v59_v41, %v63_v42  ;;  %v119_v34 = vld [vmem:[%s7880_s0 + $0x328] sm:$0xff]  ;;  %v117_v35 = vld [vmem:[%s7880_s0 + $0x318] sm:$0xff] }
 0x123   :  { %2908 = vmatprep.mubr.bf16.mxu0 %v4388_v48  ;;  %v4198_v48 = vcombine.high %v61_v43, %v65_v44  ;;  %v121_v36 = vld [vmem:[%s7880_s0 + $0x338] sm:$0xff] }
 0x129   :  { %2331 = vmatmul.mubr.bf16.gmra.mrb[116].mxu1 %v4383_v53  ;;  %v4193_v53 = vcombine.low %v59_v41, %v63_v42  ;;  %v123_v41 = vld [vmem:[%s7880_s0 + $0x348] sm:$0xff] }
 0x12a   :  { %2909 = vmatmul.mubr.bf16.gmra.mrb[116].mxu0 %v4387_v54  ;;  %2338 = vmatprep.mubr.bf16.mxu1 %v4392_v55  ;;  %v4197_v54 = vcombine.low %v61_v43, %v65_v44  ;;  %v4202_v55 = vcombine.high %v67_v49, %v71_v50  ;;  %v127_v42 = vld [vmem:[%s7880_s0 + $0x368] sm:$0xff]  ;;  %v125_v43 = vld [vmem:[%s7880_s0 + $0x358] sm:$0xff] }
 0x12b   :  { %2916 = vmatprep.mubr.bf16.mxu0 %v4396_v56  ;;  %v4206_v56 = vcombine.high %v69_v51, %v73_v52  ;;  %v129_v44 = vld [vmem:[%s7880_s0 + $0x378] sm:$0xff] }
 0x131   :  { %2339 = vmatmul.mubr.bf16.gmra.mrb[120].mxu1 %v4391_v60  ;;  %v4201_v60 = vcombine.low %v67_v49, %v71_v50  ;;  %v131_v49 = vld [vmem:[%s7880_s0 + $0x388] sm:$0xff] }
 0x132   :  { %2917 = vmatmul.mubr.bf16.gmra.mrb[120].mxu0 %v4395_v61  ;;  %2346 = vmatprep.mubr.bf16.mxu1 %v4400_v62  ;;  %v4205_v61 = vcombine.low %v69_v51, %v73_v52  ;;  %v4210_v62 = vcombine.high %v75_v57, %v79_v0  ;;  %v135_v50 = vld [vmem:[%s7880_s0 + $0x3a8] sm:$0xff]  ;;  %v133_v51 = vld [vmem:[%s7880_s0 + $0x398] sm:$0xff] }
 0x133   :  { %2924 = vmatprep.mubr.bf16.mxu0 %v4404_v63  ;;  %v4214_v63 = vcombine.high %v77_v58, %v81_v59  ;;  %v137_v52 = vld [vmem:[%s7880_s0 + $0x3b8] sm:$0xff] }
 0x139   :  { %2347 = vmatmul.mubr.bf16.gmra.mrb[124].mxu1 %v4399_v5  ;;  %v4209_v5 = vcombine.low %v75_v57, %v79_v0  ;;  %v139_v57 = vld [vmem:[%s7880_s0 + $0x3c8] sm:$0xff] }
 0x13a   :  { %2925 = vmatmul.mubr.bf16.gmra.mrb[124].mxu0 %v4403_v6  ;;  %2387 = vmatprep.mubr.bf16.mxu1 %v4154_v7  ;;  %v4213_v6 = vcombine.low %v77_v58, %v81_v59  ;;  %v4218_v7 = vcombine.high %v83_v1, %v87_v2  ;;  %v143_v0 = vld [vmem:[%s7880_s0 + $0x3e8] sm:$0xff]  ;;  %v141_v58 = vld [vmem:[%s7880_s0 + $0x3d8] sm:$0xff] }
 0x13b   :  { %2965 = vmatprep.mubr.bf16.mxu0 %v4158_v8  ;;  %v4222_v8 = vcombine.high %v85_v3, %v89_v4  ;;  %v145_v59 = vld [vmem:[%s7880_s0 + $0x3f8] sm:$0xff] }
 0x141   :  { %2388 = vmatmul.mubr.bf16.vlgmr.msra.gmra.mrb[0].mxu1 %v4153_v13  ;;  %v4217_v13 = vcombine.low %v83_v1, %v87_v2  ;;  %v147_v1 = vld [vmem:[%s7880_s0 + $0x408] sm:$0xff] }
 0x142   :  { %2966 = vmatmul.mubr.bf16.vlgmr.msra.gmra.mrb[0].mxu0 %v4157_v14  ;;  %2395 = vmatprep.mubr.bf16.mxu1 %v4162_v15  ;;  %v4221_v14 = vcombine.low %v85_v3, %v89_v4  ;;  %v4226_v15 = vcombine.high %v91_v9, %v95_v10  ;;  %v151_v2 = vld [vmem:[%s7880_s0 + $0x428] sm:$0xff]  ;;  %v149_v3 = vld [vmem:[%s7880_s0 + $0x418] sm:$0xff] }
 0x143   :  { %2973 = vmatprep.mubr.bf16.mxu0 %v4166_v16  ;;  %v4230_v16 = vcombine.high %v93_v11, %v97_v12  ;;  %v153_v4 = vld [vmem:[%s7880_s0 + $0x438] sm:$0xff] }
 0x149   :  { %2396 = vmatmul.mubr.bf16.gmra.mrb[4].mxu1 %v4161_v21  ;;  %v4225_v21 = vcombine.low %v91_v9, %v95_v10  ;;  %v155_v9 = vld [vmem:[%s7880_s0 + $0x448] sm:$0xff] }
 0x14a   :  { %2974 = vmatmul.mubr.bf16.gmra.mrb[4].mxu0 %v4165_v22  ;;  %2403 = vmatprep.mubr.bf16.mxu1 %v4170_v23  ;;  %v4229_v22 = vcombine.low %v93_v11, %v97_v12  ;;  %v4234_v23 = vcombine.high %v99_v17, %v103_v18  ;;  %v159_v10 = vld [vmem:[%s7880_s0 + $0x468] sm:$0xff]  ;;  %v157_v11 = vld [vmem:[%s7880_s0 + $0x458] sm:$0xff] }
 0x14b   :  { %2981 = vmatprep.mubr.bf16.mxu0 %v4174_v24  ;;  %v4238_v24 = vcombine.high %v101_v19, %v105_v20  ;;  %v161_v12 = vld [vmem:[%s7880_s0 + $0x478] sm:$0xff] }
 0x151   :  { %2404 = vmatmul.mubr.bf16.gmra.mrb[8].mxu1 %v4169_v29  ;;  %v4233_v29 = vcombine.low %v99_v17, %v103_v18  ;;  %v163_v17 = vld [vmem:[%s7880_s0 + $0x488] sm:$0xff] }
 0x152   :  { %2982 = vmatmul.mubr.bf16.gmra.mrb[8].mxu0 %v4173_v30  ;;  %2411 = vmatprep.mubr.bf16.mxu1 %v4178_v31  ;;  %v4237_v30 = vcombine.low %v101_v19, %v105_v20  ;;  %v4242_v31 = vcombine.high %v107_v25, %v111_v26  ;;  %v167_v18 = vld [vmem:[%s7880_s0 + $0x4a8] sm:$0xff]  ;;  %v165_v19 = vld [vmem:[%s7880_s0 + $0x498] sm:$0xff] }
 0x153   :  { %2989 = vmatprep.mubr.bf16.mxu0 %v4182_v32  ;;  %v4246_v32 = vcombine.high %v109_v27, %v113_v28  ;;  %v169_v20 = vld [vmem:[%s7880_s0 + $0x4b8] sm:$0xff] }
 0x159   :  { %2412 = vmatmul.mubr.bf16.gmra.mrb[12].mxu1 %v4177_v37  ;;  %v4241_v37 = vcombine.low %v107_v25, %v111_v26  ;;  %v171_v25 = vld [vmem:[%s7880_s0 + $0x4c8] sm:$0xff] }
 0x15a   :  { %2990 = vmatmul.mubr.bf16.gmra.mrb[12].mxu0 %v4181_v38  ;;  %2419 = vmatprep.mubr.bf16.mxu1 %v4186_v39  ;;  %v4245_v38 = vcombine.low %v109_v27, %v113_v28  ;;  %v4250_v39 = vcombine.high %v115_v33, %v119_v34  ;;  %v175_v26 = vld [vmem:[%s7880_s0 + $0x4e8] sm:$0xff]  ;;  %v173_v27 = vld [vmem:[%s7880_s0 + $0x4d8] sm:$0xff] }
 0x15b   :  { %2997 = vmatprep.mubr.bf16.mxu0 %v4190_v40  ;;  %v4254_v40 = vcombine.high %v117_v35, %v121_v36  ;;  %v177_v28 = vld [vmem:[%s7880_s0 + $0x4f8] sm:$0xff] }
 0x161   :  { %2420 = vmatmul.mubr.bf16.gmra.mrb[16].mxu1 %v4185_v45  ;;  %v4249_v45 = vcombine.low %v115_v33, %v119_v34  ;;  %v179_v33 = vld [vmem:[%s7880_s0 + $0x508] sm:$0xff] }
 0x162   :  { %2998 = vmatmul.mubr.bf16.gmra.mrb[16].mxu0 %v4189_v46  ;;  %2427 = vmatprep.mubr.bf16.mxu1 %v4194_v47  ;;  %v4253_v46 = vcombine.low %v117_v35, %v121_v36  ;;  %v4258_v47 = vcombine.high %v123_v41, %v127_v42  ;;  %v183_v34 = vld [vmem:[%s7880_s0 + $0x528] sm:$0xff]  ;;  %v181_v35 = vld [vmem:[%s7880_s0 + $0x518] sm:$0xff] }
 0x163   :  { %3005 = vmatprep.mubr.bf16.mxu0 %v4198_v48  ;;  %v4262_v48 = vcombine.high %v125_v43, %v129_v44  ;;  %v185_v36 = vld [vmem:[%s7880_s0 + $0x538] sm:$0xff] }
 0x169   :  { %2428 = vmatmul.mubr.bf16.gmra.mrb[20].mxu1 %v4193_v53  ;;  %v4257_v53 = vcombine.low %v123_v41, %v127_v42  ;;  %v187_v41 = vld [vmem:[%s7880_s0 + $0x548] sm:$0xff] }
 0x16a   :  { %3006 = vmatmul.mubr.bf16.gmra.mrb[20].mxu0 %v4197_v54  ;;  %2435 = vmatprep.mubr.bf16.mxu1 %v4202_v55  ;;  %v4261_v54 = vcombine.low %v125_v43, %v129_v44  ;;  %v4266_v55 = vcombine.high %v131_v49, %v135_v50  ;;  %v191_v42 = vld [vmem:[%s7880_s0 + $0x568] sm:$0xff]  ;;  %v189_v43 = vld [vmem:[%s7880_s0 + $0x558] sm:$0xff] }
 0x16b   :  { %3013 = vmatprep.mubr.bf16.mxu0 %v4206_v56  ;;  %v4270_v56 = vcombine.high %v133_v51, %v137_v52  ;;  %v193_v44 = vld [vmem:[%s7880_s0 + $0x578] sm:$0xff] }
 0x171   :  { %2436 = vmatmul.mubr.bf16.gmra.mrb[24].mxu1 %v4201_v60  ;;  %v4265_v60 = vcombine.low %v131_v49, %v135_v50  ;;  %v195_v49 = vld [vmem:[%s7880_s0 + $0x588] sm:$0xff] }
 0x172   :  { %3014 = vmatmul.mubr.bf16.gmra.mrb[24].mxu0 %v4205_v61  ;;  %2443 = vmatprep.mubr.bf16.mxu1 %v4210_v62  ;;  %v4269_v61 = vcombine.low %v133_v51, %v137_v52  ;;  %v4274_v62 = vcombine.high %v139_v57, %v143_v0  ;;  %v199_v50 = vld [vmem:[%s7880_s0 + $0x5a8] sm:$0xff]  ;;  %v197_v51 = vld [vmem:[%s7880_s0 + $0x598] sm:$0xff] }
 0x173   :  { %3021 = vmatprep.mubr.bf16.mxu0 %v4214_v63  ;;  %v4278_v63 = vcombine.high %v141_v58, %v145_v59  ;;  %v201_v52 = vld [vmem:[%s7880_s0 + $0x5b8] sm:$0xff] }
 0x179   :  { %2444 = vmatmul.mubr.bf16.gmra.mrb[28].mxu1 %v4209_v5  ;;  %v4273_v5 = vcombine.low %v139_v57, %v143_v0  ;;  %v203_v57 = vld [vmem:[%s7880_s0 + $0x5c8] sm:$0xff] }
 0x17a   :  { %3022 = vmatmul.mubr.bf16.gmra.mrb[28].mxu0 %v4213_v6  ;;  %2451 = vmatprep.mubr.bf16.mxu1 %v4218_v7  ;;  %v4277_v6 = vcombine.low %v141_v58, %v145_v59  ;;  %v4282_v7 = vcombine.high %v147_v1, %v151_v2  ;;  %v207_v0 = vld [vmem:[%s7880_s0 + $0x5e8] sm:$0xff]  ;;  %v205_v58 = vld [vmem:[%s7880_s0 + $0x5d8] sm:$0xff] }
 0x17b   :  { %3029 = vmatprep.mubr.bf16.mxu0 %v4222_v8  ;;  %v4286_v8 = vcombine.high %v149_v3, %v153_v4  ;;  %v209_v59 = vld [vmem:[%s7880_s0 + $0x5f8] sm:$0xff] }
 0x181   :  { %2452 = vmatmul.mubr.bf16.gmra.mrb[32].mxu1 %v4217_v13  ;;  %v4281_v13 = vcombine.low %v147_v1, %v151_v2  ;;  %v211_v1 = vld [vmem:[%s7880_s0 + $0x608] sm:$0xff] }
 0x182   :  { %3030 = vmatmul.mubr.bf16.gmra.mrb[32].mxu0 %v4221_v14  ;;  %2459 = vmatprep.mubr.bf16.mxu1 %v4226_v15  ;;  %v4285_v14 = vcombine.low %v149_v3, %v153_v4  ;;  %v4290_v15 = vcombine.high %v155_v9, %v159_v10  ;;  %v215_v2 = vld [vmem:[%s7880_s0 + $0x628] sm:$0xff]  ;;  %v213_v3 = vld [vmem:[%s7880_s0 + $0x618] sm:$0xff] }
 0x183   :  { %3037 = vmatprep.mubr.bf16.mxu0 %v4230_v16  ;;  %v4294_v16 = vcombine.high %v157_v11, %v161_v12  ;;  %v217_v4 = vld [vmem:[%s7880_s0 + $0x638] sm:$0xff] }
 0x189   :  { %2460 = vmatmul.mubr.bf16.gmra.mrb[36].mxu1 %v4225_v21  ;;  %v4289_v21 = vcombine.low %v155_v9, %v159_v10  ;;  %v219_v9 = vld [vmem:[%s7880_s0 + $0x648] sm:$0xff] }
 0x18a   :  { %3038 = vmatmul.mubr.bf16.gmra.mrb[36].mxu0 %v4229_v22  ;;  %2467 = vmatprep.mubr.bf16.mxu1 %v4234_v23  ;;  %v4293_v22 = vcombine.low %v157_v11, %v161_v12  ;;  %v4298_v23 = vcombine.high %v163_v17, %v167_v18  ;;  %v223_v10 = vld [vmem:[%s7880_s0 + $0x668] sm:$0xff]  ;;  %v221_v11 = vld [vmem:[%s7880_s0 + $0x658] sm:$0xff] }
 0x18b   :  { %3045 = vmatprep.mubr.bf16.mxu0 %v4238_v24  ;;  %v4302_v24 = vcombine.high %v165_v19, %v169_v20  ;;  %v225_v12 = vld [vmem:[%s7880_s0 + $0x678] sm:$0xff] }
 0x191   :  { %2468 = vmatmul.mubr.bf16.gmra.mrb[40].mxu1 %v4233_v29  ;;  %v4297_v29 = vcombine.low %v163_v17, %v167_v18  ;;  %v227_v17 = vld [vmem:[%s7880_s0 + $0x688] sm:$0xff] }
 0x192   :  { %3046 = vmatmul.mubr.bf16.gmra.mrb[40].mxu0 %v4237_v30  ;;  %2475 = vmatprep.mubr.bf16.mxu1 %v4242_v31  ;;  %v4301_v30 = vcombine.low %v165_v19, %v169_v20  ;;  %v4306_v31 = vcombine.high %v171_v25, %v175_v26  ;;  %v231_v18 = vld [vmem:[%s7880_s0 + $0x6a8] sm:$0xff]  ;;  %v229_v19 = vld [vmem:[%s7880_s0 + $0x698] sm:$0xff] }
 0x193   :  { %3053 = vmatprep.mubr.bf16.mxu0 %v4246_v32  ;;  %v4310_v32 = vcombine.high %v173_v27, %v177_v28  ;;  %v233_v20 = vld [vmem:[%s7880_s0 + $0x6b8] sm:$0xff] }
 0x199   :  { %2476 = vmatmul.mubr.bf16.gmra.mrb[44].mxu1 %v4241_v37  ;;  %v4305_v37 = vcombine.low %v171_v25, %v175_v26  ;;  %v235_v25 = vld [vmem:[%s7880_s0 + $0x6c8] sm:$0xff] }
 0x19a   :  { %3054 = vmatmul.mubr.bf16.gmra.mrb[44].mxu0 %v4245_v38  ;;  %2483 = vmatprep.mubr.bf16.mxu1 %v4250_v39  ;;  %v4309_v38 = vcombine.low %v173_v27, %v177_v28  ;;  %v4314_v39 = vcombine.high %v179_v33, %v183_v34  ;;  %v239_v26 = vld [vmem:[%s7880_s0 + $0x6e8] sm:$0xff]  ;;  %v237_v27 = vld [vmem:[%s7880_s0 + $0x6d8] sm:$0xff] }
 0x19b   :  { %3061 = vmatprep.mubr.bf16.mxu0 %v4254_v40  ;;  %v4318_v40 = vcombine.high %v181_v35, %v185_v36  ;;  %v241_v28 = vld [vmem:[%s7880_s0 + $0x6f8] sm:$0xff] }
 0x1a1   :  { %2484 = vmatmul.mubr.bf16.gmra.mrb[48].mxu1 %v4249_v45  ;;  %v4313_v45 = vcombine.low %v179_v33, %v183_v34  ;;  %v243_v33 = vld [vmem:[%s7880_s0 + $0x708] sm:$0xff] }
 0x1a2   :  { %3062 = vmatmul.mubr.bf16.gmra.mrb[48].mxu0 %v4253_v46  ;;  %2491 = vmatprep.mubr.bf16.mxu1 %v4258_v47  ;;  %v4317_v46 = vcombine.low %v181_v35, %v185_v36  ;;  %v4322_v47 = vcombine.high %v187_v41, %v191_v42  ;;  %v247_v34 = vld [vmem:[%s7880_s0 + $0x728] sm:$0xff]  ;;  %v245_v36 = vld [vmem:[%s7880_s0 + $0x718] sm:$0xff] }
 0x1a3   :  { %3069 = vmatprep.mubr.bf16.mxu0 %v4262_v48  ;;  %v4326_v48 = vcombine.high %v189_v43, %v193_v44 }
 0x1a9   :  { %2492 = vmatmul.mubr.bf16.gmra.mrb[52].mxu1 %v4257_v53  ;;  %v4321_v53 = vcombine.low %v187_v41, %v191_v42 }
 0x1aa   :  { %3070 = vmatmul.mubr.bf16.gmra.mrb[52].mxu0 %v4261_v54  ;;  %2499 = vmatprep.mubr.bf16.mxu1 %v4266_v55  ;;  %v4325_v54 = vcombine.low %v189_v43, %v193_v44  ;;  %v4330_v55 = vcombine.high %v195_v49, %v199_v50  ;;  %v4373_v44 = vcombine.low %v237_v27, %v241_v28 }
 0x1ab   :  { %3077 = vmatprep.mubr.bf16.mxu0 %v4270_v56  ;;  %v4334_v56 = vcombine.high %v197_v51, %v201_v52 }
 0x1b1   :  { %2500 = vmatmul.mubr.bf16.gmra.mrb[56].mxu1 %v4265_v60  ;;  %v4329_v60 = vcombine.low %v195_v49, %v199_v50 }
 0x1b2   :  { %3078 = vmatmul.mubr.bf16.gmra.mrb[56].mxu0 %v4269_v61  ;;  %2507 = vmatprep.mubr.bf16.mxu1 %v4274_v62  ;;  %v4333_v61 = vcombine.low %v197_v51, %v201_v52  ;;  %v4338_v62 = vcombine.high %v203_v57, %v207_v0  ;;  %v251_v51 = vld [vmem:[%s7880_s0 + $0x748] sm:$0xff] }
 0x1b3   :  { %3085 = vmatprep.mubr.bf16.mxu0 %v4278_v63  ;;  %v4342_v63 = vcombine.high %v205_v58, %v209_v59  ;;  %v255_v52 = vld [vmem:[%s7880_s0 + $0x768] sm:$0xff] }
 0x1b9   :  { %2508 = vmatmul.mubr.bf16.gmra.mrb[60].mxu1 %v4273_v5  ;;  %v4337_v5 = vcombine.low %v203_v57, %v207_v0  ;;  %v4377_v0 = vcombine.low %v243_v33, %v247_v34 }
 0x1ba   :  { %3086 = vmatmul.mubr.bf16.gmra.mrb[60].mxu0 %v4277_v6  ;;  %2515 = vmatprep.mubr.bf16.mxu1 %v4282_v7  ;;  %v4341_v6 = vcombine.low %v205_v58, %v209_v59  ;;  %v4346_v7 = vcombine.high %v211_v1, %v215_v2 }
 0x1bb   :  { %3093 = vmatprep.mubr.bf16.mxu0 %v4286_v8  ;;  %v4350_v8 = vcombine.high %v213_v3, %v217_v4 }
 0x1c1   :  { %2516 = vmatmul.mubr.bf16.gmra.mrb[64].mxu1 %v4281_v13  ;;  %v4345_v13 = vcombine.low %v211_v1, %v215_v2 }
 0x1c2   :  { %3094 = vmatmul.mubr.bf16.gmra.mrb[64].mxu0 %v4285_v14  ;;  %2523 = vmatprep.mubr.bf16.mxu1 %v4290_v15  ;;  %v4349_v14 = vcombine.low %v213_v3, %v217_v4  ;;  %v4354_v15 = vcombine.high %v219_v9, %v223_v10 }
 0x1c3   :  { %3101 = vmatprep.mubr.bf16.mxu0 %v4294_v16  ;;  %v4358_v16 = vcombine.high %v221_v11, %v225_v12 }
 0x1c9   :  { %2524 = vmatmul.mubr.bf16.gmra.mrb[68].mxu1 %v4289_v21  ;;  %v4353_v21 = vcombine.low %v219_v9, %v223_v10  ;;  %v265_v9 = vld [vmem:[%s7880_s0 + $0x7b8] sm:$0xff] }
 0x1ca   :  { %3102 = vmatmul.mubr.bf16.gmra.mrb[68].mxu0 %v4293_v22  ;;  %2531 = vmatprep.mubr.bf16.mxu1 %v4298_v23  ;;  %v4357_v22 = vcombine.low %v221_v11, %v225_v12  ;;  %v4362_v23 = vcombine.high %v227_v17, %v231_v18  ;;  %v4385_v12 = vcombine.low %v251_v51, %v255_v52 }
 0x1cb   :  { %3109 = vmatprep.mubr.bf16.mxu0 %v4302_v24  ;;  %v4366_v24 = vcombine.high %v229_v19, %v233_v20 }
 0x1d1   :  { %2532 = vmatmul.mubr.bf16.gmra.mrb[72].mxu1 %v4297_v29  ;;  %v4361_v29 = vcombine.low %v227_v17, %v231_v18 }
 0x1d2   :  { %3110 = vmatmul.mubr.bf16.gmra.mrb[72].mxu0 %v4301_v30  ;;  %2539 = vmatprep.mubr.bf16.mxu1 %v4306_v31  ;;  %v4365_v30 = vcombine.low %v229_v19, %v233_v20  ;;  %v4370_v31 = vcombine.high %v235_v25, %v239_v26 }
 0x1d3   :  { %3117 = vmatprep.mubr.bf16.mxu0 %v4310_v32  ;;  %v4374_v32 = vcombine.high %v237_v27, %v241_v28  ;;  %v273_v27 = vld [vmem:[%s7880_s0 + $0x7f8] sm:$0xff] }
 0x1d9   :  { %2540 = vmatmul.mubr.bf16.gmra.mrb[76].mxu1 %v4305_v37  ;;  %v249_v37 = vld [vmem:[%s7880_s0 + $0x738] sm:$0xff] }
 0x1da   :  { %3118 = vmatmul.mubr.bf16.gmra.mrb[76].mxu0 %v4309_v38  ;;  %2547 = vmatprep.mubr.bf16.mxu1 %v4314_v39 }
 0x1db   :  { %3125 = vmatprep.mubr.bf16.mxu0 %v4318_v40  ;;  %v4369_v40 = vcombine.low %v235_v25, %v239_v26  ;;  %v269_v26 = vld [vmem:[%s7880_s0 + $0x7d8] sm:$0xff] }
 0x1e1   :  { %2548 = vmatmul.mubr.bf16.gmra.mrb[80].mxu1 %v4313_v45  ;;  %v4378_v45 = vcombine.high %v243_v33, %v247_v34 }
 0x1e2   :  { %3126 = vmatmul.mubr.bf16.gmra.mrb[80].mxu0 %v4317_v46  ;;  %2555 = vmatprep.mubr.bf16.mxu1 %v4322_v47 }
 0x1e3   :  { %3133 = vmatprep.mubr.bf16.mxu0 %v4326_v48  ;;  %v4382_v48 = vcombine.high %v245_v36, %v249_v37 }
 0x1e9   :  { %2556 = vmatmul.mubr.bf16.gmra.mrb[84].mxu1 %v4321_v53 }
 0x1ea   :  { %3134 = vmatmul.mubr.bf16.gmra.mrb[84].mxu0 %v4325_v54  ;;  %2563 = vmatprep.mubr.bf16.mxu1 %v4330_v55  ;;  %v253_v54 = vld [vmem:[%s7880_s0 + $0x758] sm:$0xff] }
 0x1eb   :  { %3141 = vmatprep.mubr.bf16.mxu0 %v4334_v56  ;;  %v257_v55 = vld [vmem:[%s7880_s0 + $0x778] sm:$0xff] }
 0x1ec   :  { %v4390_v2 = vcombine.high %v253_v54, %v257_v55 }
 0x1f1   :  { %2564 = vmatmul.mubr.bf16.gmra.mrb[88].mxu1 %v4329_v60 }
 0x1f2   :  { %3142 = vmatmul.mubr.bf16.gmra.mrb[88].mxu0 %v4333_v61  ;;  %2571 = vmatprep.mubr.bf16.mxu1 %v4338_v62  ;;  %v4381_v61 = vcombine.low %v245_v36, %v249_v37  ;;  %v4386_v62 = vcombine.high %v251_v51, %v255_v52 }
 0x1f3   :  { %3149 = vmatprep.mubr.bf16.mxu0 %v4342_v63 }
 0x1f9   :  { %2572 = vmatmul.mubr.bf16.gmra.mrb[92].mxu1 %v4337_v5  ;;  %v259_v5 = vld [vmem:[%s7880_s0 + $0x788] sm:$0xff] }
 0x1fa   :  { %3150 = vmatmul.mubr.bf16.gmra.mrb[92].mxu0 %v4341_v6  ;;  %2579 = vmatprep.mubr.bf16.mxu1 %v4346_v7  ;;  %v263_v6 = vld [vmem:[%s7880_s0 + $0x7a8] sm:$0xff] }
 0x1fb   :  { %3157 = vmatprep.mubr.bf16.mxu0 %v4350_v8  ;;  %v261_v8 = vld [vmem:[%s7880_s0 + $0x798] sm:$0xff]  ;;  %v4394_v17 = vcombine.high %v259_v5, %v263_v6 }
 0x1fc   :  { %v4398_v20 = vcombine.high %v261_v8, %v265_v9  ;;  %v4397_v34 = vcombine.low %v261_v8, %v265_v9 }
 0x201   :  { %2580 = vmatmul.mubr.bf16.gmra.mrb[96].mxu1 %v4345_v13 }
 0x202   :  { %3158 = vmatmul.mubr.bf16.gmra.mrb[96].mxu0 %v4349_v14  ;;  %2587 = vmatprep.mubr.bf16.mxu1 %v4354_v15 }
 0x203   :  { %3165 = vmatprep.mubr.bf16.mxu0 %v4358_v16  ;;  %v4389_v16 = vcombine.low %v253_v54, %v257_v55 }
 0x209   :  { %2588 = vmatmul.mubr.bf16.gmra.mrb[100].mxu1 %v4353_v21 }
 0x20a   :  { %3166 = vmatmul.mubr.bf16.gmra.mrb[100].mxu0 %v4357_v22  ;;  %2595 = vmatprep.mubr.bf16.mxu1 %v4362_v23  ;;  %v267_v23 = vld [vmem:[%s7880_s0 + $0x7c8] sm:$0xff] }
 0x20b   :  { %3173 = vmatprep.mubr.bf16.mxu0 %v4366_v24  ;;  %v271_v24 = vld [vmem:[%s7880_s0 + $0x7e8] sm:$0xff] }
 0x211   :  { %2596 = vmatmul.mubr.bf16.gmra.mrb[104].mxu1 %v4361_v29 }
 0x212   :  { %3174 = vmatmul.mubr.bf16.gmra.mrb[104].mxu0 %v4365_v30  ;;  %2603 = vmatprep.mubr.bf16.mxu1 %v4370_v31  ;;  %v4393_v30 = vcombine.low %v259_v5, %v263_v6 }
 0x213   :  { %3181 = vmatprep.mubr.bf16.mxu0 %v4374_v32 }
 0x214   :  { %v2389_v35 = vpop.f32.mrb[0].mxu1 }
 0x215   :  { %v2967_v38 = vpop.f32.mrb[0].mxu0  ;;  %v2391_v39 = vpop.f32.mrb[1].mxu1 }
 0x216   :  { %v6208_v41 = vadd.f32 %v2967_v38, %v2389_v35  ;;  %v2969_v42 = vpop.f32.mrb[1].mxu0  ;;  %v2392_v43 = vpop.f32.mrb[2].mxu1  ;;  %v4402_v35 = vcombine.high %v267_v23, %v271_v24  ;;  %v4406_v38 = vcombine.high %v269_v26, %v273_v27 }
 0x217   :  { %v2970_v46 = vpop.f32.mrb[2].mxu0  ;;  %v2394_v47 = vpop.f32.mrb[3].mxu1 }
 0x218   :  { %v6210_v49 = vadd.f32 %v2970_v46, %v2392_v43  ;;  %v2972_v50 = vpop.f32.mrb[3].mxu0 }
 0x219   :  { %2604 = vmatmul.mubr.bf16.gmra.mrb[108].mxu1 %v4369_v40  ;;  %v4405_v50 = vcombine.low %v269_v26, %v273_v27 }
 0x21a   :  { %3182 = vmatmul.mubr.bf16.gmra.mrb[108].mxu0 %v4373_v44  ;;  %2611 = vmatprep.mubr.bf16.mxu1 %v4378_v45  ;;  %v4401_v45 = vcombine.low %v267_v23, %v271_v24 }
 0x21b   :  { %3189 = vmatprep.mubr.bf16.mxu0 %v4382_v48 }
 0x21c   :  { %v2397_v53 = vpop.f32.mrb[4].mxu1 }
 0x21d   :  { %v2975_v56 = vpop.f32.mrb[4].mxu0  ;;  %v2399_v57 = vpop.f32.mrb[5].mxu1 }
 0x21e   :  { %v6224_v58 = vadd.f32 %v2975_v56, %v2397_v53  ;;  %v2977_v59 = vpop.f32.mrb[5].mxu0  ;;  %v2400_v60 = vpop.f32.mrb[6].mxu1 }
 0x21f   :  { %v2978_v63 = vpop.f32.mrb[6].mxu0  ;;  %v2402_v1 = vpop.f32.mrb[7].mxu1 }
 0x220   :  { %v6226_v3 = vadd.f32 %v2978_v63, %v2400_v60  ;;  %v2980_v4 = vpop.f32.mrb[7].mxu0 }
 0x221   :  { %2612 = vmatmul.mubr.bf16.gmra.mrb[112].mxu1 %v4377_v0 }
 0x222   :  { %3190 = vmatmul.mubr.bf16.gmra.mrb[112].mxu0 %v4381_v61  ;;  %2619 = vmatprep.mubr.bf16.mxu1 %v4386_v62 }
 0x223   :  { %3197 = vmatprep.mubr.bf16.mxu0 %v4390_v2 }
 0x224   :  { %v2405_v7 = vpop.f32.mrb[8].mxu1 }
 0x225   :  { %v2983_v10 = vpop.f32.mrb[8].mxu0  ;;  %v2407_v11 = vpop.f32.mrb[9].mxu1 }
 0x226   :  { %v6240_v13 = vadd.f32 %v2983_v10, %v2405_v7  ;;  %v2985_v14 = vpop.f32.mrb[9].mxu0  ;;  %v2408_v15 = vpop.f32.mrb[10].mxu1 }
 0x227   :  { %v2986_v18 = vpop.f32.mrb[10].mxu0  ;;  %v2410_v19 = vpop.f32.mrb[11].mxu1 }
 0x228   :  { %v6242_v21 = vadd.f32 %v2986_v18, %v2408_v15  ;;  %v2988_v22 = vpop.f32.mrb[11].mxu0 }
 0x229   :  { %2620 = vmatmul.mubr.bf16.gmra.mrb[116].mxu1 %v4385_v12 }
 0x22a   :  { %3198 = vmatmul.mubr.bf16.gmra.mrb[116].mxu0 %v4389_v16  ;;  %2627 = vmatprep.mubr.bf16.mxu1 %v4394_v17 }
 0x22b   :  { %3205 = vmatprep.mubr.bf16.mxu0 %v4398_v20 }
 0x22c   :  { %v2413_v25 = vpop.f32.mrb[12].mxu1 }
 0x22d   :  { %v2991_v28 = vpop.f32.mrb[12].mxu0  ;;  %v2415_v29 = vpop.f32.mrb[13].mxu1 }
 0x22e   :  { %v6256_v31 = vadd.f32 %v2991_v28, %v2413_v25  ;;  %v2993_v32 = vpop.f32.mrb[13].mxu0  ;;  %v2416_v33 = vpop.f32.mrb[14].mxu1  ;;  %v3222_v25 = vadd.f32 %v6210_v49, %v6208_v41 }
 0x22f   :  { %v2994_v36 = vpop.f32.mrb[14].mxu0  ;;  %v2418_v37 = vpop.f32.mrb[15].mxu1 }
 0x230   :  { %v6258_v39 = vadd.f32 %v2994_v36, %v2416_v33  ;;  %v2996_v40 = vpop.f32.mrb[15].mxu0  ;;  %v3223_v26 = vadd.f32 %v6224_v58, %v3222_v25 }
 0x231   :  { %2628 = vmatmul.mubr.bf16.gmra.mrb[120].mxu1 %v4393_v30 }
 0x232   :  { %3206 = vmatmul.mubr.bf16.gmra.mrb[120].mxu0 %v4397_v34  ;;  %2635 = vmatprep.mubr.bf16.mxu1 %v4402_v35  ;;  %v3224_v36 = vadd.f32 %v6226_v3, %v3223_v26 }
 0x233   :  { %3213 = vmatprep.mubr.bf16.mxu0 %v4406_v38 }
 0x234   :  { %v2421_v42 = vpop.f32.mrb[16].mxu1  ;;  %v3225_v40 = vadd.f32 %v6240_v13, %v3224_v36 }
 0x235   :  { %v2999_v43 = vpop.f32.mrb[16].mxu0  ;;  %v2423_v44 = vpop.f32.mrb[17].mxu1 }
 0x236   :  { %v6260_v46 = vadd.f32 %v2999_v43, %v2421_v42  ;;  %v3001_v47 = vpop.f32.mrb[17].mxu0  ;;  %v2424_v48 = vpop.f32.mrb[18].mxu1 }
 0x237   :  { %v3002_v51 = vpop.f32.mrb[18].mxu0  ;;  %v2426_v52 = vpop.f32.mrb[19].mxu1 }
 0x238   :  { %v6262_v53 = vadd.f32 %v3002_v51, %v2424_v48  ;;  %v3004_v54 = vpop.f32.mrb[19].mxu0 }
 0x239   :  { %2636 = vmatmul.mubr.bf16.gmra.mrb[124].mxu1 %v4401_v45  ;;  %v3226_v45 = vadd.f32 %v6242_v21, %v3225_v40 }
 0x23a   :  { %3214 = vmatmul.mubr.bf16.gmra.mrb[124].mxu0 %v4405_v50 }
 0x23b   :  { %v3227_v54 = vadd.f32 %v6256_v31, %v3226_v45 }
 0x23c   :  { %v2429_v55 = vpop.f32.mrb[20].mxu1 }
 0x23d   :  { %v3007_v56 = vpop.f32.mrb[20].mxu0  ;;  %v2431_v57 = vpop.f32.mrb[21].mxu1 }
 0x23e   :  { %v6264_v0 = vadd.f32 %v3007_v56, %v2429_v55  ;;  %v3009_v59 = vpop.f32.mrb[21].mxu0  ;;  %v2432_v60 = vpop.f32.mrb[22].mxu1  ;;  %v3228_v57 = vadd.f32 %v6258_v39, %v3227_v54 }
 0x23f   :  { %v3010_v61 = vpop.f32.mrb[22].mxu0  ;;  %v2434_v62 = vpop.f32.mrb[23].mxu1 }
 0x240   :  { %v6266_v63 = vadd.f32 %v3010_v61, %v2432_v60  ;;  %v3012_v1 = vpop.f32.mrb[23].mxu0  ;;  %v3229_v62 = vadd.f32 %v6260_v46, %v3228_v57 }
 0x244   :  { %v2437_v2 = vpop.f32.mrb[24].mxu1 }
 0x245   :  { %v3015_v4 = vpop.f32.mrb[24].mxu0  ;;  %v2439_v5 = vpop.f32.mrb[25].mxu1 }
 0x246   :  { %v6268_v6 = vadd.f32 %v3015_v4, %v2437_v2  ;;  %v3017_v7 = vpop.f32.mrb[25].mxu0  ;;  %v2440_v8 = vpop.f32.mrb[26].mxu1 }
 0x247   :  { %v3018_v9 = vpop.f32.mrb[26].mxu0  ;;  %v2442_v10 = vpop.f32.mrb[27].mxu1 }
 0x248   :  { %v6270_v11 = vadd.f32 %v3018_v9, %v2440_v8  ;;  %v3020_v12 = vpop.f32.mrb[27].mxu0  ;;  %v3230_v10 = vadd.f32 %v6262_v53, %v3229_v62 }
 0x24a   :  { %v3231_v12 = vadd.f32 %v6264_v0, %v3230_v10 }
 0x24c   :  { %v2445_v14 = vpop.f32.mrb[28].mxu1  ;;  %v3232_v25 = vadd.f32 %v6266_v63, %v3231_v12 }
 0x24d   :  { %v3023_v15 = vpop.f32.mrb[28].mxu0  ;;  %v2447_v16 = vpop.f32.mrb[29].mxu1 }
 0x24e   :  { %v6272_v17 = vadd.f32 %v3023_v15, %v2445_v14  ;;  %v3025_v18 = vpop.f32.mrb[29].mxu0  ;;  %v2448_v19 = vpop.f32.mrb[30].mxu1 }
 0x24f   :  { %v3026_v20 = vpop.f32.mrb[30].mxu0  ;;  %v2450_v22 = vpop.f32.mrb[31].mxu1 }
 0x250   :  { %v6274_v23 = vadd.f32 %v3026_v20, %v2448_v19  ;;  %v3028_v24 = vpop.f32.mrb[31].mxu0 }
 0x254   :  { %v2453_v27 = vpop.f32.mrb[32].mxu1 }
 0x255   :  { %v3031_v28 = vpop.f32.mrb[32].mxu0  ;;  %v2455_v29 = vpop.f32.mrb[33].mxu1 }
 0x256   :  { %v6279_v30 = vadd.f32 %v3031_v28, %v2453_v27  ;;  %v3033_v32 = vpop.f32.mrb[33].mxu0  ;;  %v2456_v33 = vpop.f32.mrb[34].mxu1  ;;  %v3233_v28 = vadd.f32 %v6268_v6, %v3232_v25 }
 0x257   :  { %v3034_v34 = vpop.f32.mrb[34].mxu0  ;;  %v2458_v35 = vpop.f32.mrb[35].mxu1 }
 0x258   :  { %v6282_v37 = vadd.f32 %v3034_v34, %v2456_v33  ;;  %v3036_v38 = vpop.f32.mrb[35].mxu0  ;;  %v3234_v34 = vadd.f32 %v6270_v11, %v3233_v28 }
 0x25c   :  { %v2461_v42 = vpop.f32.mrb[36].mxu1 }
 0x25d   :  { %v3039_v43 = vpop.f32.mrb[36].mxu0  ;;  %v2463_v44 = vpop.f32.mrb[37].mxu1 }
 0x25e   :  { %v6286_v47 = vadd.f32 %v3039_v43, %v2461_v42  ;;  %v3041_v48 = vpop.f32.mrb[37].mxu0  ;;  %v2464_v50 = vpop.f32.mrb[38].mxu1  ;;  %v3235_v43 = vadd.f32 %v6272_v17, %v3234_v34 }
 0x25f   :  { %v3042_v51 = vpop.f32.mrb[38].mxu0  ;;  %v2466_v52 = vpop.f32.mrb[39].mxu1 }
 0x260   :  { %v6289_v55 = vadd.f32 %v3042_v51, %v2464_v50  ;;  %v3044_v56 = vpop.f32.mrb[39].mxu0  ;;  %v3236_v48 = vadd.f32 %v6274_v23, %v3235_v43 }
 0x262   :  { %v3237_v54 = vadd.f32 %v6279_v30, %v3236_v48 }
 0x264   :  { %v2469_v59 = vpop.f32.mrb[40].mxu1 }
 0x265   :  { %v3047_v60 = vpop.f32.mrb[40].mxu0  ;;  %v2471_v61 = vpop.f32.mrb[41].mxu1 }
 0x266   :  { %v6293_v1 = vadd.f32 %v3047_v60, %v2469_v59  ;;  %v3049_v2 = vpop.f32.mrb[41].mxu0  ;;  %v2472_v4 = vpop.f32.mrb[42].mxu1 }
 0x267   :  { %v3050_v5 = vpop.f32.mrb[42].mxu0  ;;  %v2474_v7 = vpop.f32.mrb[43].mxu1 }
 0x268   :  { %v6295_v8 = vadd.f32 %v3050_v5, %v2472_v4  ;;  %v3052_v9 = vpop.f32.mrb[43].mxu0  ;;  %v3238_v4 = vadd.f32 %v6282_v37, %v3237_v54 }
 0x26a   :  { %v3239_v5 = vadd.f32 %v6286_v47, %v3238_v4 }
 0x26c   :  { %v2477_v14 = vpop.f32.mrb[44].mxu1 }
 0x26d   :  { %v3055_v15 = vpop.f32.mrb[44].mxu0  ;;  %v2479_v16 = vpop.f32.mrb[45].mxu1 }
 0x26e   :  { %v6299_v18 = vadd.f32 %v3055_v15, %v2477_v14  ;;  %v3057_v19 = vpop.f32.mrb[45].mxu0  ;;  %v2480_v20 = vpop.f32.mrb[46].mxu1 }
 0x26f   :  { %v3058_v22 = vpop.f32.mrb[46].mxu0  ;;  %v2482_v24 = vpop.f32.mrb[47].mxu1 }
 0x270   :  { %v6302_v26 = vadd.f32 %v3058_v22, %v2480_v20  ;;  %v3060_v27 = vpop.f32.mrb[47].mxu0  ;;  %v3240_v20 = vadd.f32 %v6289_v55, %v3239_v5 }
 0x272   :  { %v3241_v25 = vadd.f32 %v6293_v1, %v3240_v20 }
 0x274   :  { %v2485_v29 = vpop.f32.mrb[48].mxu1 }
 0x275   :  { %v3063_v32 = vpop.f32.mrb[48].mxu0  ;;  %v2487_v33 = vpop.f32.mrb[49].mxu1 }
 0x276   :  { %v6306_v35 = vadd.f32 %v3063_v32, %v2485_v29  ;;  %v3065_v36 = vpop.f32.mrb[49].mxu0  ;;  %v2488_v38 = vpop.f32.mrb[50].mxu1  ;;  %v3242_v32 = vadd.f32 %v6295_v8, %v3241_v25 }
 0x277   :  { %v3066_v40 = vpop.f32.mrb[50].mxu0  ;;  %v2490_v42 = vpop.f32.mrb[51].mxu1 }
 0x278   :  { %v6309_v44 = vadd.f32 %v3066_v40, %v2488_v38  ;;  %v3068_v45 = vpop.f32.mrb[51].mxu0  ;;  %v3243_v42 = vadd.f32 %v6299_v18, %v3242_v32 }
 0x27a   :  { %v3244_v48 = vadd.f32 %v6302_v26, %v3243_v42 }
 0x27c   :  { %v2493_v50 = vpop.f32.mrb[52].mxu1  ;;  %v3245_v54 = vadd.f32 %v6306_v35, %v3244_v48 }
 0x27d   :  { %v3071_v51 = vpop.f32.mrb[52].mxu0  ;;  %v2495_v52 = vpop.f32.mrb[53].mxu1 }
 0x27e   :  { %v6313_v56 = vadd.f32 %v3071_v51, %v2493_v50  ;;  %v3073_v57 = vpop.f32.mrb[53].mxu0  ;;  %v2496_v59 = vpop.f32.mrb[54].mxu1 }
 0x27f   :  { %v3074_v60 = vpop.f32.mrb[54].mxu0  ;;  %v2498_v61 = vpop.f32.mrb[55].mxu1 }
 0x280   :  { %v6315_v62 = vadd.f32 %v3074_v60, %v2496_v59  ;;  %v3076_v2 = vpop.f32.mrb[55].mxu0 }
 0x284   :  { %v2501_v7 = vpop.f32.mrb[56].mxu1 }
 0x285   :  { %v3079_v9 = vpop.f32.mrb[56].mxu0  ;;  %v2503_v10 = vpop.f32.mrb[57].mxu1 }
 0x286   :  { %v6319_v12 = vadd.f32 %v3079_v9, %v2501_v7  ;;  %v3081_v14 = vpop.f32.mrb[57].mxu0  ;;  %v2504_v15 = vpop.f32.mrb[58].mxu1  ;;  %v3246_v7 = vadd.f32 %v6309_v44, %v3245_v54 }
 0x287   :  { %v3082_v16 = vpop.f32.mrb[58].mxu0  ;;  %v2506_v19 = vpop.f32.mrb[59].mxu1 }
 0x288   :  { %v6322_v22 = vadd.f32 %v3082_v16, %v2504_v15  ;;  %v3084_v24 = vpop.f32.mrb[59].mxu0  ;;  %v3247_v9 = vadd.f32 %v6313_v56, %v3246_v7 }
 0x28c   :  { %v2509_v27 = vpop.f32.mrb[60].mxu1 }
 0x28d   :  { %v3087_v28 = vpop.f32.mrb[60].mxu0  ;;  %v2511_v29 = vpop.f32.mrb[61].mxu1 }
 0x28e   :  { %v6326_v33 = vadd.f32 %v3087_v28, %v2509_v27  ;;  %v3089_v34 = vpop.f32.mrb[61].mxu0  ;;  %v2512_v36 = vpop.f32.mrb[62].mxu1  ;;  %v3248_v27 = vadd.f32 %v6315_v62, %v3247_v9 }
 0x28f   :  { %v3090_v38 = vpop.f32.mrb[62].mxu0  ;;  %v2514_v40 = vpop.f32.mrb[63].mxu1 }
 0x290   :  { %v6329_v43 = vadd.f32 %v3090_v38, %v2512_v36  ;;  %v3092_v45 = vpop.f32.mrb[63].mxu0  ;;  %v3249_v32 = vadd.f32 %v6319_v12, %v3248_v27 }
 0x292   :  { %v3250_v40 = vadd.f32 %v6322_v22, %v3249_v32 }
 0x294   :  { %v2517_v50 = vpop.f32.mrb[64].mxu1 }
 0x295   :  { %v3095_v51 = vpop.f32.mrb[64].mxu0  ;;  %v2519_v52 = vpop.f32.mrb[65].mxu1 }
 0x296   :  { %v6333_v57 = vadd.f32 %v3095_v51, %v2517_v50  ;;  %v3097_v59 = vpop.f32.mrb[65].mxu0  ;;  %v2520_v60 = vpop.f32.mrb[66].mxu1  ;;  %v3251_v52 = vadd.f32 %v6326_v33, %v3250_v40 }
 0x297   :  { %v3098_v61 = vpop.f32.mrb[66].mxu0  ;;  %v2522_v2 = vpop.f32.mrb[67].mxu1 }
 0x298   :  { %v6335_v4 = vadd.f32 %v3098_v61, %v2520_v60  ;;  %v3100_v5 = vpop.f32.mrb[67].mxu0  ;;  %v3252_v60 = vadd.f32 %v6329_v43, %v3251_v52 }
 0x29a   :  { %v3253_v7 = vadd.f32 %v6333_v57, %v3252_v60 }
 0x29c   :  { %v2525_v10 = vpop.f32.mrb[68].mxu1 }
 0x29d   :  { %v3103_v14 = vpop.f32.mrb[68].mxu0  ;;  %v2527_v15 = vpop.f32.mrb[69].mxu1 }
 0x29e   :  { %v6339_v16 = vadd.f32 %v3103_v14, %v2525_v10  ;;  %v3105_v19 = vpop.f32.mrb[69].mxu0  ;;  %v2528_v20 = vpop.f32.mrb[70].mxu1 }
 0x29f   :  { %v3106_v24 = vpop.f32.mrb[70].mxu0  ;;  %v2530_v25 = vpop.f32.mrb[71].mxu1 }
 0x2a0   :  { %7954 = vst [vmem:[#allocation2_spill] sm:$0xff] %v6339_v16  ;;  %v6342_v28 = vadd.f32 %v3106_v24, %v2528_v20  ;;  %v3108_v29 = vpop.f32.mrb[71].mxu0  ;;  %v3254_v25 = vadd.f32 %v6335_v4, %v3253_v7 }
 0x2a2   :  { %7955 = vst [vmem:[#allocation3_spill] sm:$0xff] %v6342_v28  ;;  %v3255_v27 = vadd.f32 %v6339_v16, %v3254_v25 }
 0x2a4   :  { %v2533_v34 = vpop.f32.mrb[72].mxu1 }
 0x2a5   :  { %v3111_v36 = vpop.f32.mrb[72].mxu0  ;;  %v2535_v38 = vpop.f32.mrb[73].mxu1 }
 0x2a6   :  { %v6346_v42 = vadd.f32 %v3111_v36, %v2533_v34  ;;  %v3113_v45 = vpop.f32.mrb[73].mxu0  ;;  %v2536_v48 = vpop.f32.mrb[74].mxu1 }
 0x2a7   :  { %v3114_v50 = vpop.f32.mrb[74].mxu0  ;;  %v2538_v51 = vpop.f32.mrb[75].mxu1 }
 0x2a8   :  { %7956 = vst [vmem:[#allocation4_spill] sm:$0xff] %v6346_v42  ;;  %v6349_v54 = vadd.f32 %v3114_v50, %v2536_v48  ;;  %v3116_v59 = vpop.f32.mrb[75].mxu0  ;;  %v3256_v50 = vadd.f32 %v6342_v28, %v3255_v27 }
 0x2aa   :  { %7957 = vst [vmem:[#allocation5_spill] sm:$0xff] %v6349_v54  ;;  %v3257_v59 = vadd.f32 %v6346_v42, %v3256_v50 }
 0x2ac   :  { %v2541_v61 = vpop.f32.mrb[76].mxu1 }
 0x2ad   :  { %v3119_v2 = vpop.f32.mrb[76].mxu0  ;;  %v2543_v5 = vpop.f32.mrb[77].mxu1 }
 0x2ae   :  { %v6353_v9 = vadd.f32 %v3119_v2, %v2541_v61  ;;  %v3121_v10 = vpop.f32.mrb[77].mxu0  ;;  %v2544_v14 = vpop.f32.mrb[78].mxu1  ;;  %v3258_v5 = vadd.f32 %v6349_v54, %v3257_v59 }
 0x2af   :  { %v3122_v15 = vpop.f32.mrb[78].mxu0  ;;  %v2546_v19 = vpop.f32.mrb[79].mxu1 }
 0x2b0   :  { %7958 = vst [vmem:[#allocation6_spill] sm:$0xff] %v6353_v9  ;;  %v6355_v20 = vadd.f32 %v3122_v15, %v2544_v14  ;;  %v3124_v24 = vpop.f32.mrb[79].mxu0 }
 0x2b1   :  { %v3259_v24 = vadd.f32 %v6353_v9, %v3258_v5 }
 0x2b2   :  { %7959 = vst [vmem:[#allocation7_spill] sm:$0xff] %v6355_v20 }
 0x2b4   :  { %v2549_v29 = vpop.f32.mrb[80].mxu1 }
 0x2b5   :  { %v3127_v32 = vpop.f32.mrb[80].mxu0  ;;  %v2551_v34 = vpop.f32.mrb[81].mxu1 }
 0x2b6   :  { %v6359_v36 = vadd.f32 %v3127_v32, %v2549_v29  ;;  %v3129_v38 = vpop.f32.mrb[81].mxu0  ;;  %v2552_v40 = vpop.f32.mrb[82].mxu1  ;;  %v3260_v29 = vadd.f32 %v6355_v20, %v3259_v24 }
 0x2b7   :  { %v3130_v45 = vpop.f32.mrb[82].mxu0  ;;  %v2554_v48 = vpop.f32.mrb[83].mxu1 }
 0x2b8   :  { %7960 = vst [vmem:[#allocation8_spill] sm:$0xff] %v6359_v36  ;;  %v6362_v51 = vadd.f32 %v3130_v45, %v2552_v40  ;;  %v3132_v52 = vpop.f32.mrb[83].mxu0  ;;  %v3261_v40 = vadd.f32 %v6359_v36, %v3260_v29 }
 0x2ba   :  { %7961 = vst [vmem:[#allocation9_spill] sm:$0xff] %v6362_v51 }
 0x2bc   :  { %v2557_v60 = vpop.f32.mrb[84].mxu1 }
 0x2bd   :  { %v3135_v61 = vpop.f32.mrb[84].mxu0  ;;  %v2559_v2 = vpop.f32.mrb[85].mxu1 }
 0x2be   :  { %v6366_v7 = vadd.f32 %v3135_v61, %v2557_v60  ;;  %v3137_v10 = vpop.f32.mrb[85].mxu0  ;;  %v2560_v14 = vpop.f32.mrb[86].mxu1  ;;  %v3262_v2 = vadd.f32 %v6362_v51, %v3261_v40 }
 0x2bf   :  { %v3138_v15 = vpop.f32.mrb[86].mxu0  ;;  %v2562_v19 = vpop.f32.mrb[87].mxu1 }
 0x2c0   :  { %7962 = vst [vmem:[#allocation10_spill] sm:$0xff] %v6366_v7  ;;  %v6369_v25 = vadd.f32 %v3138_v15, %v2560_v14  ;;  %v3140_v27 = vpop.f32.mrb[87].mxu0  ;;  %v3263_v5 = vadd.f32 %v6366_v7, %v3262_v2 }
 0x2c2   :  { %7963 = vst [vmem:[#allocation11_spill] sm:$0xff] %v6369_v25 }
 0x2c4   :  { %v2565_v32 = vpop.f32.mrb[88].mxu1 }
 0x2c5   :  { %v3143_v34 = vpop.f32.mrb[88].mxu0  ;;  %v2567_v38 = vpop.f32.mrb[89].mxu1 }
 0x2c6   :  { %v6373_v45 = vadd.f32 %v3143_v34, %v2565_v32  ;;  %v3145_v48 = vpop.f32.mrb[89].mxu0  ;;  %v2568_v50 = vpop.f32.mrb[90].mxu1  ;;  %v3264_v34 = vadd.f32 %v6369_v25, %v3263_v5 }
 0x2c7   :  { %v3146_v52 = vpop.f32.mrb[90].mxu0  ;;  %v2570_v59 = vpop.f32.mrb[91].mxu1 }
 0x2c8   :  { %7964 = vst [vmem:[#allocation12_spill] sm:$0xff] %v6373_v45  ;;  %v6375_v60 = vadd.f32 %v3146_v52, %v2568_v50  ;;  %v3148_v61 = vpop.f32.mrb[91].mxu0  ;;  %v3265_v50 = vadd.f32 %v6373_v45, %v3264_v34 }
 0x2ca   :  { %7965 = vst [vmem:[#allocation13_spill] sm:$0xff] %v6375_v60  ;;  %v3266_v61 = vadd.f32 %v6375_v60, %v3265_v50 }
 0x2cc   :  { %v2573_v10 = vpop.f32.mrb[92].mxu1 }
 0x2cd   :  { %v3151_v14 = vpop.f32.mrb[92].mxu0  ;;  %v2575_v15 = vpop.f32.mrb[93].mxu1 }
 0x2ce   :  { %v6379_v19 = vadd.f32 %v3151_v14, %v2573_v10  ;;  %v3153_v24 = vpop.f32.mrb[93].mxu0  ;;  %v2576_v27 = vpop.f32.mrb[94].mxu1 }
 0x2cf   :  { %v3154_v29 = vpop.f32.mrb[94].mxu0  ;;  %v2578_v32 = vpop.f32.mrb[95].mxu1 }
 0x2d0   :  { %7966 = vst [vmem:[#allocation14_spill] sm:$0xff] %v6379_v19  ;;  %v6382_v38 = vadd.f32 %v3154_v29, %v2576_v27  ;;  %v3156_v48 = vpop.f32.mrb[95].mxu0  ;;  %v3267_v32 = vadd.f32 %v6379_v19, %v3266_v61 }
 0x2d2   :  { %7967 = vst [vmem:[#allocation15_spill] sm:$0xff] %v6382_v38  ;;  %v3268_v27 = vadd.f32 %v6382_v38, %v3267_v32 }
 0x2d4   :  { %v2581_v52 = vpop.f32.mrb[96].mxu1 }
 0x2d5   :  { %v3159_v40 = vpop.f32.mrb[96].mxu0  ;;  %v2583_v59 = vpop.f32.mrb[97].mxu1 }
 0x2d6   :  { %v6386_v2 = vadd.f32 %v3159_v40, %v2581_v52  ;;  %v3161_v10 = vpop.f32.mrb[97].mxu0  ;;  %v2584_v14 = vpop.f32.mrb[98].mxu1 }
 0x2d7   :  { %v3162_v15 = vpop.f32.mrb[98].mxu0  ;;  %v2586_v24 = vpop.f32.mrb[99].mxu1 }
 0x2d8   :  { %7968 = vst [vmem:[#allocation16_spill] sm:$0xff] %v6386_v2  ;;  %v6389_v7 = vadd.f32 %v3162_v15, %v2584_v14  ;;  %v3164_v5 = vpop.f32.mrb[99].mxu0  ;;  %v3269_v59 = vadd.f32 %v6386_v2, %v3268_v27 }
 0x2da   :  { %7969 = vst [vmem:[#allocation17_spill] sm:$0xff] %v6389_v7  ;;  %v3270_v61 = vadd.f32 %v6389_v7, %v3269_v59 }
 0x2dc   :  { %v2589_v29 = vpop.f32.mrb[100].mxu1 }
 0x2dd   :  { %v3167_v34 = vpop.f32.mrb[100].mxu0  ;;  %v2591_v48 = vpop.f32.mrb[101].mxu1 }
 0x2de   :  { %v6393_v45 = vadd.f32 %v3167_v34, %v2589_v29  ;;  %v3169_v50 = vpop.f32.mrb[101].mxu0  ;;  %v2592_v52 = vpop.f32.mrb[102].mxu1 }
 0x2df   :  { %v3170_v40 = vpop.f32.mrb[102].mxu0  ;;  %v2594_v10 = vpop.f32.mrb[103].mxu1 }
 0x2e0   :  { %7970 = vst [vmem:[#allocation18_spill] sm:$0xff] %v6393_v45  ;;  %v6395_v60 = vadd.f32 %v3170_v40, %v2592_v52  ;;  %v3172_v24 = vpop.f32.mrb[103].mxu0  ;;  %v3271_v14 = vadd.f32 %v6393_v45, %v3270_v61 }
 0x2e2   :  { %7971 = vst [vmem:[#allocation19_spill] sm:$0xff] %v6395_v60  ;;  %v3272_v50 = vadd.f32 %v6395_v60, %v3271_v14 }
 0x2e4   :  { %v2597_v15 = vpop.f32.mrb[104].mxu1 }
 0x2e5   :  { %v3175_v32 = vpop.f32.mrb[104].mxu0  ;;  %v2599_v5 = vpop.f32.mrb[105].mxu1 }
 0x2e6   :  { %v6399_v38 = vadd.f32 %v3175_v32, %v2597_v15  ;;  %v3177_v48 = vpop.f32.mrb[105].mxu0  ;;  %v2600_v27 = vpop.f32.mrb[106].mxu1 }
 0x2e7   :  { %v3178_v29 = vpop.f32.mrb[106].mxu0  ;;  %v2602_v34 = vpop.f32.mrb[107].mxu1 }
 0x2e8   :  { %7972 = vst [vmem:[#allocation20_spill] sm:$0xff] %v6399_v38  ;;  %v6402_v2 = vadd.f32 %v3178_v29, %v2600_v27  ;;  %v3180_v52 = vpop.f32.mrb[107].mxu0  ;;  %v3273_v40 = vadd.f32 %v6399_v38, %v3272_v50 }
 0x2ea   :  { %7973 = vst [vmem:[#allocation21_spill] sm:$0xff] %v6402_v2  ;;  %v3274_v61 = vadd.f32 %v6402_v2, %v3273_v40 }
 0x2ec   :  { %v2605_v10 = vpop.f32.mrb[108].mxu1 }
 0x2ed   :  { %v3183_v59 = vpop.f32.mrb[108].mxu0  ;;  %v2607_v24 = vpop.f32.mrb[109].mxu1 }
 0x2ee   :  { %v6406_v45 = vadd.f32 %v3183_v59, %v2605_v10  ;;  %v3185_v15 = vpop.f32.mrb[109].mxu0  ;;  %v2608_v32 = vpop.f32.mrb[110].mxu1 }
 0x2ef   :  { %v3186_v5 = vpop.f32.mrb[110].mxu0  ;;  %v2610_v48 = vpop.f32.mrb[111].mxu1 }
 0x2f0   :  { %v3275_v34 = vadd.f32 %v6406_v45, %v3274_v61  ;;  %v4846_v7 = vadd.f32 %v3186_v5, %v2608_v32  ;;  %v3188_v14 = vpop.f32.mrb[111].mxu0 }
 0x2f2   :  { %v3276_v27 = vadd.f32 %v4846_v7, %v3275_v34 }
 0x2f4   :  { %v2613_v29 = vpop.f32.mrb[112].mxu1 }
 0x2f5   :  { %v3191_v52 = vpop.f32.mrb[112].mxu0  ;;  %v2615_v60 = vpop.f32.mrb[113].mxu1 }
 0x2f6   :  { %v4847_v50 = vadd.f32 %v3191_v52, %v2613_v29  ;;  %v3193_v38 = vpop.f32.mrb[113].mxu0  ;;  %v2616_v19 = vpop.f32.mrb[114].mxu1 }
 0x2f7   :  { %v3194_v24 = vpop.f32.mrb[114].mxu0  ;;  %v2618_v25 = vpop.f32.mrb[115].mxu1 }
 0x2f8   :  { %v3277_v40 = vadd.f32 %v4847_v50, %v3276_v27  ;;  %v4848_v10 = vadd.f32 %v3194_v24, %v2616_v19  ;;  %v3196_v59 = vpop.f32.mrb[115].mxu0 }
 0x2fa   :  { %v3278_v15 = vadd.f32 %v4848_v10, %v3277_v40 }
 0x2fc   :  { %v2621_v2 = vpop.f32.mrb[116].mxu1 }
 0x2fd   :  { %v3199_v51 = vpop.f32.mrb[116].mxu0  ;;  %v2623_v48 = vpop.f32.mrb[117].mxu1 }
 0x2fe   :  { %v4849_v36 = vadd.f32 %v3199_v51, %v2621_v2  ;;  %v3201_v61 = vpop.f32.mrb[117].mxu0  ;;  %v2624_v32 = vpop.f32.mrb[118].mxu1 }
 0x2ff   :  { %v3202_v5 = vpop.f32.mrb[118].mxu0  ;;  %v2626_v34 = vpop.f32.mrb[119].mxu1 }
 0x300   :  { %v3279_v14 = vadd.f32 %v4849_v36, %v3278_v15  ;;  %v4850_v20 = vadd.f32 %v3202_v5, %v2624_v32  ;;  %v3204_v60 = vpop.f32.mrb[119].mxu0 }
 0x302   :  { %v3280_v29 = vadd.f32 %v4850_v20, %v3279_v14 }
 0x304   :  { %v2629_v38 = vpop.f32.mrb[120].mxu1 }
 0x305   :  { %v3207_v52 = vpop.f32.mrb[120].mxu0  ;;  %v2631_v9 = vpop.f32.mrb[121].mxu1 }
 0x306   :  { %v4851_v25 = vadd.f32 %v3207_v52, %v2629_v38  ;;  %v3209_v27 = vpop.f32.mrb[121].mxu0  ;;  %v2632_v19 = vpop.f32.mrb[122].mxu1 }
 0x307   :  { %v3210_v24 = vpop.f32.mrb[122].mxu0  ;;  %v2634_v40 = vpop.f32.mrb[123].mxu1 }
 0x308   :  { %v3281_v59 = vadd.f32 %v4851_v25, %v3280_v29  ;;  %v4852_v54 = vadd.f32 %v3210_v24, %v2632_v19  ;;  %v3212_v48 = vpop.f32.mrb[123].mxu0 }
 0x30a   :  { %v3282_v51 = vadd.f32 %v4852_v54, %v3281_v59 }
 0x30c   :  { %v2637_v2 = vpop.f32.mrb[124].mxu1 }
 0x30d   :  { %v3215_v61 = vpop.f32.mrb[124].mxu0  ;;  %v2639_v42 = vpop.f32.mrb[125].mxu1 }
 0x30e   :  { %v4853_v34 = vadd.f32 %v3215_v61, %v2637_v2  ;;  %v3217_v15 = vpop.f32.mrb[125].mxu0  ;;  %v2640_v32 = vpop.f32.mrb[126].mxu1 }
 0x30f   :  { %v3218_v5 = vpop.f32.mrb[126].mxu0  ;;  %v2642_v14 = vpop.f32.mrb[127].mxu1 }
 0x310   :  { %v3283_v60 = vadd.f32 %v4853_v34, %v3282_v51  ;;  %v4854_v28 = vadd.f32 %v3218_v5, %v2640_v32  ;;  %v3220_v9 = vpop.f32.mrb[127].mxu0 }
 0x312   :  { %v3284_v38 = vadd.f32 %v4854_v28, %v3283_v60 }
 0x314   :  { %v3285_v52 = vrot.slane %v3284_v38, 4 }
 0x316   :  { %v3286_v27 = vadd.f32 %v3285_v52, %v3284_v38 }
 0x318   :  { %v3287_v16 = vrot.slane %v3286_v27, 2 }
 0x31a   :  { %v3288_v40 = vadd.f32 %v3287_v16, %v3286_v27 }
 0x31c   :  { %v3289_v29 = vrot.slane %v3288_v40, 1 }
 0x31e   :  { %v3290_v19 = vadd.f32 %v3289_v29, %v3288_v40 }
 0x320   :  { %v6409_v24 = vmul.f32 0.001953125, %v3290_v19 }
 0x322   :  { %v6413_v42 = vsub.f32 %v6406_v45, %v6409_v24  ;;  %v6416_v59 = vsub.f32 %v4846_v7, %v6409_v24  ;;  %v6419_v48 = vsub.f32 %v4847_v50, %v6409_v24  ;;  %v6422_v51 = vsub.f32 %v4848_v10, %v6409_v24 }
 0x323   :  { %v6425_v2 = vsub.f32 %v4849_v36, %v6409_v24  ;;  %v6428_v16 = vsub.f32 %v4850_v20, %v6409_v24  ;;  %v6431_v61 = vsub.f32 %v4851_v25, %v6409_v24  ;;  %v6434_v45 = vsub.f32 %v4852_v54, %v6409_v24 }
 0x324   :  { %v6437_v7 = vsub.f32 %v4853_v34, %v6409_v24  ;;  %v6440_v50 = vsub.f32 %v4854_v28, %v6409_v24  ;;  %v6444_v10 = vsub.f32 %v6208_v41, %v6409_v24  ;;  %v6448_v20 = vsub.f32 %v6210_v49, %v6409_v24 }
 0x325   :  { %v6452_v36 = vsub.f32 %v6224_v58, %v6409_v24  ;;  %v6460_v28 = vsub.f32 %v6226_v3, %v6409_v24  ;;  %v6464_v41 = vsub.f32 %v6240_v13, %v6409_v24  ;;  %v6470_v58 = vsub.f32 %v6242_v21, %v6409_v24 }
 0x326   :  { %v3356_v54 = vmul.f32 %v6444_v10, %v6444_v10  ;;  %v3357_v25 = vmul.f32 %v6448_v20, %v6448_v20  ;;  %v6476_v3 = vsub.f32 %v6256_v31, %v6409_v24  ;;  %v6482_v14 = vsub.f32 %v6258_v39, %v6409_v24 }
 0x327   :  { %v3358_v49 = vmul.f32 %v6452_v36, %v6452_v36  ;;  %v3359_v15 = vmul.f32 %v6460_v28, %v6460_v28  ;;  %v3360_v13 = vmul.f32 %v6464_v41, %v6464_v41  ;;  %v3361_v21 = vmul.f32 %v6470_v58, %v6470_v58 }
 0x328   :  { %v3420_v34 = vadd.f32 %v3357_v25, %v3356_v54  ;;  %v6488_v9 = vsub.f32 %v6260_v46, %v6409_v24  ;;  %v3362_v31 = vmul.f32 %v6476_v3, %v6476_v3  ;;  %v6494_v52 = vsub.f32 %v6262_v53, %v6409_v24 }
 0x329   :  { %v3363_v39 = vmul.f32 %v6482_v14, %v6482_v14  ;;  %v6500_v40 = vsub.f32 %v6264_v0, %v6409_v24  ;;  %v6506_v19 = vsub.f32 %v6266_v63, %v6409_v24  ;;  %v6512_v25 = vsub.f32 %v6268_v6, %v6409_v24 }
 0x32a   :  { %v3421_v32 = vadd.f32 %v3420_v34, %v3358_v49  ;;  %v3364_v46 = vmul.f32 %v6488_v9, %v6488_v9  ;;  %v3365_v53 = vmul.f32 %v6494_v52, %v6494_v52  ;;  %v6518_v34 = vsub.f32 %v6270_v11, %v6409_v24 }
 0x32b   :  { %v3366_v0 = vmul.f32 %v6500_v40, %v6500_v40  ;;  %v3367_v63 = vmul.f32 %v6506_v19, %v6506_v19  ;;  %v3368_v6 = vmul.f32 %v6512_v25, %v6512_v25 }
 0x32c   :  { %v3422_v5 = vadd.f32 %v3421_v32, %v3359_v15  ;;  %v6524_v32 = vsub.f32 %v6272_v17, %v6409_v24  ;;  %v3369_v11 = vmul.f32 %v6518_v34, %v6518_v34 }
 0x32e   :  { %v3423_v60 = vadd.f32 %v3422_v5, %v3360_v13  ;;  %v6530_v5 = vsub.f32 %v6274_v23, %v6409_v24  ;;  %v3370_v17 = vmul.f32 %v6524_v32, %v6524_v32 }
 0x330   :  { %v3424_v38 = vadd.f32 %v3423_v60, %v3361_v21  ;;  %v6536_v60 = vsub.f32 %v6279_v30, %v6409_v24  ;;  %v3371_v23 = vmul.f32 %v6530_v5, %v6530_v5 }
 0x332   :  { %v3425_v27 = vadd.f32 %v3424_v38, %v3362_v31  ;;  %v6542_v38 = vsub.f32 %v6282_v37, %v6409_v24  ;;  %v3372_v30 = vmul.f32 %v6536_v60, %v6536_v60 }
 0x334   :  { %v3426_v29 = vadd.f32 %v3425_v27, %v3363_v39  ;;  %v6548_v27 = vsub.f32 %v6286_v47, %v6409_v24  ;;  %v3373_v37 = vmul.f32 %v6542_v38, %v6542_v38 }
 0x336   :  { %v3427_v54 = vadd.f32 %v3426_v29, %v3364_v46  ;;  %v6554_v29 = vsub.f32 %v6289_v55, %v6409_v24  ;;  %v3374_v47 = vmul.f32 %v6548_v27, %v6548_v27 }
 0x338   :  { %v3428_v49 = vadd.f32 %v3427_v54, %v3365_v53  ;;  %v6560_v54 = vsub.f32 %v6293_v1, %v6409_v24  ;;  %v3375_v55 = vmul.f32 %v6554_v29, %v6554_v29 }
 0x33a   :  { %v3429_v15 = vadd.f32 %v3428_v49, %v3366_v0  ;;  %v6566_v49 = vsub.f32 %v6295_v8, %v6409_v24  ;;  %v3376_v1 = vmul.f32 %v6560_v54, %v6560_v54 }
 0x33c   :  { %v3430_v13 = vadd.f32 %v3429_v15, %v3367_v63  ;;  %v6572_v15 = vsub.f32 %v6299_v18, %v6409_v24  ;;  %v3377_v8 = vmul.f32 %v6566_v49, %v6566_v49 }
 0x33e   :  { %v3431_v21 = vadd.f32 %v3430_v13, %v3368_v6  ;;  %v6578_v13 = vsub.f32 %v6302_v26, %v6409_v24  ;;  %v3378_v18 = vmul.f32 %v6572_v15, %v6572_v15 }
 0x340   :  { %v3432_v31 = vadd.f32 %v3431_v21, %v3369_v11  ;;  %v6584_v21 = vsub.f32 %v6306_v35, %v6409_v24  ;;  %v3379_v26 = vmul.f32 %v6578_v13, %v6578_v13 }
 0x342   :  { %v3433_v39 = vadd.f32 %v3432_v31, %v3370_v17  ;;  %v6590_v31 = vsub.f32 %v6309_v44, %v6409_v24  ;;  %v3380_v35 = vmul.f32 %v6584_v21, %v6584_v21 }
 0x344   :  { %v3434_v46 = vadd.f32 %v3433_v39, %v3371_v23  ;;  %v6596_v39 = vsub.f32 %v6313_v56, %v6409_v24  ;;  %v3381_v44 = vmul.f32 %v6590_v31, %v6590_v31 }
 0x346   :  { %v3435_v53 = vadd.f32 %v3434_v46, %v3372_v30  ;;  %v6602_v46 = vsub.f32 %v6315_v62, %v6409_v24  ;;  %v3382_v56 = vmul.f32 %v6596_v39, %v6596_v39 }
 0x348   :  { %v3436_v0 = vadd.f32 %v3435_v53, %v3373_v37  ;;  %v6608_v53 = vsub.f32 %v6319_v12, %v6409_v24  ;;  %v3383_v62 = vmul.f32 %v6602_v46, %v6602_v46 }
 0x34a   :  { %v3437_v63 = vadd.f32 %v3436_v0, %v3374_v47  ;;  %v6614_v0 = vsub.f32 %v6322_v22, %v6409_v24  ;;  %v3384_v12 = vmul.f32 %v6608_v53, %v6608_v53 }
 0x34c   :  { %v3438_v6 = vadd.f32 %v3437_v63, %v3375_v55  ;;  %v6620_v63 = vsub.f32 %v6326_v33, %v6409_v24  ;;  %v3385_v22 = vmul.f32 %v6614_v0, %v6614_v0 }
 0x34e   :  { %v3439_v11 = vadd.f32 %v3438_v6, %v3376_v1  ;;  %v6626_v6 = vsub.f32 %v6329_v43, %v6409_v24  ;;  %v3386_v33 = vmul.f32 %v6620_v63, %v6620_v63 }
 0x350   :  { %v3440_v17 = vadd.f32 %v3439_v11, %v3377_v8  ;;  %v6632_v11 = vsub.f32 %v6333_v57, %v6409_v24  ;;  %v3387_v43 = vmul.f32 %v6626_v6, %v6626_v6 }
 0x352   :  { %v3441_v23 = vadd.f32 %v3440_v17, %v3378_v18  ;;  %v6638_v17 = vsub.f32 %v6335_v4, %v6409_v24  ;;  %v3388_v57 = vmul.f32 %v6632_v11, %v6632_v11 }
 0x354   :  { %v3442_v30 = vadd.f32 %v3441_v23, %v3379_v26  ;;  %7974 = vst [vmem:[#allocation22_spill] sm:$0xff] %v6638_v17  ;;  %v7975_v23 = vld [vmem:[#allocation2_spill] sm:$0xff]  ;;  %v3389_v4 = vmul.f32 %v6638_v17, %v6638_v17 }
 0x356   :  { %v3443_v37 = vadd.f32 %v3442_v30, %v3380_v35  ;;  %v6644_v35 = vsub.f32 %v7975_v23, %v6409_v24 }
 0x358   :  { %v3444_v47 = vadd.f32 %v3443_v37, %v3381_v44  ;;  %7976 = vst [vmem:[#allocation2_spill] sm:$0xff] %v6644_v35  ;;  %v7977_v44 = vld [vmem:[#allocation3_spill] sm:$0xff] }
 0x359   :  { %v6650_v37 = vsub.f32 %v7977_v44, %v6409_v24 }
 0x35a   :  { %v3445_v55 = vadd.f32 %v3444_v47, %v3382_v56  ;;  %v7979_v47 = vld [vmem:[#allocation4_spill] sm:$0xff] }
 0x35b   :  { %7978 = vst [vmem:[#allocation3_spill] sm:$0xff] %v6650_v37 }
 0x35c   :  { %v3446_v1 = vadd.f32 %v3445_v55, %v3383_v62  ;;  %v6656_v62 = vsub.f32 %v7979_v47, %v6409_v24  ;;  %v3390_v55 = vmul.f32 %v6644_v35, %v6644_v35 }
 0x35e   :  { %v3447_v8 = vadd.f32 %v3446_v1, %v3384_v12  ;;  %7980 = vst [vmem:[#allocation4_spill] sm:$0xff] %v6656_v62  ;;  %v7981_v1 = vld [vmem:[#allocation5_spill] sm:$0xff] }
 0x360   :  { %v3448_v18 = vadd.f32 %v3447_v8, %v3385_v22  ;;  %v6662_v22 = vsub.f32 %v7981_v1, %v6409_v24  ;;  %v3391_v8 = vmul.f32 %v6650_v37, %v6650_v37  ;;  %v7989_v1 = vld [vmem:[#allocation9_spill] sm:$0xff] }
 0x362   :  { %v3449_v26 = vadd.f32 %v3448_v18, %v3386_v33  ;;  %7982 = vst [vmem:[#allocation5_spill] sm:$0xff] %v6662_v22  ;;  %v7983_v18 = vld [vmem:[#allocation6_spill] sm:$0xff]  ;;  %v3393_v44 = vmul.f32 %v6662_v22, %v6662_v22 }
 0x364   :  { %v3450_v30 = vadd.f32 %v3449_v26, %v3387_v43  ;;  %v6668_v43 = vsub.f32 %v7983_v18, %v6409_v24  ;;  %v3392_v26 = vmul.f32 %v6656_v62, %v6656_v62  ;;  %v6686_v18 = vsub.f32 %v7989_v1, %v6409_v24  ;;  %v7995_v1 = vld [vmem:[#allocation12_spill] sm:$0xff] }
 0x366   :  { %v3451_v56 = vadd.f32 %v3450_v30, %v3388_v57  ;;  %7984 = vst [vmem:[#allocation6_spill] sm:$0xff] %v6668_v43  ;;  %v7985_v57 = vld [vmem:[#allocation7_spill] sm:$0xff]  ;;  %7990 = vst [vmem:[#allocation9_spill] sm:$0xff] %v6686_v18 }
 0x367   :  { %v6674_v30 = vsub.f32 %v7985_v57, %v6409_v24  ;;  %v7991_v57 = vld [vmem:[#allocation10_spill] sm:$0xff] }
 0x368   :  { %v3452_v12 = vadd.f32 %v3451_v56, %v3389_v4  ;;  %v7987_v56 = vld [vmem:[#allocation8_spill] sm:$0xff]  ;;  %v6692_v22 = vsub.f32 %v7991_v57, %v6409_v24  ;;  %v7997_v57 = vld [vmem:[#allocation13_spill] sm:$0xff] }
 0x369   :  { %7986 = vst [vmem:[#allocation7_spill] sm:$0xff] %v6674_v30  ;;  %v6680_v47 = vsub.f32 %v7987_v56, %v6409_v24  ;;  %v7993_v56 = vld [vmem:[#allocation11_spill] sm:$0xff] }
 0x36a   :  { %v3453_v33 = vadd.f32 %v3452_v12, %v3390_v55  ;;  %v3394_v55 = vmul.f32 %v6668_v43, %v6668_v43  ;;  %7992 = vst [vmem:[#allocation10_spill] sm:$0xff] %v6692_v22  ;;  %v6698_v43 = vsub.f32 %v7993_v56, %v6409_v24  ;;  %v7999_v56 = vld [vmem:[#allocation14_spill] sm:$0xff] }
 0x36b   :  { %7988 = vst [vmem:[#allocation8_spill] sm:$0xff] %v6680_v47 }
 0x36c   :  { %v3454_v23 = vadd.f32 %v3453_v33, %v3391_v8  ;;  %v3395_v8 = vmul.f32 %v6674_v30, %v6674_v30  ;;  %7994 = vst [vmem:[#allocation11_spill] sm:$0xff] %v6698_v43  ;;  %v6704_v30 = vsub.f32 %v7995_v1, %v6409_v24  ;;  %v8001_v1 = vld [vmem:[#allocation15_spill] sm:$0xff] }
 0x36e   :  { %v3455_v4 = vadd.f32 %v3454_v23, %v3392_v26  ;;  %v3396_v26 = vmul.f32 %v6680_v47, %v6680_v47  ;;  %7996 = vst [vmem:[#allocation12_spill] sm:$0xff] %v6704_v30  ;;  %v6710_v47 = vsub.f32 %v7997_v57, %v6409_v24  ;;  %v8003_v57 = vld [vmem:[#allocation16_spill] sm:$0xff] }
 0x370   :  { %v3456_v12 = vadd.f32 %v3455_v4, %v3393_v44  ;;  %v3397_v44 = vmul.f32 %v6686_v18, %v6686_v18  ;;  %7998 = vst [vmem:[#allocation13_spill] sm:$0xff] %v6710_v47  ;;  %v6716_v18 = vsub.f32 %v7999_v56, %v6409_v24  ;;  %v8005_v56 = vld [vmem:[#allocation17_spill] sm:$0xff] }
 0x372   :  { %v3457_v33 = vadd.f32 %v3456_v12, %v3394_v55  ;;  %v3398_v55 = vmul.f32 %v6692_v22, %v6692_v22  ;;  %8000 = vst [vmem:[#allocation14_spill] sm:$0xff] %v6716_v18  ;;  %v6722_v22 = vsub.f32 %v8001_v1, %v6409_v24  ;;  %v8007_v1 = vld [vmem:[#allocation18_spill] sm:$0xff] }
 0x374   :  { %v3458_v23 = vadd.f32 %v3457_v33, %v3395_v8  ;;  %v3399_v8 = vmul.f32 %v6698_v43, %v6698_v43  ;;  %8002 = vst [vmem:[#allocation15_spill] sm:$0xff] %v6722_v22  ;;  %v6728_v43 = vsub.f32 %v8003_v57, %v6409_v24  ;;  %v8009_v57 = vld [vmem:[#allocation19_spill] sm:$0xff] }
 0x376   :  { %v3459_v4 = vadd.f32 %v3458_v23, %v3396_v26  ;;  %v3400_v26 = vmul.f32 %v6704_v30, %v6704_v30  ;;  %8004 = vst [vmem:[#allocation16_spill] sm:$0xff] %v6728_v43  ;;  %v6734_v30 = vsub.f32 %v8005_v56, %v6409_v24  ;;  %v8011_v56 = vld [vmem:[#allocation20_spill] sm:$0xff] }
 0x378   :  { %v3460_v12 = vadd.f32 %v3459_v4, %v3397_v44  ;;  %v3401_v44 = vmul.f32 %v6710_v47, %v6710_v47  ;;  %8006 = vst [vmem:[#allocation17_spill] sm:$0xff] %v6734_v30  ;;  %v6740_v47 = vsub.f32 %v8007_v1, %v6409_v24  ;;  %v8012_v1 = vld [vmem:[#allocation21_spill] sm:$0xff] }
 0x379   :  { %v3345_v62 = vsub.f32 %v8012_v1, %v6409_v24  ;;  %v3415_v1 = vmul.f32 %v6428_v16, %v6428_v16 }
 0x37a   :  { %v3461_v33 = vadd.f32 %v3460_v12, %v3398_v55  ;;  %v3402_v55 = vmul.f32 %v6716_v18, %v6716_v18  ;;  %8008 = vst [vmem:[#allocation18_spill] sm:$0xff] %v6740_v47  ;;  %v6746_v18 = vsub.f32 %v8009_v57, %v6409_v24 }
 0x37b   :  { %v3409_v37 = vmul.f32 %v3345_v62, %v3345_v62 }
 0x37c   :  { %v3462_v23 = vadd.f32 %v3461_v33, %v3399_v8  ;;  %v3403_v8 = vmul.f32 %v6722_v22, %v6722_v22  ;;  %8010 = vst [vmem:[#allocation19_spill] sm:$0xff] %v6746_v18  ;;  %v3344_v22 = vsub.f32 %v8011_v56, %v6409_v24  ;;  %v3411_v56 = vmul.f32 %v6416_v59, %v6416_v59 }
 0x37e   :  { %v3463_v4 = vadd.f32 %v3462_v23, %v3400_v26  ;;  %v3404_v26 = vmul.f32 %v6728_v43, %v6728_v43  ;;  %v3408_v57 = vmul.f32 %v3344_v22, %v3344_v22 }
 0x380   :  { %v3464_v12 = vadd.f32 %v3463_v4, %v3401_v44  ;;  %v3405_v44 = vmul.f32 %v6734_v30, %v6734_v30  ;;  %v3495_v30 = vlaneseq }
 0x382   :  { %v3465_v33 = vadd.f32 %v3464_v12, %v3402_v55  ;;  %v3406_v55 = vmul.f32 %v6740_v47, %v6740_v47 }
 0x384   :  { %v3466_v23 = vadd.f32 %v3465_v33, %v3403_v8  ;;  %v3407_v8 = vmul.f32 %v6746_v18, %v6746_v18 }
 0x386   :  { %v3467_v4 = vadd.f32 %v3466_v23, %v3404_v26  ;;  %v3410_v26 = vmul.f32 %v6413_v42, %v6413_v42 }
 0x388   :  { %v3468_v12 = vadd.f32 %v3467_v4, %v3405_v44  ;;  %v3412_v44 = vmul.f32 %v6419_v48, %v6419_v48  ;;  %v3413_v4 = vmul.f32 %v6422_v51, %v6422_v51 }
 0x38a   :  { %v3469_v33 = vadd.f32 %v3468_v12, %v3406_v55  ;;  %v3414_v12 = vmul.f32 %v6425_v2, %v6425_v2 }
 0x38c   :  { %v3470_v43 = vadd.f32 %v3469_v33, %v3407_v8  ;;  %v3417_v33 = vmul.f32 %v6434_v45, %v6434_v45 }
 0x38e   :  { %v3471_v35 = vadd.f32 %v3470_v43, %v3408_v57  ;;  %v3418_v57 = vmul.f32 %v6437_v7, %v6437_v7 }
 0x390   :  { %v3472_v23 = vadd.f32 %v3471_v35, %v3409_v37  ;;  %v3416_v37 = vmul.f32 %v6431_v61, %v6431_v61 }
 0x392   :  { %v3473_v47 = vadd.f32 %v3472_v23, %v3410_v26  ;;  %v3419_v23 = vmul.f32 %v6440_v50, %v6440_v50 }
 0x394   :  { %v3474_v24 = vadd.f32 %v3473_v47, %v3411_v56 }
 0x396   :  { %v3475_v55 = vadd.f32 %v3474_v24, %v3412_v44 }
 0x398   :  { %v3476_v43 = vadd.f32 %v3475_v55, %v3413_v4 }
 0x39a   :  { %v3477_v35 = vadd.f32 %v3476_v43, %v3414_v12 }
 0x39c   :  { %v3478_v8 = vadd.f32 %v3477_v35, %v3415_v1 }
 0x39e   :  { %v3479_v47 = vadd.f32 %v3478_v8, %v3416_v37  ;;  %v3496_v37 = vshrl.u32 %v3495_v30, 7 }
 0x3a0   :  { %v3480_v26 = vadd.f32 %v3479_v47, %v3417_v33  ;;  %v3490_v33 = vld [vmem:[%s7881_s2] sm:$0x1]  ;;  %v3497_v17 = vsub.s32 0, %v3496_v37  ;;  %v8029_v37 = vld [vmem:[#allocation8_spill] sm:$0xff] }
 0x3a2   :  { %v3481_v56 = vadd.f32 %v3480_v26, %v3418_v57 }
 0x3a4   :  { %v3482_v44 = vadd.f32 %v3481_v56, %v3419_v23 }
 0x3a6   :  { %v3483_v24 = vrot.slane %v3482_v44, 4 }
 0x3a8   :  { %v3484_v4 = vadd.f32 %v3483_v24, %v3482_v44  ;;  %v8022_v24 = vld [vmem:[#allocation22_spill] sm:$0xff] }
 0x3aa   :  { %v3485_v55 = vrot.slane %v3484_v4, 2 }
 0x3ac   :  { %v3486_v12 = vadd.f32 %v3485_v55, %v3484_v4  ;;  %v8023_v4 = vld [vmem:[#allocation2_spill] sm:$0xff]  ;;  %v8024_v55 = vld [vmem:[#allocation3_spill] sm:$0xff] }
 0x3ae   :  { %v3487_v43 = vrot.slane %v3486_v12, 1 }
 0x3b0   :  { %v3488_v18 = vadd.f32 %v3487_v43, %v3486_v12  ;;  %v8025_v12 = vld [vmem:[#allocation4_spill] sm:$0xff]  ;;  %v8026_v43 = vld [vmem:[#allocation5_spill] sm:$0xff] }
 0x3b2   :  { %v3489_v1 = vmul.f32 0.001953125, %v3488_v18 }
 0x3b4   :  { %v3491_v35 = vadd.f32 1e-05, %v3489_v1  ;;  %v8027_v1 = vld [vmem:[#allocation6_spill] sm:$0xff] }
 0x3b6   :  { %5176 = vrsqrt.f32 %v3491_v35  ;;  %v8028_v35 = vld [vmem:[#allocation7_spill] sm:$0xff] }
 0x3c0   :  { %v5177_v8 = vpop.eup %5176 }
 0x3c1   :  { %v3493_v47 = vmul.f32 %v5177_v8, %v3490_v33  ;;  %v8030_v33 = vld [vmem:[#allocation9_spill] sm:$0xff] }
 0x3c3   :  { %v6781_v57 = vrot.slane %v3493_v47, %v3497_v17 }
 0x3c5   :  { %v6784_v26 = vmul.f32 %v6781_v57, %v3344_v22  ;;  %v6787_v23 = vmul.f32 %v6781_v57, %v3345_v62  ;;  %v6791_v18 = vmul.f32 %v6781_v57, %v6413_v42  ;;  %v6795_v30 = vmul.f32 %v6781_v57, %v6416_v59 }
 0x3c6   :  { %v6799_v56 = vmul.f32 %v6781_v57, %v6419_v48  ;;  %v6803_v17 = vmul.f32 %v6781_v57, %v6422_v51  ;;  %v6807_v62 = vmul.f32 %v6781_v57, %v6425_v2  ;;  %v6811_v42 = vmul.f32 %v6781_v57, %v6428_v16 }
 0x3c7   :  { %8013 = vst [vmem:[#allocation20_spill] sm:$0xff] %v6795_v30  ;;  %v6815_v59 = vmul.f32 %v6781_v57, %v6431_v61  ;;  %v6819_v48 = vmul.f32 %v6781_v57, %v6434_v45  ;;  %v6823_v51 = vmul.f32 %v6781_v57, %v6437_v7  ;;  %v6827_v2 = vmul.f32 %v6781_v57, %v6440_v50  ;;  %v8040_v30 = vld [vmem:[#allocation19_spill] sm:$0xff] }
 0x3c8   :  { %8014 = vst [vmem:[#allocation21_spill] sm:$0xff] %v6799_v56  ;;  %8015 = vst [vmem:[#allocation23_spill] sm:$0xff] %v6803_v17  ;;  %v3500_v16 = vmul.f32 %v6781_v57, %v6444_v10  ;;  %v3501_v22 = vmul.f32 %v6781_v57, %v6448_v20  ;;  %v3502_v61 = vmul.f32 %v6781_v57, %v6452_v36  ;;  %v8039_v56 = vld [vmem:[#allocation18_spill] sm:$0xff] }
 0x3c9   :  { %8016 = vst [vmem:[#allocation24_spill] sm:$0xff] %v6807_v62  ;;  %8017 = vst [vmem:[#allocation25_spill] sm:$0xff] %v6811_v42  ;;  %v3503_v45 = vmul.f32 %v6781_v57, %v6460_v28  ;;  %v3504_v7 = vmul.f32 %v6781_v57, %v6464_v41  ;;  %v3505_v44 = vmul.f32 %v6781_v57, %v6470_v58  ;;  %v8038_v62 = vld [vmem:[#allocation17_spill] sm:$0xff] }
 0x3ca   :  { %8018 = vst [vmem:[#allocation26_spill] sm:$0xff] %v6815_v59  ;;  %8019 = vst [vmem:[#allocation27_spill] sm:$0xff] %v6819_v48  ;;  %v3506_v50 = vmul.f32 %v6781_v57, %v6476_v3  ;;  %v3507_v10 = vmul.f32 %v6781_v57, %v6482_v14  ;;  %v3508_v20 = vmul.f32 %v6781_v57, %v6488_v9  ;;  %v8036_v48 = vld [vmem:[#allocation15_spill] sm:$0xff]  ;;  %v8037_v59 = vld [vmem:[#allocation16_spill] sm:$0xff] }
 0x3cb   :  { %8020 = vst [vmem:[#allocation28_spill] sm:$0xff] %v6823_v51  ;;  %8021 = vst [vmem:[#allocation29_spill] sm:$0xff] %v6827_v2  ;;  %v3509_v36 = vmul.f32 %v6781_v57, %v6494_v52  ;;  %v3510_v28 = vmul.f32 %v6781_v57, %v6500_v40  ;;  %v3511_v41 = vmul.f32 %v6781_v57, %v6506_v19  ;;  %v8034_v2 = vld [vmem:[#allocation13_spill] sm:$0xff]  ;;  %v8035_v51 = vld [vmem:[#allocation14_spill] sm:$0xff] }
 0x3cc   :  { %v3512_v58 = vmul.f32 %v6781_v57, %v6512_v25  ;;  %v3513_v3 = vmul.f32 %v6781_v57, %v6518_v34  ;;  %v3514_v14 = vmul.f32 %v6781_v57, %v6524_v32  ;;  %v3515_v9 = vmul.f32 %v6781_v57, %v6530_v5 }
 0x3cd   :  { %v3516_v52 = vmul.f32 %v6781_v57, %v6536_v60  ;;  %v3517_v40 = vmul.f32 %v6781_v57, %v6542_v38  ;;  %v3518_v19 = vmul.f32 %v6781_v57, %v6548_v27  ;;  %v3519_v25 = vmul.f32 %v6781_v57, %v6554_v29 }
 0x3ce   :  { %v3520_v34 = vmul.f32 %v6781_v57, %v6560_v54  ;;  %v3521_v32 = vmul.f32 %v6781_v57, %v6566_v49  ;;  %v3522_v5 = vmul.f32 %v6781_v57, %v6572_v15  ;;  %v3523_v60 = vmul.f32 %v6781_v57, %v6578_v13 }
 0x3cf   :  { %v3524_v38 = vmul.f32 %v6781_v57, %v6584_v21  ;;  %v3525_v27 = vmul.f32 %v6781_v57, %v6590_v31  ;;  %v3526_v29 = vmul.f32 %v6781_v57, %v6596_v39  ;;  %v3527_v54 = vmul.f32 %v6781_v57, %v6602_v46 }
 0x3d0   :  { %v3528_v49 = vmul.f32 %v6781_v57, %v6608_v53  ;;  %v3529_v15 = vmul.f32 %v6781_v57, %v6614_v0  ;;  %v3530_v13 = vmul.f32 %v6781_v57, %v6620_v63  ;;  %v3531_v21 = vmul.f32 %v6781_v57, %v6626_v6 }
 0x3d1   :  { %v3532_v31 = vmul.f32 %v6781_v57, %v6632_v11  ;;  %v3533_v39 = vmul.f32 %v6781_v57, %v8022_v24  ;;  %v3534_v46 = vmul.f32 %v6781_v57, %v8023_v4  ;;  %v3535_v53 = vmul.f32 %v6781_v57, %v8024_v55  ;;  %v8031_v24 = vld [vmem:[#allocation10_spill] sm:$0xff] }
 0x3d2   :  { %v3536_v0 = vmul.f32 %v6781_v57, %v8025_v12  ;;  %v3537_v63 = vmul.f32 %v6781_v57, %v8026_v43  ;;  %v3538_v6 = vmul.f32 %v6781_v57, %v8027_v1  ;;  %v3539_v11 = vmul.f32 %v6781_v57, %v8028_v35  ;;  %v6918_v55 = vld [vmem:[%s7882_s3] ss:$0 sm:$0xff]  ;;  %v8032_v12 = vld [vmem:[#allocation11_spill] sm:$0xff]  ;;  %v8033_v1 = vld [vmem:[#allocation12_spill] sm:$0xff] }
 0x3d3   :  { %v3540_v8 = vmul.f32 %v6781_v57, %v8029_v37  ;;  %v3541_v47 = vmul.f32 %v6781_v57, %v8030_v33  ;;  %v3542_v4 = vmul.f32 %v6781_v57, %v8031_v24  ;;  %v3543_v43 = vmul.f32 %v6781_v57, %v8032_v12 }
 0x3d4   :  { %v3544_v35 = vmul.f32 %v6781_v57, %v8033_v1  ;;  %v3545_v37 = vmul.f32 %v6781_v57, %v8034_v2  ;;  %v3546_v33 = vmul.f32 %v6781_v57, %v8035_v51  ;;  %v3547_v24 = vmul.f32 %v6781_v57, %v8036_v48 }
 0x3d5   :  { %v3548_v42 = vmul.f32 %v6781_v57, %v8037_v59  ;;  %v3549_v17 = vmul.f32 %v6781_v57, %v8038_v62  ;;  %v3550_v12 = vmul.f32 %v6781_v57, %v8039_v56  ;;  %v3551_v1 = vmul.f32 %v6781_v57, %v8040_v30 }
 0x3d6   :  { %v6939_v2 = vadd.f32 %v6918_v55, %v3500_v16  ;;  %v6942_v51 = vadd.f32 %v6918_v55, %v3501_v22  ;;  %v6945_v48 = vadd.f32 %v6918_v55, %v3502_v61  ;;  %v6948_v59 = vadd.f32 %v6918_v55, %v3503_v45 }
 0x3d7   :  { %v6951_v62 = vadd.f32 %v6918_v55, %v3504_v7  ;;  %v6954_v56 = vadd.f32 %v6918_v55, %v3505_v44  ;;  %v6957_v57 = vadd.f32 %v6918_v55, %v3506_v50  ;;  %v6960_v30 = vadd.f32 %v6918_v55, %v3507_v10 }
 0x3d8   :  { %v6963_v16 = vadd.f32 %v6918_v55, %v3508_v20  ;;  %v6966_v22 = vadd.f32 %v6918_v55, %v3509_v36  ;;  %v6969_v61 = vadd.f32 %v6918_v55, %v3510_v28  ;;  %v6972_v45 = vadd.f32 %v6918_v55, %v3511_v41 }
 0x3d9   :  { %v6975_v7 = vadd.f32 %v6918_v55, %v3512_v58  ;;  %v6978_v44 = vadd.f32 %v6918_v55, %v3513_v3  ;;  %v6981_v50 = vadd.f32 %v6918_v55, %v3514_v14  ;;  %v6984_v10 = vadd.f32 %v6918_v55, %v3515_v9 }
 0x3da   :  { %v6987_v20 = vadd.f32 %v6918_v55, %v3516_v52  ;;  %v6990_v36 = vadd.f32 %v6918_v55, %v3517_v40  ;;  %v6993_v28 = vadd.f32 %v6918_v55, %v3518_v19  ;;  %v6996_v41 = vadd.f32 %v6918_v55, %v3519_v25 }
 0x3db   :  { %v6999_v58 = vadd.f32 %v6918_v55, %v3520_v34  ;;  %v7002_v3 = vadd.f32 %v6918_v55, %v3521_v32  ;;  %v7005_v14 = vadd.f32 %v6918_v55, %v3522_v5  ;;  %v7008_v9 = vadd.f32 %v6918_v55, %v3523_v60 }
 0x3dc   :  { %v7011_v52 = vadd.f32 %v6918_v55, %v3524_v38  ;;  %v7014_v40 = vadd.f32 %v6918_v55, %v3525_v27  ;;  %v7017_v19 = vadd.f32 %v6918_v55, %v3526_v29  ;;  %v7020_v25 = vadd.f32 %v6918_v55, %v3527_v54 }
 0x3dd   :  { %v7023_v34 = vadd.f32 %v6918_v55, %v3528_v49  ;;  %v7026_v32 = vadd.f32 %v6918_v55, %v3529_v15  ;;  %v7029_v5 = vadd.f32 %v6918_v55, %v3530_v13  ;;  %v7032_v60 = vadd.f32 %v6918_v55, %v3531_v21 }
 0x3de   :  { %v7035_v38 = vadd.f32 %v6918_v55, %v3532_v31  ;;  %v7038_v27 = vadd.f32 %v6918_v55, %v3533_v39  ;;  %v7041_v29 = vadd.f32 %v6918_v55, %v3534_v46  ;;  %v7044_v54 = vadd.f32 %v6918_v55, %v3535_v53 }
 0x3df   :  { %v7047_v49 = vadd.f32 %v6918_v55, %v3536_v0  ;;  %v7050_v15 = vadd.f32 %v6918_v55, %v3537_v63  ;;  %v7053_v13 = vadd.f32 %v6918_v55, %v3538_v6  ;;  %v7056_v21 = vadd.f32 %v6918_v55, %v3539_v11 }
 0x3e0   :  { %v7059_v31 = vadd.f32 %v6918_v55, %v3540_v8  ;;  %v7062_v39 = vadd.f32 %v6918_v55, %v3541_v47  ;;  %v7065_v46 = vadd.f32 %v6918_v55, %v3542_v4  ;;  %v7068_v53 = vadd.f32 %v6918_v55, %v3543_v43 }
 0x3e1   :  { %v7071_v0 = vadd.f32 %v6918_v55, %v3544_v35  ;;  %v7074_v63 = vadd.f32 %v6918_v55, %v3545_v37  ;;  %v7077_v6 = vadd.f32 %v6918_v55, %v3546_v33  ;;  %v7080_v11 = vadd.f32 %v6918_v55, %v3547_v24  ;;  %v8051_v24 = vld [vmem:[#allocation21_spill] sm:$0xff] }
 0x3e2   :  { %v7083_v8 = vadd.f32 %v6918_v55, %v3548_v42  ;;  %v7086_v47 = vadd.f32 %v6918_v55, %v3549_v17  ;;  %v7089_v4 = vadd.f32 %v6918_v55, %v3550_v12  ;;  %v7092_v43 = vadd.f32 %v6918_v55, %v3551_v1  ;;  %v8049_v17 = vld [vmem:[#allocation20_spill] sm:$0xff]  ;;  %v8053_v1 = vld [vmem:[#allocation23_spill] sm:$0xff] }
 0x3e3   :  { %8041 = vst [vmem:[#allocation22_spill] sm:$0xff] %v7074_v63  ;;  %v7096_v35 = vadd.f32 %v6918_v55, %v6784_v26  ;;  %v7100_v37 = vadd.f32 %v6918_v55, %v6787_v23  ;;  %v7104_v42 = vadd.f32 %v6918_v55, %v6791_v18  ;;  %v7108_v33 = vadd.f32 %v6918_v55, %v8049_v17 }
 0x3e4   :  { %8042 = vst [vmem:[#allocation2_spill] sm:$0xff] %v7083_v8  ;;  %8043 = vst [vmem:[#allocation3_spill] sm:$0xff] %v7086_v47  ;;  %v7112_v12 = vadd.f32 %v6918_v55, %v8051_v24  ;;  %v7116_v26 = vadd.f32 %v6918_v55, %v8053_v1  ;;  %vm3635_vm0 = vcmp.gt.f32.partialorder %v6939_v2, 0.0  ;;  %vm3636_vm1 = vcmp.gt.f32.partialorder %v6942_v51, 0.0 }
 0x3e5   :  { %8044 = vst [vmem:[#allocation4_spill] sm:$0xff] %v7089_v4  ;;  %8045 = vst [vmem:[#allocation5_spill] sm:$0xff] %v7092_v43  ;;  %vm3637_vm2 = vcmp.gt.f32.partialorder %v6945_v48, 0.0  ;;  %vm3638_vm3 = vcmp.gt.f32.partialorder %v6948_v59, 0.0  ;;  %vm3639_vm4 = vcmp.gt.f32.partialorder %v6951_v62, 0.0  ;;  %vm3640_vm5 = vcmp.gt.f32.partialorder %v6954_v56, 0.0 }
 0x3e6   :  { %8046 = vst [vmem:[#allocation6_spill] sm:$0xff] %v7096_v35  ;;  %8047 = vst [vmem:[#allocation7_spill] sm:$0xff] %v7100_v37  ;;  %v8055_v35 = vld [vmem:[#allocation24_spill] sm:$0xff]  ;;  %v8057_v37 = vld [vmem:[#allocation25_spill] sm:$0xff]  ;;  %vm3641_vm6 = vcmp.gt.f32.partialorder %v6957_v57, 0.0  ;;  %vm3642_vm7 = vcmp.gt.f32.partialorder %v6960_v30, 0.0 }
 0x3e7   :  { %8048 = vst [vmem:[#allocation8_spill] sm:$0xff] %v7104_v42  ;;  %8050 = vst [vmem:[#allocation9_spill] sm:$0xff] %v7108_v33  ;;  %v7120_v23 = vadd.f32 %v6918_v55, %v8055_v35  ;;  %v7124_v18 = vadd.f32 %v6918_v55, %v8057_v37  ;;  %v8059_v42 = vld [vmem:[#allocation26_spill] sm:$0xff]  ;;  %v8061_v33 = vld [vmem:[#allocation27_spill] sm:$0xff]  ;;  %vm3643_vm8 = vcmp.gt.f32.partialorder %v6963_v16, 0.0  ;;  %vm3644_vm9 = vcmp.gt.f32.partialorder %v6966_v22, 0.0 }
 0x3e8   :  { %8052 = vst [vmem:[#allocation10_spill] sm:$0xff] %v7112_v12  ;;  %8054 = vst [vmem:[#allocation11_spill] sm:$0xff] %v7116_v26  ;;  %v7128_v17 = vadd.f32 %v6918_v55, %v8059_v42  ;;  %v7132_v24 = vadd.f32 %v6918_v55, %v8061_v33  ;;  %v8063_v35 = vld [vmem:[#allocation28_spill] sm:$0xff]  ;;  %v3699_v42 = vmul.f32 0.2, %v6939_v2  ;;  %vm3645_vm10 = vcmp.gt.f32.partialorder %v6969_v61, 0.0 }
 0x3e9   :  { %8056 = vst [vmem:[#allocation12_spill] sm:$0xff] %v7120_v23  ;;  %8058 = vst [vmem:[#allocation13_spill] sm:$0xff] %v7124_v18  ;;  %v7145_v37 = vadd.f32 %v6918_v55, %v8063_v35  ;;  %v3700_v33 = vmul.f32 0.2, %v6942_v51  ;;  %v3701_v1 = vmul.f32 0.2, %v6945_v48 }
 0x3ea   :  { %8060 = vst [vmem:[#allocation14_spill] sm:$0xff] %v7128_v17  ;;  %8062 = vst [vmem:[#allocation15_spill] sm:$0xff] %v7132_v24  ;;  %v8065_v24 = vld [vmem:[#allocation29_spill] sm:$0xff]  ;;  %v3702_v18 = vmul.f32 0.2, %v6948_v59  ;;  %vm3646_vm11 = vcmp.gt.f32.partialorder %v6972_v45, 0.0 }
 0x3eb   :  { %8064 = vst [vmem:[#allocation16_spill] sm:$0xff] %v7145_v37  ;;  %v7153_v17 = vadd.f32 %v6918_v55, %v8065_v24  ;;  %v3703_v23 = vmul.f32 0.2, %v6951_v62  ;;  %v3704_v35 = vmul.f32 0.2, %v6954_v56  ;;  %v7166_v55 = vsel %vm3635_vm0, %v6939_v2, %v3699_v42 }
 0x3ec   :  { %v3705_v37 = vmul.f32 0.2, %v6957_v57  ;;  %v3706_v26 = vmul.f32 0.2, %v6960_v30  ;;  %v3707_v12 = vmul.f32 0.2, %v6963_v16  ;;  %v7177_v4 = vsel %vm3636_vm1, %v6942_v51, %v3700_v33 }
 0x3ed   :  { %8066 = vst [vmem:[#allocation17_spill] sm:$0xff] %v7153_v17  ;;  %8067 = vst [vmem:[#allocation18_spill] sm:$0xff] %v7166_v55  ;;  %vm3647_vm12 = vcmp.gt.f32.partialorder %v6975_v7, 0.0  ;;  %v3708_v24 = vmul.f32 0.2, %v6966_v22  ;;  %vm3648_vm13 = vcmp.gt.f32.partialorder %v6978_v44, 0.0  ;;  %v7192_v55 = vsel %vm3637_vm2, %v6945_v48, %v3701_v1 }
 0x3ee   :  { %v3709_v17 = vmul.f32 0.2, %v6969_v61  ;;  %v7172_v43 = vmul.f32 0.2, %v6972_v45  ;;  %8068 = vst [vmem:[#allocation19_spill] sm:$0xff] %v7177_v4  ;;  %8070 = vst [vmem:[#allocation21_spill] sm:$0xff] %v7192_v55 }
 0x3ef   :  { %v7181_v47 = vmul.f32 0.2, %v6975_v7  ;;  %v7184_v2 = vmul.f32 0.2, %v6978_v44  ;;  %v7187_v42 = vmul.f32 0.2, %v6981_v50 }
 0x3f0   :  { %vm3649_vm14 = vcmp.gt.f32.partialorder %v6981_v50, 0.0  ;;  %v7196_v51 = vmul.f32 0.2, %v6984_v10  ;;  %v7199_v33 = vmul.f32 0.2, %v6987_v20  ;;  %vm3650_vm15 = vcmp.gt.f32.partialorder %v6984_v10, 0.0 }
 0x3f1   :  { %8069 = vst [vmem:[#allocation20_spill] sm:$0xff] %v7187_v42  ;;  %v7202_v4 = vmul.f32 0.2, %v6990_v36  ;;  %v7207_v42 = vsel %vm3638_vm3, %v6948_v59, %v3702_v18  ;;  %v7211_v48 = vmul.f32 0.2, %v6993_v28  ;;  %vm3651_vm0 = vcmp.gt.f32.partialorder %v6987_v20, 0.0 }
 0x3f2   :  { %8072 = vst [vmem:[#allocation24_spill] sm:$0xff] %v7207_v42  ;;  %v7214_v1 = vmul.f32 0.2, %v6996_v41  ;;  %v7217_v55 = vmul.f32 0.2, %v6999_v58  ;;  %vm3652_vm1 = vcmp.gt.f32.partialorder %v6990_v36, 0.0 }
 0x3f3   :  { %8071 = vst [vmem:[#allocation23_spill] sm:$0xff] %v7202_v4  ;;  %v7222_v4 = vsel %vm3639_vm4, %v6951_v62, %v3703_v23  ;;  %v7226_v59 = vmul.f32 0.2, %v7002_v3  ;;  %v7229_v18 = vmul.f32 0.2, %v7005_v14  ;;  %vm3653_vm2 = vcmp.gt.f32.partialorder %v6993_v28, 0.0 }
 0x3f4   :  { %8073 = vst [vmem:[#allocation25_spill] sm:$0xff] %v7217_v55  ;;  %8074 = vst [vmem:[#allocation26_spill] sm:$0xff] %v7222_v4  ;;  %v7232_v42 = vmul.f32 0.2, %v7008_v9  ;;  %v7237_v55 = vsel %vm3640_vm5, %v6954_v56, %v3704_v35  ;;  %v7241_v62 = vmul.f32 0.2, %v7011_v52 }
 0x3f5   :  { %8076 = vst [vmem:[#allocation28_spill] sm:$0xff] %v7237_v55  ;;  %v7244_v23 = vmul.f32 0.2, %v7014_v40  ;;  %v7247_v4 = vmul.f32 0.2, %v7017_v19  ;;  %vm3654_vm3 = vcmp.gt.f32.partialorder %v6996_v41, 0.0 }
 0x3f6   :  { %8075 = vst [vmem:[#allocation27_spill] sm:$0xff] %v7232_v42  ;;  %v7252_v42 = vsel %vm3641_vm6, %v6957_v57, %v3705_v37  ;;  %v7256_v56 = vmul.f32 0.2, %v7020_v25  ;;  %v7259_v35 = vmul.f32 0.2, %v7023_v34  ;;  %vm3657_vm6 = vcmp.gt.f32.partialorder %v7005_v14, 0.0 }
 0x3f7   :  { %8077 = vst [vmem:[#allocation29_spill] sm:$0xff] %v7247_v4  ;;  %8078 = vst [vmem:[#allocation30_spill] sm:$0xff] %v7252_v42  ;;  %v7262_v55 = vmul.f32 0.2, %v7026_v32  ;;  %v7267_v4 = vsel %vm3642_vm7, %v6960_v30, %v3706_v26  ;;  %v7273_v57 = vmul.f32 0.2, %v7029_v5  ;;  %v7284_v30 = vsel %vm3643_vm8, %v6963_v16, %v3707_v12 }
 0x3f8   :  { %8079 = vst [vmem:[#allocation31_spill] sm:$0xff] %v7267_v4  ;;  %v7276_v37 = vmul.f32 0.2, %v7032_v60  ;;  %v7279_v42 = vmul.f32 0.2, %v7035_v38  ;;  %8081 = vst [vmem:[#allocation33_spill] sm:$0xff] %v7284_v30  ;;  %v7302_v16 = vsel %vm3644_vm9, %v6966_v22, %v3708_v24  ;;  %v7320_v22 = vsel %vm3645_vm10, %v6969_v61, %v3709_v17 }
 0x3f9   :  { %v7291_v26 = vmul.f32 0.2, %v7038_v27  ;;  %v7294_v4 = vmul.f32 0.2, %v7041_v29  ;;  %8083 = vst [vmem:[#allocation35_spill] sm:$0xff] %v7302_v16  ;;  %vm3661_vm8 = vcmp.gt.f32.partialorder %v7017_v19, 0.0  ;;  %v7339_v61 = vsel %vm3646_vm11, %v6972_v45, %v7172_v43 }
 0x3fa   :  { %8080 = vst [vmem:[#allocation32_spill] sm:$0xff] %v7279_v42  ;;  %v7297_v42 = vmul.f32 0.2, %v7044_v54  ;;  %v7309_v12 = vmul.f32 0.2, %v7047_v49  ;;  %8085 = vst [vmem:[#allocation37_spill] sm:$0xff] %v7320_v22  ;;  %v7358_v45 = vsel %vm3647_vm12, %v6975_v7, %v7181_v47  ;;  %v7377_v7 = vsel %vm3648_vm13, %v6978_v44, %v7184_v2 }
 0x3fb   :  { %v7312_v30 = vmul.f32 0.2, %v7050_v15  ;;  %vm3665_vm9 = vcmp.gt.f32.partialorder %v7029_v5, 0.0  ;;  %v7327_v24 = vmul.f32 0.2, %v7056_v21  ;;  %8087 = vst [vmem:[#allocation39_spill] sm:$0xff] %v7339_v61 }
 0x3fc   :  { %8082 = vst [vmem:[#allocation34_spill] sm:$0xff] %v7297_v42  ;;  %v7315_v42 = vmul.f32 0.2, %v7053_v13  ;;  %v7330_v16 = vmul.f32 0.2, %v7059_v31  ;;  %vm3669_vm10 = vcmp.gt.f32.partialorder %v7041_v29, 0.0 }
 0x3fd   :  { %v7346_v17 = vmul.f32 0.2, %v7065_v46  ;;  %v7349_v22 = vmul.f32 0.2, %v7068_v53  ;;  %8090 = vst [vmem:[#allocation42_spill] sm:$0xff] %v7358_v45  ;;  %vm3673_vm11 = vcmp.gt.f32.partialorder %v7053_v13, 0.0 }
 0x3fe   :  { %8084 = vst [vmem:[#allocation36_spill] sm:$0xff] %v7315_v42  ;;  %v7333_v42 = vmul.f32 0.2, %v7062_v39  ;;  %v7365_v43 = vmul.f32 0.2, %v7074_v63  ;;  %8094 = vst [vmem:[#allocation46_spill] sm:$0xff] %v7377_v7 }
 0x3ff   :  { %8088 = vst [vmem:[#allocation40_spill] sm:$0xff] %v7349_v22  ;;  %v7368_v61 = vmul.f32 0.2, %v7077_v6  ;;  %vm3677_vm12 = vcmp.gt.f32.partialorder %v7065_v46, 0.0  ;;  %v7384_v47 = vmul.f32 0.2, %v7083_v8 }
 0x400   :  { %8086 = vst [vmem:[#allocation38_spill] sm:$0xff] %v7333_v42  ;;  %v7352_v42 = vmul.f32 0.2, %v7071_v0  ;;  %8091 = vst [vmem:[#allocation43_spill] sm:$0xff] %v7365_v43  ;;  %v8096_v45 = vld [vmem:[#allocation3_spill] sm:$0xff]  ;;  %v8100_v22 = vld [vmem:[#allocation20_spill] sm:$0xff] }
 0x401   :  { %8092 = vst [vmem:[#allocation44_spill] sm:$0xff] %v7368_v61  ;;  %8095 = vst [vmem:[#allocation47_spill] sm:$0xff] %v7384_v47  ;;  %v7387_v61 = vmul.f32 0.2, %v8096_v45  ;;  %v7396_v44 = vsel %vm3649_vm14, %v6981_v50, %v8100_v22  ;;  %vm3681_vm13 = vcmp.gt.f32.partialorder %v7077_v6, 0.0  ;;  %v8102_v2 = vld [vmem:[#allocation5_spill] sm:$0xff]  ;;  %v7415_v50 = vsel %vm3650_vm15, %v6984_v10, %v7196_v51 }
 0x402   :  { %8089 = vst [vmem:[#allocation41_spill] sm:$0xff] %v7352_v42  ;;  %v7371_v42 = vmul.f32 0.2, %v7080_v11  ;;  %8101 = vst [vmem:[#allocation20_spill] sm:$0xff] %v7396_v44  ;;  %v7403_v7 = vmul.f32 0.2, %v8102_v2  ;;  %v7428_v10 = vsel %vm3651_vm0, %v6987_v20, %v7199_v33 }
 0x403   :  { %8097 = vst [vmem:[#allocation48_spill] sm:$0xff] %v7387_v61  ;;  %v8104_v61 = vld [vmem:[#allocation6_spill] sm:$0xff]  ;;  %8108 = vst [vmem:[#allocation53_spill] sm:$0xff] %v7415_v50  ;;  %v8109_v22 = vld [vmem:[#allocation8_spill] sm:$0xff]  ;;  %vm8123_vm7 = vcmp.gt.f32.partialorder %v6999_v58, 0.0 }
 0x404   :  { %8093 = vst [vmem:[#allocation45_spill] sm:$0xff] %v7371_v42  ;;  %v8098_v42 = vld [vmem:[#allocation4_spill] sm:$0xff]  ;;  %8103 = vst [vmem:[#allocation50_spill] sm:$0xff] %v7403_v7  ;;  %v7406_v47 = vmul.f32 0.2, %v8104_v61  ;;  %v8111_v45 = vld [vmem:[#allocation10_spill] sm:$0xff] }
 0x405   :  { %v7390_v43 = vmul.f32 0.2, %v8098_v42  ;;  %vm3685_vm14 = vcmp.gt.f32.partialorder %v8098_v42, 0.0  ;;  %v3753_v44 = vmul.f32 0.2, %v8109_v22  ;;  %8112 = vst [vmem:[#allocation54_spill] sm:$0xff] %v7428_v10 }
 0x406   :  { %8105 = vst [vmem:[#allocation51_spill] sm:$0xff] %v7406_v47  ;;  %v8110_v47 = vld [vmem:[#allocation9_spill] sm:$0xff]  ;;  %vm3689_vm15 = vcmp.gt.f32.partialorder %v8109_v22, 0.0  ;;  %v8113_v51 = vld [vmem:[#allocation11_spill] sm:$0xff]  ;;  %v8118_v33 = vld [vmem:[#allocation14_spill] sm:$0xff] }
 0x407   :  { %8099 = vst [vmem:[#allocation49_spill] sm:$0xff] %v7390_v43  ;;  %v8106_v43 = vld [vmem:[#allocation7_spill] sm:$0xff]  ;;  %v3754_v7 = vmul.f32 0.2, %v8110_v47  ;;  %v3756_v50 = vmul.f32 0.2, %v8113_v51 }
 0x408   :  { %v7409_v63 = vmul.f32 0.2, %v8106_v43  ;;  %v8114_v43 = vld [vmem:[#allocation12_spill] sm:$0xff]  ;;  %v8115_v2 = vld [vmem:[#allocation13_spill] sm:$0xff]  ;;  %v8116_v8 = vld [vmem:[#allocation23_spill] sm:$0xff]  ;;  %vm3695_vm4 = vcmp.gt.f32.partialorder %v8118_v33, 0.0 }
 0x409   :  { %v3757_v61 = vmul.f32 0.2, %v8114_v43  ;;  %v3758_v42 = vmul.f32 0.2, %v8115_v2  ;;  %v7441_v20 = vsel %vm3652_vm1, %v6990_v36, %v8116_v8  ;;  %vm3693_vm0 = vcmp.gt.f32.partialorder %v8114_v43, 0.0  ;;  %v8119_v10 = vld [vmem:[#allocation15_spill] sm:$0xff] }
 0x40a   :  { %8107 = vst [vmem:[#allocation52_spill] sm:$0xff] %v7409_v63  ;;  %v3755_v63 = vmul.f32 0.2, %v8111_v45  ;;  %8117 = vst [vmem:[#allocation12_spill] sm:$0xff] %v7441_v20  ;;  %v3759_v51 = vmul.f32 0.2, %v8118_v33  ;;  %v7454_v36 = vsel %vm3653_vm2, %v6993_v28, %v7211_v48  ;;  %v7463_v33 = vsel %vm3654_vm3, %v6996_v41, %v7214_v1 }
 0x40b   :  { %v3760_v45 = vmul.f32 0.2, %v8119_v10  ;;  %v8120_v47 = vld [vmem:[#allocation16_spill] sm:$0xff]  ;;  %v8121_v8 = vld [vmem:[#allocation17_spill] sm:$0xff]  ;;  %vm8124_vm2 = vcmp.gt.f32.partialorder %v7002_v3, 0.0  ;;  %v7481_v48 = vsel %vm3657_vm6, %v7005_v14, %v7229_v18  ;;  %v8125_v41 = vld [vmem:[#allocation27_spill] sm:$0xff] }
 0x40c   :  { %v3761_v22 = vmul.f32 0.2, %v8120_v47  ;;  %vm3697_vm1 = vcmp.gt.f32.partialorder %v8120_v47, 0.0  ;;  %vm3698_vm5 = vcmp.gt.f32.partialorder %v8121_v8, 0.0  ;;  %v3762_v20 = vmul.f32 0.2, %v8121_v8 }
 0x40d   :  { %v8122_v10 = vld [vmem:[#allocation25_spill] sm:$0xff]  ;;  %v7475_v28 = vsel %vm8124_vm2, %v7002_v3, %v7226_v59  ;;  %vm8126_vm3 = vcmp.gt.f32.partialorder %v7008_v9, 0.0  ;;  %vm8128_vm2 = vcmp.gt.f32.partialorder %v7014_v40, 0.0  ;;  %vm8130_vm6 = vcmp.gt.f32.partialorder %v7020_v25, 0.0 }
 0x40e   :  { %v7469_v2 = vsel %vm8123_vm7, %v6999_v58, %v8122_v10  ;;  %v7487_v1 = vsel %vm8126_vm3, %v7008_v9, %v8125_v41  ;;  %vm8127_vm7 = vcmp.gt.f32.partialorder %v7011_v52, 0.0  ;;  %v7499_v3 = vsel %vm8128_vm2, %v7014_v40, %v7244_v23  ;;  %v8129_v14 = vld [vmem:[#allocation29_spill] sm:$0xff]  ;;  %v8163_v10 = vld [vmem:[#allocation4_spill] sm:$0xff] }
 0x40f   :  { %v7493_v58 = vsel %vm8127_vm7, %v7011_v52, %v7241_v62  ;;  %v7505_v59 = vsel %vm3661_vm8, %v7017_v19, %v8129_v14  ;;  %v7511_v9 = vsel %vm8130_vm6, %v7020_v25, %v7256_v56  ;;  %vm8131_vm3 = vcmp.gt.f32.partialorder %v7023_v34, 0.0  ;;  %v8165_v14 = vld [vmem:[#allocation5_spill] sm:$0xff] }
 0x410   :  { %v7517_v52 = vsel %vm8131_vm3, %v7023_v34, %v7259_v35  ;;  %vm8132_vm7 = vcmp.gt.f32.partialorder %v7026_v32, 0.0  ;;  %v7529_v19 = vsel %vm3665_vm9, %v7029_v5, %v7273_v57  ;;  %vm8133_vm8 = vcmp.gt.f32.partialorder %v7032_v60, 0.0  ;;  %v8134_v34 = vld [vmem:[#allocation32_spill] sm:$0xff]  ;;  %v8151_v35 = vld [vmem:[#allocation22_spill] sm:$0xff] }
 0x411   :  { %v7523_v40 = vsel %vm8132_vm7, %v7026_v32, %v7262_v55  ;;  %v7535_v25 = vsel %vm8133_vm8, %v7032_v60, %v7276_v37  ;;  %vm8135_vm2 = vcmp.gt.f32.partialorder %v7035_v38, 0.0  ;;  %vm8136_vm6 = vcmp.gt.f32.partialorder %v7038_v27, 0.0  ;;  %v8137_v60 = vld [vmem:[#allocation34_spill] sm:$0xff] }
 0x412   :  { %v7541_v18 = vsel %vm8135_vm2, %v7035_v38, %v8134_v34  ;;  %v7547_v32 = vsel %vm8136_vm6, %v7038_v27, %v7291_v26  ;;  %v7553_v5 = vsel %vm3669_vm10, %v7041_v29, %v7294_v4  ;;  %vm8138_vm9 = vcmp.gt.f32.partialorder %v7044_v54, 0.0  ;;  %v8141_v29 = vld [vmem:[#allocation36_spill] sm:$0xff]  ;;  %v8157_v26 = vld [vmem:[#allocation2_spill] sm:$0xff] }
 0x413   :  { %v7559_v55 = vsel %vm8138_vm9, %v7044_v54, %v8137_v60  ;;  %vm8139_vm3 = vcmp.gt.f32.partialorder %v7047_v49, 0.0  ;;  %vm8140_vm7 = vcmp.gt.f32.partialorder %v7050_v15, 0.0  ;;  %v7577_v4 = vsel %vm3673_vm11, %v7053_v13, %v8141_v29  ;;  %v8167_v60 = vld [vmem:[#allocation51_spill] sm:$0xff]  ;;  %v8168_v29 = vld [vmem:[#allocation6_spill] sm:$0xff] }
 0x414   :  { %v7565_v38 = vsel %vm8139_vm3, %v7047_v49, %v7309_v12  ;;  %v7571_v27 = vsel %vm8140_vm7, %v7050_v15, %v7312_v30  ;;  %vm8142_vm10 = vcmp.gt.f32.partialorder %v7056_v21, 0.0  ;;  %vm8143_vm8 = vcmp.gt.f32.partialorder %v7059_v31, 0.0  ;;  %v8144_v15 = vld [vmem:[#allocation38_spill] sm:$0xff]  ;;  %v8159_v12 = vld [vmem:[#allocation48_spill] sm:$0xff] }
 0x415   :  { %v7583_v54 = vsel %vm8142_vm10, %v7056_v21, %v7327_v24  ;;  %v7589_v49 = vsel %vm8143_vm8, %v7059_v31, %v7330_v16  ;;  %vm8145_vm2 = vcmp.gt.f32.partialorder %v7062_v39, 0.0  ;;  %v7601_v13 = vsel %vm3677_vm12, %v7065_v46, %v7346_v17  ;;  %v8146_v21 = vld [vmem:[#allocation40_spill] sm:$0xff]  ;;  %v8148_v31 = vld [vmem:[#allocation41_spill] sm:$0xff]  ;;  %v8160_v24 = vld [vmem:[#allocation3_spill] sm:$0xff] }
 0x416   :  { %v7595_v62 = vsel %vm8145_vm2, %v7062_v39, %v8144_v15  ;;  %vm8147_vm11 = vcmp.gt.f32.partialorder %v7068_v53, 0.0  ;;  %vm8149_vm6 = vcmp.gt.f32.partialorder %v7071_v0, 0.0  ;;  %v8150_v39 = vld [vmem:[#allocation43_spill] sm:$0xff]  ;;  %vm8152_vm9 = vcmp.gt.f32.partialorder %v8151_v35, 0.0  ;;  %v8153_v46 = vld [vmem:[#allocation44_spill] sm:$0xff] }
 0x417   :  { %v7607_v23 = vsel %vm8147_vm11, %v7068_v53, %v8146_v21  ;;  %v7613_v56 = vsel %vm8149_vm6, %v7071_v0, %v8148_v31  ;;  %v7619_v57 = vsel %vm8152_vm9, %v8151_v35, %v8150_v39  ;;  %v7625_v37 = vsel %vm3681_vm13, %v7077_v6, %v8153_v46  ;;  %v8154_v53 = vld [vmem:[#allocation45_spill] sm:$0xff]  ;;  %v8156_v0 = vld [vmem:[#allocation47_spill] sm:$0xff]  ;;  %v8170_v21 = vld [vmem:[#allocation52_spill] sm:$0xff] }
 0x418   :  { %vm8155_vm12 = vcmp.gt.f32.partialorder %v7080_v11, 0.0  ;;  %vm8158_vm3 = vcmp.gt.f32.partialorder %v8157_v26, 0.0  ;;  %vm8161_vm7 = vcmp.gt.f32.partialorder %v8160_v24, 0.0  ;;  %v8162_v6 = vld [vmem:[#allocation49_spill] sm:$0xff]  ;;  %vm8166_vm13 = vcmp.gt.f32.partialorder %v8165_v14, 0.0  ;;  %v8171_v31 = vld [vmem:[#allocation7_spill] sm:$0xff] }
 0x419   :  { %v7631_v30 = vsel %vm8155_vm12, %v7080_v11, %v8154_v53  ;;  %v7637_v16 = vsel %vm8158_vm3, %v8157_v26, %v8156_v0  ;;  %v7643_v17 = vsel %vm8161_vm7, %v8160_v24, %v8159_v12  ;;  %v7649_v41 = vsel %vm3685_vm14, %v8163_v10, %v8162_v6  ;;  %v8164_v11 = vld [vmem:[#allocation50_spill] sm:$0xff]  ;;  %v8173_v35 = vld [vmem:[#allocation8_spill] sm:$0xff]  ;;  %v8174_v53 = vld [vmem:[#allocation9_spill] sm:$0xff] }
 0x41a   :  { %v7655_v34 = vsel %vm8166_vm13, %v8165_v14, %v8164_v11  ;;  %vm8169_vm10 = vcmp.gt.f32.partialorder %v8168_v29, 0.0  ;;  %vm8172_vm8 = vcmp.gt.f32.partialorder %v8171_v31, 0.0  ;;  %v7672_v46 = vsel %vm3689_vm15, %v8173_v35, %v3753_v44  ;;  %v8176_v26 = vld [vmem:[#allocation10_spill] sm:$0xff]  ;;  %v8178_v24 = vld [vmem:[#allocation11_spill] sm:$0xff]  ;;  %v8180_v10 = vld [vmem:[#allocation13_spill] sm:$0xff] }
 0x41b   :  { %v7661_v15 = vsel %vm8169_vm10, %v8168_v29, %v8167_v60  ;;  %v7667_v39 = vsel %vm8172_vm8, %v8171_v31, %v8170_v21  ;;  %vm8175_vm14 = vcmp.gt.f32.partialorder %v8174_v53, 0.0  ;;  %vm8177_vm2 = vcmp.gt.f32.partialorder %v8176_v26, 0.0  ;;  %v8182_v11 = vld [vmem:[#allocation14_spill] sm:$0xff]  ;;  %v8183_v14 = vld [vmem:[#allocation15_spill] sm:$0xff]  ;;  %v8190_v21 = vld [vmem:[#allocation24_spill] sm:$0xff] }
 0x41c   :  { %v7677_v0 = vsel %vm8175_vm14, %v8174_v53, %v3754_v7  ;;  %v7682_v12 = vsel %vm8177_vm2, %v8176_v26, %v3755_v63  ;;  %vm8179_vm11 = vcmp.gt.f32.partialorder %v8178_v24, 0.0  ;;  %v7692_v44 = vsel %vm3693_vm0, %v8114_v43, %v3757_v61  ;;  %v8187_v43 = vld [vmem:[#allocation18_spill] sm:$0xff]  ;;  %v8188_v60 = vld [vmem:[#allocation19_spill] sm:$0xff]  ;;  %v8192_v53 = vld [vmem:[#allocation28_spill] sm:$0xff] }
 0x41d   :  { %v7687_v6 = vsel %vm8179_vm11, %v8178_v24, %v3756_v50  ;;  %vm8181_vm15 = vcmp.gt.f32.partialorder %v8180_v10, 0.0  ;;  %v7702_v63 = vsel %vm3695_vm4, %v8182_v11, %v3759_v51  ;;  %vm8184_vm6 = vcmp.gt.f32.partialorder %v8183_v14, 0.0  ;;  %v8189_v51 = vld [vmem:[#allocation21_spill] sm:$0xff]  ;;  %v8191_v35 = vld [vmem:[#allocation26_spill] sm:$0xff]  ;;  %v8194_v24 = vld [vmem:[#allocation31_spill] sm:$0xff] }
 0x41e   :  { %v7697_v7 = vsel %vm8181_vm15, %v8180_v10, %v3758_v42  ;;  %v7707_v50 = vsel %vm8184_vm6, %v8183_v14, %v3760_v45  ;;  %v7712_v61 = vsel %vm3697_vm1, %v8120_v47, %v3761_v22  ;;  %v7717_v42 = vsel %vm3698_vm5, %v8121_v8, %v3762_v20  ;;  %v8193_v26 = vld [vmem:[#allocation30_spill] sm:$0xff]  ;;  %v8195_v11 = vld [vmem:[#allocation33_spill] sm:$0xff]  ;;  %v8196_v47 = vld [vmem:[#allocation35_spill] sm:$0xff] }
 0x41f   :  { %8185 = vst [vmem:[#allocation23_spill] sm:$0xff] %v7707_v50  ;;  %8186 = vst [vmem:[#allocation16_spill] sm:$0xff] %v7712_v61  ;;  %v4603_v29 = vpack.c.bf16 %v8188_v60, %v8187_v43  ;;  %v4608_v31 = vpack.c.bf16 %v8190_v21, %v8189_v51  ;;  %v4613_v45 = vpack.c.bf16 %v8192_v53, %v8191_v35  ;;  %v8197_v14 = vld [vmem:[#allocation37_spill] sm:$0xff]  ;;  %v8198_v61 = vld [vmem:[#allocation39_spill] sm:$0xff] }
 0x420   :  { %v4618_v10 = vpack.c.bf16 %v8194_v24, %v8193_v26  ;;  %v4623_v22 = vpack.c.bf16 %v8196_v47, %v8195_v11  ;;  %v4628_v50 = vpack.c.bf16 %v8198_v61, %v8197_v14  ;;  %v8199_v20 = vld [vmem:[#allocation42_spill] sm:$0xff]  ;;  %v8201_v60 = vld [vmem:[#allocation20_spill] sm:$0xff]  ;;  %v8202_v51 = vld [vmem:[#allocation53_spill] sm:$0xff]  ;;  %v4648_v61 = vpack.c.bf16 %v7463_v33, %v7454_v36 }
 0x421   :  { %4604 = vst [vmem:[%s7883_s4] sm:$0xff] %v4603_v29   ;;  %4760 = vst [vmem:[%s7883_s4 + $0x8] sm:$0xff] %v4608_v31   ;;  %v8200_v8 = vld [vmem:[#allocation46_spill] sm:$0xff]  ;;  %v4638_v21 = vpack.c.bf16 %v8202_v51, %v8201_v60  ;;  %v8204_v53 = vld [vmem:[#allocation12_spill] sm:$0xff]  ;;  %v4653_v29 = vpack.c.bf16 %v7475_v28, %v7469_v2  ;;  %v4658_v33 = vpack.c.bf16 %v7487_v1, %v7481_v48 }
 0x422   :  { %v4633_v43 = vpack.c.bf16 %v8200_v8, %v8199_v20  ;;  %v8203_v35 = vld [vmem:[#allocation54_spill] sm:$0xff]  ;;  %4761 = vst [vmem:[%s7883_s4 + $0x10] sm:$0xff] %v4613_v45   ;;  %4762 = vst [vmem:[%s7883_s4 + $0x18] sm:$0xff] %v4618_v10   ;;  %v4663_v36 = vpack.c.bf16 %v7499_v3, %v7493_v58  ;;  %v4668_v31 = vpack.c.bf16 %v7511_v9, %v7505_v59 }
 0x423   :  { %v4643_v26 = vpack.c.bf16 %v8204_v53, %v8203_v35  ;;  %4763 = vst [vmem:[%s7883_s4 + $0x20] sm:$0xff] %v4623_v22   ;;  %4764 = vst [vmem:[%s7883_s4 + $0x28] sm:$0xff] %v4628_v50   ;;  %v4673_v2 = vpack.c.bf16 %v7523_v40, %v7517_v52  ;;  %v4678_v28 = vpack.c.bf16 %v7535_v25, %v7529_v19 }
 0x424   :  { %4765 = vst [vmem:[%s7883_s4 + $0x30] sm:$0xff] %v4633_v43   ;;  %4766 = vst [vmem:[%s7883_s4 + $0x38] sm:$0xff] %v4638_v21   ;;  %v4683_v48 = vpack.c.bf16 %v7547_v32, %v7541_v18  ;;  %v4688_v1 = vpack.c.bf16 %v7559_v55, %v7553_v5  ;;  %v4693_v58 = vpack.c.bf16 %v7571_v27, %v7565_v38 }
 0x425   :  { %4767 = vst [vmem:[%s7883_s4 + $0x40] sm:$0xff] %v4643_v26   ;;  %4768 = vst [vmem:[%s7883_s4 + $0x48] sm:$0xff] %v4648_v61   ;;  %v4698_v3 = vpack.c.bf16 %v7583_v54, %v7577_v4  ;;  %v4703_v59 = vpack.c.bf16 %v7595_v62, %v7589_v49  ;;  %v4708_v9 = vpack.c.bf16 %v7607_v23, %v7601_v13 }
 0x426   :  { %4769 = vst [vmem:[%s7883_s4 + $0x50] sm:$0xff] %v4653_v29   ;;  %4770 = vst [vmem:[%s7883_s4 + $0x58] sm:$0xff] %v4658_v33   ;;  %v4713_v52 = vpack.c.bf16 %v7619_v57, %v7613_v56  ;;  %v4718_v40 = vpack.c.bf16 %v7631_v30, %v7625_v37  ;;  %v4723_v19 = vpack.c.bf16 %v7643_v17, %v7637_v16  ;;  %v8205_v38 = vld [vmem:[#allocation23_spill] sm:$0xff]  ;;  %v8206_v4 = vld [vmem:[#allocation16_spill] sm:$0xff] }
 0x427   :  { %4771 = vst [vmem:[%s7883_s4 + $0x60] sm:$0xff] %v4663_v36   ;;  %4772 = vst [vmem:[%s7883_s4 + $0x68] sm:$0xff] %v4668_v31   ;;  %v4728_v25 = vpack.c.bf16 %v7655_v34, %v7649_v41  ;;  %v4733_v18 = vpack.c.bf16 %v7667_v39, %v7661_v15  ;;  %v4738_v32 = vpack.c.bf16 %v7677_v0, %v7672_v46 }
 0x428   :  { %4773 = vst [vmem:[%s7883_s4 + $0x70] sm:$0xff] %v4673_v2   ;;  %4774 = vst [vmem:[%s7883_s4 + $0x78] sm:$0xff] %v4678_v28   ;;  %v4743_v5 = vpack.c.bf16 %v7687_v6, %v7682_v12  ;;  %v4748_v55 = vpack.c.bf16 %v7697_v7, %v7692_v44  ;;  %v4753_v27 = vpack.c.bf16 %v8205_v38, %v7702_v63 }
 0x429   :  { %4775 = vst [vmem:[%s7883_s4 + $0x80] sm:$0xff] %v4683_v48   ;;  %4776 = vst [vmem:[%s7883_s4 + $0x88] sm:$0xff] %v4688_v1   ;;  %v4758_v54 = vpack.c.bf16 %v7717_v42, %v8206_v4 }
 0x42a   :  { %4777 = vst [vmem:[%s7883_s4 + $0x90] sm:$0xff] %v4693_v58   ;;  %4778 = vst [vmem:[%s7883_s4 + $0x98] sm:$0xff] %v4698_v3  }
 0x42b   :  { %4779 = vst [vmem:[%s7883_s4 + $0xa0] sm:$0xff] %v4703_v59   ;;  %4780 = vst [vmem:[%s7883_s4 + $0xa8] sm:$0xff] %v4708_v9  }
 0x42c   :  { %4781 = vst [vmem:[%s7883_s4 + $0xb0] sm:$0xff] %v4713_v52   ;;  %4782 = vst [vmem:[%s7883_s4 + $0xb8] sm:$0xff] %v4718_v40  }
 0x42d   :  { %4783 = vst [vmem:[%s7883_s4 + $0xc0] sm:$0xff] %v4723_v19   ;;  %4784 = vst [vmem:[%s7883_s4 + $0xc8] sm:$0xff] %v4728_v25  }
 0x42e   :  { %4785 = vst [vmem:[%s7883_s4 + $0xd0] sm:$0xff] %v4733_v18   ;;  %4786 = vst [vmem:[%s7883_s4 + $0xd8] sm:$0xff] %v4738_v32  }
 0x42f   :  { %4787 = vst [vmem:[%s7883_s4 + $0xe0] sm:$0xff] %v4743_v5   ;;  %4788 = vst [vmem:[%s7883_s4 + $0xe8] sm:$0xff] %v4748_v55  }
 0x430   :  { %4789 = vst [vmem:[%s7883_s4 + $0xf0] sm:$0xff] %v4753_v27   ;;  %4790 = vst [vmem:[%s7883_s4 + $0xf8] sm:$0xff] %v4758_v54  }

// kernel: discriminator_forward.6
= control target key start
LH: loop header
LB: loop body
LE: loop exit
PB: predicated region body
PF: predicated region fallthrough
CT: control target
= control target key end

     0   :  { %s5349_s15 = smov 0   ;;  %s5351_s16 = smov 0   ;;  %s6776_s0 = inlined_call_operand.vmem [shape: bf16[128,2048], index: 0, kind: input, shape index: {}]   ;;  %s6777_s1 = inlined_call_operand.vmem [shape: bf16[2048,256], index: 1, kind: input, shape index: {}]   ;;  %s6778_s2 = inlined_call_operand.vmem [shape: f32[1,256], index: 2, kind: input, shape index: {}]   ;;  %s6779_s3 = inlined_call_operand.vmem [shape: f32[1,256], index: 3, kind: input, shape index: {}]   ;;  %s6780_s4 = inlined_call_operand.vmem [shape: bf16[128,256], index: 4, kind: output, shape index: {}]  }
   0x1   :  { %s5353_s17 = smov 0  }
   0x2 LB: > { %s5365_s18 = sadd.s32 4294967295, %s5322_s17   ;;  %s5368_s19 = sadd.s32 1, %s5322_s17   ;;  %s5322_s17 = sphi %s5353_s17, %s6784_s17   ;;  %s5318_s16 = sphi %s5351_s16, %s6783_s16   ;;  %s5314_s15 = sphi %s5349_s15, %s6782_s15  }
   0x3   : > { %s39_s20 = ssub.s32 %s5322_s17, %s5368_s19  ;;  %s42_s21 = sadd.s32 1, %s5318_s16 }
   0x4   : > { %p40_p0 = scmp.eq.s32.totalorder %s39_s20, 0  ;;  %p49_p1 = scmp.ne.s32.totalorder %s5318_s16, %s5314_s15 }
   0x5   : > { %p50_p2 = scmp.eq.s32.totalorder %s5322_s17, 0  ;;  %p131_p3 = scmp.eq.s32.totalorder %s5365_s18, 1 }
   0x6   : > { %s5378_s22 = scalar_select %p40_p0, %s5318_s16, %s42_s21  }
   0x7   : > { %p51_p4 = por %p50_p2, %p49_p1  ;;  %p5380_p5 = por %p131_p3, %p49_p1 }
   0x8   : > { %p4288_p6 = scmp.ge.s32.totalorder %s5322_s17, 2 }
   0xa   : > { %156 = sbr.rel (%p4288_p6) target bundleno = 191 (0xbf), region = 20 }
  0x11   : > { %159 = sbr.rel (!%p51_p4) target bundleno = 191 (0xbf), region = 24  ;;  %s161_s24 = sand.u32 (%p51_p4), 1, %s5318_s16  }
  0x12   : > { %s4290_s25 = sshll.u32 (%p51_p4), %s5322_s17, 2  ;;  %s4289_s26 = sshll.u32 (%p51_p4), %s161_s24, 10 }
  0x13   : > { %s5390_s29 = scalar_lea.vmem (%p51_p4), %s6777_s1, %s4290_s25  ;;  %s5394_s30 = scalar_lea.vmem (%p51_p4), [#allocation2], %s4289_s26 }
  0x14   : > { %v181_v0 = vld [vmem:[%s5390_s29] sm:$0xf] (%p51_p4)  ;;  %v183_v1 = vld [vmem:[%s5390_s29 + $0x8] sm:$0xf] (%p51_p4)  ;;  %v185_v2 = vld [vmem:[%s5390_s29 + $0x10] sm:$0xf] (%p51_p4) }
  0x15   : > { %182 = vst [vmem:[%s5394_s30] sm:$0xf] (%p51_p4), %v181_v0  ;;  %184 = vst [vmem:[%s5394_s30 + $0x4] sm:$0xf] (%p51_p4), %v183_v1  ;;  %v187_v3 = vld [vmem:[%s5390_s29 + $0x18] sm:$0xf] (%p51_p4) }
  0x16   : > { %v189_v4 = vld [vmem:[%s5390_s29 + $0x20] sm:$0xf] (%p51_p4)  ;;  %186 = vst [vmem:[%s5394_s30 + $0x8] sm:$0xf] (%p51_p4), %v185_v2  ;;  %188 = vst [vmem:[%s5394_s30 + $0xc] sm:$0xf] (%p51_p4), %v187_v3 }
  0x17   : > { %190 = vst [vmem:[%s5394_s30 + $0x10] sm:$0xf] (%p51_p4), %v189_v4  ;;  %v191_v5 = vld [vmem:[%s5390_s29 + $0x28] sm:$0xf] (%p51_p4)  ;;  %v193_v6 = vld [vmem:[%s5390_s29 + $0x30] sm:$0xf] (%p51_p4) }
  0x18   : > { %v195_v7 = vld [vmem:[%s5390_s29 + $0x38] sm:$0xf]  ;;  %192 = vst [vmem:[%s5394_s30 + $0x14] sm:$0xf] %v191_v5  ;;  %194 = vst [vmem:[%s5394_s30 + $0x18] sm:$0xf] %v193_v6 }
  0x19   : > { %196 = vst [vmem:[%s5394_s30 + $0x1c] sm:$0xf] %v195_v7  ;;  %v197_v8 = vld [vmem:[%s5390_s29 + $0x40] sm:$0xf]  ;;  %v199_v9 = vld [vmem:[%s5390_s29 + $0x48] sm:$0xf] }
  0x1a   : > { %v201_v10 = vld [vmem:[%s5390_s29 + $0x50] sm:$0xf]  ;;  %198 = vst [vmem:[%s5394_s30 + $0x20] sm:$0xf] %v197_v8  ;;  %200 = vst [vmem:[%s5394_s30 + $0x24] sm:$0xf] %v199_v9 }
  0x1b   : > { %202 = vst [vmem:[%s5394_s30 + $0x28] sm:$0xf] %v201_v10  ;;  %v203_v11 = vld [vmem:[%s5390_s29 + $0x58] sm:$0xf]  ;;  %v205_v12 = vld [vmem:[%s5390_s29 + $0x60] sm:$0xf] }
  0x1c   : > { %v207_v13 = vld [vmem:[%s5390_s29 + $0x68] sm:$0xf]  ;;  %204 = vst [vmem:[%s5394_s30 + $0x2c] sm:$0xf] %v203_v11  ;;  %206 = vst [vmem:[%s5394_s30 + $0x30] sm:$0xf] %v205_v12 }
  0x1d   : > { %208 = vst [vmem:[%s5394_s30 + $0x34] sm:$0xf] %v207_v13  ;;  %v209_v14 = vld [vmem:[%s5390_s29 + $0x70] sm:$0xf]  ;;  %v211_v15 = vld [vmem:[%s5390_s29 + $0x78] sm:$0xf] }
  0x1e   : > { %v213_v16 = vld [vmem:[%s5390_s29 + $0x80] sm:$0xf]  ;;  %210 = vst [vmem:[%s5394_s30 + $0x38] sm:$0xf] %v209_v14  ;;  %212 = vst [vmem:[%s5394_s30 + $0x3c] sm:$0xf] %v211_v15 }
  0x1f   : > { %214 = vst [vmem:[%s5394_s30 + $0x40] sm:$0xf] %v213_v16  ;;  %v215_v17 = vld [vmem:[%s5390_s29 + $0x88] sm:$0xf]  ;;  %v217_v18 = vld [vmem:[%s5390_s29 + $0x90] sm:$0xf] }
  0x20   : > { %v219_v19 = vld [vmem:[%s5390_s29 + $0x98] sm:$0xf]  ;;  %216 = vst [vmem:[%s5394_s30 + $0x44] sm:$0xf] %v215_v17  ;;  %218 = vst [vmem:[%s5394_s30 + $0x48] sm:$0xf] %v217_v18 }
  0x21   : > { %220 = vst [vmem:[%s5394_s30 + $0x4c] sm:$0xf] %v219_v19  ;;  %v221_v20 = vld [vmem:[%s5390_s29 + $0xa0] sm:$0xf]  ;;  %v223_v21 = vld [vmem:[%s5390_s29 + $0xa8] sm:$0xf] }
  0x22   : > { %v225_v22 = vld [vmem:[%s5390_s29 + $0xb0] sm:$0xf]  ;;  %222 = vst [vmem:[%s5394_s30 + $0x50] sm:$0xf] %v221_v20  ;;  %224 = vst [vmem:[%s5394_s30 + $0x54] sm:$0xf] %v223_v21 }
  0x23   : > { %226 = vst [vmem:[%s5394_s30 + $0x58] sm:$0xf] %v225_v22  ;;  %v227_v23 = vld [vmem:[%s5390_s29 + $0xb8] sm:$0xf]  ;;  %v229_v24 = vld [vmem:[%s5390_s29 + $0xc0] sm:$0xf] }
  0x24   : > { %v231_v25 = vld [vmem:[%s5390_s29 + $0xc8] sm:$0xf]  ;;  %228 = vst [vmem:[%s5394_s30 + $0x5c] sm:$0xf] %v227_v23  ;;  %230 = vst [vmem:[%s5394_s30 + $0x60] sm:$0xf] %v229_v24 }
  0x25   : > { %232 = vst [vmem:[%s5394_s30 + $0x64] sm:$0xf] %v231_v25  ;;  %v233_v26 = vld [vmem:[%s5390_s29 + $0xd0] sm:$0xf]  ;;  %v235_v27 = vld [vmem:[%s5390_s29 + $0xd8] sm:$0xf] }
  0x26   : > { %v237_v28 = vld [vmem:[%s5390_s29 + $0xe0] sm:$0xf]  ;;  %234 = vst [vmem:[%s5394_s30 + $0x68] sm:$0xf] %v233_v26  ;;  %236 = vst [vmem:[%s5394_s30 + $0x6c] sm:$0xf] %v235_v27 }
  0x27   : > { %238 = vst [vmem:[%s5394_s30 + $0x70] sm:$0xf] %v237_v28  ;;  %v239_v29 = vld [vmem:[%s5390_s29 + $0xe8] sm:$0xf]  ;;  %v241_v30 = vld [vmem:[%s5390_s29 + $0xf0] sm:$0xf] }
  0x28   : > { %v243_v31 = vld [vmem:[%s5390_s29 + $0xf8] sm:$0xf]  ;;  %240 = vst [vmem:[%s5394_s30 + $0x74] sm:$0xf] %v239_v29  ;;  %242 = vst [vmem:[%s5394_s30 + $0x78] sm:$0xf] %v241_v30 }
  0x29   : > { %244 = vst [vmem:[%s5394_s30 + $0x7c] sm:$0xf] %v243_v31  ;;  %v245_v32 = vld [vmem:[%s5390_s29 + $0x100] sm:$0xf]  ;;  %v247_v33 = vld [vmem:[%s5390_s29 + $0x108] sm:$0xf] }
  0x2a   : > { %v249_v34 = vld [vmem:[%s5390_s29 + $0x110] sm:$0xf]  ;;  %246 = vst [vmem:[%s5394_s30 + $0x80] sm:$0xf] %v245_v32  ;;  %248 = vst [vmem:[%s5394_s30 + $0x84] sm:$0xf] %v247_v33 }
  0x2b   : > { %250 = vst [vmem:[%s5394_s30 + $0x88] sm:$0xf] %v249_v34  ;;  %v251_v35 = vld [vmem:[%s5390_s29 + $0x118] sm:$0xf]  ;;  %v253_v36 = vld [vmem:[%s5390_s29 + $0x120] sm:$0xf] }
  0x2c   : > { %v255_v37 = vld [vmem:[%s5390_s29 + $0x128] sm:$0xf]  ;;  %252 = vst [vmem:[%s5394_s30 + $0x8c] sm:$0xf] %v251_v35  ;;  %254 = vst [vmem:[%s5394_s30 + $0x90] sm:$0xf] %v253_v36 }
  0x2d   : > { %256 = vst [vmem:[%s5394_s30 + $0x94] sm:$0xf] %v255_v37  ;;  %v257_v38 = vld [vmem:[%s5390_s29 + $0x130] sm:$0xf]  ;;  %v259_v39 = vld [vmem:[%s5390_s29 + $0x138] sm:$0xf] }
  0x2e   : > { %v261_v40 = vld [vmem:[%s5390_s29 + $0x140] sm:$0xf]  ;;  %258 = vst [vmem:[%s5394_s30 + $0x98] sm:$0xf] %v257_v38  ;;  %260 = vst [vmem:[%s5394_s30 + $0x9c] sm:$0xf] %v259_v39 }
  0x2f   : > { %262 = vst [vmem:[%s5394_s30 + $0xa0] sm:$0xf] %v261_v40  ;;  %v263_v41 = vld [vmem:[%s5390_s29 + $0x148] sm:$0xf]  ;;  %v265_v42 = vld [vmem:[%s5390_s29 + $0x150] sm:$0xf] }
  0x30   : > { %v267_v43 = vld [vmem:[%s5390_s29 + $0x158] sm:$0xf]  ;;  %264 = vst [vmem:[%s5394_s30 + $0xa4] sm:$0xf] %v263_v41  ;;  %266 = vst [vmem:[%s5394_s30 + $0xa8] sm:$0xf] %v265_v42 }
  0x31   : > { %268 = vst [vmem:[%s5394_s30 + $0xac] sm:$0xf] %v267_v43  ;;  %v269_v44 = vld [vmem:[%s5390_s29 + $0x160] sm:$0xf]  ;;  %v271_v45 = vld [vmem:[%s5390_s29 + $0x168] sm:$0xf] }
  0x32   : > { %v273_v46 = vld [vmem:[%s5390_s29 + $0x170] sm:$0xf]  ;;  %270 = vst [vmem:[%s5394_s30 + $0xb0] sm:$0xf] %v269_v44  ;;  %272 = vst [vmem:[%s5394_s30 + $0xb4] sm:$0xf] %v271_v45 }
  0x33   : > { %274 = vst [vmem:[%s5394_s30 + $0xb8] sm:$0xf] %v273_v46  ;;  %v275_v47 = vld [vmem:[%s5390_s29 + $0x178] sm:$0xf]  ;;  %v277_v48 = vld [vmem:[%s5390_s29 + $0x180] sm:$0xf] }
  0x34   : > { %v279_v49 = vld [vmem:[%s5390_s29 + $0x188] sm:$0xf]  ;;  %276 = vst [vmem:[%s5394_s30 + $0xbc] sm:$0xf] %v275_v47  ;;  %278 = vst [vmem:[%s5394_s30 + $0xc0] sm:$0xf] %v277_v48 }
  0x35   : > { %280 = vst [vmem:[%s5394_s30 + $0xc4] sm:$0xf] %v279_v49  ;;  %v281_v50 = vld [vmem:[%s5390_s29 + $0x190] sm:$0xf]  ;;  %v283_v51 = vld [vmem:[%s5390_s29 + $0x198] sm:$0xf] }
  0x36   : > { %v285_v52 = vld [vmem:[%s5390_s29 + $0x1a0] sm:$0xf]  ;;  %282 = vst [vmem:[%s5394_s30 + $0xc8] sm:$0xf] %v281_v50  ;;  %284 = vst [vmem:[%s5394_s30 + $0xcc] sm:$0xf] %v283_v51 }
  0x37   : > { %286 = vst [vmem:[%s5394_s30 + $0xd0] sm:$0xf] %v285_v52  ;;  %v287_v53 = vld [vmem:[%s5390_s29 + $0x1a8] sm:$0xf]  ;;  %v289_v54 = vld [vmem:[%s5390_s29 + $0x1b0] sm:$0xf] }
  0x38   : > { %v291_v55 = vld [vmem:[%s5390_s29 + $0x1b8] sm:$0xf]  ;;  %288 = vst [vmem:[%s5394_s30 + $0xd4] sm:$0xf] %v287_v53  ;;  %290 = vst [vmem:[%s5394_s30 + $0xd8] sm:$0xf] %v289_v54 }
  0x39   : > { %292 = vst [vmem:[%s5394_s30 + $0xdc] sm:$0xf] %v291_v55  ;;  %v293_v56 = vld [vmem:[%s5390_s29 + $0x1c0] sm:$0xf]  ;;  %v295_v57 = vld [vmem:[%s5390_s29 + $0x1c8] sm:$0xf] }
  0x3a   : > { %v297_v58 = vld [vmem:[%s5390_s29 + $0x1d0] sm:$0xf]  ;;  %294 = vst [vmem:[%s5394_s30 + $0xe0] sm:$0xf] %v293_v56  ;;  %296 = vst [vmem:[%s5394_s30 + $0xe4] sm:$0xf] %v295_v57 }
  0x3b   : > { %298 = vst [vmem:[%s5394_s30 + $0xe8] sm:$0xf] %v297_v58  ;;  %v299_v59 = vld [vmem:[%s5390_s29 + $0x1d8] sm:$0xf]  ;;  %v301_v60 = vld [vmem:[%s5390_s29 + $0x1e0] sm:$0xf] }
  0x3c   : > { %v303_v61 = vld [vmem:[%s5390_s29 + $0x1e8] sm:$0xf]  ;;  %300 = vst [vmem:[%s5394_s30 + $0xec] sm:$0xf] %v299_v59  ;;  %302 = vst [vmem:[%s5394_s30 + $0xf0] sm:$0xf] %v301_v60 }
  0x3d   : > { %304 = vst [vmem:[%s5394_s30 + $0xf4] sm:$0xf] %v303_v61  ;;  %v305_v62 = vld [vmem:[%s5390_s29 + $0x1f0] sm:$0xf]  ;;  %v307_v63 = vld [vmem:[%s5390_s29 + $0x1f8] sm:$0xf] }
  0x3e   : > { %v309_v0 = vld [vmem:[%s5390_s29 + $0x200] sm:$0xf]  ;;  %306 = vst [vmem:[%s5394_s30 + $0xf8] sm:$0xf] %v305_v62  ;;  %308 = vst [vmem:[%s5394_s30 + $0xfc] sm:$0xf] %v307_v63 }
  0x3f   : > { %310 = vst [vmem:[%s5394_s30 + $0x100] sm:$0xf] %v309_v0  ;;  %v311_v1 = vld [vmem:[%s5390_s29 + $0x208] sm:$0xf]  ;;  %v313_v2 = vld [vmem:[%s5390_s29 + $0x210] sm:$0xf] }
  0x40   : > { %v315_v3 = vld [vmem:[%s5390_s29 + $0x218] sm:$0xf]  ;;  %312 = vst [vmem:[%s5394_s30 + $0x104] sm:$0xf] %v311_v1  ;;  %314 = vst [vmem:[%s5394_s30 + $0x108] sm:$0xf] %v313_v2 }
  0x41   : > { %316 = vst [vmem:[%s5394_s30 + $0x10c] sm:$0xf] %v315_v3  ;;  %v317_v4 = vld [vmem:[%s5390_s29 + $0x220] sm:$0xf]  ;;  %v319_v5 = vld [vmem:[%s5390_s29 + $0x228] sm:$0xf] }
  0x42   : > { %v321_v6 = vld [vmem:[%s5390_s29 + $0x230] sm:$0xf]  ;;  %318 = vst [vmem:[%s5394_s30 + $0x110] sm:$0xf] %v317_v4  ;;  %320 = vst [vmem:[%s5394_s30 + $0x114] sm:$0xf] %v319_v5 }
  0x43   : > { %322 = vst [vmem:[%s5394_s30 + $0x118] sm:$0xf] %v321_v6  ;;  %v323_v7 = vld [vmem:[%s5390_s29 + $0x238] sm:$0xf]  ;;  %v325_v8 = vld [vmem:[%s5390_s29 + $0x240] sm:$0xf] }
  0x44   : > { %v327_v9 = vld [vmem:[%s5390_s29 + $0x248] sm:$0xf]  ;;  %324 = vst [vmem:[%s5394_s30 + $0x11c] sm:$0xf] %v323_v7  ;;  %326 = vst [vmem:[%s5394_s30 + $0x120] sm:$0xf] %v325_v8 }
  0x45   : > { %328 = vst [vmem:[%s5394_s30 + $0x124] sm:$0xf] %v327_v9  ;;  %v329_v10 = vld [vmem:[%s5390_s29 + $0x250] sm:$0xf]  ;;  %v331_v11 = vld [vmem:[%s5390_s29 + $0x258] sm:$0xf] }
  0x46   : > { %v333_v12 = vld [vmem:[%s5390_s29 + $0x260] sm:$0xf]  ;;  %330 = vst [vmem:[%s5394_s30 + $0x128] sm:$0xf] %v329_v10  ;;  %332 = vst [vmem:[%s5394_s30 + $0x12c] sm:$0xf] %v331_v11 }
  0x47   : > { %334 = vst [vmem:[%s5394_s30 + $0x130] sm:$0xf] %v333_v12  ;;  %v335_v13 = vld [vmem:[%s5390_s29 + $0x268] sm:$0xf]  ;;  %v337_v14 = vld [vmem:[%s5390_s29 + $0x270] sm:$0xf] }
  0x48   : > { %v339_v15 = vld [vmem:[%s5390_s29 + $0x278] sm:$0xf]  ;;  %336 = vst [vmem:[%s5394_s30 + $0x134] sm:$0xf] %v335_v13  ;;  %338 = vst [vmem:[%s5394_s30 + $0x138] sm:$0xf] %v337_v14 }
  0x49   : > { %340 = vst [vmem:[%s5394_s30 + $0x13c] sm:$0xf] %v339_v15  ;;  %v341_v16 = vld [vmem:[%s5390_s29 + $0x280] sm:$0xf]  ;;  %v343_v17 = vld [vmem:[%s5390_s29 + $0x288] sm:$0xf] }
  0x4a   : > { %v345_v18 = vld [vmem:[%s5390_s29 + $0x290] sm:$0xf]  ;;  %342 = vst [vmem:[%s5394_s30 + $0x140] sm:$0xf] %v341_v16  ;;  %344 = vst [vmem:[%s5394_s30 + $0x144] sm:$0xf] %v343_v17 }
  0x4b   : > { %346 = vst [vmem:[%s5394_s30 + $0x148] sm:$0xf] %v345_v18  ;;  %v347_v19 = vld [vmem:[%s5390_s29 + $0x298] sm:$0xf]  ;;  %v349_v20 = vld [vmem:[%s5390_s29 + $0x2a0] sm:$0xf] }
  0x4c   : > { %v351_v21 = vld [vmem:[%s5390_s29 + $0x2a8] sm:$0xf]  ;;  %348 = vst [vmem:[%s5394_s30 + $0x14c] sm:$0xf] %v347_v19  ;;  %350 = vst [vmem:[%s5394_s30 + $0x150] sm:$0xf] %v349_v20 }
  0x4d   : > { %352 = vst [vmem:[%s5394_s30 + $0x154] sm:$0xf] %v351_v21  ;;  %v353_v22 = vld [vmem:[%s5390_s29 + $0x2b0] sm:$0xf]  ;;  %v355_v23 = vld [vmem:[%s5390_s29 + $0x2b8] sm:$0xf] }
  0x4e   : > { %v357_v24 = vld [vmem:[%s5390_s29 + $0x2c0] sm:$0xf]  ;;  %354 = vst [vmem:[%s5394_s30 + $0x158] sm:$0xf] %v353_v22  ;;  %356 = vst [vmem:[%s5394_s30 + $0x15c] sm:$0xf] %v355_v23 }
  0x4f   : > { %358 = vst [vmem:[%s5394_s30 + $0x160] sm:$0xf] %v357_v24  ;;  %v359_v25 = vld [vmem:[%s5390_s29 + $0x2c8] sm:$0xf]  ;;  %v361_v26 = vld [vmem:[%s5390_s29 + $0x2d0] sm:$0xf] }
  0x50   : > { %v363_v27 = vld [vmem:[%s5390_s29 + $0x2d8] sm:$0xf]  ;;  %360 = vst [vmem:[%s5394_s30 + $0x164] sm:$0xf] %v359_v25  ;;  %362 = vst [vmem:[%s5394_s30 + $0x168] sm:$0xf] %v361_v26 }
  0x51   : > { %364 = vst [vmem:[%s5394_s30 + $0x16c] sm:$0xf] %v363_v27  ;;  %v365_v28 = vld [vmem:[%s5390_s29 + $0x2e0] sm:$0xf]  ;;  %v367_v29 = vld [vmem:[%s5390_s29 + $0x2e8] sm:$0xf] }
  0x52   : > { %v369_v30 = vld [vmem:[%s5390_s29 + $0x2f0] sm:$0xf]  ;;  %366 = vst [vmem:[%s5394_s30 + $0x170] sm:$0xf] %v365_v28  ;;  %368 = vst [vmem:[%s5394_s30 + $0x174] sm:$0xf] %v367_v29 }
  0x53   : > { %370 = vst [vmem:[%s5394_s30 + $0x178] sm:$0xf] %v369_v30  ;;  %v371_v31 = vld [vmem:[%s5390_s29 + $0x2f8] sm:$0xf]  ;;  %v373_v32 = vld [vmem:[%s5390_s29 + $0x300] sm:$0xf] }
  0x54   : > { %v375_v33 = vld [vmem:[%s5390_s29 + $0x308] sm:$0xf]  ;;  %372 = vst [vmem:[%s5394_s30 + $0x17c] sm:$0xf] %v371_v31  ;;  %374 = vst [vmem:[%s5394_s30 + $0x180] sm:$0xf] %v373_v32 }
  0x55   : > { %376 = vst [vmem:[%s5394_s30 + $0x184] sm:$0xf] %v375_v33  ;;  %v377_v34 = vld [vmem:[%s5390_s29 + $0x310] sm:$0xf]  ;;  %v379_v35 = vld [vmem:[%s5390_s29 + $0x318] sm:$0xf] }
  0x56   : > { %v381_v36 = vld [vmem:[%s5390_s29 + $0x320] sm:$0xf]  ;;  %378 = vst [vmem:[%s5394_s30 + $0x188] sm:$0xf] %v377_v34  ;;  %380 = vst [vmem:[%s5394_s30 + $0x18c] sm:$0xf] %v379_v35 }
  0x57   : > { %382 = vst [vmem:[%s5394_s30 + $0x190] sm:$0xf] %v381_v36  ;;  %v383_v37 = vld [vmem:[%s5390_s29 + $0x328] sm:$0xf]  ;;  %v385_v38 = vld [vmem:[%s5390_s29 + $0x330] sm:$0xf] }
  0x58   : > { %v387_v39 = vld [vmem:[%s5390_s29 + $0x338] sm:$0xf]  ;;  %384 = vst [vmem:[%s5394_s30 + $0x194] sm:$0xf] %v383_v37  ;;  %386 = vst [vmem:[%s5394_s30 + $0x198] sm:$0xf] %v385_v38 }
  0x59   : > { %388 = vst [vmem:[%s5394_s30 + $0x19c] sm:$0xf] %v387_v39  ;;  %v389_v40 = vld [vmem:[%s5390_s29 + $0x340] sm:$0xf]  ;;  %v391_v41 = vld [vmem:[%s5390_s29 + $0x348] sm:$0xf] }
  0x5a   : > { %v393_v42 = vld [vmem:[%s5390_s29 + $0x350] sm:$0xf]  ;;  %390 = vst [vmem:[%s5394_s30 + $0x1a0] sm:$0xf] %v389_v40  ;;  %392 = vst [vmem:[%s5394_s30 + $0x1a4] sm:$0xf] %v391_v41 }
  0x5b   : > { %394 = vst [vmem:[%s5394_s30 + $0x1a8] sm:$0xf] %v393_v42  ;;  %v395_v43 = vld [vmem:[%s5390_s29 + $0x358] sm:$0xf]  ;;  %v397_v44 = vld [vmem:[%s5390_s29 + $0x360] sm:$0xf] }
  0x5c   : > { %v399_v45 = vld [vmem:[%s5390_s29 + $0x368] sm:$0xf]  ;;  %396 = vst [vmem:[%s5394_s30 + $0x1ac] sm:$0xf] %v395_v43  ;;  %398 = vst [vmem:[%s5394_s30 + $0x1b0] sm:$0xf] %v397_v44 }
  0x5d   : > { %400 = vst [vmem:[%s5394_s30 + $0x1b4] sm:$0xf] %v399_v45  ;;  %v401_v46 = vld [vmem:[%s5390_s29 + $0x370] sm:$0xf]  ;;  %v403_v47 = vld [vmem:[%s5390_s29 + $0x378] sm:$0xf] }
  0x5e   : > { %v405_v48 = vld [vmem:[%s5390_s29 + $0x380] sm:$0xf]  ;;  %402 = vst [vmem:[%s5394_s30 + $0x1b8] sm:$0xf] %v401_v46  ;;  %404 = vst [vmem:[%s5394_s30 + $0x1bc] sm:$0xf] %v403_v47 }
  0x5f   : > { %406 = vst [vmem:[%s5394_s30 + $0x1c0] sm:$0xf] %v405_v48  ;;  %v407_v49 = vld [vmem:[%s5390_s29 + $0x388] sm:$0xf]  ;;  %v409_v50 = vld [vmem:[%s5390_s29 + $0x390] sm:$0xf] }
  0x60   : > { %v411_v51 = vld [vmem:[%s5390_s29 + $0x398] sm:$0xf]  ;;  %408 = vst [vmem:[%s5394_s30 + $0x1c4] sm:$0xf] %v407_v49  ;;  %410 = vst [vmem:[%s5394_s30 + $0x1c8] sm:$0xf] %v409_v50 }
  0x61   : > { %412 = vst [vmem:[%s5394_s30 + $0x1cc] sm:$0xf] %v411_v51  ;;  %v413_v52 = vld [vmem:[%s5390_s29 + $0x3a0] sm:$0xf]  ;;  %v415_v53 = vld [vmem:[%s5390_s29 + $0x3a8] sm:$0xf] }
  0x62   : > { %v417_v54 = vld [vmem:[%s5390_s29 + $0x3b0] sm:$0xf]  ;;  %414 = vst [vmem:[%s5394_s30 + $0x1d0] sm:$0xf] %v413_v52  ;;  %416 = vst [vmem:[%s5394_s30 + $0x1d4] sm:$0xf] %v415_v53 }
  0x63   : > { %418 = vst [vmem:[%s5394_s30 + $0x1d8] sm:$0xf] %v417_v54  ;;  %v419_v55 = vld [vmem:[%s5390_s29 + $0x3b8] sm:$0xf]  ;;  %v421_v56 = vld [vmem:[%s5390_s29 + $0x3c0] sm:$0xf] }
  0x64   : > { %v423_v57 = vld [vmem:[%s5390_s29 + $0x3c8] sm:$0xf]  ;;  %420 = vst [vmem:[%s5394_s30 + $0x1dc] sm:$0xf] %v419_v55  ;;  %422 = vst [vmem:[%s5394_s30 + $0x1e0] sm:$0xf] %v421_v56 }
  0x65   : > { %424 = vst [vmem:[%s5394_s30 + $0x1e4] sm:$0xf] %v423_v57  ;;  %v425_v58 = vld [vmem:[%s5390_s29 + $0x3d0] sm:$0xf]  ;;  %v427_v59 = vld [vmem:[%s5390_s29 + $0x3d8] sm:$0xf] }
  0x66   : > { %v429_v60 = vld [vmem:[%s5390_s29 + $0x3e0] sm:$0xf]  ;;  %426 = vst [vmem:[%s5394_s30 + $0x1e8] sm:$0xf] %v425_v58  ;;  %428 = vst [vmem:[%s5394_s30 + $0x1ec] sm:$0xf] %v427_v59 }
  0x67   : > { %430 = vst [vmem:[%s5394_s30 + $0x1f0] sm:$0xf] %v429_v60  ;;  %v431_v61 = vld [vmem:[%s5390_s29 + $0x3e8] sm:$0xf]  ;;  %v433_v62 = vld [vmem:[%s5390_s29 + $0x3f0] sm:$0xf] }
  0x68   : > { %v435_v63 = vld [vmem:[%s5390_s29 + $0x3f8] sm:$0xf]  ;;  %432 = vst [vmem:[%s5394_s30 + $0x1f4] sm:$0xf] %v431_v61  ;;  %434 = vst [vmem:[%s5394_s30 + $0x1f8] sm:$0xf] %v433_v62 }
  0x69   : > { %436 = vst [vmem:[%s5394_s30 + $0x1fc] sm:$0xf] %v435_v63  ;;  %v437_v0 = vld [vmem:[%s5390_s29 + $0x400] sm:$0xf]  ;;  %v439_v1 = vld [vmem:[%s5390_s29 + $0x408] sm:$0xf] }
  0x6a   : > { %v441_v2 = vld [vmem:[%s5390_s29 + $0x410] sm:$0xf]  ;;  %438 = vst [vmem:[%s5394_s30 + $0x200] sm:$0xf] %v437_v0  ;;  %440 = vst [vmem:[%s5394_s30 + $0x204] sm:$0xf] %v439_v1 }
  0x6b   : > { %442 = vst [vmem:[%s5394_s30 + $0x208] sm:$0xf] %v441_v2  ;;  %v443_v3 = vld [vmem:[%s5390_s29 + $0x418] sm:$0xf]  ;;  %v445_v4 = vld [vmem:[%s5390_s29 + $0x420] sm:$0xf] }
  0x6c   : > { %v447_v5 = vld [vmem:[%s5390_s29 + $0x428] sm:$0xf]  ;;  %444 = vst [vmem:[%s5394_s30 + $0x20c] sm:$0xf] %v443_v3  ;;  %446 = vst [vmem:[%s5394_s30 + $0x210] sm:$0xf] %v445_v4 }
  0x6d   : > { %448 = vst [vmem:[%s5394_s30 + $0x214] sm:$0xf] %v447_v5  ;;  %v449_v6 = vld [vmem:[%s5390_s29 + $0x430] sm:$0xf]  ;;  %v451_v7 = vld [vmem:[%s5390_s29 + $0x438] sm:$0xf] }
  0x6e   : > { %v453_v8 = vld [vmem:[%s5390_s29 + $0x440] sm:$0xf]  ;;  %450 = vst [vmem:[%s5394_s30 + $0x218] sm:$0xf] %v449_v6  ;;  %452 = vst [vmem:[%s5394_s30 + $0x21c] sm:$0xf] %v451_v7 }
  0x6f   : > { %454 = vst [vmem:[%s5394_s30 + $0x220] sm:$0xf] %v453_v8  ;;  %v455_v9 = vld [vmem:[%s5390_s29 + $0x448] sm:$0xf]  ;;  %v457_v10 = vld [vmem:[%s5390_s29 + $0x450] sm:$0xf] }
  0x70   : > { %v459_v11 = vld [vmem:[%s5390_s29 + $0x458] sm:$0xf]  ;;  %456 = vst [vmem:[%s5394_s30 + $0x224] sm:$0xf] %v455_v9  ;;  %458 = vst [vmem:[%s5394_s30 + $0x228] sm:$0xf] %v457_v10 }
  0x71   : > { %460 = vst [vmem:[%s5394_s30 + $0x22c] sm:$0xf] %v459_v11  ;;  %v461_v12 = vld [vmem:[%s5390_s29 + $0x460] sm:$0xf]  ;;  %v463_v13 = vld [vmem:[%s5390_s29 + $0x468] sm:$0xf] }
  0x72   : > { %v465_v14 = vld [vmem:[%s5390_s29 + $0x470] sm:$0xf]  ;;  %462 = vst [vmem:[%s5394_s30 + $0x230] sm:$0xf] %v461_v12  ;;  %464 = vst [vmem:[%s5394_s30 + $0x234] sm:$0xf] %v463_v13 }
  0x73   : > { %466 = vst [vmem:[%s5394_s30 + $0x238] sm:$0xf] %v465_v14  ;;  %v467_v15 = vld [vmem:[%s5390_s29 + $0x478] sm:$0xf]  ;;  %v469_v16 = vld [vmem:[%s5390_s29 + $0x480] sm:$0xf] }
  0x74   : > { %v471_v17 = vld [vmem:[%s5390_s29 + $0x488] sm:$0xf]  ;;  %468 = vst [vmem:[%s5394_s30 + $0x23c] sm:$0xf] %v467_v15  ;;  %470 = vst [vmem:[%s5394_s30 + $0x240] sm:$0xf] %v469_v16 }
  0x75   : > { %472 = vst [vmem:[%s5394_s30 + $0x244] sm:$0xf] %v471_v17  ;;  %v473_v18 = vld [vmem:[%s5390_s29 + $0x490] sm:$0xf]  ;;  %v475_v19 = vld [vmem:[%s5390_s29 + $0x498] sm:$0xf] }
  0x76   : > { %v477_v20 = vld [vmem:[%s5390_s29 + $0x4a0] sm:$0xf]  ;;  %474 = vst [vmem:[%s5394_s30 + $0x248] sm:$0xf] %v473_v18  ;;  %476 = vst [vmem:[%s5394_s30 + $0x24c] sm:$0xf] %v475_v19 }
  0x77   : > { %478 = vst [vmem:[%s5394_s30 + $0x250] sm:$0xf] %v477_v20  ;;  %v479_v21 = vld [vmem:[%s5390_s29 + $0x4a8] sm:$0xf]  ;;  %v481_v22 = vld [vmem:[%s5390_s29 + $0x4b0] sm:$0xf] }
  0x78   : > { %v483_v23 = vld [vmem:[%s5390_s29 + $0x4b8] sm:$0xf]  ;;  %480 = vst [vmem:[%s5394_s30 + $0x254] sm:$0xf] %v479_v21  ;;  %482 = vst [vmem:[%s5394_s30 + $0x258] sm:$0xf] %v481_v22 }
  0x79   : > { %484 = vst [vmem:[%s5394_s30 + $0x25c] sm:$0xf] %v483_v23  ;;  %v485_v24 = vld [vmem:[%s5390_s29 + $0x4c0] sm:$0xf]  ;;  %v487_v25 = vld [vmem:[%s5390_s29 + $0x4c8] sm:$0xf] }
  0x7a   : > { %v489_v26 = vld [vmem:[%s5390_s29 + $0x4d0] sm:$0xf]  ;;  %486 = vst [vmem:[%s5394_s30 + $0x260] sm:$0xf] %v485_v24  ;;  %488 = vst [vmem:[%s5394_s30 + $0x264] sm:$0xf] %v487_v25 }
  0x7b   : > { %490 = vst [vmem:[%s5394_s30 + $0x268] sm:$0xf] %v489_v26  ;;  %v491_v27 = vld [vmem:[%s5390_s29 + $0x4d8] sm:$0xf]  ;;  %v493_v28 = vld [vmem:[%s5390_s29 + $0x4e0] sm:$0xf] }
  0x7c   : > { %v495_v29 = vld [vmem:[%s5390_s29 + $0x4e8] sm:$0xf]  ;;  %492 = vst [vmem:[%s5394_s30 + $0x26c] sm:$0xf] %v491_v27  ;;  %494 = vst [vmem:[%s5394_s30 + $0x270] sm:$0xf] %v493_v28 }
  0x7d   : > { %496 = vst [vmem:[%s5394_s30 + $0x274] sm:$0xf] %v495_v29  ;;  %v497_v30 = vld [vmem:[%s5390_s29 + $0x4f0] sm:$0xf]  ;;  %v499_v31 = vld [vmem:[%s5390_s29 + $0x4f8] sm:$0xf] }
  0x7e   : > { %v501_v32 = vld [vmem:[%s5390_s29 + $0x500] sm:$0xf]  ;;  %498 = vst [vmem:[%s5394_s30 + $0x278] sm:$0xf] %v497_v30  ;;  %500 = vst [vmem:[%s5394_s30 + $0x27c] sm:$0xf] %v499_v31 }
  0x7f   : > { %502 = vst [vmem:[%s5394_s30 + $0x280] sm:$0xf] %v501_v32  ;;  %v503_v33 = vld [vmem:[%s5390_s29 + $0x508] sm:$0xf]  ;;  %v505_v34 = vld [vmem:[%s5390_s29 + $0x510] sm:$0xf] }
  0x80   : > { %v507_v35 = vld [vmem:[%s5390_s29 + $0x518] sm:$0xf]  ;;  %504 = vst [vmem:[%s5394_s30 + $0x284] sm:$0xf] %v503_v33  ;;  %506 = vst [vmem:[%s5394_s30 + $0x288] sm:$0xf] %v505_v34 }
  0x81   : > { %508 = vst [vmem:[%s5394_s30 + $0x28c] sm:$0xf] %v507_v35  ;;  %v509_v36 = vld [vmem:[%s5390_s29 + $0x520] sm:$0xf]  ;;  %v511_v37 = vld [vmem:[%s5390_s29 + $0x528] sm:$0xf] }
  0x82   : > { %v513_v38 = vld [vmem:[%s5390_s29 + $0x530] sm:$0xf]  ;;  %510 = vst [vmem:[%s5394_s30 + $0x290] sm:$0xf] %v509_v36  ;;  %512 = vst [vmem:[%s5394_s30 + $0x294] sm:$0xf] %v511_v37 }
  0x83   : > { %514 = vst [vmem:[%s5394_s30 + $0x298] sm:$0xf] %v513_v38  ;;  %v515_v39 = vld [vmem:[%s5390_s29 + $0x538] sm:$0xf]  ;;  %v517_v40 = vld [vmem:[%s5390_s29 + $0x540] sm:$0xf] }
  0x84   : > { %v519_v41 = vld [vmem:[%s5390_s29 + $0x548] sm:$0xf]  ;;  %516 = vst [vmem:[%s5394_s30 + $0x29c] sm:$0xf] %v515_v39  ;;  %518 = vst [vmem:[%s5394_s30 + $0x2a0] sm:$0xf] %v517_v40 }
  0x85   : > { %520 = vst [vmem:[%s5394_s30 + $0x2a4] sm:$0xf] %v519_v41  ;;  %v521_v42 = vld [vmem:[%s5390_s29 + $0x550] sm:$0xf]  ;;  %v523_v43 = vld [vmem:[%s5390_s29 + $0x558] sm:$0xf] }
  0x86   : > { %v525_v44 = vld [vmem:[%s5390_s29 + $0x560] sm:$0xf]  ;;  %522 = vst [vmem:[%s5394_s30 + $0x2a8] sm:$0xf] %v521_v42  ;;  %524 = vst [vmem:[%s5394_s30 + $0x2ac] sm:$0xf] %v523_v43 }
  0x87   : > { %526 = vst [vmem:[%s5394_s30 + $0x2b0] sm:$0xf] %v525_v44  ;;  %v527_v45 = vld [vmem:[%s5390_s29 + $0x568] sm:$0xf]  ;;  %v529_v46 = vld [vmem:[%s5390_s29 + $0x570] sm:$0xf] }
  0x88   : > { %v531_v47 = vld [vmem:[%s5390_s29 + $0x578] sm:$0xf]  ;;  %528 = vst [vmem:[%s5394_s30 + $0x2b4] sm:$0xf] %v527_v45  ;;  %530 = vst [vmem:[%s5394_s30 + $0x2b8] sm:$0xf] %v529_v46 }
  0x89   : > { %532 = vst [vmem:[%s5394_s30 + $0x2bc] sm:$0xf] %v531_v47  ;;  %v533_v48 = vld [vmem:[%s5390_s29 + $0x580] sm:$0xf]  ;;  %v535_v49 = vld [vmem:[%s5390_s29 + $0x588] sm:$0xf] }
  0x8a   : > { %v537_v50 = vld [vmem:[%s5390_s29 + $0x590] sm:$0xf]  ;;  %534 = vst [vmem:[%s5394_s30 + $0x2c0] sm:$0xf] %v533_v48  ;;  %536 = vst [vmem:[%s5394_s30 + $0x2c4] sm:$0xf] %v535_v49 }
  0x8b   : > { %538 = vst [vmem:[%s5394_s30 + $0x2c8] sm:$0xf] %v537_v50  ;;  %v539_v51 = vld [vmem:[%s5390_s29 + $0x598] sm:$0xf]  ;;  %v541_v52 = vld [vmem:[%s5390_s29 + $0x5a0] sm:$0xf] }
  0x8c   : > { %v543_v53 = vld [vmem:[%s5390_s29 + $0x5a8] sm:$0xf]  ;;  %540 = vst [vmem:[%s5394_s30 + $0x2cc] sm:$0xf] %v539_v51  ;;  %542 = vst [vmem:[%s5394_s30 + $0x2d0] sm:$0xf] %v541_v52 }
  0x8d   : > { %544 = vst [vmem:[%s5394_s30 + $0x2d4] sm:$0xf] %v543_v53  ;;  %v545_v54 = vld [vmem:[%s5390_s29 + $0x5b0] sm:$0xf]  ;;  %v547_v55 = vld [vmem:[%s5390_s29 + $0x5b8] sm:$0xf] }
  0x8e   : > { %v549_v56 = vld [vmem:[%s5390_s29 + $0x5c0] sm:$0xf]  ;;  %546 = vst [vmem:[%s5394_s30 + $0x2d8] sm:$0xf] %v545_v54  ;;  %548 = vst [vmem:[%s5394_s30 + $0x2dc] sm:$0xf] %v547_v55 }
  0x8f   : > { %550 = vst [vmem:[%s5394_s30 + $0x2e0] sm:$0xf] %v549_v56  ;;  %v551_v57 = vld [vmem:[%s5390_s29 + $0x5c8] sm:$0xf]  ;;  %v553_v58 = vld [vmem:[%s5390_s29 + $0x5d0] sm:$0xf] }
  0x90   : > { %v555_v59 = vld [vmem:[%s5390_s29 + $0x5d8] sm:$0xf]  ;;  %552 = vst [vmem:[%s5394_s30 + $0x2e4] sm:$0xf] %v551_v57  ;;  %554 = vst [vmem:[%s5394_s30 + $0x2e8] sm:$0xf] %v553_v58 }
  0x91   : > { %556 = vst [vmem:[%s5394_s30 + $0x2ec] sm:$0xf] %v555_v59  ;;  %v557_v60 = vld [vmem:[%s5390_s29 + $0x5e0] sm:$0xf]  ;;  %v559_v61 = vld [vmem:[%s5390_s29 + $0x5e8] sm:$0xf] }
  0x92   : > { %v561_v62 = vld [vmem:[%s5390_s29 + $0x5f0] sm:$0xf]  ;;  %558 = vst [vmem:[%s5394_s30 + $0x2f0] sm:$0xf] %v557_v60  ;;  %560 = vst [vmem:[%s5394_s30 + $0x2f4] sm:$0xf] %v559_v61 }
  0x93   : > { %562 = vst [vmem:[%s5394_s30 + $0x2f8] sm:$0xf] %v561_v62  ;;  %v563_v63 = vld [vmem:[%s5390_s29 + $0x5f8] sm:$0xf]  ;;  %v565_v0 = vld [vmem:[%s5390_s29 + $0x600] sm:$0xf] }
  0x94   : > { %v567_v1 = vld [vmem:[%s5390_s29 + $0x608] sm:$0xf]  ;;  %564 = vst [vmem:[%s5394_s30 + $0x2fc] sm:$0xf] %v563_v63  ;;  %566 = vst [vmem:[%s5394_s30 + $0x300] sm:$0xf] %v565_v0 }
  0x95   : > { %568 = vst [vmem:[%s5394_s30 + $0x304] sm:$0xf] %v567_v1  ;;  %v569_v2 = vld [vmem:[%s5390_s29 + $0x610] sm:$0xf]  ;;  %v571_v3 = vld [vmem:[%s5390_s29 + $0x618] sm:$0xf] }
  0x96   : > { %v573_v4 = vld [vmem:[%s5390_s29 + $0x620] sm:$0xf]  ;;  %570 = vst [vmem:[%s5394_s30 + $0x308] sm:$0xf] %v569_v2  ;;  %572 = vst [vmem:[%s5394_s30 + $0x30c] sm:$0xf] %v571_v3 }
  0x97   : > { %574 = vst [vmem:[%s5394_s30 + $0x310] sm:$0xf] %v573_v4  ;;  %v575_v5 = vld [vmem:[%s5390_s29 + $0x628] sm:$0xf]  ;;  %v577_v6 = vld [vmem:[%s5390_s29 + $0x630] sm:$0xf] }
  0x98   : > { %v579_v7 = vld [vmem:[%s5390_s29 + $0x638] sm:$0xf]  ;;  %576 = vst [vmem:[%s5394_s30 + $0x314] sm:$0xf] %v575_v5  ;;  %578 = vst [vmem:[%s5394_s30 + $0x318] sm:$0xf] %v577_v6 }
  0x99   : > { %580 = vst [vmem:[%s5394_s30 + $0x31c] sm:$0xf] %v579_v7  ;;  %v581_v8 = vld [vmem:[%s5390_s29 + $0x640] sm:$0xf]  ;;  %v583_v9 = vld [vmem:[%s5390_s29 + $0x648] sm:$0xf] }
  0x9a   : > { %v585_v10 = vld [vmem:[%s5390_s29 + $0x650] sm:$0xf]  ;;  %582 = vst [vmem:[%s5394_s30 + $0x320] sm:$0xf] %v581_v8  ;;  %584 = vst [vmem:[%s5394_s30 + $0x324] sm:$0xf] %v583_v9 }
  0x9b   : > { %586 = vst [vmem:[%s5394_s30 + $0x328] sm:$0xf] %v585_v10  ;;  %v587_v11 = vld [vmem:[%s5390_s29 + $0x658] sm:$0xf]  ;;  %v589_v12 = vld [vmem:[%s5390_s29 + $0x660] sm:$0xf] }
  0x9c   : > { %v591_v13 = vld [vmem:[%s5390_s29 + $0x668] sm:$0xf]  ;;  %588 = vst [vmem:[%s5394_s30 + $0x32c] sm:$0xf] %v587_v11  ;;  %590 = vst [vmem:[%s5394_s30 + $0x330] sm:$0xf] %v589_v12 }
  0x9d   : > { %592 = vst [vmem:[%s5394_s30 + $0x334] sm:$0xf] %v591_v13  ;;  %v593_v14 = vld [vmem:[%s5390_s29 + $0x670] sm:$0xf]  ;;  %v595_v15 = vld [vmem:[%s5390_s29 + $0x678] sm:$0xf] }
  0x9e   : > { %v597_v16 = vld [vmem:[%s5390_s29 + $0x680] sm:$0xf]  ;;  %594 = vst [vmem:[%s5394_s30 + $0x338] sm:$0xf] %v593_v14  ;;  %596 = vst [vmem:[%s5394_s30 + $0x33c] sm:$0xf] %v595_v15 }
  0x9f   : > { %598 = vst [vmem:[%s5394_s30 + $0x340] sm:$0xf] %v597_v16  ;;  %v599_v17 = vld [vmem:[%s5390_s29 + $0x688] sm:$0xf]  ;;  %v601_v18 = vld [vmem:[%s5390_s29 + $0x690] sm:$0xf] }
  0xa0   : > { %v603_v19 = vld [vmem:[%s5390_s29 + $0x698] sm:$0xf]  ;;  %600 = vst [vmem:[%s5394_s30 + $0x344] sm:$0xf] %v599_v17  ;;  %602 = vst [vmem:[%s5394_s30 + $0x348] sm:$0xf] %v601_v18 }
  0xa1   : > { %604 = vst [vmem:[%s5394_s30 + $0x34c] sm:$0xf] %v603_v19  ;;  %v605_v20 = vld [vmem:[%s5390_s29 + $0x6a0] sm:$0xf]  ;;  %v607_v21 = vld [vmem:[%s5390_s29 + $0x6a8] sm:$0xf] }
  0xa2   : > { %v609_v22 = vld [vmem:[%s5390_s29 + $0x6b0] sm:$0xf]  ;;  %606 = vst [vmem:[%s5394_s30 + $0x350] sm:$0xf] %v605_v20  ;;  %608 = vst [vmem:[%s5394_s30 + $0x354] sm:$0xf] %v607_v21 }
  0xa3   : > { %610 = vst [vmem:[%s5394_s30 + $0x358] sm:$0xf] %v609_v22  ;;  %v611_v23 = vld [vmem:[%s5390_s29 + $0x6b8] sm:$0xf]  ;;  %v613_v24 = vld [vmem:[%s5390_s29 + $0x6c0] sm:$0xf] }
  0xa4   : > { %v615_v25 = vld [vmem:[%s5390_s29 + $0x6c8] sm:$0xf]  ;;  %612 = vst [vmem:[%s5394_s30 + $0x35c] sm:$0xf] %v611_v23  ;;  %614 = vst [vmem:[%s5394_s30 + $0x360] sm:$0xf] %v613_v24 }
  0xa5   : > { %616 = vst [vmem:[%s5394_s30 + $0x364] sm:$0xf] %v615_v25  ;;  %v617_v26 = vld [vmem:[%s5390_s29 + $0x6d0] sm:$0xf]  ;;  %v619_v27 = vld [vmem:[%s5390_s29 + $0x6d8] sm:$0xf] }
  0xa6   : > { %v621_v28 = vld [vmem:[%s5390_s29 + $0x6e0] sm:$0xf]  ;;  %618 = vst [vmem:[%s5394_s30 + $0x368] sm:$0xf] %v617_v26  ;;  %620 = vst [vmem:[%s5394_s30 + $0x36c] sm:$0xf] %v619_v27 }
  0xa7   : > { %622 = vst [vmem:[%s5394_s30 + $0x370] sm:$0xf] %v621_v28  ;;  %v623_v29 = vld [vmem:[%s5390_s29 + $0x6e8] sm:$0xf]  ;;  %v625_v30 = vld [vmem:[%s5390_s29 + $0x6f0] sm:$0xf] }
  0xa8   : > { %v627_v31 = vld [vmem:[%s5390_s29 + $0x6f8] sm:$0xf]  ;;  %624 = vst [vmem:[%s5394_s30 + $0x374] sm:$0xf] %v623_v29  ;;  %626 = vst [vmem:[%s5394_s30 + $0x378] sm:$0xf] %v625_v30 }
  0xa9   : > { %628 = vst [vmem:[%s5394_s30 + $0x37c] sm:$0xf] %v627_v31  ;;  %v629_v32 = vld [vmem:[%s5390_s29 + $0x700] sm:$0xf]  ;;  %v631_v33 = vld [vmem:[%s5390_s29 + $0x708] sm:$0xf] }
  0xaa   : > { %v633_v34 = vld [vmem:[%s5390_s29 + $0x710] sm:$0xf]  ;;  %630 = vst [vmem:[%s5394_s30 + $0x380] sm:$0xf] %v629_v32  ;;  %632 = vst [vmem:[%s5394_s30 + $0x384] sm:$0xf] %v631_v33 }
  0xab   : > { %634 = vst [vmem:[%s5394_s30 + $0x388] sm:$0xf] %v633_v34  ;;  %v635_v35 = vld [vmem:[%s5390_s29 + $0x718] sm:$0xf]  ;;  %v637_v36 = vld [vmem:[%s5390_s29 + $0x720] sm:$0xf] }
  0xac   : > { %v639_v37 = vld [vmem:[%s5390_s29 + $0x728] sm:$0xf]  ;;  %636 = vst [vmem:[%s5394_s30 + $0x38c] sm:$0xf] %v635_v35  ;;  %638 = vst [vmem:[%s5394_s30 + $0x390] sm:$0xf] %v637_v36 }
  0xad   : > { %640 = vst [vmem:[%s5394_s30 + $0x394] sm:$0xf] %v639_v37  ;;  %v641_v38 = vld [vmem:[%s5390_s29 + $0x730] sm:$0xf]  ;;  %v643_v39 = vld [vmem:[%s5390_s29 + $0x738] sm:$0xf] }
  0xae   : > { %v645_v40 = vld [vmem:[%s5390_s29 + $0x740] sm:$0xf]  ;;  %642 = vst [vmem:[%s5394_s30 + $0x398] sm:$0xf] %v641_v38  ;;  %644 = vst [vmem:[%s5394_s30 + $0x39c] sm:$0xf] %v643_v39 }
  0xaf   : > { %646 = vst [vmem:[%s5394_s30 + $0x3a0] sm:$0xf] %v645_v40  ;;  %v647_v41 = vld [vmem:[%s5390_s29 + $0x748] sm:$0xf]  ;;  %v649_v42 = vld [vmem:[%s5390_s29 + $0x750] sm:$0xf] }
  0xb0   : > { %v651_v43 = vld [vmem:[%s5390_s29 + $0x758] sm:$0xf]  ;;  %648 = vst [vmem:[%s5394_s30 + $0x3a4] sm:$0xf] %v647_v41  ;;  %650 = vst [vmem:[%s5394_s30 + $0x3a8] sm:$0xf] %v649_v42 }
  0xb1   : > { %652 = vst [vmem:[%s5394_s30 + $0x3ac] sm:$0xf] %v651_v43  ;;  %v653_v44 = vld [vmem:[%s5390_s29 + $0x760] sm:$0xf]  ;;  %v655_v45 = vld [vmem:[%s5390_s29 + $0x768] sm:$0xf] }
  0xb2   : > { %v657_v46 = vld [vmem:[%s5390_s29 + $0x770] sm:$0xf]  ;;  %654 = vst [vmem:[%s5394_s30 + $0x3b0] sm:$0xf] %v653_v44  ;;  %656 = vst [vmem:[%s5394_s30 + $0x3b4] sm:$0xf] %v655_v45 }
  0xb3   : > { %658 = vst [vmem:[%s5394_s30 + $0x3b8] sm:$0xf] %v657_v46  ;;  %v659_v47 = vld [vmem:[%s5390_s29 + $0x778] sm:$0xf]  ;;  %v661_v48 = vld [vmem:[%s5390_s29 + $0x780] sm:$0xf] }
  0xb4   : > { %v663_v49 = vld [vmem:[%s5390_s29 + $0x788] sm:$0xf]  ;;  %660 = vst [vmem:[%s5394_s30 + $0x3bc] sm:$0xf] %v659_v47  ;;  %662 = vst [vmem:[%s5394_s30 + $0x3c0] sm:$0xf] %v661_v48 }
  0xb5   : > { %664 = vst [vmem:[%s5394_s30 + $0x3c4] sm:$0xf] %v663_v49  ;;  %v665_v50 = vld [vmem:[%s5390_s29 + $0x790] sm:$0xf]  ;;  %v667_v51 = vld [vmem:[%s5390_s29 + $0x798] sm:$0xf] }
  0xb6   : > { %v669_v52 = vld [vmem:[%s5390_s29 + $0x7a0] sm:$0xf]  ;;  %666 = vst [vmem:[%s5394_s30 + $0x3c8] sm:$0xf] %v665_v50  ;;  %668 = vst [vmem:[%s5394_s30 + $0x3cc] sm:$0xf] %v667_v51 }
  0xb7   : > { %670 = vst [vmem:[%s5394_s30 + $0x3d0] sm:$0xf] %v669_v52  ;;  %v671_v53 = vld [vmem:[%s5390_s29 + $0x7a8] sm:$0xf]  ;;  %v673_v54 = vld [vmem:[%s5390_s29 + $0x7b0] sm:$0xf] }
  0xb8   : > { %v675_v55 = vld [vmem:[%s5390_s29 + $0x7b8] sm:$0xf]  ;;  %672 = vst [vmem:[%s5394_s30 + $0x3d4] sm:$0xf] %v671_v53  ;;  %674 = vst [vmem:[%s5394_s30 + $0x3d8] sm:$0xf] %v673_v54 }
  0xb9   : > { %676 = vst [vmem:[%s5394_s30 + $0x3dc] sm:$0xf] %v675_v55  ;;  %v677_v56 = vld [vmem:[%s5390_s29 + $0x7c0] sm:$0xf]  ;;  %v679_v57 = vld [vmem:[%s5390_s29 + $0x7c8] sm:$0xf] }
  0xba   : > { %v681_v58 = vld [vmem:[%s5390_s29 + $0x7d0] sm:$0xf]  ;;  %678 = vst [vmem:[%s5394_s30 + $0x3e0] sm:$0xf] %v677_v56  ;;  %680 = vst [vmem:[%s5394_s30 + $0x3e4] sm:$0xf] %v679_v57 }
  0xbb   : > { %682 = vst [vmem:[%s5394_s30 + $0x3e8] sm:$0xf] %v681_v58  ;;  %v683_v59 = vld [vmem:[%s5390_s29 + $0x7d8] sm:$0xf]  ;;  %v685_v60 = vld [vmem:[%s5390_s29 + $0x7e0] sm:$0xf] }
  0xbc   : > { %v687_v61 = vld [vmem:[%s5390_s29 + $0x7e8] sm:$0xf]  ;;  %684 = vst [vmem:[%s5394_s30 + $0x3ec] sm:$0xf] %v683_v59  ;;  %686 = vst [vmem:[%s5394_s30 + $0x3f0] sm:$0xf] %v685_v60 }
  0xbd   : > { %688 = vst [vmem:[%s5394_s30 + $0x3f4] sm:$0xf] %v687_v61  ;;  %v689_v62 = vld [vmem:[%s5390_s29 + $0x7f0] sm:$0xf]  ;;  %v691_v63 = vld [vmem:[%s5390_s29 + $0x7f8] sm:$0xf] }
  0xbe   : > { %690 = vst [vmem:[%s5394_s30 + $0x3f8] sm:$0xf] %v689_v62  ;;  %692 = vst [vmem:[%s5394_s30 + $0x3fc] sm:$0xf] %v691_v63 }
  0xbf PF: > { %p4291_p7 = scmp.ge.s32.totalorder %s5322_s17, 1  ;;  %p1238_p8 = scmp.lt.s32.totalorder %s5322_s17, 3 }
  0xc1   : > { %p1239_p9 = pnand %p4291_p7, %p1238_p8 }
  0xc2   : > { %s1245_s5 = sand.u32 (!%p1239_p9), 1, %s5314_s15   ;;  %v5912_v0 = vld [vmem:[%s6776_s0] sm:$0xff] (!%p1239_p9)  ;;  %v5922_v2 = vld [vmem:[%s6776_s0 + $0x8] sm:$0xff] (!%p1239_p9)  ;;  %p1275_p10 = scmp.lt.s32.totalorder (!%p1239_p9), %s5365_s18, 1 }
  0xc3   : > { %1242 = sbr.rel (%p1239_p9) target bundleno = 823 (0x337), region = 73  ;;  %v5917_v1 = vld [vmem:[%s6776_s0 + $0x40] sm:$0xff] (!%p1239_p9)  ;;  %s4292_s12 = sshll.u32 (!%p1239_p9), %s1245_s5, 10  ;;  %v5931_v4 = vld [vmem:[%s6776_s0 + $0x48] sm:$0xff] (!%p1239_p9) }
  0xc4   : > { %v4295_v3 = vcombine.high (!%p1239_p9), %v5912_v0, %v5917_v1  ;;  %v4297_v5 = vcombine.high (!%p1239_p9), %v5922_v2, %v5931_v4  ;;  %s5935_s17 = scalar_lea.vmem (!%p1239_p9), [#allocation2], %s4292_s12  ;;  %v1298_v35 = vld [vmem:[%s6776_s0 + $0x80] sm:$0xff] (!%p1239_p9)  ;;  %v1299_v38 = vld [vmem:[%s6776_s0 + $0x88] sm:$0xff] (!%p1239_p9)  ;;  %v4294_v42 = vcombine.low (!%p1239_p9), %v5912_v0, %v5917_v1  ;;  %v4296_v43 = vcombine.low (!%p1239_p9), %v5922_v2, %v5931_v4  ;;  %s6715_s13 = sshll.u32 (!%p1239_p9), %s1245_s5, 6 }
  0xc5   : > { %v5170_v6 = vld [vmem:[%s5935_s17 + $0x40] sm:$0xff] (!%p1239_p9)   ;;  %v5174_v10 = vld [vmem:[%s5935_s17 + $0x48] sm:$0xff] (!%p1239_p9)   ;;  %v5178_v14 = vld [vmem:[%s5935_s17 + $0x50] sm:$0xff] (!%p1239_p9)   ;;  %s6734_s15 = scalar_lea.vmem (!%p1239_p9), [#allocation3], %s6715_s13 }
  0xc6   : > { %3106 = vmatprep.mubr.bf16.mxu0 (!%p1239_p9), %v4295_v3  ;;  %v5171_v7 = vld [vmem:[%s5935_s17 + $0xc0] sm:$0xff] (!%p1239_p9)   ;;  %3203 = vmatprep.mubr.bf16.mxu1 (!%p1239_p9), %v4297_v5  ;;  %v5175_v11 = vld [vmem:[%s5935_s17 + $0xc8] sm:$0xff] (!%p1239_p9)   ;;  %v5179_v15 = vld [vmem:[%s5935_s17 + $0xd0] sm:$0xff] (!%p1239_p9)  }
  0xc7   : > { %4634 = vmatprep.subr.bf16.mxu0 (!%p1239_p9), %v5170_v6  ;;  %v5172_v8 = vld [vmem:[%s5935_s17] sm:$0xff] (!%p1239_p9)   ;;  %4698 = vmatprep.subr.bf16.mxu1 (!%p1239_p9), %v5171_v7  ;;  %v5176_v12 = vld [vmem:[%s5935_s17 + $0x8] sm:$0xff] (!%p1239_p9)   ;;  %v5180_v16 = vld [vmem:[%s5935_s17 + $0x10] sm:$0xff] (!%p1239_p9)  }
  0xc8   : > { %v5173_v9 = vld [vmem:[%s5935_s17 + $0x80] sm:$0xff] (!%p1239_p9)   ;;  %4635 = vmatpush3.bf16.msra.mxu0 (!%p1239_p9), %v5172_v8  ;;  %v5177_v13 = vld [vmem:[%s5935_s17 + $0x88] sm:$0xff] (!%p1239_p9)   ;;  %v5181_v17 = vld [vmem:[%s5935_s17 + $0x90] sm:$0xff] (!%p1239_p9)  }
  0xc9   : > { %4699 = vmatpush3.bf16.msra.mxu1 (!%p1239_p9), %v5173_v9  ;;  %4636 = vmatprep.subr.bf16.mxu0 (!%p1239_p9), %v5174_v10  ;;  %v5182_v18 = vld [vmem:[%s5935_s17 + $0x58] sm:$0xff] (!%p1239_p9)   ;;  %v5186_v22 = vld [vmem:[%s5935_s17 + $0x60] sm:$0xff] (!%p1239_p9)   ;;  %v5190_v26 = vld [vmem:[%s5935_s17 + $0x68] sm:$0xff] (!%p1239_p9)  }
  0xca   : > { %4700 = vmatprep.subr.bf16.mxu1 %v5175_v11  ;;  %v5183_v19 = vld [vmem:[%s5935_s17 + $0xd8] sm:$0xff]   ;;  %v5187_v23 = vld [vmem:[%s5935_s17 + $0xe0] sm:$0xff]   ;;  %v5191_v27 = vld [vmem:[%s5935_s17 + $0xe8] sm:$0xff]   ;;  %s4568_s5 = sshll.u32 (%p5380_p5), %s5365_s18, 2 }
  0xcb   : > { %v5184_v20 = vld [vmem:[%s5935_s17 + $0x18] sm:$0xff]   ;;  %v5188_v24 = vld [vmem:[%s5935_s17 + $0x20] sm:$0xff]   ;;  %v5192_v28 = vld [vmem:[%s5935_s17 + $0x28] sm:$0xff]   ;;  %s4111_s21 = scalar_lea.vmem (%p5380_p5), %s6780_s4, %s4568_s5 }
  0xcc   : > { %4637 = vmatpush3.bf16.msra.mxu0 %v5176_v12  ;;  %v5185_v21 = vld [vmem:[%s5935_s17 + $0x98] sm:$0xff]   ;;  %v5189_v25 = vld [vmem:[%s5935_s17 + $0xa0] sm:$0xff]   ;;  %v5193_v29 = vld [vmem:[%s5935_s17 + $0xa8] sm:$0xff]  }
  0xcd   : > { %4701 = vmatpush3.bf16.msra.mxu1 %v5177_v13  ;;  %4638 = vmatprep.subr.bf16.mxu0 %v5178_v14  ;;  %v5194_v30 = vld [vmem:[%s5935_s17 + $0x70] sm:$0xff]   ;;  %v5198_v34 = vld [vmem:[%s5935_s17 + $0x78] sm:$0xff]   ;;  %v1306_v36 = vld [vmem:[%s6776_s0 + $0xc0] sm:$0xff] }
  0xce   : > { %4702 = vmatprep.subr.bf16.mxu1 %v5179_v15  ;;  %v5195_v31 = vld [vmem:[%s5935_s17 + $0xf0] sm:$0xff]   ;;  %v5199_v37 = vld [vmem:[%s5935_s17 + $0xf8] sm:$0xff]   ;;  %v1307_v39 = vld [vmem:[%s6776_s0 + $0xc8] sm:$0xff]  ;;  %v4311_v46 = vcombine.high %v1298_v35, %v1306_v36  ;;  %v4310_v54 = vcombine.low %v1298_v35, %v1306_v36 }
  0xcf   : > { %v5196_v32 = vld [vmem:[%s5935_s17 + $0x30] sm:$0xff]   ;;  %v5200_v40 = vld [vmem:[%s5935_s17 + $0x38] sm:$0xff]   ;;  %v5202_v44 = vld [vmem:[%s5935_s17 + $0x140] sm:$0xff]   ;;  %v4313_v48 = vcombine.high %v1299_v38, %v1307_v39  ;;  %v4312_v56 = vcombine.low %v1299_v38, %v1307_v39 }
  0xd0   : > { %4639 = vmatpush3.bf16.msra.mxu0 %v5180_v16  ;;  %v5197_v33 = vld [vmem:[%s5935_s17 + $0xb0] sm:$0xff]   ;;  %v5201_v41 = vld [vmem:[%s5935_s17 + $0xb8] sm:$0xff]   ;;  %v5203_v45 = vld [vmem:[%s5935_s17 + $0x100] sm:$0xff]  }
  0xd1   : > { %4703 = vmatpush3.bf16.msra.mxu1 %v5181_v17  ;;  %4640 = vmatprep.subr.bf16.mxu0 %v5182_v18  ;;  %v5204_v47 = vld [vmem:[%s5935_s17 + $0x1c0] sm:$0xff]   ;;  %v5206_v50 = vld [vmem:[%s5935_s17 + $0x148] sm:$0xff]   ;;  %v5210_v62 = vld [vmem:[%s5935_s17 + $0x150] sm:$0xff]  }
  0xd2   : > { %4704 = vmatprep.subr.bf16.mxu1 %v5183_v19  ;;  %v5205_v49 = vld [vmem:[%s5935_s17 + $0x180] sm:$0xff]   ;;  %v5207_v52 = vld [vmem:[%s5935_s17 + $0x108] sm:$0xff]   ;;  %v5211_v63 = vld [vmem:[%s5935_s17 + $0x110] sm:$0xff]  }
  0xd3   : > { %v1314_v51 = vld [vmem:[%s6776_s0 + $0x100] sm:$0xff]  ;;  %v5208_v53 = vld [vmem:[%s5935_s17 + $0x1c8] sm:$0xff]   ;;  %v5212_v0 = vld [vmem:[%s5935_s17 + $0x1d0] sm:$0xff]  }
  0xd4   : > { %4641 = vmatpush3.bf16.msra.mxu0 %v5184_v20  ;;  %v5209_v55 = vld [vmem:[%s5935_s17 + $0x188] sm:$0xff]   ;;  %v1322_v57 = vld [vmem:[%s6776_s0 + $0x140] sm:$0xff]  ;;  %v5213_v1 = vld [vmem:[%s5935_s17 + $0x190] sm:$0xff]  }
  0xd5   : > { %4705 = vmatpush3.bf16.msra.mxu1 %v5185_v21  ;;  %4642 = vmatprep.subr.bf16.mxu0 %v5186_v22  ;;  %v1315_v58 = vld [vmem:[%s6776_s0 + $0x108] sm:$0xff]  ;;  %v4327_v60 = vcombine.high %v1314_v51, %v1322_v57  ;;  %v1330_v2 = vld [vmem:[%s6776_s0 + $0x180] sm:$0xff]  ;;  %v4326_v6 = vcombine.low %v1314_v51, %v1322_v57  ;;  %v5214_v7 = vld [vmem:[%s5935_s17 + $0x158] sm:$0xff]  }
  0xd6   : > { %4706 = vmatprep.subr.bf16.mxu1 %v5187_v23  ;;  %v1323_v59 = vld [vmem:[%s6776_s0 + $0x148] sm:$0xff]  ;;  %v1338_v3 = vld [vmem:[%s6776_s0 + $0x1c0] sm:$0xff]  ;;  %v5215_v10 = vld [vmem:[%s5935_s17 + $0x118] sm:$0xff]  }
  0xd7   : > { %v4329_v61 = vcombine.high %v1315_v58, %v1323_v59  ;;  %v1331_v4 = vld [vmem:[%s6776_s0 + $0x188] sm:$0xff]  ;;  %v4328_v8 = vcombine.low %v1315_v58, %v1323_v59  ;;  %v4343_v9 = vcombine.high %v1330_v2, %v1338_v3  ;;  %v5216_v12 = vld [vmem:[%s5935_s17 + $0x1d8] sm:$0xff]   ;;  %v1346_v14 = vld [vmem:[%s6776_s0 + $0x200] sm:$0xff]  ;;  %v4342_v21 = vcombine.low %v1330_v2, %v1338_v3 }
  0xd8   : > { %4643 = vmatpush3.bf16.msra.mxu0 %v5188_v24  ;;  %v1339_v5 = vld [vmem:[%s6776_s0 + $0x1c8] sm:$0xff]  ;;  %v5217_v13 = vld [vmem:[%s5935_s17 + $0x198] sm:$0xff]   ;;  %v1354_v15 = vld [vmem:[%s6776_s0 + $0x240] sm:$0xff] }
  0xd9   : > { %4707 = vmatpush3.bf16.msra.mxu1 %v5189_v25  ;;  %4644 = vmatprep.subr.bf16.mxu0 %v5190_v26  ;;  %v4345_v11 = vcombine.high %v1331_v4, %v1339_v5  ;;  %v1347_v16 = vld [vmem:[%s6776_s0 + $0x208] sm:$0xff]  ;;  %v5218_v18 = vld [vmem:[%s5935_s17 + $0x160] sm:$0xff]   ;;  %v4344_v23 = vcombine.low %v1331_v4, %v1339_v5  ;;  %v4359_v24 = vcombine.high %v1346_v14, %v1354_v15  ;;  %v5226_v35 = vld [vmem:[%s5935_s17 + $0x170] sm:$0xff]  }
  0xda   : > { %4708 = vmatprep.subr.bf16.mxu1 %v5191_v27  ;;  %v1355_v17 = vld [vmem:[%s6776_s0 + $0x248] sm:$0xff]  ;;  %v5219_v19 = vld [vmem:[%s5935_s17 + $0x120] sm:$0xff]   ;;  %v5227_v38 = vld [vmem:[%s5935_s17 + $0x130] sm:$0xff]  }
  0xdb   : > { %v5220_v20 = vld [vmem:[%s5935_s17 + $0x1e0] sm:$0xff]   ;;  %v4361_v25 = vcombine.high %v1347_v16, %v1355_v17  ;;  %v5222_v26 = vld [vmem:[%s5935_s17 + $0x168] sm:$0xff]   ;;  %v4360_v36 = vcombine.low %v1347_v16, %v1355_v17  ;;  %v1285_v2 = vld [vmem:[%s6776_s0 + $0x18] sm:$0xff] }
  0xdc   : > { %4645 = vmatpush3.bf16.msra.mxu0 %v5192_v28  ;;  %v5221_v22 = vld [vmem:[%s5935_s17 + $0x1a0] sm:$0xff]   ;;  %v5223_v27 = vld [vmem:[%s5935_s17 + $0x128] sm:$0xff]   ;;  %v1293_v3 = vld [vmem:[%s6776_s0 + $0x58] sm:$0xff] }
  0xdd   : > { %4709 = vmatpush3.bf16.msra.mxu1 %v5193_v29  ;;  %4646 = vmatprep.subr.bf16.mxu0 %v5194_v30  ;;  %v5224_v28 = vld [vmem:[%s5935_s17 + $0x1e8] sm:$0xff]   ;;  %v1362_v30 = vld [vmem:[%s6776_s0 + $0x280] sm:$0xff] }
  0xde   : > { %4710 = vmatprep.subr.bf16.mxu1 %v5195_v31  ;;  %v5225_v29 = vld [vmem:[%s5935_s17 + $0x1a8] sm:$0xff]   ;;  %v1370_v31 = vld [vmem:[%s6776_s0 + $0x2c0] sm:$0xff] }
  0xdf   : > { %v1402_v57 = vld [vmem:[%s6776_s0 + $0x3c0] sm:$0xff]  ;;  %v1395_v58 = vld [vmem:[%s6776_s0 + $0x388] sm:$0xff] }
  0xe0   : > { %4647 = vmatpush3.bf16.msra.mxu0 %v5196_v32  ;;  %v1363_v32 = vld [vmem:[%s6776_s0 + $0x288] sm:$0xff] }
  0xe1   : > { %4711 = vmatpush3.bf16.msra.mxu1 %v5197_v33  ;;  %4648 = vmatprep.subr.bf16.mxu0 %v5198_v34  ;;  %v1371_v33 = vld [vmem:[%s6776_s0 + $0x2c8] sm:$0xff]  ;;  %v4358_v34 = vcombine.low %v1346_v14, %v1354_v15  ;;  %v5235_v14 = vld [vmem:[%s5935_s17 + $0x200] sm:$0xff]  }
  0xe2   : > { %4712 = vmatprep.subr.bf16.mxu1 %v5199_v37  ;;  %v4375_v37 = vcombine.high %v1362_v30, %v1370_v31  ;;  %v4377_v39 = vcombine.high %v1363_v32, %v1371_v33  ;;  %v4376_v51 = vcombine.low %v1363_v32, %v1371_v33  ;;  %v1403_v59 = vld [vmem:[%s6776_s0 + $0x3c8] sm:$0xff]  ;;  %v5237_v15 = vld [vmem:[%s5935_s17 + $0x280] sm:$0xff]   ;;  %v5245_v33 = vld [vmem:[%s5935_s17 + $0x290] sm:$0xff]  }
  0xe3   : > { %v4408_v5 = vcombine.low %v1395_v58, %v1403_v59 }
  0xe4   : > { %4649 = vmatpush3.bf16.msra.mxu0 %v5200_v40  ;;  %v5228_v40 = vld [vmem:[%s5935_s17 + $0x1f0] sm:$0xff]  }
  0xe5   : > { %4713 = vmatpush3.bf16.msra.mxu1 %v5201_v41  ;;  %4762 = vmatprep.subr.bf16.mxu0 %v5202_v44  ;;  %v5229_v41 = vld [vmem:[%s5935_s17 + $0x1b0] sm:$0xff]   ;;  %v1379_v44 = vld [vmem:[%s6776_s0 + $0x308] sm:$0xff] }
  0xe6   : > { %4826 = vmatprep.subr.bf16.mxu1 %v5204_v47  ;;  %v5231_v47 = vld [vmem:[%s5935_s17 + $0x138] sm:$0xff]  }
  0xe7   : > { %3107 = vmatmul.mubr.bf16.vlgmr.msra.gmra.mrb[0].mxu0 %v4294_v42  ;;  %v1378_v42 = vld [vmem:[%s6776_s0 + $0x300] sm:$0xff] }
  0xe8   : > { %3204 = vmatmul.mubr.bf16.vlgmr.msra.gmra.mrb[0].mxu1 %v4296_v43  ;;  %4763 = vmatpush3.bf16.msra.mxu0 %v5203_v45  ;;  %v1386_v43 = vld [vmem:[%s6776_s0 + $0x340] sm:$0xff]  ;;  %v1387_v45 = vld [vmem:[%s6776_s0 + $0x348] sm:$0xff] }
  0xe9   : > { %3114 = vmatprep.mubr.bf16.mxu0 %v4311_v46  ;;  %4827 = vmatpush3.bf16.msra.mxu1 %v5205_v49  ;;  %v5230_v46 = vld [vmem:[%s5935_s17 + $0x178] sm:$0xff]   ;;  %v4374_v49 = vcombine.low %v1362_v30, %v1370_v31  ;;  %v5243_v31 = vld [vmem:[%s5935_s17 + $0x210] sm:$0xff]  }
  0xea   : > { %3211 = vmatprep.mubr.bf16.mxu1 %v4313_v48  ;;  %4764 = vmatprep.subr.bf16.mxu0 %v5206_v50  ;;  %v5232_v48 = vld [vmem:[%s5935_s17 + $0x1f8] sm:$0xff]  }
  0xeb   : > { %4828 = vmatprep.subr.bf16.mxu1 %v5208_v53  ;;  %v5233_v50 = vld [vmem:[%s5935_s17 + $0x1b8] sm:$0xff]   ;;  %v4393_v53 = vcombine.high %v1379_v44, %v1387_v45 }
  0xec   : > { %4765 = vmatpush3.bf16.msra.mxu0 %v5207_v52  ;;  %v4391_v52 = vcombine.high %v1378_v42, %v1386_v43 }
  0xed   : > { %4829 = vmatpush3.bf16.msra.mxu1 %v5209_v55  ;;  %4766 = vmatprep.subr.bf16.mxu0 %v5210_v62  ;;  %v5236_v55 = vld [vmem:[%s5935_s17 + $0x2c0] sm:$0xff]  }
  0xee   : > { %4830 = vmatprep.subr.bf16.mxu1 %v5212_v0  ;;  %v1284_v0 = vld [vmem:[%s6776_s0 + $0x10] sm:$0xff] }
  0xef   : > { %3115 = vmatmul.mubr.bf16.gmra.mrb[4].mxu0 %v4310_v54  ;;  %v5234_v54 = vld [vmem:[%s5935_s17 + $0x240] sm:$0xff]  }
  0xf0   : > { %3212 = vmatmul.mubr.bf16.gmra.mrb[4].mxu1 %v4312_v56  ;;  %3122 = vmatprep.mubr.bf16.mxu0 %v4327_v60  ;;  %v1394_v56 = vld [vmem:[%s6776_s0 + $0x380] sm:$0xff]  ;;  %v4390_v60 = vcombine.low %v1378_v42, %v1386_v43 }
  0xf1   : > { %3219 = vmatprep.mubr.bf16.mxu1 %v4329_v61  ;;  %4767 = vmatpush3.bf16.msra.mxu0 %v5211_v63  ;;  %v4392_v61 = vcombine.low %v1379_v44, %v1387_v45  ;;  %v4407_v62 = vcombine.high %v1394_v56, %v1402_v57  ;;  %v4409_v63 = vcombine.high %v1395_v58, %v1403_v59  ;;  %v5250_v42 = vld [vmem:[%s5935_s17 + $0x260] sm:$0xff]   ;;  %v5258_v58 = vld [vmem:[%s5935_s17 + $0x270] sm:$0xff]  }
  0xf2   : > { %4831 = vmatpush3.bf16.msra.mxu1 %v5213_v1  ;;  %4768 = vmatprep.subr.bf16.mxu0 %v5214_v7  ;;  %v1292_v1 = vld [vmem:[%s6776_s0 + $0x50] sm:$0xff]  ;;  %v4406_v4 = vcombine.low %v1394_v56, %v1402_v57  ;;  %v4301_v7 = vcombine.high %v1285_v2, %v1293_v3  ;;  %v5252_v44 = vld [vmem:[%s5935_s17 + $0x2e0] sm:$0xff]   ;;  %v5255_v56 = vld [vmem:[%s5935_s17 + $0x228] sm:$0xff]  }
  0xf3   : > { %4832 = vmatprep.subr.bf16.mxu1 %v5216_v12  ;;  %v1309_v12 = vld [vmem:[%s6776_s0 + $0xd8] sm:$0xff]  ;;  %v5257_v57 = vld [vmem:[%s5935_s17 + $0x2a8] sm:$0xff]  }
  0xf5   : > { %4769 = vmatpush3.bf16.msra.mxu0 %v5215_v10  ;;  %v1301_v10 = vld [vmem:[%s6776_s0 + $0x98] sm:$0xff] }
  0xf6   : > { %4833 = vmatpush3.bf16.msra.mxu1 %v5217_v13  ;;  %4770 = vmatprep.subr.bf16.mxu0 %v5218_v18  ;;  %v4300_v13 = vcombine.low %v1285_v2, %v1293_v3  ;;  %v4317_v17 = vcombine.high %v1301_v10, %v1309_v12  ;;  %v5238_v18 = vld [vmem:[%s5935_s17 + $0x248] sm:$0xff]   ;;  %v5262_v2 = vld [vmem:[%s5935_s17 + $0x278] sm:$0xff]   ;;  %v1364_v3 = vld [vmem:[%s6776_s0 + $0x290] sm:$0xff] }
  0xf7   : > { %3123 = vmatmul.mubr.bf16.gmra.mrb[8].mxu0 %v4326_v6  ;;  %4834 = vmatprep.subr.bf16.mxu1 %v5220_v20  ;;  %v4299_v6 = vcombine.high %v1284_v0, %v1292_v1  ;;  %v5240_v20 = vld [vmem:[%s5935_s17 + $0x2c8] sm:$0xff]  }
  0xf8   : > { %3220 = vmatmul.mubr.bf16.gmra.mrb[8].mxu1 %v4328_v8  ;;  %3130 = vmatprep.mubr.bf16.mxu0 %v4343_v9  ;;  %v1300_v8 = vld [vmem:[%s6776_s0 + $0x90] sm:$0xff] }
  0xf9   : > { %3227 = vmatprep.mubr.bf16.mxu1 %v4345_v11  ;;  %4771 = vmatpush3.bf16.msra.mxu0 %v5219_v19  ;;  %v1308_v9 = vld [vmem:[%s6776_s0 + $0xd0] sm:$0xff]  ;;  %v4298_v11 = vcombine.low %v1284_v0, %v1292_v1  ;;  %v5239_v19 = vld [vmem:[%s5935_s17 + $0x208] sm:$0xff]  }
  0xfa   : > { %4835 = vmatpush3.bf16.msra.mxu1 %v5221_v22  ;;  %4772 = vmatprep.subr.bf16.mxu0 %v5222_v26  ;;  %v4315_v16 = vcombine.high %v1300_v8, %v1308_v9  ;;  %v1316_v22 = vld [vmem:[%s6776_s0 + $0x110] sm:$0xff] }
  0xfb   : > { %4836 = vmatprep.subr.bf16.mxu1 %v5224_v28  ;;  %v5242_v26 = vld [vmem:[%s5935_s17 + $0x250] sm:$0xff]   ;;  %v4314_v28 = vcombine.low %v1300_v8, %v1308_v9  ;;  %v5263_v8 = vld [vmem:[%s5935_s17 + $0x238] sm:$0xff]  }
  0xfc   : > { %v5261_v1 = vld [vmem:[%s5935_s17 + $0x2b0] sm:$0xff]   ;;  %v5265_v9 = vld [vmem:[%s5935_s17 + $0x2b8] sm:$0xff]  }
  0xfd   : > { %4773 = vmatpush3.bf16.msra.mxu0 %v5223_v27  ;;  %v5244_v27 = vld [vmem:[%s5935_s17 + $0x2d0] sm:$0xff]  }
  0xfe   : > { %4837 = vmatpush3.bf16.msra.mxu1 %v5225_v29  ;;  %4774 = vmatprep.subr.bf16.mxu0 %v5226_v35  ;;  %v4316_v29 = vcombine.low %v1301_v10, %v1309_v12  ;;  %v1332_v35 = vld [vmem:[%s6776_s0 + $0x190] sm:$0xff]  ;;  %v5266_v10 = vld [vmem:[%s5935_s17 + $0x340] sm:$0xff]  }
  0xff   : > { %3131 = vmatmul.mubr.bf16.gmra.mrb[12].mxu0 %v4342_v21  ;;  %4838 = vmatprep.subr.bf16.mxu1 %v5228_v40  ;;  %v5241_v21 = vld [vmem:[%s5935_s17 + $0x288] sm:$0xff]   ;;  %v5247_v40 = vld [vmem:[%s5935_s17 + $0x218] sm:$0xff]   ;;  %v5268_v12 = vld [vmem:[%s5935_s17 + $0x3c0] sm:$0xff]  }
 0x100   : > { %3228 = vmatmul.mubr.bf16.gmra.mrb[12].mxu1 %v4344_v23  ;;  %3138 = vmatprep.mubr.bf16.mxu0 %v4359_v24  ;;  %v1324_v23 = vld [vmem:[%s6776_s0 + $0x150] sm:$0xff]  ;;  %v1317_v24 = vld [vmem:[%s6776_s0 + $0x118] sm:$0xff] }
 0x101   : > { %3235 = vmatprep.mubr.bf16.mxu1 %v4361_v25  ;;  %4775 = vmatpush3.bf16.msra.mxu0 %v5227_v38  ;;  %v1325_v25 = vld [vmem:[%s6776_s0 + $0x158] sm:$0xff]  ;;  %v4331_v30 = vcombine.high %v1316_v22, %v1324_v23  ;;  %v4330_v43 = vcombine.low %v1316_v22, %v1324_v23 }
 0x102   : > { %4839 = vmatpush3.bf16.msra.mxu1 %v5229_v41  ;;  %4776 = vmatprep.subr.bf16.mxu0 %v5230_v46  ;;  %v4333_v32 = vcombine.high %v1317_v24, %v1325_v25  ;;  %v1333_v38 = vld [vmem:[%s6776_s0 + $0x198] sm:$0xff]  ;;  %v4332_v45 = vcombine.low %v1317_v24, %v1325_v25  ;;  %v1396_v24 = vld [vmem:[%s6776_s0 + $0x390] sm:$0xff] }
 0x103   : > { %4840 = vmatprep.subr.bf16.mxu1 %v5232_v48  ;;  %v5249_v41 = vld [vmem:[%s5935_s17 + $0x298] sm:$0xff]   ;;  %v5251_v48 = vld [vmem:[%s5935_s17 + $0x220] sm:$0xff]   ;;  %v1404_v25 = vld [vmem:[%s6776_s0 + $0x3d0] sm:$0xff] }
 0x105   : > { %4777 = vmatpush3.bf16.msra.mxu0 %v5231_v47 }
 0x106   : > { %4841 = vmatpush3.bf16.msra.mxu1 %v5233_v50  ;;  %4890 = vmatprep.subr.bf16.mxu0 %v5234_v54  ;;  %v5254_v50 = vld [vmem:[%s5935_s17 + $0x268] sm:$0xff]   ;;  %v1349_v54 = vld [vmem:[%s6776_s0 + $0x218] sm:$0xff] }
 0x107   : > { %3139 = vmatmul.mubr.bf16.gmra.mrb[16].mxu0 %v4358_v34  ;;  %4954 = vmatprep.subr.bf16.mxu1 %v5236_v55  ;;  %v5246_v34 = vld [vmem:[%s5935_s17 + $0x258] sm:$0xff]  }
 0x108   : > { %3236 = vmatmul.mubr.bf16.gmra.mrb[16].mxu1 %v4360_v36  ;;  %3146 = vmatprep.mubr.bf16.mxu0 %v4375_v37  ;;  %v1340_v36 = vld [vmem:[%s6776_s0 + $0x1d0] sm:$0xff]  ;;  %v5248_v37 = vld [vmem:[%s5935_s17 + $0x2d8] sm:$0xff]  }
 0x109   : > { %3243 = vmatprep.mubr.bf16.mxu1 %v4377_v39  ;;  %v1341_v39 = vld [vmem:[%s6776_s0 + $0x1d8] sm:$0xff]  ;;  %v4347_v46 = vcombine.high %v1332_v35, %v1340_v36  ;;  %v4346_v59 = vcombine.low %v1332_v35, %v1340_v36  ;;  %v1295_v35 = vld [vmem:[%s6776_s0 + $0x68] sm:$0xff]  ;;  %v4410_v36 = vcombine.low %v1396_v24, %v1404_v25 }
 0x10a   : > { %v4349_v47 = vcombine.high %v1333_v38, %v1341_v39  ;;  %v1357_v55 = vld [vmem:[%s6776_s0 + $0x258] sm:$0xff] }
 0x10b   : > { %v4365_v0 = vcombine.high %v1349_v54, %v1357_v55 }
 0x10f   : > { %3147 = vmatmul.mubr.bf16.gmra.mrb[20].mxu0 %v4374_v49  ;;  %v5253_v49 = vld [vmem:[%s5935_s17 + $0x2a0] sm:$0xff]  }
 0x110   : > { %3244 = vmatmul.mubr.bf16.gmra.mrb[20].mxu1 %v4376_v51  ;;  %3154 = vmatprep.mubr.bf16.mxu0 %v4391_v52  ;;  %v1348_v51 = vld [vmem:[%s6776_s0 + $0x210] sm:$0xff] }
 0x111   : > { %3251 = vmatprep.mubr.bf16.mxu1 %v4393_v53  ;;  %v1356_v52 = vld [vmem:[%s6776_s0 + $0x250] sm:$0xff]  ;;  %v5256_v53 = vld [vmem:[%s5935_s17 + $0x2e8] sm:$0xff]  }
 0x117   : > { %3155 = vmatmul.mubr.bf16.gmra.mrb[24].mxu0 %v4390_v60  ;;  %v5260_v60 = vld [vmem:[%s5935_s17 + $0x2f0] sm:$0xff]  }
 0x118   : > { %3252 = vmatmul.mubr.bf16.gmra.mrb[24].mxu1 %v4392_v61  ;;  %3162 = vmatprep.mubr.bf16.mxu0 %v4407_v62  ;;  %v4348_v61 = vcombine.low %v1333_v38, %v1341_v39  ;;  %v4363_v62 = vcombine.high %v1348_v51, %v1356_v52 }
 0x119   : > { %3259 = vmatprep.mubr.bf16.mxu1 %v4409_v63  ;;  %v5259_v63 = vld [vmem:[%s5935_s17 + $0x230] sm:$0xff]  }
 0x11f   : > { %3163 = vmatmul.mubr.bf16.gmra.mrb[28].mxu0 %v4406_v4  ;;  %v1372_v4 = vld [vmem:[%s6776_s0 + $0x2d0] sm:$0xff] }
 0x120   : > { %3260 = vmatmul.mubr.bf16.gmra.mrb[28].mxu1 %v4408_v5  ;;  %3300 = vmatprep.mubr.bf16.mxu0 %v4299_v6  ;;  %v5264_v5 = vld [vmem:[%s5935_s17 + $0x2f8] sm:$0xff]  }
 0x121   : > { %3397 = vmatprep.mubr.bf16.mxu1 %v4301_v7  ;;  %v1365_v6 = vld [vmem:[%s6776_s0 + $0x298] sm:$0xff] }
 0x122   : > { %v1373_v7 = vld [vmem:[%s6776_s0 + $0x2d8] sm:$0xff] }
 0x127   : > { %3301 = vmatmul.mubr.bf16.vlgmr.msra.gmra.mrb[32].mxu0 %v4298_v11  ;;  %v4362_v11 = vcombine.low %v1348_v51, %v1356_v52  ;;  %v5272_v51 = vld [vmem:[%s5935_s17 + $0x3c8] sm:$0xff]  }
 0x128   : > { %3398 = vmatmul.mubr.bf16.vlgmr.msra.gmra.mrb[32].mxu1 %v4300_v13  ;;  %4891 = vmatpush3.bf16.msra.mxu0 %v5235_v14  ;;  %v4364_v13 = vcombine.low %v1349_v54, %v1357_v55  ;;  %v4379_v14 = vcombine.high %v1364_v3, %v1372_v4  ;;  %v5271_v52 = vld [vmem:[%s5935_s17 + $0x308] sm:$0xff]   ;;  %v1318_v54 = vld [vmem:[%s6776_s0 + $0x120] sm:$0xff] }
 0x129   : > { %4955 = vmatpush3.bf16.msra.mxu1 %v5237_v15  ;;  %3308 = vmatprep.mubr.bf16.mxu0 %v4315_v16  ;;  %v4381_v15 = vcombine.high %v1365_v6, %v1373_v7  ;;  %v1380_v16 = vld [vmem:[%s6776_s0 + $0x310] sm:$0xff]  ;;  %v1326_v55 = vld [vmem:[%s6776_s0 + $0x160] sm:$0xff] }
 0x12a   : > { %3405 = vmatprep.mubr.bf16.mxu1 %v4317_v17  ;;  %4892 = vmatprep.subr.bf16.mxu0 %v5238_v18  ;;  %v1388_v17 = vld [vmem:[%s6776_s0 + $0x350] sm:$0xff]  ;;  %v1381_v18 = vld [vmem:[%s6776_s0 + $0x318] sm:$0xff] }
 0x12b   : > { %4956 = vmatprep.subr.bf16.mxu1 %v5240_v20  ;;  %v4378_v20 = vcombine.low %v1364_v3, %v1372_v4  ;;  %v4395_v22 = vcombine.high %v1380_v16, %v1388_v17  ;;  %v5280_v3 = vld [vmem:[%s5935_s17 + $0x3d8] sm:$0xff]   ;;  %v1334_v4 = vld [vmem:[%s6776_s0 + $0x1a0] sm:$0xff] }
 0x12c   : > { %4893 = vmatpush3.bf16.msra.mxu0 %v5239_v19  ;;  %v1389_v19 = vld [vmem:[%s6776_s0 + $0x358] sm:$0xff] }
 0x12d   : > { %4957 = vmatpush3.bf16.msra.mxu1 %v5241_v21  ;;  %4894 = vmatprep.subr.bf16.mxu0 %v5242_v26  ;;  %v4380_v21 = vcombine.low %v1365_v6, %v1373_v7  ;;  %v4397_v23 = vcombine.high %v1381_v18, %v1389_v19  ;;  %v1397_v26 = vld [vmem:[%s6776_s0 + $0x398] sm:$0xff]  ;;  %v1335_v6 = vld [vmem:[%s6776_s0 + $0x1a8] sm:$0xff] }
 0x12e   : > { %4958 = vmatprep.subr.bf16.mxu1 %v5244_v27  ;;  %v1405_v27 = vld [vmem:[%s6776_s0 + $0x3d8] sm:$0xff] }
 0x12f   : > { %3309 = vmatmul.mubr.bf16.gmra.mrb[36].mxu0 %v4314_v28  ;;  %v4394_v28 = vcombine.low %v1380_v16, %v1388_v17  ;;  %v5279_v7 = vld [vmem:[%s5935_s17 + $0x318] sm:$0xff]   ;;  %v5283_v16 = vld [vmem:[%s5935_s17 + $0x320] sm:$0xff]  }
 0x130   : > { %3406 = vmatmul.mubr.bf16.gmra.mrb[36].mxu1 %v4316_v29  ;;  %3316 = vmatprep.mubr.bf16.mxu0 %v4331_v30  ;;  %v4396_v29 = vcombine.low %v1381_v18, %v1389_v19  ;;  %v4411_v30 = vcombine.high %v1396_v24, %v1404_v25  ;;  %v5285_v17 = vld [vmem:[%s5935_s17 + $0x3a0] sm:$0xff]   ;;  %v5286_v18 = vld [vmem:[%s5935_s17 + $0x368] sm:$0xff]  }
 0x131   : > { %3413 = vmatprep.mubr.bf16.mxu1 %v4333_v32  ;;  %4895 = vmatpush3.bf16.msra.mxu0 %v5243_v31  ;;  %v4413_v31 = vcombine.high %v1397_v26, %v1405_v27  ;;  %v1286_v32 = vld [vmem:[%s6776_s0 + $0x20] sm:$0xff]  ;;  %v5288_v19 = vld [vmem:[%s5935_s17 + $0x3e8] sm:$0xff]  }
 0x132   : > { %4959 = vmatpush3.bf16.msra.mxu1 %v5245_v33  ;;  %4896 = vmatprep.subr.bf16.mxu0 %v5246_v34  ;;  %v1294_v33 = vld [vmem:[%s6776_s0 + $0x60] sm:$0xff]  ;;  %v1287_v34 = vld [vmem:[%s6776_s0 + $0x28] sm:$0xff] }
 0x133   : > { %4960 = vmatprep.subr.bf16.mxu1 %v5248_v37  ;;  %v4412_v37 = vcombine.low %v1397_v26, %v1405_v27  ;;  %v4303_v38 = vcombine.high %v1286_v32, %v1294_v33  ;;  %v4305_v39 = vcombine.high %v1287_v34, %v1295_v35  ;;  %v1359_v24 = vld [vmem:[%s6776_s0 + $0x268] sm:$0xff]  ;;  %v5290_v26 = vld [vmem:[%s5935_s17 + $0x370] sm:$0xff]  }
 0x134   : > { %v5289_v25 = vld [vmem:[%s5935_s17 + $0x3a8] sm:$0xff]  }
 0x135   : > { %4897 = vmatpush3.bf16.msra.mxu0 %v5247_v40  ;;  %v1302_v40 = vld [vmem:[%s6776_s0 + $0xa0] sm:$0xff] }
 0x136   : > { %4961 = vmatpush3.bf16.msra.mxu1 %v5249_v41  ;;  %4898 = vmatprep.subr.bf16.mxu0 %v5250_v42  ;;  %v1310_v41 = vld [vmem:[%s6776_s0 + $0xe0] sm:$0xff]  ;;  %v4302_v42 = vcombine.low %v1286_v32, %v1294_v33  ;;  %v5291_v32 = vld [vmem:[%s5935_s17 + $0x330] sm:$0xff]  }
 0x137   : > { %3317 = vmatmul.mubr.bf16.gmra.mrb[40].mxu0 %v4330_v43  ;;  %4962 = vmatprep.subr.bf16.mxu1 %v5252_v44  ;;  %v1303_v43 = vld [vmem:[%s6776_s0 + $0xa8] sm:$0xff]  ;;  %v5293_v33 = vld [vmem:[%s5935_s17 + $0x3b0] sm:$0xff]  }
 0x138   : > { %3414 = vmatmul.mubr.bf16.gmra.mrb[40].mxu1 %v4332_v45  ;;  %3324 = vmatprep.mubr.bf16.mxu0 %v4347_v46  ;;  %v1311_v44 = vld [vmem:[%s6776_s0 + $0xe8] sm:$0xff]  ;;  %v4304_v45 = vcombine.low %v1287_v34, %v1295_v35  ;;  %v5267_v46 = vld [vmem:[%s5935_s17 + $0x300] sm:$0xff]   ;;  %v5294_v34 = vld [vmem:[%s5935_s17 + $0x378] sm:$0xff]  }
 0x139   : > { %3421 = vmatprep.mubr.bf16.mxu1 %v4349_v47  ;;  %4899 = vmatpush3.bf16.msra.mxu0 %v5251_v48  ;;  %v5269_v47 = vld [vmem:[%s5935_s17 + $0x380] sm:$0xff]   ;;  %v4319_v48 = vcombine.high %v1302_v40, %v1310_v41  ;;  %v5296_v35 = vld [vmem:[%s5935_s17 + $0x3f8] sm:$0xff]  }
 0x13a   : > { %4963 = vmatpush3.bf16.msra.mxu1 %v5253_v49  ;;  %4900 = vmatprep.subr.bf16.mxu0 %v5254_v50  ;;  %v4321_v49 = vcombine.high %v1303_v43, %v1311_v44  ;;  %v5270_v50 = vld [vmem:[%s5935_s17 + $0x348] sm:$0xff]  }
 0x13b   : > { %4964 = vmatprep.subr.bf16.mxu1 %v5256_v53  ;;  %v5273_v53 = vld [vmem:[%s5935_s17 + $0x388] sm:$0xff]  }
 0x13d   : > { %4901 = vmatpush3.bf16.msra.mxu0 %v5255_v56  ;;  %v5274_v56 = vld [vmem:[%s5935_s17 + $0x350] sm:$0xff]  }
 0x13e   : > { %4965 = vmatpush3.bf16.msra.mxu1 %v5257_v57  ;;  %4902 = vmatprep.subr.bf16.mxu0 %v5258_v58  ;;  %v1319_v57 = vld [vmem:[%s6776_s0 + $0x128] sm:$0xff] }
 0x13f   : > { %3325 = vmatmul.mubr.bf16.gmra.mrb[44].mxu0 %v4346_v59  ;;  %4966 = vmatprep.subr.bf16.mxu1 %v5260_v60  ;;  %v1327_v58 = vld [vmem:[%s6776_s0 + $0x168] sm:$0xff]  ;;  %v5276_v59 = vld [vmem:[%s5935_s17 + $0x3d0] sm:$0xff]   ;;  %v4318_v60 = vcombine.low %v1302_v40, %v1310_v41  ;;  %v5297_v41 = vld [vmem:[%s5935_s17 + $0x3b8] sm:$0xff]  }
 0x140   : > { %3422 = vmatmul.mubr.bf16.gmra.mrb[44].mxu1 %v4348_v61  ;;  %3332 = vmatprep.mubr.bf16.mxu0 %v4363_v62  ;;  %v4320_v61 = vcombine.low %v1303_v43, %v1311_v44  ;;  %v4335_v62 = vcombine.high %v1318_v54, %v1326_v55  ;;  %v1375_v40 = vld [vmem:[%s6776_s0 + $0x2e8] sm:$0xff] }
 0x141   : > { %3429 = vmatprep.mubr.bf16.mxu1 %v4365_v0  ;;  %4903 = vmatpush3.bf16.msra.mxu0 %v5259_v63  ;;  %v4337_v63 = vcombine.high %v1319_v57, %v1327_v58  ;;  %v5275_v0 = vld [vmem:[%s5935_s17 + $0x310] sm:$0xff]  }
 0x142   : > { %4967 = vmatpush3.bf16.msra.mxu1 %v5261_v1  ;;  %4904 = vmatprep.subr.bf16.mxu0 %v5262_v2  ;;  %v5277_v1 = vld [vmem:[%s5935_s17 + $0x390] sm:$0xff]   ;;  %v5278_v2 = vld [vmem:[%s5935_s17 + $0x358] sm:$0xff]  }
 0x143   : > { %4968 = vmatprep.subr.bf16.mxu1 %v5264_v5  ;;  %v1342_v5 = vld [vmem:[%s6776_s0 + $0x1e0] sm:$0xff] }
 0x144   : > { %v4350_v27 = vcombine.low %v1334_v4, %v1342_v5 }
 0x145   : > { %4905 = vmatpush3.bf16.msra.mxu0 %v5263_v8  ;;  %v1343_v8 = vld [vmem:[%s6776_s0 + $0x1e8] sm:$0xff] }
 0x146   : > { %4969 = vmatpush3.bf16.msra.mxu1 %v5265_v9  ;;  %5018 = vmatprep.subr.bf16.mxu0 %v5266_v10  ;;  %v5281_v9 = vld [vmem:[%s5935_s17 + $0x398] sm:$0xff]   ;;  %v5282_v10 = vld [vmem:[%s5935_s17 + $0x360] sm:$0xff]  }
 0x147   : > { %3333 = vmatmul.mubr.bf16.gmra.mrb[48].mxu0 %v4362_v11  ;;  %5082 = vmatprep.subr.bf16.mxu1 %v5268_v12  ;;  %v4334_v11 = vcombine.low %v1318_v54, %v1326_v55  ;;  %v5284_v12 = vld [vmem:[%s5935_s17 + $0x3e0] sm:$0xff]  }
 0x148   : > { %3430 = vmatmul.mubr.bf16.gmra.mrb[48].mxu1 %v4364_v13  ;;  %3340 = vmatprep.mubr.bf16.mxu0 %v4379_v14  ;;  %v4336_v13 = vcombine.low %v1319_v57, %v1327_v58  ;;  %v4351_v14 = vcombine.high %v1334_v4, %v1342_v5  ;;  %v1398_v54 = vld [vmem:[%s6776_s0 + $0x3a0] sm:$0xff]  ;;  %v1407_v57 = vld [vmem:[%s6776_s0 + $0x3e8] sm:$0xff] }
 0x149   : > { %3437 = vmatprep.mubr.bf16.mxu1 %v4381_v15  ;;  %v4353_v15 = vcombine.high %v1335_v6, %v1343_v8  ;;  %v1406_v55 = vld [vmem:[%s6776_s0 + $0x3e0] sm:$0xff] }
 0x14f   : > { %3341 = vmatmul.mubr.bf16.gmra.mrb[52].mxu0 %v4378_v20  ;;  %v1350_v20 = vld [vmem:[%s6776_s0 + $0x220] sm:$0xff] }
 0x150   : > { %3438 = vmatmul.mubr.bf16.gmra.mrb[52].mxu1 %v4380_v21  ;;  %3348 = vmatprep.mubr.bf16.mxu0 %v4395_v22  ;;  %v1358_v21 = vld [vmem:[%s6776_s0 + $0x260] sm:$0xff]  ;;  %v1351_v22 = vld [vmem:[%s6776_s0 + $0x228] sm:$0xff] }
 0x151   : > { %3445 = vmatprep.mubr.bf16.mxu1 %v4397_v23  ;;  %v5287_v23 = vld [vmem:[%s5935_s17 + $0x328] sm:$0xff]   ;;  %v4368_v43 = vcombine.low %v1351_v22, %v1359_v24 }
 0x157   : > { %3349 = vmatmul.mubr.bf16.gmra.mrb[56].mxu0 %v4394_v28  ;;  %v5292_v28 = vld [vmem:[%s5935_s17 + $0x3f0] sm:$0xff]  }
 0x158   : > { %3446 = vmatmul.mubr.bf16.gmra.mrb[56].mxu1 %v4396_v29  ;;  %3356 = vmatprep.mubr.bf16.mxu0 %v4411_v30  ;;  %v4352_v29 = vcombine.low %v1335_v6, %v1343_v8  ;;  %v4367_v30 = vcombine.high %v1350_v20, %v1358_v21  ;;  %v1304_v6 = vld [vmem:[%s6776_s0 + $0xb0] sm:$0xff]  ;;  %v1305_v8 = vld [vmem:[%s6776_s0 + $0xb8] sm:$0xff] }
 0x159   : > { %3453 = vmatprep.mubr.bf16.mxu1 %v4413_v31  ;;  %v4369_v31 = vcombine.high %v1351_v22, %v1359_v24  ;;  %v1336_v22 = vld [vmem:[%s6776_s0 + $0x1b0] sm:$0xff]  ;;  %v1337_v24 = vld [vmem:[%s6776_s0 + $0x1b8] sm:$0xff] }
 0x15f   : > { %3357 = vmatmul.mubr.bf16.gmra.mrb[60].mxu0 %v4410_v36  ;;  %v1366_v36 = vld [vmem:[%s6776_s0 + $0x2a0] sm:$0xff] }
 0x160   : > { %3454 = vmatmul.mubr.bf16.gmra.mrb[60].mxu1 %v4412_v37  ;;  %3494 = vmatprep.mubr.bf16.mxu0 %v4303_v38  ;;  %v1374_v37 = vld [vmem:[%s6776_s0 + $0x2e0] sm:$0xff]  ;;  %v5295_v38 = vld [vmem:[%s5935_s17 + $0x338] sm:$0xff]   ;;  %s1276_s17 = scalar_select %p1275_p10, %s5365_s18, 1 }
 0x161   : > { %3591 = vmatprep.mubr.bf16.mxu1 %v4305_v39  ;;  %v1367_v39 = vld [vmem:[%s6776_s0 + $0x2a8] sm:$0xff]  ;;  %v4383_v44 = vcombine.high %v1366_v36, %v1374_v37 }
 0x162   : > { %s1277_s9 = scalar_lea.vmem %s6778_s2, %s1276_s17  ;;  %s1280_s12 = scalar_lea.vmem %s6779_s3, %s1276_s17 }
 0x167   : > { %3495 = vmatmul.mubr.bf16.vlgmr.msra.gmra.mrb[64].mxu0 %v4302_v42  ;;  %v4366_v42 = vcombine.low %v1350_v20, %v1358_v21 }
 0x168   : > { %3592 = vmatmul.mubr.bf16.vlgmr.msra.gmra.mrb[64].mxu1 %v4304_v45  ;;  %5019 = vmatpush3.bf16.msra.mxu0 %v5267_v46  ;;  %v4385_v45 = vcombine.high %v1367_v39, %v1375_v40  ;;  %v1382_v46 = vld [vmem:[%s6776_s0 + $0x320] sm:$0xff] }
 0x169   : > { %5083 = vmatpush3.bf16.msra.mxu1 %v5269_v47  ;;  %3502 = vmatprep.mubr.bf16.mxu0 %v4319_v48  ;;  %v1390_v47 = vld [vmem:[%s6776_s0 + $0x360] sm:$0xff]  ;;  %v1383_v48 = vld [vmem:[%s6776_s0 + $0x328] sm:$0xff] }
 0x16a   : > { %3599 = vmatprep.mubr.bf16.mxu1 %v4321_v49  ;;  %5020 = vmatprep.subr.bf16.mxu0 %v5270_v50  ;;  %v1391_v49 = vld [vmem:[%s6776_s0 + $0x368] sm:$0xff]  ;;  %v4382_v50 = vcombine.low %v1366_v36, %v1374_v37  ;;  %v4398_v58 = vcombine.low %v1382_v46, %v1390_v47 }
 0x16b   : > { %5084 = vmatprep.subr.bf16.mxu1 %v5272_v51  ;;  %v4384_v51 = vcombine.low %v1367_v39, %v1375_v40 }
 0x16c   : > { %5021 = vmatpush3.bf16.msra.mxu0 %v5271_v52  ;;  %v4399_v52 = vcombine.high %v1382_v46, %v1390_v47 }
 0x16d   : > { %5085 = vmatpush3.bf16.msra.mxu1 %v5273_v53  ;;  %5022 = vmatprep.subr.bf16.mxu0 %v5274_v56  ;;  %v4401_v53 = vcombine.high %v1383_v48, %v1391_v49  ;;  %v1399_v56 = vld [vmem:[%s6776_s0 + $0x3a8] sm:$0xff] }
 0x16e   : > { %5086 = vmatprep.subr.bf16.mxu1 %v5276_v59  ;;  %v4400_v59 = vcombine.low %v1383_v48, %v1391_v49 }
 0x16f   : > { %3503 = vmatmul.mubr.bf16.gmra.mrb[68].mxu0 %v4318_v60  ;;  %v4415_v60 = vcombine.high %v1398_v54, %v1406_v55 }
 0x170   : > { %3600 = vmatmul.mubr.bf16.gmra.mrb[68].mxu1 %v4320_v61  ;;  %3510 = vmatprep.mubr.bf16.mxu0 %v4335_v62  ;;  %v4417_v61 = vcombine.high %v1399_v56, %v1407_v57  ;;  %v1288_v62 = vld [vmem:[%s6776_s0 + $0x30] sm:$0xff] }
 0x171   : > { %3607 = vmatprep.mubr.bf16.mxu1 %v4337_v63  ;;  %5023 = vmatpush3.bf16.msra.mxu0 %v5275_v0  ;;  %v1296_v63 = vld [vmem:[%s6776_s0 + $0x70] sm:$0xff]  ;;  %v1289_v0 = vld [vmem:[%s6776_s0 + $0x38] sm:$0xff] }
 0x172   : > { %5087 = vmatpush3.bf16.msra.mxu1 %v5277_v1  ;;  %5024 = vmatprep.subr.bf16.mxu0 %v5278_v2  ;;  %v1297_v1 = vld [vmem:[%s6776_s0 + $0x78] sm:$0xff]  ;;  %v4414_v2 = vcombine.low %v1398_v54, %v1406_v55  ;;  %v4307_v4 = vcombine.high %v1288_v62, %v1296_v63 }
 0x173   : > { %5088 = vmatprep.subr.bf16.mxu1 %v5280_v3  ;;  %v4416_v3 = vcombine.low %v1399_v56, %v1407_v57  ;;  %v4309_v5 = vcombine.high %v1289_v0, %v1297_v1  ;;  %v1369_v55 = vld [vmem:[%s6776_s0 + $0x2b8] sm:$0xff] }
 0x174   : > { %v1377_v56 = vld [vmem:[%s6776_s0 + $0x2f8] sm:$0xff] }
 0x175   : > { %5025 = vmatpush3.bf16.msra.mxu0 %v5279_v7  ;;  %v1312_v7 = vld [vmem:[%s6776_s0 + $0xf0] sm:$0xff] }
 0x176   : > { %5089 = vmatpush3.bf16.msra.mxu1 %v5281_v9  ;;  %5026 = vmatprep.subr.bf16.mxu0 %v5282_v10  ;;  %v1313_v9 = vld [vmem:[%s6776_s0 + $0xf8] sm:$0xff]  ;;  %v4306_v10 = vcombine.low %v1288_v62, %v1296_v63 }
 0x177   : > { %3511 = vmatmul.mubr.bf16.gmra.mrb[72].mxu0 %v4334_v11  ;;  %5090 = vmatprep.subr.bf16.mxu1 %v5284_v12  ;;  %v4308_v11 = vcombine.low %v1289_v0, %v1297_v1  ;;  %v4323_v12 = vcombine.high %v1304_v6, %v1312_v7 }
 0x178   : > { %3608 = vmatmul.mubr.bf16.gmra.mrb[72].mxu1 %v4336_v13  ;;  %3518 = vmatprep.mubr.bf16.mxu0 %v4351_v14  ;;  %v4325_v13 = vcombine.high %v1305_v8, %v1313_v9  ;;  %v1320_v14 = vld [vmem:[%s6776_s0 + $0x130] sm:$0xff] }
 0x179   : > { %3615 = vmatprep.mubr.bf16.mxu1 %v4353_v15  ;;  %5027 = vmatpush3.bf16.msra.mxu0 %v5283_v16  ;;  %v1328_v15 = vld [vmem:[%s6776_s0 + $0x170] sm:$0xff]  ;;  %v1321_v16 = vld [vmem:[%s6776_s0 + $0x138] sm:$0xff] }
 0x17a   : > { %5091 = vmatpush3.bf16.msra.mxu1 %v5285_v17  ;;  %5028 = vmatprep.subr.bf16.mxu0 %v5286_v18  ;;  %v1329_v17 = vld [vmem:[%s6776_s0 + $0x178] sm:$0xff]  ;;  %v4322_v18 = vcombine.low %v1304_v6, %v1312_v7  ;;  %v4339_v20 = vcombine.high %v1320_v14, %v1328_v15 }
 0x17b   : > { %5092 = vmatprep.subr.bf16.mxu1 %v5288_v19  ;;  %v4324_v19 = vcombine.low %v1305_v8, %v1313_v9  ;;  %v4341_v21 = vcombine.high %v1321_v16, %v1329_v17 }
 0x17d   : > { %5029 = vmatpush3.bf16.msra.mxu0 %v5287_v23  ;;  %v1344_v23 = vld [vmem:[%s6776_s0 + $0x1f0] sm:$0xff] }
 0x17e   : > { %5093 = vmatpush3.bf16.msra.mxu1 %v5289_v25  ;;  %5030 = vmatprep.subr.bf16.mxu0 %v5290_v26  ;;  %v1345_v25 = vld [vmem:[%s6776_s0 + $0x1f8] sm:$0xff]  ;;  %v4338_v26 = vcombine.low %v1320_v14, %v1328_v15  ;;  %v4354_v37 = vcombine.low %v1336_v22, %v1344_v23 }
 0x17f   : > { %3519 = vmatmul.mubr.bf16.gmra.mrb[76].mxu0 %v4350_v27  ;;  %5094 = vmatprep.subr.bf16.mxu1 %v5292_v28  ;;  %v4340_v27 = vcombine.low %v1321_v16, %v1329_v17  ;;  %v4355_v28 = vcombine.high %v1336_v22, %v1344_v23  ;;  %v1393_v14 = vld [vmem:[%s6776_s0 + $0x378] sm:$0xff] }
 0x180   : > { %3616 = vmatmul.mubr.bf16.gmra.mrb[76].mxu1 %v4352_v29  ;;  %3526 = vmatprep.mubr.bf16.mxu0 %v4367_v30  ;;  %v4357_v29 = vcombine.high %v1337_v24, %v1345_v25  ;;  %v1352_v30 = vld [vmem:[%s6776_s0 + $0x230] sm:$0xff] }
 0x181   : > { %3623 = vmatprep.mubr.bf16.mxu1 %v4369_v31  ;;  %5031 = vmatpush3.bf16.msra.mxu0 %v5291_v32  ;;  %v1360_v31 = vld [vmem:[%s6776_s0 + $0x270] sm:$0xff] }
 0x182   : > { %5095 = vmatpush3.bf16.msra.mxu1 %v5293_v33  ;;  %5032 = vmatprep.subr.bf16.mxu0 %v5294_v34  ;;  %v1353_v33 = vld [vmem:[%s6776_s0 + $0x238] sm:$0xff] }
 0x183   : > { %5096 = vmatprep.subr.bf16.mxu1 %v5296_v35  ;;  %v1361_v34 = vld [vmem:[%s6776_s0 + $0x278] sm:$0xff] }
 0x184   : > { %v4373_v46 = vcombine.high %v1353_v33, %v1361_v34  ;;  %v4372_v63 = vcombine.low %v1353_v33, %v1361_v34  ;;  %v1408_v33 = vld [vmem:[%s6776_s0 + $0x3f0] sm:$0xff] }
 0x185   : > { %5033 = vmatpush3.bf16.msra.mxu0 %v5295_v38 }
 0x186   : > { %5097 = vmatpush3.bf16.msra.mxu1 %v5297_v41  ;;  %v4356_v41 = vcombine.low %v1337_v24, %v1345_v25 }
 0x187   : > { %3527 = vmatmul.mubr.bf16.gmra.mrb[80].mxu0 %v4366_v42  ;;  %v4371_v42 = vcombine.high %v1352_v30, %v1360_v31 }
 0x188   : > { %3624 = vmatmul.mubr.bf16.gmra.mrb[80].mxu1 %v4368_v43  ;;  %3534 = vmatprep.mubr.bf16.mxu0 %v4383_v44 }
 0x189   : > { %3631 = vmatprep.mubr.bf16.mxu1 %v4385_v45 }
 0x18f   : > { %3535 = vmatmul.mubr.bf16.gmra.mrb[84].mxu0 %v4382_v50 }
 0x190   : > { %3632 = vmatmul.mubr.bf16.gmra.mrb[84].mxu1 %v4384_v51  ;;  %3542 = vmatprep.mubr.bf16.mxu0 %v4399_v52  ;;  %v1368_v52 = vld [vmem:[%s6776_s0 + $0x2b0] sm:$0xff] }
 0x191   : > { %3639 = vmatprep.mubr.bf16.mxu1 %v4401_v53  ;;  %v1376_v53 = vld [vmem:[%s6776_s0 + $0x2f0] sm:$0xff] }
 0x192   : > { %v4387_v0 = vcombine.high %v1368_v52, %v1376_v53  ;;  %v4386_v17 = vcombine.low %v1368_v52, %v1376_v53 }
 0x197   : > { %3543 = vmatmul.mubr.bf16.gmra.mrb[88].mxu0 %v4398_v58 }
 0x198   : > { %3640 = vmatmul.mubr.bf16.gmra.mrb[88].mxu1 %v4400_v59  ;;  %3550 = vmatprep.mubr.bf16.mxu0 %v4415_v60  ;;  %v4370_v59 = vcombine.low %v1352_v30, %v1360_v31 }
 0x199   : > { %3647 = vmatprep.mubr.bf16.mxu1 %v4417_v61 }
 0x19f   : > { %3551 = vmatmul.mubr.bf16.gmra.mrb[92].mxu0 %v4414_v2 }
 0x1a0   : > { %3648 = vmatmul.mubr.bf16.gmra.mrb[92].mxu1 %v4416_v3  ;;  %3688 = vmatprep.mubr.bf16.mxu0 %v4307_v4  ;;  %v4389_v4 = vcombine.high %v1369_v55, %v1377_v56 }
 0x1a1   : > { %3785 = vmatprep.mubr.bf16.mxu1 %v4309_v5 }
 0x1a7   : > { %3689 = vmatmul.mubr.bf16.vlgmr.msra.gmra.mrb[96].mxu0 %v4306_v10  ;;  %v1384_v10 = vld [vmem:[%s6776_s0 + $0x330] sm:$0xff] }
 0x1a8   : > { %3786 = vmatmul.mubr.bf16.vlgmr.msra.gmra.mrb[96].mxu1 %v4308_v11  ;;  %3696 = vmatprep.mubr.bf16.mxu0 %v4323_v12  ;;  %v1392_v11 = vld [vmem:[%s6776_s0 + $0x370] sm:$0xff] }
 0x1a9   : > { %3793 = vmatprep.mubr.bf16.mxu1 %v4325_v13  ;;  %v1385_v13 = vld [vmem:[%s6776_s0 + $0x338] sm:$0xff]  ;;  %v4403_v22 = vcombine.high %v1384_v10, %v1392_v11 }
 0x1af   : > { %3697 = vmatmul.mubr.bf16.gmra.mrb[100].mxu0 %v4322_v18 }
 0x1b0   : > { %3794 = vmatmul.mubr.bf16.gmra.mrb[100].mxu1 %v4324_v19  ;;  %3704 = vmatprep.mubr.bf16.mxu0 %v4339_v20 }
 0x1b1   : > { %3801 = vmatprep.mubr.bf16.mxu1 %v4341_v21  ;;  %v4388_v21 = vcombine.low %v1369_v55, %v1377_v56 }
 0x1b7   : > { %3705 = vmatmul.mubr.bf16.gmra.mrb[104].mxu0 %v4338_v26  ;;  %v4405_v26 = vcombine.high %v1385_v13, %v1393_v14 }
 0x1b8   : > { %3802 = vmatmul.mubr.bf16.gmra.mrb[104].mxu1 %v4340_v27  ;;  %3712 = vmatprep.mubr.bf16.mxu0 %v4355_v28 }
 0x1b9   : > { %3809 = vmatprep.mubr.bf16.mxu1 %v4357_v29 }
 0x1ba   : > { %v4650_v32 = vpop.f32.mrb[0].mxu0 }
 0x1bb   : > { %v4714_v35 = vpop.f32.mrb[0].mxu1  ;;  %v4651_v36 = vpop.f32.mrb[1].mxu0 }
 0x1bc   : > { %v4652_v38 = vadd.f32 %v4651_v36, %v4650_v32  ;;  %v4715_v39 = vpop.f32.mrb[1].mxu1  ;;  %v4653_v40 = vpop.f32.mrb[2].mxu0  ;;  %v1400_v32 = vld [vmem:[%s6776_s0 + $0x3b0] sm:$0xff]  ;;  %v1409_v36 = vld [vmem:[%s6776_s0 + $0x3f8] sm:$0xff] }
 0x1bd   : > { %v4716_v43 = vadd.f32 %v4715_v39, %v4714_v35  ;;  %v4717_v44 = vpop.f32.mrb[2].mxu1  ;;  %v4654_v45 = vpop.f32.mrb[3].mxu0  ;;  %v1401_v35 = vld [vmem:[%s6776_s0 + $0x3b8] sm:$0xff]  ;;  %v4402_v39 = vcombine.low %v1384_v10, %v1392_v11 }
 0x1be   : > { %v4655_v47 = vadd.f32 %v4654_v45, %v4653_v40  ;;  %v4718_v48 = vpop.f32.mrb[3].mxu1 }
 0x1bf   : > { %v6405_v49 = vadd.f32 %v4716_v43, %v4652_v38  ;;  %v4719_v50 = vadd.f32 %v4718_v48, %v4717_v44  ;;  %3713 = vmatmul.mubr.bf16.gmra.mrb[108].mxu0 %v4354_v37  ;;  %v4404_v43 = vcombine.low %v1385_v13, %v1393_v14  ;;  %v4419_v44 = vcombine.high %v1400_v32, %v1408_v33 }
 0x1c0   : > { %3810 = vmatmul.mubr.bf16.gmra.mrb[108].mxu1 %v4356_v41  ;;  %3720 = vmatprep.mubr.bf16.mxu0 %v4371_v42  ;;  %v4421_v48 = vcombine.high %v1401_v35, %v1409_v36 }
 0x1c1   : > { %v6407_v51 = vadd.f32 %v4719_v50, %v4655_v47  ;;  %3817 = vmatprep.mubr.bf16.mxu1 %v4373_v46 }
 0x1c2   : > { %v4656_v54 = vpop.f32.mrb[4].mxu0 }
 0x1c3   : > { %v4720_v57 = vpop.f32.mrb[4].mxu1  ;;  %v4657_v58 = vpop.f32.mrb[5].mxu0 }
 0x1c4   : > { %v4658_v60 = vadd.f32 %v4657_v58, %v4656_v54  ;;  %v4721_v61 = vpop.f32.mrb[5].mxu1  ;;  %v4659_v62 = vpop.f32.mrb[6].mxu0 }
 0x1c5   : > { %v4722_v1 = vadd.f32 %v4721_v61, %v4720_v57  ;;  %v4723_v2 = vpop.f32.mrb[6].mxu1  ;;  %v4660_v3 = vpop.f32.mrb[7].mxu0 }
 0x1c6   : > { %v4661_v5 = vadd.f32 %v4660_v3, %v4659_v62  ;;  %v4724_v6 = vpop.f32.mrb[7].mxu1 }
 0x1c7   : > { %v6421_v7 = vadd.f32 %v4722_v1, %v4658_v60  ;;  %v4725_v8 = vadd.f32 %v4724_v6, %v4723_v2  ;;  %3721 = vmatmul.mubr.bf16.gmra.mrb[112].mxu0 %v4370_v59  ;;  %v4418_v59 = vcombine.low %v1400_v32, %v1408_v33 }
 0x1c8   : > { %3818 = vmatmul.mubr.bf16.gmra.mrb[112].mxu1 %v4372_v63  ;;  %3728 = vmatprep.mubr.bf16.mxu0 %v4387_v0  ;;  %v4420_v63 = vcombine.low %v1401_v35, %v1409_v36 }
 0x1c9   : > { %v6423_v9 = vadd.f32 %v4725_v8, %v4661_v5  ;;  %3825 = vmatprep.mubr.bf16.mxu1 %v4389_v4 }
 0x1ca   : > { %v4662_v12 = vpop.f32.mrb[8].mxu0 }
 0x1cb   : > { %v4726_v15 = vpop.f32.mrb[8].mxu1  ;;  %v4663_v16 = vpop.f32.mrb[9].mxu0 }
 0x1cc   : > { %v4664_v18 = vadd.f32 %v4663_v16, %v4662_v12  ;;  %v4727_v19 = vpop.f32.mrb[9].mxu1  ;;  %v4665_v20 = vpop.f32.mrb[10].mxu0 }
 0x1cd   : > { %v4728_v23 = vadd.f32 %v4727_v19, %v4726_v15  ;;  %v4729_v24 = vpop.f32.mrb[10].mxu1  ;;  %v4666_v25 = vpop.f32.mrb[11].mxu0 }
 0x1ce   : > { %v4667_v27 = vadd.f32 %v4666_v25, %v4665_v20  ;;  %v4730_v28 = vpop.f32.mrb[11].mxu1 }
 0x1cf   : > { %v6437_v29 = vadd.f32 %v4728_v23, %v4664_v18  ;;  %v4731_v30 = vadd.f32 %v4730_v28, %v4729_v24  ;;  %3729 = vmatmul.mubr.bf16.gmra.mrb[116].mxu0 %v4386_v17 }
 0x1d0   : > { %3826 = vmatmul.mubr.bf16.gmra.mrb[116].mxu1 %v4388_v21  ;;  %3736 = vmatprep.mubr.bf16.mxu0 %v4403_v22 }
 0x1d1   : > { %v6439_v31 = vadd.f32 %v4731_v30, %v4667_v27  ;;  %3833 = vmatprep.mubr.bf16.mxu1 %v4405_v26 }
 0x1d2   : > { %v4668_v34 = vpop.f32.mrb[12].mxu0 }
 0x1d3   : > { %v4732_v37 = vpop.f32.mrb[12].mxu1  ;;  %v4669_v38 = vpop.f32.mrb[13].mxu0 }
 0x1d4   : > { %v4670_v40 = vadd.f32 %v4669_v38, %v4668_v34  ;;  %v4733_v41 = vpop.f32.mrb[13].mxu1  ;;  %v4671_v42 = vpop.f32.mrb[14].mxu0 }
 0x1d5   : > { %v4734_v45 = vadd.f32 %v4733_v41, %v4732_v37  ;;  %v4735_v46 = vpop.f32.mrb[14].mxu1  ;;  %v4672_v47 = vpop.f32.mrb[15].mxu0 }
 0x1d6   : > { %v4673_v50 = vadd.f32 %v4672_v47, %v4671_v42  ;;  %v4736_v52 = vpop.f32.mrb[15].mxu1 }
 0x1d7   : > { %v6453_v53 = vadd.f32 %v4734_v45, %v4670_v40  ;;  %v4737_v54 = vadd.f32 %v4736_v52, %v4735_v46  ;;  %3737 = vmatmul.mubr.bf16.gmra.mrb[120].mxu0 %v4402_v39 }
 0x1d8   : > { %3834 = vmatmul.mubr.bf16.gmra.mrb[120].mxu1 %v4404_v43  ;;  %3744 = vmatprep.mubr.bf16.mxu0 %v4419_v44 }
 0x1d9   : > { %v6455_v55 = vadd.f32 %v4737_v54, %v4673_v50  ;;  %3841 = vmatprep.mubr.bf16.mxu1 %v4421_v48 }
 0x1da   : > { %v4674_v56 = vpop.f32.mrb[16].mxu0 }
 0x1db   : > { %v4738_v57 = vpop.f32.mrb[16].mxu1  ;;  %v4675_v58 = vpop.f32.mrb[17].mxu0 }
 0x1dc   : > { %v4676_v60 = vadd.f32 %v4675_v58, %v4674_v56  ;;  %v4739_v61 = vpop.f32.mrb[17].mxu1  ;;  %v4677_v62 = vpop.f32.mrb[18].mxu0 }
 0x1dd   : > { %v4740_v0 = vadd.f32 %v4739_v61, %v4738_v57  ;;  %v4741_v1 = vpop.f32.mrb[18].mxu1  ;;  %v4678_v2 = vpop.f32.mrb[19].mxu0 }
 0x1de   : > { %v4679_v3 = vadd.f32 %v4678_v2, %v4677_v62  ;;  %v4742_v4 = vpop.f32.mrb[19].mxu1 }
 0x1df   : > { %v6457_v5 = vadd.f32 %v4740_v0, %v4676_v60  ;;  %v4743_v6 = vadd.f32 %v4742_v4, %v4741_v1  ;;  %3745 = vmatmul.mubr.bf16.gmra.mrb[124].mxu0 %v4418_v59 }
 0x1e0   : > { %3842 = vmatmul.mubr.bf16.gmra.mrb[124].mxu1 %v4420_v63 }
 0x1e1   : > { %v6459_v8 = vadd.f32 %v4743_v6, %v4679_v3 }
 0x1e2   : > { %v4680_v10 = vpop.f32.mrb[20].mxu0 }
 0x1e3   : > { %v4744_v11 = vpop.f32.mrb[20].mxu1  ;;  %v4681_v12 = vpop.f32.mrb[21].mxu0 }
 0x1e4   : > { %v4682_v13 = vadd.f32 %v4681_v12, %v4680_v10  ;;  %v4745_v14 = vpop.f32.mrb[21].mxu1  ;;  %v4683_v15 = vpop.f32.mrb[22].mxu0 }
 0x1e5   : > { %v4746_v16 = vadd.f32 %v4745_v14, %v4744_v11  ;;  %v4747_v17 = vpop.f32.mrb[22].mxu1  ;;  %v4684_v18 = vpop.f32.mrb[23].mxu0 }
 0x1e6   : > { %v4685_v19 = vadd.f32 %v4684_v18, %v4683_v15  ;;  %v4748_v20 = vpop.f32.mrb[23].mxu1 }
 0x1e7   : > { %v6461_v21 = vadd.f32 %v4746_v16, %v4682_v13  ;;  %v4749_v22 = vadd.f32 %v4748_v20, %v4747_v17 }
 0x1e9   : > { %v6463_v23 = vadd.f32 %v4749_v22, %v4685_v19 }
 0x1ea   : > { %v4686_v24 = vpop.f32.mrb[24].mxu0 }
 0x1eb   : > { %v4750_v25 = vpop.f32.mrb[24].mxu1  ;;  %v4687_v26 = vpop.f32.mrb[25].mxu0 }
 0x1ec   : > { %v4688_v27 = vadd.f32 %v4687_v26, %v4686_v24  ;;  %v4751_v28 = vpop.f32.mrb[25].mxu1  ;;  %v4689_v30 = vpop.f32.mrb[26].mxu0 }
 0x1ed   : > { %v4752_v32 = vadd.f32 %v4751_v28, %v4750_v25  ;;  %v4753_v33 = vpop.f32.mrb[26].mxu1  ;;  %v4690_v34 = vpop.f32.mrb[27].mxu0 }
 0x1ee   : > { %v4691_v35 = vadd.f32 %v4690_v34, %v4689_v30  ;;  %v4754_v36 = vpop.f32.mrb[27].mxu1 }
 0x1ef   : > { %v6465_v37 = vadd.f32 %v4752_v32, %v4688_v27  ;;  %v4755_v38 = vadd.f32 %v4754_v36, %v4753_v33 }
 0x1f1   : > { %v6467_v39 = vadd.f32 %v4755_v38, %v4691_v35 }
 0x1f2   : > { %v4692_v40 = vpop.f32.mrb[28].mxu0 }
 0x1f3   : > { %v4756_v41 = vpop.f32.mrb[28].mxu1  ;;  %v4693_v42 = vpop.f32.mrb[29].mxu0 }
 0x1f4   : > { %v4694_v43 = vadd.f32 %v4693_v42, %v4692_v40  ;;  %v4757_v44 = vpop.f32.mrb[29].mxu1  ;;  %v4695_v45 = vpop.f32.mrb[30].mxu0 }
 0x1f5   : > { %v4758_v46 = vadd.f32 %v4757_v44, %v4756_v41  ;;  %v4759_v47 = vpop.f32.mrb[30].mxu1  ;;  %v4696_v48 = vpop.f32.mrb[31].mxu0 }
 0x1f6   : > { %v4697_v50 = vadd.f32 %v4696_v48, %v4695_v45  ;;  %v4760_v52 = vpop.f32.mrb[31].mxu1 }
 0x1f7   : > { %v6469_v54 = vadd.f32 %v4758_v46, %v4694_v43  ;;  %v4761_v56 = vadd.f32 %v4760_v52, %v4759_v47 }
 0x1f9   : > { %v6471_v57 = vadd.f32 %v4761_v56, %v4697_v50 }
 0x1fa   : > { %v4778_v58 = vpop.f32.mrb[32].mxu0 }
 0x1fb   : > { %v4842_v59 = vpop.f32.mrb[32].mxu1  ;;  %v4779_v60 = vpop.f32.mrb[33].mxu0 }
 0x1fc   : > { %v4780_v61 = vadd.f32 %v4779_v60, %v4778_v58  ;;  %v4843_v62 = vpop.f32.mrb[33].mxu1  ;;  %v4781_v63 = vpop.f32.mrb[34].mxu0 }
 0x1fd   : > { %v4844_v0 = vadd.f32 %v4843_v62, %v4842_v59  ;;  %v4845_v1 = vpop.f32.mrb[34].mxu1  ;;  %v4782_v2 = vpop.f32.mrb[35].mxu0 }
 0x1fe   : > { %v3303_v3 = vadd.f32 %v4780_v61, %v6405_v49  ;;  %v4783_v4 = vadd.f32 %v4782_v2, %v4781_v63  ;;  %v4846_v6 = vpop.f32.mrb[35].mxu1 }
 0x1ff   : > { %v4847_v10 = vadd.f32 %v4846_v6, %v4845_v1 }
 0x200   : > { %v6474_v11 = vadd.f32 %v4844_v0, %v3303_v3  ;;  %v3306_v12 = vadd.f32 %v4783_v4, %v6407_v51 }
 0x202   : > { %v6477_v13 = vadd.f32 %v4847_v10, %v3306_v12  ;;  %v4784_v14 = vpop.f32.mrb[36].mxu0 }
 0x203   : > { %v4848_v15 = vpop.f32.mrb[36].mxu1  ;;  %v4785_v16 = vpop.f32.mrb[37].mxu0 }
 0x204   : > { %v4786_v17 = vadd.f32 %v4785_v16, %v4784_v14  ;;  %v4849_v18 = vpop.f32.mrb[37].mxu1  ;;  %v4787_v19 = vpop.f32.mrb[38].mxu0 }
 0x205   : > { %v4850_v20 = vadd.f32 %v4849_v18, %v4848_v15  ;;  %v4851_v22 = vpop.f32.mrb[38].mxu1  ;;  %v4788_v24 = vpop.f32.mrb[39].mxu0 }
 0x206   : > { %v3311_v49 = vadd.f32 %v4786_v17, %v6421_v7  ;;  %v4789_v25 = vadd.f32 %v4788_v24, %v4787_v19  ;;  %v4852_v26 = vpop.f32.mrb[39].mxu1 }
 0x207   : > { %v4853_v27 = vadd.f32 %v4852_v26, %v4851_v22 }
 0x208   : > { %v6480_v28 = vadd.f32 %v4850_v20, %v3311_v49  ;;  %v3314_v51 = vadd.f32 %v4789_v25, %v6423_v9 }
 0x20a   : > { %v6483_v30 = vadd.f32 %v4853_v27, %v3314_v51  ;;  %v4790_v32 = vpop.f32.mrb[40].mxu0 }
 0x20b   : > { %v4854_v33 = vpop.f32.mrb[40].mxu1  ;;  %v4791_v34 = vpop.f32.mrb[41].mxu0 }
 0x20c   : > { %v4792_v35 = vadd.f32 %v4791_v34, %v4790_v32  ;;  %v4855_v36 = vpop.f32.mrb[41].mxu1  ;;  %v4793_v38 = vpop.f32.mrb[42].mxu0 }
 0x20d   : > { %v4856_v40 = vadd.f32 %v4855_v36, %v4854_v33  ;;  %v4857_v41 = vpop.f32.mrb[42].mxu1  ;;  %v4794_v42 = vpop.f32.mrb[43].mxu0 }
 0x20e   : > { %v3319_v7 = vadd.f32 %v4792_v35, %v6437_v29  ;;  %v4795_v43 = vadd.f32 %v4794_v42, %v4793_v38  ;;  %v4858_v44 = vpop.f32.mrb[43].mxu1 }
 0x20f   : > { %v4859_v45 = vadd.f32 %v4858_v44, %v4857_v41 }
 0x210   : > { %v6486_v46 = vadd.f32 %v4856_v40, %v3319_v7  ;;  %v3322_v9 = vadd.f32 %v4795_v43, %v6439_v31 }
 0x212   : > { %v6489_v47 = vadd.f32 %v4859_v45, %v3322_v9  ;;  %v4796_v48 = vpop.f32.mrb[44].mxu0 }
 0x213   : > { %v4860_v50 = vpop.f32.mrb[44].mxu1  ;;  %v4797_v52 = vpop.f32.mrb[45].mxu0 }
 0x214   : > { %v4798_v56 = vadd.f32 %v4797_v52, %v4796_v48  ;;  %v4861_v58 = vpop.f32.mrb[45].mxu1  ;;  %v4799_v59 = vpop.f32.mrb[46].mxu0 }
 0x215   : > { %v4862_v60 = vadd.f32 %v4861_v58, %v4860_v50  ;;  %v4863_v61 = vpop.f32.mrb[46].mxu1  ;;  %v4800_v62 = vpop.f32.mrb[47].mxu0 }
 0x216   : > { %v3327_v29 = vadd.f32 %v4798_v56, %v6453_v53  ;;  %v4801_v63 = vadd.f32 %v4800_v62, %v4799_v59  ;;  %v4864_v0 = vpop.f32.mrb[47].mxu1 }
 0x217   : > { %v4865_v1 = vadd.f32 %v4864_v0, %v4863_v61 }
 0x218   : > { %v6492_v2 = vadd.f32 %v4862_v60, %v3327_v29  ;;  %v3330_v31 = vadd.f32 %v4801_v63, %v6455_v55 }
 0x21a   : > { %v6495_v3 = vadd.f32 %v4865_v1, %v3330_v31  ;;  %v4802_v4 = vpop.f32.mrb[48].mxu0 }
 0x21b   : > { %v4866_v6 = vpop.f32.mrb[48].mxu1  ;;  %v4803_v10 = vpop.f32.mrb[49].mxu0 }
 0x21c   : > { %v4804_v12 = vadd.f32 %v4803_v10, %v4802_v4  ;;  %v4867_v14 = vpop.f32.mrb[49].mxu1  ;;  %v4805_v15 = vpop.f32.mrb[50].mxu0 }
 0x21d   : > { %v4868_v16 = vadd.f32 %v4867_v14, %v4866_v6  ;;  %v4869_v17 = vpop.f32.mrb[50].mxu1  ;;  %v4806_v18 = vpop.f32.mrb[51].mxu0 }
 0x21e   : > { %v3335_v53 = vadd.f32 %v4804_v12, %v6457_v5  ;;  %v4807_v19 = vadd.f32 %v4806_v18, %v4805_v15  ;;  %v4870_v20 = vpop.f32.mrb[51].mxu1 }
 0x21f   : > { %v4871_v22 = vadd.f32 %v4870_v20, %v4869_v17 }
 0x220   : > { %v6498_v24 = vadd.f32 %v4868_v16, %v3335_v53  ;;  %v3338_v55 = vadd.f32 %v4807_v19, %v6459_v8 }
 0x222   : > { %v6501_v49 = vadd.f32 %v4871_v22, %v3338_v55  ;;  %v4808_v25 = vpop.f32.mrb[52].mxu0 }
 0x223   : > { %v4872_v26 = vpop.f32.mrb[52].mxu1  ;;  %v4809_v27 = vpop.f32.mrb[53].mxu0 }
 0x224   : > { %v4810_v51 = vadd.f32 %v4809_v27, %v4808_v25  ;;  %v4873_v32 = vpop.f32.mrb[53].mxu1  ;;  %v4811_v33 = vpop.f32.mrb[54].mxu0 }
 0x225   : > { %v4874_v34 = vadd.f32 %v4873_v32, %v4872_v26  ;;  %v4875_v35 = vpop.f32.mrb[54].mxu1  ;;  %v4812_v36 = vpop.f32.mrb[55].mxu0 }
 0x226   : > { %v3343_v5 = vadd.f32 %v4810_v51, %v6461_v21  ;;  %v4813_v38 = vadd.f32 %v4812_v36, %v4811_v33  ;;  %v4876_v40 = vpop.f32.mrb[55].mxu1 }
 0x227   : > { %v4877_v41 = vadd.f32 %v4876_v40, %v4875_v35 }
 0x228   : > { %v6504_v42 = vadd.f32 %v4874_v34, %v3343_v5  ;;  %v3346_v8 = vadd.f32 %v4813_v38, %v6463_v23 }
 0x22a   : > { %v6507_v7 = vadd.f32 %v4877_v41, %v3346_v8  ;;  %v4814_v43 = vpop.f32.mrb[56].mxu0 }
 0x22b   : > { %v4878_v44 = vpop.f32.mrb[56].mxu1  ;;  %v4815_v45 = vpop.f32.mrb[57].mxu0 }
 0x22c   : > { %v4816_v9 = vadd.f32 %v4815_v45, %v4814_v43  ;;  %v4879_v48 = vpop.f32.mrb[57].mxu1  ;;  %v4817_v50 = vpop.f32.mrb[58].mxu0 }
 0x22d   : > { %v4880_v52 = vadd.f32 %v4879_v48, %v4878_v44  ;;  %v4881_v56 = vpop.f32.mrb[58].mxu1  ;;  %v4818_v58 = vpop.f32.mrb[59].mxu0 }
 0x22e   : > { %v3351_v21 = vadd.f32 %v4816_v9, %v6465_v37  ;;  %v4819_v59 = vadd.f32 %v4818_v58, %v4817_v50  ;;  %v4882_v60 = vpop.f32.mrb[59].mxu1 }
 0x22f   : > { %v4883_v61 = vadd.f32 %v4882_v60, %v4881_v56 }
 0x230   : > { %v6510_v62 = vadd.f32 %v4880_v52, %v3351_v21  ;;  %v3354_v23 = vadd.f32 %v4819_v59, %v6467_v39 }
 0x232   : > { %v6513_v29 = vadd.f32 %v4883_v61, %v3354_v23  ;;  %v4820_v63 = vpop.f32.mrb[60].mxu0 }
 0x233   : > { %v4884_v0 = vpop.f32.mrb[60].mxu1  ;;  %v4821_v1 = vpop.f32.mrb[61].mxu0 }
 0x234   : > { %v4822_v31 = vadd.f32 %v4821_v1, %v4820_v63  ;;  %v4885_v4 = vpop.f32.mrb[61].mxu1  ;;  %v4823_v6 = vpop.f32.mrb[62].mxu0 }
 0x235   : > { %v4886_v10 = vadd.f32 %v4885_v4, %v4884_v0  ;;  %v4887_v12 = vpop.f32.mrb[62].mxu1  ;;  %v4824_v14 = vpop.f32.mrb[63].mxu0 }
 0x236   : > { %v3359_v37 = vadd.f32 %v4822_v31, %v6469_v54  ;;  %v4825_v15 = vadd.f32 %v4824_v14, %v4823_v6  ;;  %v4888_v16 = vpop.f32.mrb[63].mxu1 }
 0x237   : > { %v4889_v17 = vadd.f32 %v4888_v16, %v4887_v12 }
 0x238   : > { %v6516_v18 = vadd.f32 %v4886_v10, %v3359_v37  ;;  %v3362_v39 = vadd.f32 %v4825_v15, %v6471_v57 }
 0x23a   : > { %v6519_v53 = vadd.f32 %v4889_v17, %v3362_v39  ;;  %v4906_v19 = vpop.f32.mrb[64].mxu0 }
 0x23b   : > { %v4970_v20 = vpop.f32.mrb[64].mxu1  ;;  %v4907_v22 = vpop.f32.mrb[65].mxu0 }
 0x23c   : > { %v4908_v55 = vadd.f32 %v4907_v22, %v4906_v19  ;;  %v4971_v25 = vpop.f32.mrb[65].mxu1  ;;  %v4909_v26 = vpop.f32.mrb[66].mxu0 }
 0x23d   : > { %v4972_v27 = vadd.f32 %v4971_v25, %v4970_v20  ;;  %v4973_v51 = vpop.f32.mrb[66].mxu1  ;;  %v4910_v32 = vpop.f32.mrb[67].mxu0 }
 0x23e   : > { %v3497_v54 = vadd.f32 %v4908_v55, %v6474_v11  ;;  %v4911_v33 = vadd.f32 %v4910_v32, %v4909_v26  ;;  %v4974_v34 = vpop.f32.mrb[67].mxu1 }
 0x23f   : > { %v4975_v35 = vadd.f32 %v4974_v34, %v4973_v51 }
 0x240   : > { %v6522_v36 = vadd.f32 %v4972_v27, %v3497_v54  ;;  %v3500_v57 = vadd.f32 %v4911_v33, %v6477_v13 }
 0x242   : > { %v6525_v5 = vadd.f32 %v4975_v35, %v3500_v57  ;;  %v4912_v38 = vpop.f32.mrb[68].mxu0 }
 0x243   : > { %v4976_v40 = vpop.f32.mrb[68].mxu1  ;;  %v4913_v41 = vpop.f32.mrb[69].mxu0 }
 0x244   : > { %v4914_v8 = vadd.f32 %v4913_v41, %v4912_v38  ;;  %v4977_v43 = vpop.f32.mrb[69].mxu1  ;;  %v4915_v44 = vpop.f32.mrb[70].mxu0 }
 0x245   : > { %v4978_v45 = vadd.f32 %v4977_v43, %v4976_v40  ;;  %v4979_v9 = vpop.f32.mrb[70].mxu1  ;;  %v4916_v48 = vpop.f32.mrb[71].mxu0 }
 0x246   : > { %v3505_v11 = vadd.f32 %v4914_v8, %v6480_v28  ;;  %v4917_v50 = vadd.f32 %v4916_v48, %v4915_v44  ;;  %v4980_v52 = vpop.f32.mrb[71].mxu1 }
 0x247   : > { %v4981_v56 = vadd.f32 %v4980_v52, %v4979_v9 }
 0x248   : > { %v6528_v58 = vadd.f32 %v4978_v45, %v3505_v11  ;;  %v3508_v13 = vadd.f32 %v4917_v50, %v6483_v30 }
 0x24a   : > { %v6531_v21 = vadd.f32 %v4981_v56, %v3508_v13  ;;  %v4918_v59 = vpop.f32.mrb[72].mxu0 }
 0x24b   : > { %v4982_v60 = vpop.f32.mrb[72].mxu1  ;;  %v4919_v61 = vpop.f32.mrb[73].mxu0 }
 0x24c   : > { %v4920_v23 = vadd.f32 %v4919_v61, %v4918_v59  ;;  %v4983_v63 = vpop.f32.mrb[73].mxu1  ;;  %v4921_v0 = vpop.f32.mrb[74].mxu0 }
 0x24d   : > { %v4984_v1 = vadd.f32 %v4983_v63, %v4982_v60  ;;  %v4985_v31 = vpop.f32.mrb[74].mxu1  ;;  %v4922_v4 = vpop.f32.mrb[75].mxu0 }
 0x24e   : > { %v3513_v28 = vadd.f32 %v4920_v23, %v6486_v46  ;;  %v4923_v6 = vadd.f32 %v4922_v4, %v4921_v0  ;;  %v4986_v10 = vpop.f32.mrb[75].mxu1 }
 0x24f   : > { %v4987_v12 = vadd.f32 %v4986_v10, %v4985_v31 }
 0x250   : > { %v6534_v14 = vadd.f32 %v4984_v1, %v3513_v28  ;;  %v3516_v30 = vadd.f32 %v4923_v6, %v6489_v47 }
 0x252   : > { %v6537_v37 = vadd.f32 %v4987_v12, %v3516_v30  ;;  %v4924_v15 = vpop.f32.mrb[76].mxu0 }
 0x253   : > { %v4988_v16 = vpop.f32.mrb[76].mxu1  ;;  %v4925_v17 = vpop.f32.mrb[77].mxu0 }
 0x254   : > { %v4926_v39 = vadd.f32 %v4925_v17, %v4924_v15  ;;  %v4989_v19 = vpop.f32.mrb[77].mxu1  ;;  %v4927_v20 = vpop.f32.mrb[78].mxu0 }
 0x255   : > { %v4990_v22 = vadd.f32 %v4989_v19, %v4988_v16  ;;  %v4991_v55 = vpop.f32.mrb[78].mxu1  ;;  %v4928_v25 = vpop.f32.mrb[79].mxu0 }
 0x256   : > { %v3521_v46 = vadd.f32 %v4926_v39, %v6492_v2  ;;  %v4929_v26 = vadd.f32 %v4928_v25, %v4927_v20  ;;  %v4992_v27 = vpop.f32.mrb[79].mxu1 }
 0x257   : > { %v4993_v51 = vadd.f32 %v4992_v27, %v4991_v55 }
 0x258   : > { %v6540_v32 = vadd.f32 %v4990_v22, %v3521_v46  ;;  %v3524_v47 = vadd.f32 %v4929_v26, %v6495_v3 }
 0x25a   : > { %v6543_v54 = vadd.f32 %v4993_v51, %v3524_v47  ;;  %v4930_v33 = vpop.f32.mrb[80].mxu0 }
 0x25b   : > { %v4994_v34 = vpop.f32.mrb[80].mxu1  ;;  %v4931_v35 = vpop.f32.mrb[81].mxu0 }
 0x25c   : > { %v4932_v57 = vadd.f32 %v4931_v35, %v4930_v33  ;;  %v4995_v38 = vpop.f32.mrb[81].mxu1  ;;  %v4933_v40 = vpop.f32.mrb[82].mxu0 }
 0x25d   : > { %v4996_v41 = vadd.f32 %v4995_v38, %v4994_v34  ;;  %v4997_v8 = vpop.f32.mrb[82].mxu1  ;;  %v4934_v43 = vpop.f32.mrb[83].mxu0 }
 0x25e   : > { %v3529_v2 = vadd.f32 %v4932_v57, %v6498_v24  ;;  %v4935_v44 = vadd.f32 %v4934_v43, %v4933_v40  ;;  %v4998_v45 = vpop.f32.mrb[83].mxu1 }
 0x25f   : > { %v4999_v9 = vadd.f32 %v4998_v45, %v4997_v8 }
 0x260   : > { %v6546_v48 = vadd.f32 %v4996_v41, %v3529_v2  ;;  %v3532_v3 = vadd.f32 %v4935_v44, %v6501_v49 }
 0x262   : > { %v6549_v11 = vadd.f32 %v4999_v9, %v3532_v3  ;;  %v4936_v50 = vpop.f32.mrb[84].mxu0 }
 0x263   : > { %v5000_v52 = vpop.f32.mrb[84].mxu1  ;;  %v4937_v56 = vpop.f32.mrb[85].mxu0 }
 0x264   : > { %v4938_v13 = vadd.f32 %v4937_v56, %v4936_v50  ;;  %v5001_v59 = vpop.f32.mrb[85].mxu1  ;;  %v4939_v60 = vpop.f32.mrb[86].mxu0 }
 0x265   : > { %v5002_v61 = vadd.f32 %v5001_v59, %v5000_v52  ;;  %v5003_v23 = vpop.f32.mrb[86].mxu1  ;;  %v4940_v63 = vpop.f32.mrb[87].mxu0 }
 0x266   : > { %v3537_v24 = vadd.f32 %v4938_v13, %v6504_v42  ;;  %v4941_v0 = vadd.f32 %v4940_v63, %v4939_v60  ;;  %v5004_v1 = vpop.f32.mrb[87].mxu1 }
 0x267   : > { %v5005_v31 = vadd.f32 %v5004_v1, %v5003_v23 }
 0x268   : > { %v6552_v4 = vadd.f32 %v5002_v61, %v3537_v24  ;;  %v3540_v49 = vadd.f32 %v4941_v0, %v6507_v7 }
 0x26a   : > { %v6555_v28 = vadd.f32 %v5005_v31, %v3540_v49  ;;  %v4942_v6 = vpop.f32.mrb[88].mxu0 }
 0x26b   : > { %v5006_v10 = vpop.f32.mrb[88].mxu1  ;;  %v4943_v12 = vpop.f32.mrb[89].mxu0 }
 0x26c   : > { %v4944_v30 = vadd.f32 %v4943_v12, %v4942_v6  ;;  %v5007_v15 = vpop.f32.mrb[89].mxu1  ;;  %v4945_v16 = vpop.f32.mrb[90].mxu0 }
 0x26d   : > { %v5008_v17 = vadd.f32 %v5007_v15, %v5006_v10  ;;  %v5009_v39 = vpop.f32.mrb[90].mxu1  ;;  %v4946_v19 = vpop.f32.mrb[91].mxu0 }
 0x26e   : > { %v3545_v42 = vadd.f32 %v4944_v30, %v6510_v62  ;;  %v4947_v20 = vadd.f32 %v4946_v19, %v4945_v16  ;;  %v5010_v22 = vpop.f32.mrb[91].mxu1 }
 0x26f   : > { %v5011_v55 = vadd.f32 %v5010_v22, %v5009_v39 }
 0x270   : > { %v6558_v25 = vadd.f32 %v5008_v17, %v3545_v42  ;;  %v3548_v7 = vadd.f32 %v4947_v20, %v6513_v29 }
 0x272   : > { %v6561_v46 = vadd.f32 %v5011_v55, %v3548_v7  ;;  %v4948_v26 = vpop.f32.mrb[92].mxu0 }
 0x273   : > { %v5012_v27 = vpop.f32.mrb[92].mxu1  ;;  %v4949_v51 = vpop.f32.mrb[93].mxu0 }
 0x274   : > { %v4950_v47 = vadd.f32 %v4949_v51, %v4948_v26  ;;  %v5013_v33 = vpop.f32.mrb[93].mxu1  ;;  %v4951_v34 = vpop.f32.mrb[94].mxu0 }
 0x275   : > { %v5014_v35 = vadd.f32 %v5013_v33, %v5012_v27  ;;  %v5015_v57 = vpop.f32.mrb[94].mxu1  ;;  %v4952_v38 = vpop.f32.mrb[95].mxu0 }
 0x276   : > { %v3553_v62 = vadd.f32 %v4950_v47, %v6516_v18  ;;  %v4953_v40 = vadd.f32 %v4952_v38, %v4951_v34  ;;  %v5016_v41 = vpop.f32.mrb[95].mxu1 }
 0x277   : > { %v5017_v8 = vadd.f32 %v5016_v41, %v5015_v57 }
 0x278   : > { %v6564_v43 = vadd.f32 %v5014_v35, %v3553_v62  ;;  %v3556_v29 = vadd.f32 %v4953_v40, %v6519_v53 }
 0x27a   : > { %v6567_v2 = vadd.f32 %v5017_v8, %v3556_v29  ;;  %v5034_v44 = vpop.f32.mrb[96].mxu0 }
 0x27b   : > { %v5098_v45 = vpop.f32.mrb[96].mxu1  ;;  %v5035_v9 = vpop.f32.mrb[97].mxu0 }
 0x27c   : > { %v5036_v3 = vadd.f32 %v5035_v9, %v5034_v44  ;;  %v5099_v50 = vpop.f32.mrb[97].mxu1  ;;  %v5037_v52 = vpop.f32.mrb[98].mxu0 }
 0x27d   : > { %v5100_v56 = vadd.f32 %v5099_v50, %v5098_v45  ;;  %v5101_v13 = vpop.f32.mrb[98].mxu1  ;;  %v5038_v59 = vpop.f32.mrb[99].mxu0 }
 0x27e   : > { %v3691_v18 = vadd.f32 %v5036_v3, %v6522_v36  ;;  %v5039_v60 = vadd.f32 %v5038_v59, %v5037_v52  ;;  %v5102_v61 = vpop.f32.mrb[99].mxu1 }
 0x27f   : > { %v5103_v23 = vadd.f32 %v5102_v61, %v5101_v13 }
 0x280   : > { %v6570_v63 = vadd.f32 %v5100_v56, %v3691_v18  ;;  %v3694_v53 = vadd.f32 %v5039_v60, %v6525_v5 }
 0x282   : > { %v6573_v24 = vadd.f32 %v5103_v23, %v3694_v53  ;;  %v5040_v0 = vpop.f32.mrb[100].mxu0 }
 0x283   : > { %v5104_v1 = vpop.f32.mrb[100].mxu1  ;;  %v5041_v31 = vpop.f32.mrb[101].mxu0 }
 0x284   : > { %v3850_v49 = vadd.f32 %v6573_v24, %v6570_v63  ;;  %v5042_v6 = vadd.f32 %v5041_v31, %v5040_v0  ;;  %v5105_v10 = vpop.f32.mrb[101].mxu1  ;;  %v5043_v12 = vpop.f32.mrb[102].mxu0 }
 0x285   : > { %v5106_v30 = vadd.f32 %v5105_v10, %v5104_v1  ;;  %v5107_v36 = vpop.f32.mrb[102].mxu1  ;;  %v5044_v15 = vpop.f32.mrb[103].mxu0 }
 0x286   : > { %v3699_v16 = vadd.f32 %v5042_v6, %v6528_v58  ;;  %v5045_v17 = vadd.f32 %v5044_v15, %v5043_v12  ;;  %v5108_v39 = vpop.f32.mrb[103].mxu1 }
 0x287   : > { %v5109_v19 = vadd.f32 %v5108_v39, %v5107_v36 }
 0x288   : > { %v6578_v5 = vadd.f32 %v5106_v30, %v3699_v16  ;;  %v3702_v42 = vadd.f32 %v5045_v17, %v6531_v21 }
 0x28a   : > { %v3851_v20 = vadd.f32 %v3850_v49, %v6578_v5  ;;  %v6582_v22 = vadd.f32 %v5109_v19, %v3702_v42  ;;  %v5046_v55 = vpop.f32.mrb[104].mxu0 }
 0x28b   : > { %v5110_v7 = vpop.f32.mrb[104].mxu1  ;;  %v5047_v26 = vpop.f32.mrb[105].mxu0 }
 0x28c   : > { %v3852_v27 = vadd.f32 %v3851_v20, %v6582_v22  ;;  %v5048_v51 = vadd.f32 %v5047_v26, %v5046_v55  ;;  %v5111_v47 = vpop.f32.mrb[105].mxu1  ;;  %v5049_v33 = vpop.f32.mrb[106].mxu0 }
 0x28d   : > { %v5112_v58 = vadd.f32 %v5111_v47, %v5110_v7  ;;  %v5113_v34 = vpop.f32.mrb[106].mxu1  ;;  %v5050_v35 = vpop.f32.mrb[107].mxu0 }
 0x28e   : > { %v3707_v57 = vadd.f32 %v5048_v51, %v6534_v14  ;;  %v5051_v38 = vadd.f32 %v5050_v35, %v5049_v33  ;;  %v5114_v62 = vpop.f32.mrb[107].mxu1 }
 0x28f   : > { %v5115_v21 = vadd.f32 %v5114_v62, %v5113_v34 }
 0x290   : > { %v6586_v40 = vadd.f32 %v5112_v58, %v3707_v57  ;;  %v3710_v41 = vadd.f32 %v5051_v38, %v6537_v37 }
 0x292   : > { %v3853_v8 = vadd.f32 %v3852_v27, %v6586_v40  ;;  %v6590_v29 = vadd.f32 %v5115_v21, %v3710_v41  ;;  %v5052_v44 = vpop.f32.mrb[108].mxu0 }
 0x293   : > { %v5116_v45 = vpop.f32.mrb[108].mxu1  ;;  %v5053_v9 = vpop.f32.mrb[109].mxu0 }
 0x294   : > { %v3854_v3 = vadd.f32 %v3853_v8, %v6590_v29  ;;  %v5054_v50 = vadd.f32 %v5053_v9, %v5052_v44  ;;  %v5117_v52 = vpop.f32.mrb[109].mxu1  ;;  %v5055_v56 = vpop.f32.mrb[110].mxu0 }
 0x295   : > { %v5118_v14 = vadd.f32 %v5117_v52, %v5116_v45  ;;  %v5119_v13 = vpop.f32.mrb[110].mxu1  ;;  %v5056_v59 = vpop.f32.mrb[111].mxu0 }
 0x296   : > { %v3715_v18 = vadd.f32 %v5054_v50, %v6540_v32  ;;  %v5057_v60 = vadd.f32 %v5056_v59, %v5055_v56  ;;  %v5120_v61 = vpop.f32.mrb[111].mxu1 }
 0x297   : > { %v5121_v37 = vadd.f32 %v5120_v61, %v5119_v13 }
 0x298   : > { %v6594_v23 = vadd.f32 %v5118_v14, %v3715_v18  ;;  %v3718_v53 = vadd.f32 %v5057_v60, %v6543_v54 }
 0x29a   : > { %v3855_v0 = vadd.f32 %v3854_v3, %v6594_v23  ;;  %v6598_v1 = vadd.f32 %v5121_v37, %v3718_v53  ;;  %v5058_v31 = vpop.f32.mrb[112].mxu0 }
 0x29b   : > { %v5122_v49 = vpop.f32.mrb[112].mxu1  ;;  %v5059_v6 = vpop.f32.mrb[113].mxu0 }
 0x29c   : > { %v3856_v10 = vadd.f32 %v3855_v0, %v6598_v1  ;;  %v5060_v12 = vadd.f32 %v5059_v6, %v5058_v31  ;;  %v5123_v30 = vpop.f32.mrb[113].mxu1  ;;  %v5061_v36 = vpop.f32.mrb[114].mxu0 }
 0x29d   : > { %v5124_v32 = vadd.f32 %v5123_v30, %v5122_v49  ;;  %v5125_v15 = vpop.f32.mrb[114].mxu1  ;;  %v5062_v16 = vpop.f32.mrb[115].mxu0 }
 0x29e   : > { %v3723_v17 = vadd.f32 %v5060_v12, %v6546_v48  ;;  %v5063_v39 = vadd.f32 %v5062_v16, %v5061_v36  ;;  %v5126_v19 = vpop.f32.mrb[115].mxu1 }
 0x29f   : > { %v5127_v54 = vadd.f32 %v5126_v19, %v5125_v15 }
 0x2a0   : > { %v6602_v42 = vadd.f32 %v5124_v32, %v3723_v17  ;;  %v3726_v20 = vadd.f32 %v5063_v39, %v6549_v11 }
 0x2a2   : > { %v3857_v55 = vadd.f32 %v3856_v10, %v6602_v42  ;;  %v6606_v7 = vadd.f32 %v5127_v54, %v3726_v20  ;;  %v5064_v26 = vpop.f32.mrb[116].mxu0 }
 0x2a3   : > { %v5128_v27 = vpop.f32.mrb[116].mxu1  ;;  %v5065_v51 = vpop.f32.mrb[117].mxu0 }
 0x2a4   : > { %v3858_v47 = vadd.f32 %v3857_v55, %v6606_v7  ;;  %v5066_v33 = vadd.f32 %v5065_v51, %v5064_v26  ;;  %v5129_v58 = vpop.f32.mrb[117].mxu1  ;;  %v5067_v34 = vpop.f32.mrb[118].mxu0 }
 0x2a5   : > { %v5130_v48 = vadd.f32 %v5129_v58, %v5128_v27  ;;  %v5131_v35 = vpop.f32.mrb[118].mxu1  ;;  %v5068_v57 = vpop.f32.mrb[119].mxu0 }
 0x2a6   : > { %v3731_v38 = vadd.f32 %v5066_v33, %v6552_v4  ;;  %v5069_v62 = vadd.f32 %v5068_v57, %v5067_v34  ;;  %v5132_v21 = vpop.f32.mrb[119].mxu1 }
 0x2a7   : > { %v5133_v11 = vadd.f32 %v5132_v21, %v5131_v35 }
 0x2a8   : > { %v3828_v41 = vadd.f32 %v5130_v48, %v3731_v38  ;;  %v3734_v8 = vadd.f32 %v5069_v62, %v6555_v28 }
 0x2aa   : > { %v3859_v44 = vadd.f32 %v3858_v47, %v3828_v41  ;;  %v3831_v45 = vadd.f32 %v5133_v11, %v3734_v8  ;;  %v5070_v9 = vpop.f32.mrb[120].mxu0 }
 0x2ab   : > { %v5134_v3 = vpop.f32.mrb[120].mxu1  ;;  %v5071_v50 = vpop.f32.mrb[121].mxu0 }
 0x2ac   : > { %v3860_v52 = vadd.f32 %v3859_v44, %v3831_v45  ;;  %v5072_v56 = vadd.f32 %v5071_v50, %v5070_v9  ;;  %v5135_v14 = vpop.f32.mrb[121].mxu1  ;;  %v5073_v13 = vpop.f32.mrb[122].mxu0 }
 0x2ad   : > { %v5136_v59 = vadd.f32 %v5135_v14, %v5134_v3  ;;  %v5137_v18 = vpop.f32.mrb[122].mxu1  ;;  %v5074_v60 = vpop.f32.mrb[123].mxu0 }
 0x2ae   : > { %v3739_v4 = vadd.f32 %v5072_v56, %v6558_v25  ;;  %v5075_v61 = vadd.f32 %v5074_v60, %v5073_v13  ;;  %v5138_v37 = vpop.f32.mrb[123].mxu1 }
 0x2af   : > { %v5139_v53 = vadd.f32 %v5138_v37, %v5137_v18 }
 0x2b0   : > { %v3836_v0 = vadd.f32 %v5136_v59, %v3739_v4  ;;  %v3742_v28 = vadd.f32 %v5075_v61, %v6561_v46 }
 0x2b2   : > { %v3861_v31 = vadd.f32 %v3860_v52, %v3836_v0  ;;  %v3839_v49 = vadd.f32 %v5139_v53, %v3742_v28  ;;  %v5076_v6 = vpop.f32.mrb[124].mxu0 }
 0x2b3   : > { %v5140_v10 = vpop.f32.mrb[124].mxu1  ;;  %v5077_v12 = vpop.f32.mrb[125].mxu0 }
 0x2b4   : > { %v3862_v30 = vadd.f32 %v3861_v31, %v3839_v49  ;;  %v5078_v36 = vadd.f32 %v5077_v12, %v5076_v6  ;;  %v5141_v32 = vpop.f32.mrb[125].mxu1  ;;  %v5079_v15 = vpop.f32.mrb[126].mxu0 }
 0x2b5   : > { %v5142_v16 = vadd.f32 %v5141_v32, %v5140_v10  ;;  %v5143_v17 = vpop.f32.mrb[126].mxu1  ;;  %v5080_v39 = vpop.f32.mrb[127].mxu0 }
 0x2b6   : > { %v3747_v25 = vadd.f32 %v5078_v36, %v6564_v43  ;;  %v5081_v19 = vadd.f32 %v5080_v39, %v5079_v15  ;;  %v5144_v54 = vpop.f32.mrb[127].mxu1 }
 0x2b7   : > { %v5145_v20 = vadd.f32 %v5144_v54, %v5143_v17 }
 0x2b8   : > { %v3844_v55 = vadd.f32 %v5142_v16, %v3747_v25  ;;  %v3750_v46 = vadd.f32 %v5081_v19, %v6567_v2 }
 0x2ba   : > { %v3863_v26 = vadd.f32 %v3862_v30, %v3844_v55  ;;  %v3847_v27 = vadd.f32 %v5145_v20, %v3750_v46 }
 0x2bc   : > { %v3864_v51 = vadd.f32 %v3863_v26, %v3847_v27 }
 0x2be   : > { %v3865_v47 = vrot.slane %v3864_v51, 4 }
 0x2c0   : > { %v3866_v33 = vadd.f32 %v3865_v47, %v3864_v51  ;;  %v3926_v47 = vld [vmem:[%s1277_s9] sm:$0x1] }
 0x2c2   : > { %v3867_v58 = vrot.slane %v3866_v33, 2 }
 0x2c4   : > { %v3868_v34 = vadd.f32 %v3867_v58, %v3866_v33 }
 0x2c6   : > { %v3869_v48 = vrot.slane %v3868_v34, 1 }
 0x2c8   : > { %v3870_v35 = vadd.f32 %v3869_v48, %v3868_v34 }
 0x2ca   : > { %v3871_v57 = vmul.f32 0.0078125, %v3870_v35 }
 0x2cc   : > { %v6616_v38 = vsub.f32 %v6570_v63, %v3871_v57  ;;  %v6619_v43 = vsub.f32 %v6573_v24, %v3871_v57  ;;  %v6622_v62 = vsub.f32 %v6578_v5, %v3871_v57  ;;  %v6625_v2 = vsub.f32 %v6582_v22, %v3871_v57 }
 0x2cd   : > { %v6628_v21 = vsub.f32 %v6586_v40, %v3871_v57  ;;  %v6631_v11 = vsub.f32 %v6590_v29, %v3871_v57  ;;  %v6634_v8 = vsub.f32 %v6594_v23, %v3871_v57  ;;  %v6637_v63 = vsub.f32 %v6598_v1, %v3871_v57 }
 0x2ce   : > { %v6640_v24 = vsub.f32 %v6602_v42, %v3871_v57  ;;  %v6643_v5 = vsub.f32 %v6606_v7, %v3871_v57  ;;  %v6645_v22 = vsub.f32 %v3828_v41, %v3871_v57  ;;  %v6647_v44 = vsub.f32 %v3831_v45, %v3871_v57 }
 0x2cf   : > { %v6649_v40 = vsub.f32 %v3836_v0, %v3871_v57  ;;  %v6651_v29 = vsub.f32 %v3839_v49, %v3871_v57  ;;  %v6653_v9 = vsub.f32 %v3844_v55, %v3871_v57  ;;  %v6655_v23 = vsub.f32 %v3847_v27, %v3871_v57 }
 0x2d0   : > { %v3888_v1 = vmul.f32 %v6616_v38, %v6616_v38  ;;  %v3889_v42 = vmul.f32 %v6619_v43, %v6619_v43  ;;  %v3890_v7 = vmul.f32 %v6622_v62, %v6622_v62  ;;  %v3891_v45 = vmul.f32 %v6625_v2, %v6625_v2 }
 0x2d1   : > { %v3892_v50 = vmul.f32 %v6628_v21, %v6628_v21  ;;  %v3893_v56 = vmul.f32 %v6631_v11, %v6631_v11  ;;  %v3894_v13 = vmul.f32 %v6634_v8, %v6634_v8  ;;  %v3895_v18 = vmul.f32 %v6637_v63, %v6637_v63 }
 0x2d2   : > { %v3904_v41 = vadd.f32 %v3889_v42, %v3888_v1  ;;  %v3896_v4 = vmul.f32 %v6640_v24, %v6640_v24  ;;  %v3897_v37 = vmul.f32 %v6643_v5, %v6643_v5  ;;  %v3898_v0 = vmul.f32 %v6645_v22, %v6645_v22 }
 0x2d3   : > { %v3899_v31 = vmul.f32 %v6647_v44, %v6647_v44  ;;  %v3900_v6 = vmul.f32 %v6649_v40, %v6649_v40  ;;  %v3901_v12 = vmul.f32 %v6651_v29, %v6651_v29  ;;  %v3902_v36 = vmul.f32 %v6653_v9, %v6653_v9 }
 0x2d4   : > { %v3905_v3 = vadd.f32 %v3904_v41, %v3890_v7  ;;  %v3903_v15 = vmul.f32 %v6655_v23, %v6655_v23  ;;  %v3931_v27 = vlaneseq }
 0x2d6   : > { %v3906_v52 = vadd.f32 %v3905_v3, %v3891_v45  ;;  %v3932_v51 = vshrl.u32 %v3931_v27, 7 }
 0x2d8   : > { %v3907_v14 = vadd.f32 %v3906_v52, %v3892_v50  ;;  %v3933_v33 = vsub.s32 0, %v3932_v51  ;;  %v4550_v50 = vld [vmem:[%s1280_s12] ss:$0 sm:$0xff] }
 0x2da   : > { %v3908_v59 = vadd.f32 %v3907_v14, %v3893_v56 }
 0x2dc   : > { %v3909_v60 = vadd.f32 %v3908_v59, %v3894_v13 }
 0x2de   : > { %v3910_v61 = vadd.f32 %v3909_v60, %v3895_v18 }
 0x2e0   : > { %v3911_v53 = vadd.f32 %v3910_v61, %v3896_v4 }
 0x2e2   : > { %v3912_v28 = vadd.f32 %v3911_v53, %v3897_v37 }
 0x2e4   : > { %v3913_v49 = vadd.f32 %v3912_v28, %v3898_v0 }
 0x2e6   : > { %v3914_v10 = vadd.f32 %v3913_v49, %v3899_v31 }
 0x2e8   : > { %v3915_v30 = vadd.f32 %v3914_v10, %v3900_v6 }
 0x2ea   : > { %v3916_v32 = vadd.f32 %v3915_v30, %v3901_v12 }
 0x2ec   : > { %v3917_v16 = vadd.f32 %v3916_v32, %v3902_v36 }
 0x2ee   : > { %v3918_v17 = vadd.f32 %v3917_v16, %v3903_v15 }
 0x2f0   : > { %v3919_v39 = vrot.slane %v3918_v17, 4 }
 0x2f2   : > { %v3920_v25 = vadd.f32 %v3919_v39, %v3918_v17 }
 0x2f4   : > { %v3921_v19 = vrot.slane %v3920_v25, 2 }
 0x2f6   : > { %v3922_v54 = vadd.f32 %v3921_v19, %v3920_v25 }
 0x2f8   : > { %v3923_v20 = vrot.slane %v3922_v54, 1 }
 0x2fa   : > { %v3924_v55 = vadd.f32 %v3923_v20, %v3922_v54 }
 0x2fc   : > { %v3925_v46 = vmul.f32 0.0078125, %v3924_v55 }
 0x2fe   : > { %v3927_v26 = vadd.f32 1e-05, %v3925_v46 }
 0x300   : > { %5298 = vrsqrt.f32 %v3927_v26 }
 0x30a   : > { %v5299_v58 = vpop.eup %5298 }
 0x30b   : > { %v3929_v34 = vmul.f32 %v5299_v58, %v3926_v47 }
 0x30d   : > { %v3934_v48 = vrot.slane %v3929_v34, %v3933_v33 }
 0x30f   : > { %v3936_v35 = vmul.f32 %v3934_v48, %v6616_v38  ;;  %v3937_v57 = vmul.f32 %v3934_v48, %v6619_v43  ;;  %v3938_v1 = vmul.f32 %v3934_v48, %v6622_v62  ;;  %v3939_v42 = vmul.f32 %v3934_v48, %v6625_v2 }
 0x310   : > { %v3940_v7 = vmul.f32 %v3934_v48, %v6628_v21  ;;  %v3941_v41 = vmul.f32 %v3934_v48, %v6631_v11  ;;  %v3942_v45 = vmul.f32 %v3934_v48, %v6634_v8  ;;  %v3943_v3 = vmul.f32 %v3934_v48, %v6637_v63 }
 0x311   : > { %v3944_v52 = vmul.f32 %v3934_v48, %v6640_v24  ;;  %v3945_v56 = vmul.f32 %v3934_v48, %v6643_v5  ;;  %v3946_v38 = vmul.f32 %v3934_v48, %v6645_v22  ;;  %v3947_v43 = vmul.f32 %v3934_v48, %v6647_v44 }
 0x312   : > { %v3948_v62 = vmul.f32 %v3934_v48, %v6649_v40  ;;  %v3949_v2 = vmul.f32 %v3934_v48, %v6651_v29  ;;  %v3950_v21 = vmul.f32 %v3934_v48, %v6653_v9  ;;  %v3951_v11 = vmul.f32 %v3934_v48, %v6655_v23 }
 0x313   : > { %v3959_v8 = vadd.f32 %v4550_v50, %v3936_v35  ;;  %v3960_v14 = vadd.f32 %v4550_v50, %v3937_v57  ;;  %v3961_v63 = vadd.f32 %v4550_v50, %v3938_v1  ;;  %v3962_v13 = vadd.f32 %v4550_v50, %v3939_v42 }
 0x314   : > { %v3963_v59 = vadd.f32 %v4550_v50, %v3940_v7  ;;  %v3964_v24 = vadd.f32 %v4550_v50, %v3941_v41  ;;  %v3965_v18 = vadd.f32 %v4550_v50, %v3942_v45  ;;  %v3966_v5 = vadd.f32 %v4550_v50, %v3943_v3 }
 0x315   : > { %v3967_v60 = vadd.f32 %v4550_v50, %v3944_v52  ;;  %v3968_v22 = vadd.f32 %v4550_v50, %v3945_v56  ;;  %v3969_v4 = vadd.f32 %v4550_v50, %v3946_v38  ;;  %v3970_v44 = vadd.f32 %v4550_v50, %v3947_v43 }
 0x316   : > { %v3971_v61 = vadd.f32 %v4550_v50, %v3948_v62  ;;  %v3972_v40 = vadd.f32 %v4550_v50, %v3949_v2  ;;  %v3973_v29 = vadd.f32 %v4550_v50, %v3950_v21  ;;  %v3974_v37 = vadd.f32 %v4550_v50, %v3951_v11 }
 0x317   : > { %vm3975_vm0 = vcmp.gt.f32.partialorder %v3959_v8, 0.0  ;;  %vm3976_vm1 = vcmp.gt.f32.partialorder %v3960_v14, 0.0  ;;  %vm3977_vm2 = vcmp.gt.f32.partialorder %v3961_v63, 0.0  ;;  %vm3978_vm3 = vcmp.gt.f32.partialorder %v3962_v13, 0.0 }
 0x318   : > { %vm3979_vm4 = vcmp.gt.f32.partialorder %v3963_v59, 0.0  ;;  %vm3980_vm5 = vcmp.gt.f32.partialorder %v3964_v24, 0.0  ;;  %vm3981_vm6 = vcmp.gt.f32.partialorder %v3965_v18, 0.0  ;;  %vm3982_vm7 = vcmp.gt.f32.partialorder %v3966_v5, 0.0 }
 0x319   : > { %vm3983_vm8 = vcmp.gt.f32.partialorder %v3967_v60, 0.0  ;;  %vm3984_vm9 = vcmp.gt.f32.partialorder %v3968_v22, 0.0  ;;  %vm3985_vm10 = vcmp.gt.f32.partialorder %v3969_v4, 0.0  ;;  %vm3986_vm11 = vcmp.gt.f32.partialorder %v3970_v44, 0.0 }
 0x31a   : > { %vm3987_vm12 = vcmp.gt.f32.partialorder %v3971_v61, 0.0  ;;  %vm3988_vm13 = vcmp.gt.f32.partialorder %v3972_v40, 0.0  ;;  %vm3989_vm14 = vcmp.gt.f32.partialorder %v3973_v29, 0.0  ;;  %vm3990_vm15 = vcmp.gt.f32.partialorder %v3974_v37, 0.0 }
 0x31b   : > { %v3991_v9 = vmul.f32 0.2, %v3959_v8  ;;  %v3992_v23 = vmul.f32 0.2, %v3960_v14  ;;  %v3993_v53 = vmul.f32 0.2, %v3961_v63 }
 0x31c   : > { %v3994_v0 = vmul.f32 0.2, %v3962_v13  ;;  %v3995_v28 = vmul.f32 0.2, %v3963_v59  ;;  %v3996_v31 = vmul.f32 0.2, %v3964_v24 }
 0x31d   : > { %v3997_v49 = vmul.f32 0.2, %v3965_v18  ;;  %v3998_v6 = vmul.f32 0.2, %v3966_v5  ;;  %v3999_v10 = vmul.f32 0.2, %v3967_v60  ;;  %v4007_v12 = vsel %vm3975_vm0, %v3959_v8, %v3991_v9 }
 0x31e   : > { %v4000_v30 = vmul.f32 0.2, %v3968_v22  ;;  %v4001_v36 = vmul.f32 0.2, %v3969_v4  ;;  %v4002_v32 = vmul.f32 0.2, %v3970_v44  ;;  %v4008_v15 = vsel %vm3976_vm1, %v3960_v14, %v3992_v23 }
 0x31f   : > { %v4003_v16 = vmul.f32 0.2, %v3971_v61  ;;  %v4004_v17 = vmul.f32 0.2, %v3972_v40  ;;  %v4005_v39 = vmul.f32 0.2, %v3973_v29  ;;  %v4009_v25 = vsel %vm3977_vm2, %v3961_v63, %v3993_v53 }
 0x320   : > { %v4006_v19 = vmul.f32 0.2, %v3974_v37  ;;  %v4010_v54 = vsel %vm3978_vm3, %v3962_v13, %v3994_v0  ;;  %v4011_v20 = vsel %vm3979_vm4, %v3963_v59, %v3995_v28  ;;  %v4012_v55 = vsel %vm3980_vm5, %v3964_v24, %v3996_v31 }
 0x321   : > { %v4013_v46 = vsel %vm3981_vm6, %v3965_v18, %v3997_v49  ;;  %v4014_v26 = vsel %vm3982_vm7, %v3966_v5, %v3998_v6  ;;  %v4015_v27 = vsel %vm3983_vm8, %v3967_v60, %v3999_v10  ;;  %v4016_v51 = vsel %vm3984_vm9, %v3968_v22, %v4000_v30 }
 0x322   : > { %v4017_v47 = vsel %vm3985_vm10, %v3969_v4, %v4001_v36  ;;  %v4018_v33 = vsel %vm3986_vm11, %v3970_v44, %v4002_v32  ;;  %v4019_v58 = vsel %vm3987_vm12, %v3971_v61, %v4003_v16  ;;  %v4020_v34 = vsel %vm3988_vm13, %v3972_v40, %v4004_v17  ;;  %4109 = sbr.rel (!%p5380_p5) target bundleno = 823 (0x337), region = 81 }
 0x323   : > { %v4021_v48 = vsel %vm3989_vm14, %v3973_v29, %v4005_v39  ;;  %v4022_v35 = vsel %vm3990_vm15, %v3974_v37, %v4006_v19  ;;  %v4590_v57 = vpack.c.bf16 %v4008_v15, %v4007_v12  ;;  %v4595_v1 = vpack.c.bf16 %v4010_v54, %v4009_v25 }
 0x324   : > { %v4600_v42 = vpack.c.bf16 %v4012_v55, %v4011_v20  ;;  %v4605_v7 = vpack.c.bf16 %v4014_v26, %v4013_v46  ;;  %v4610_v41 = vpack.c.bf16 %v4016_v51, %v4015_v27  ;;  %v4615_v45 = vpack.c.bf16 %v4018_v33, %v4017_v47 }
 0x325   : > { %4591 = vst [vmem:[%s6734_s15] sm:$0xff] %v4590_v57   ;;  %4627 = vst [vmem:[%s6734_s15 + $0x8] sm:$0xff] %v4595_v1   ;;  %v4620_v3 = vpack.c.bf16 %v4020_v34, %v4019_v58  ;;  %v4625_v50 = vpack.c.bf16 %v4022_v35, %v4021_v48 }
 0x326   : > { %4628 = vst [vmem:[%s6734_s15 + $0x10] sm:$0xff] %v4600_v42   ;;  %4629 = vst [vmem:[%s6734_s15 + $0x18] sm:$0xff] %v4605_v7  }
 0x327   : > { %4630 = vst [vmem:[%s6734_s15 + $0x20] sm:$0xff] %v4610_v41   ;;  %4631 = vst [vmem:[%s6734_s15 + $0x28] sm:$0xff] %v4615_v45  }
 0x328   : > { %4632 = vst [vmem:[%s6734_s15 + $0x30] sm:$0xff] %v4620_v3   ;;  %4633 = vst [vmem:[%s6734_s15 + $0x38] sm:$0xff] %v4625_v50  }
 0x32c   : > { %v4127_v52 = vld [vmem:[%s6734_s15] sm:$0xf]  ;;  %v4129_v56 = vld [vmem:[%s6734_s15 + $0x4] sm:$0xf]  ;;  %v4131_v38 = vld [vmem:[%s6734_s15 + $0x8] sm:$0xf] }
 0x32d   : > { %v4133_v43 = vld [vmem:[%s6734_s15 + $0xc] sm:$0xf]  ;;  %v4135_v62 = vld [vmem:[%s6734_s15 + $0x10] sm:$0xf]  ;;  %4128 = vst [vmem:[%s4111_s21] sm:$0xf] %v4127_v52 }
 0x32e   : > { %4130 = vst [vmem:[%s4111_s21 + $0x8] sm:$0xf] %v4129_v56  ;;  %4132 = vst [vmem:[%s4111_s21 + $0x10] sm:$0xf] %v4131_v38  ;;  %v4137_v2 = vld [vmem:[%s6734_s15 + $0x14] sm:$0xf] }
 0x32f   : > { %4134 = vst [vmem:[%s4111_s21 + $0x18] sm:$0xf] %v4133_v43  ;;  %4136 = vst [vmem:[%s4111_s21 + $0x20] sm:$0xf] %v4135_v62  ;;  %v4139_v21 = vld [vmem:[%s6734_s15 + $0x18] sm:$0xf] }
 0x330   : > { %v4141_v11 = vld [vmem:[%s6734_s15 + $0x1c] sm:$0xf]  ;;  %4138 = vst [vmem:[%s4111_s21 + $0x28] sm:$0xf] %v4137_v2  ;;  %4140 = vst [vmem:[%s4111_s21 + $0x30] sm:$0xf] %v4139_v21 }
 0x331   : > { %4142 = vst [vmem:[%s4111_s21 + $0x38] sm:$0xf] %v4141_v11  ;;  %v4143_v8 = vld [vmem:[%s6734_s15 + $0x20] sm:$0xf]  ;;  %v4145_v14 = vld [vmem:[%s6734_s15 + $0x24] sm:$0xf] }
 0x332   : > { %v4147_v63 = vld [vmem:[%s6734_s15 + $0x28] sm:$0xf]  ;;  %4144 = vst [vmem:[%s4111_s21 + $0x40] sm:$0xf] %v4143_v8  ;;  %4146 = vst [vmem:[%s4111_s21 + $0x48] sm:$0xf] %v4145_v14 }
 0x333   : > { %4148 = vst [vmem:[%s4111_s21 + $0x50] sm:$0xf] %v4147_v63  ;;  %v4149_v13 = vld [vmem:[%s6734_s15 + $0x2c] sm:$0xf]  ;;  %v4151_v59 = vld [vmem:[%s6734_s15 + $0x30] sm:$0xf] }
 0x334   : > { %v4153_v24 = vld [vmem:[%s6734_s15 + $0x34] sm:$0xf]  ;;  %4150 = vst [vmem:[%s4111_s21 + $0x58] sm:$0xf] %v4149_v13  ;;  %4152 = vst [vmem:[%s4111_s21 + $0x60] sm:$0xf] %v4151_v59 }
 0x335   : > { %4154 = vst [vmem:[%s4111_s21 + $0x68] sm:$0xf] %v4153_v24  ;;  %v4155_v18 = vld [vmem:[%s6734_s15 + $0x38] sm:$0xf]  ;;  %v4157_v5 = vld [vmem:[%s6734_s15 + $0x3c] sm:$0xf] }
 0x336   : > { %4156 = vst [vmem:[%s4111_s21 + $0x70] sm:$0xf] %v4155_v18  ;;  %4158 = vst [vmem:[%s4111_s21 + $0x78] sm:$0xf] %v4157_v5 }
 0x337 PF: > { %p11_p11 = scmp.ge.s32.totalorder %s5368_s19, 4   ;;  %s6782_s15 = smov %s5318_s16 }
 0x338   : > { %s6783_s16 = smov %s5378_s22  ;;  %s6784_s17 = smov %s5368_s19 }
 0x339   :  { %13 = sbr.rel (!%p11_p11) target bundleno = 2 (0x2), region = 159 }

// kernel: discriminator_forward.7
= control target key start
LH: loop header
LB: loop body
LE: loop exit
PB: predicated region body
PF: predicated region fallthrough
CT: control target
= control target key end

     0   :  { %s10672_s0 = inlined_call_operand.vmem [shape: bf16[32,4096], index: 0, kind: input, shape index: {}]   ;;  %s10673_s1 = inlined_call_operand.vmem [shape: bf16[4096,512], index: 1, kind: input, shape index: {}]   ;;  %s10674_s2 = inlined_call_operand.vmem [shape: f32[1,512], index: 2, kind: input, shape index: {}]   ;;  %s10675_s3 = inlined_call_operand.vmem [shape: f32[1,512], index: 3, kind: input, shape index: {}]   ;;  %s10676_s4 = inlined_call_operand.vmem [shape: f32[32,512], index: 4, kind: input, shape index: {}]   ;;  %s10677_s5 = inlined_call_operand.<no memory space> [shape: f32[1,1], index: 5, kind: input, shape index: {}]   ;;  %s10678_s6 = inlined_call_operand.vmem [shape: f32[2,1], index: 6, kind: output, shape index: {}]  }
   0x1   :  { %v11_v0 = vstv %s10677_s5 }
   0x2   :  { %12 = vst [vmem:[#allocation3] sm:$0x1] %v11_v0 }
   0x3   :  { %s9076_s23 = smov 0   ;;  %s9078_s24 = smov 0  }
   0x4   :  { %s9080_s25 = smov 0  }
   0x5 LB: > { %s9092_s5 = sadd.s32 4294967295, %s9035_s25   ;;  %s9095_s26 = sadd.s32 1, %s9035_s25   ;;  %s9035_s25 = sphi %s9080_s25, %s10682_s25   ;;  %s9031_s24 = sphi %s9078_s24, %s10681_s24   ;;  %s9027_s23 = sphi %s9076_s23, %s10680_s23  }
   0x6   : > { %s43_s27 = ssub.s32 %s9035_s25, %s9095_s26  ;;  %s46_s28 = sadd.s32 1, %s9031_s24 }
   0x7   : > { %p44_p0 = scmp.eq.s32.totalorder %s43_s27, 0  ;;  %p53_p1 = scmp.ne.s32.totalorder %s9031_s24, %s9027_s23 }
   0x8   : > { %p54_p2 = scmp.eq.s32.totalorder %s9035_s25, 0  ;;  %p7941_p4 = scmp.ge.s32.totalorder %s9035_s25, 4 }
   0x9   : > { %s9104_s29 = scalar_select %p44_p0, %s9031_s24, %s46_s28  }
   0xa   : > { %p9106_p3 = por %p54_p2, %p53_p1  ;;  %205 = sbr.rel (%p7941_p4) target bundleno = 370 (0x172), region = 24 }
  0x11   : > { %208 = sbr.rel (!%p9106_p3) target bundleno = 362 (0x16a), region = 28  ;;  %s210_s7 = sand.u32 (%p9106_p3), 1, %s9031_s24  }
  0x12   : > { %s7943_s8 = sshll.u32 (%p9106_p3), %s9035_s25, 2  ;;  %s7942_s9 = sshll.u32 (%p9106_p3), %s210_s7, 11 }
  0x13   : > { %s9118_s12 = scalar_lea.vmem (%p9106_p3), %s10673_s1, %s7943_s8  ;;  %s9122_s13 = scalar_lea.vmem (%p9106_p3), [#allocation4], %s7942_s9 }
  0x14   : > { %v230_v1 = vld [vmem:[%s9118_s12] sm:$0xf] (%p9106_p3)  ;;  %v232_v2 = vld [vmem:[%s9118_s12 + $0x10] sm:$0xf] (%p9106_p3) }
  0x15   : > { %231 = vst [vmem:[%s9122_s13] sm:$0xf] (%p9106_p3), %v230_v1  ;;  %233 = vst [vmem:[%s9122_s13 + $0x4] sm:$0xf] (%p9106_p3), %v232_v2  ;;  %v234_v3 = vld [vmem:[%s9118_s12 + $0x20] sm:$0xf] (%p9106_p3) }
  0x16   : > { %v236_v4 = vld [vmem:[%s9118_s12 + $0x30] sm:$0xf] (%p9106_p3)  ;;  %v238_v5 = vld [vmem:[%s9118_s12 + $0x40] sm:$0xf] (%p9106_p3)  ;;  %235 = vst [vmem:[%s9122_s13 + $0x8] sm:$0xf] (%p9106_p3), %v234_v3 }
  0x17   : > { %237 = vst [vmem:[%s9122_s13 + $0xc] sm:$0xf] (%p9106_p3), %v236_v4  ;;  %239 = vst [vmem:[%s9122_s13 + $0x10] sm:$0xf] (%p9106_p3), %v238_v5  ;;  %v240_v6 = vld [vmem:[%s9118_s12 + $0x50] sm:$0xf] (%p9106_p3) }
  0x18   : > { %v242_v7 = vld [vmem:[%s9118_s12 + $0x60] sm:$0xf]  ;;  %v244_v8 = vld [vmem:[%s9118_s12 + $0x70] sm:$0xf]  ;;  %241 = vst [vmem:[%s9122_s13 + $0x14] sm:$0xf] %v240_v6 }
  0x19   : > { %243 = vst [vmem:[%s9122_s13 + $0x18] sm:$0xf] %v242_v7  ;;  %245 = vst [vmem:[%s9122_s13 + $0x1c] sm:$0xf] %v244_v8  ;;  %v246_v9 = vld [vmem:[%s9118_s12 + $0x80] sm:$0xf] }
  0x1a   : > { %v248_v10 = vld [vmem:[%s9118_s12 + $0x90] sm:$0xf]  ;;  %v250_v11 = vld [vmem:[%s9118_s12 + $0xa0] sm:$0xf]  ;;  %247 = vst [vmem:[%s9122_s13 + $0x20] sm:$0xf] %v246_v9 }
  0x1b   : > { %249 = vst [vmem:[%s9122_s13 + $0x24] sm:$0xf] %v248_v10  ;;  %251 = vst [vmem:[%s9122_s13 + $0x28] sm:$0xf] %v250_v11  ;;  %v252_v12 = vld [vmem:[%s9118_s12 + $0xb0] sm:$0xf] }
  0x1c   : > { %v254_v13 = vld [vmem:[%s9118_s12 + $0xc0] sm:$0xf]  ;;  %v256_v14 = vld [vmem:[%s9118_s12 + $0xd0] sm:$0xf]  ;;  %253 = vst [vmem:[%s9122_s13 + $0x2c] sm:$0xf] %v252_v12 }
  0x1d   : > { %255 = vst [vmem:[%s9122_s13 + $0x30] sm:$0xf] %v254_v13  ;;  %257 = vst [vmem:[%s9122_s13 + $0x34] sm:$0xf] %v256_v14  ;;  %v258_v15 = vld [vmem:[%s9118_s12 + $0xe0] sm:$0xf] }
  0x1e   : > { %v260_v16 = vld [vmem:[%s9118_s12 + $0xf0] sm:$0xf]  ;;  %v262_v17 = vld [vmem:[%s9118_s12 + $0x100] sm:$0xf]  ;;  %259 = vst [vmem:[%s9122_s13 + $0x38] sm:$0xf] %v258_v15 }
  0x1f   : > { %261 = vst [vmem:[%s9122_s13 + $0x3c] sm:$0xf] %v260_v16  ;;  %263 = vst [vmem:[%s9122_s13 + $0x40] sm:$0xf] %v262_v17  ;;  %v264_v18 = vld [vmem:[%s9118_s12 + $0x110] sm:$0xf] }
  0x20   : > { %v266_v19 = vld [vmem:[%s9118_s12 + $0x120] sm:$0xf]  ;;  %v268_v20 = vld [vmem:[%s9118_s12 + $0x130] sm:$0xf]  ;;  %265 = vst [vmem:[%s9122_s13 + $0x44] sm:$0xf] %v264_v18 }
  0x21   : > { %267 = vst [vmem:[%s9122_s13 + $0x48] sm:$0xf] %v266_v19  ;;  %269 = vst [vmem:[%s9122_s13 + $0x4c] sm:$0xf] %v268_v20  ;;  %v270_v21 = vld [vmem:[%s9118_s12 + $0x140] sm:$0xf] }
  0x22   : > { %v272_v22 = vld [vmem:[%s9118_s12 + $0x150] sm:$0xf]  ;;  %v274_v23 = vld [vmem:[%s9118_s12 + $0x160] sm:$0xf]  ;;  %271 = vst [vmem:[%s9122_s13 + $0x50] sm:$0xf] %v270_v21 }
  0x23   : > { %273 = vst [vmem:[%s9122_s13 + $0x54] sm:$0xf] %v272_v22  ;;  %275 = vst [vmem:[%s9122_s13 + $0x58] sm:$0xf] %v274_v23  ;;  %v276_v24 = vld [vmem:[%s9118_s12 + $0x170] sm:$0xf] }
  0x24   : > { %v278_v25 = vld [vmem:[%s9118_s12 + $0x180] sm:$0xf]  ;;  %v280_v26 = vld [vmem:[%s9118_s12 + $0x190] sm:$0xf]  ;;  %277 = vst [vmem:[%s9122_s13 + $0x5c] sm:$0xf] %v276_v24 }
  0x25   : > { %279 = vst [vmem:[%s9122_s13 + $0x60] sm:$0xf] %v278_v25  ;;  %281 = vst [vmem:[%s9122_s13 + $0x64] sm:$0xf] %v280_v26  ;;  %v282_v27 = vld [vmem:[%s9118_s12 + $0x1a0] sm:$0xf] }
  0x26   : > { %v284_v28 = vld [vmem:[%s9118_s12 + $0x1b0] sm:$0xf]  ;;  %v286_v29 = vld [vmem:[%s9118_s12 + $0x1c0] sm:$0xf]  ;;  %283 = vst [vmem:[%s9122_s13 + $0x68] sm:$0xf] %v282_v27 }
  0x27   : > { %285 = vst [vmem:[%s9122_s13 + $0x6c] sm:$0xf] %v284_v28  ;;  %287 = vst [vmem:[%s9122_s13 + $0x70] sm:$0xf] %v286_v29  ;;  %v288_v30 = vld [vmem:[%s9118_s12 + $0x1d0] sm:$0xf] }
  0x28   : > { %v290_v31 = vld [vmem:[%s9118_s12 + $0x1e0] sm:$0xf]  ;;  %v292_v32 = vld [vmem:[%s9118_s12 + $0x1f0] sm:$0xf]  ;;  %289 = vst [vmem:[%s9122_s13 + $0x74] sm:$0xf] %v288_v30 }
  0x29   : > { %291 = vst [vmem:[%s9122_s13 + $0x78] sm:$0xf] %v290_v31  ;;  %293 = vst [vmem:[%s9122_s13 + $0x7c] sm:$0xf] %v292_v32  ;;  %v294_v33 = vld [vmem:[%s9118_s12 + $0x200] sm:$0xf] }
  0x2a   : > { %v296_v34 = vld [vmem:[%s9118_s12 + $0x210] sm:$0xf]  ;;  %v298_v35 = vld [vmem:[%s9118_s12 + $0x220] sm:$0xf]  ;;  %295 = vst [vmem:[%s9122_s13 + $0x80] sm:$0xf] %v294_v33 }
  0x2b   : > { %297 = vst [vmem:[%s9122_s13 + $0x84] sm:$0xf] %v296_v34  ;;  %299 = vst [vmem:[%s9122_s13 + $0x88] sm:$0xf] %v298_v35  ;;  %v300_v36 = vld [vmem:[%s9118_s12 + $0x230] sm:$0xf] }
  0x2c   : > { %v302_v37 = vld [vmem:[%s9118_s12 + $0x240] sm:$0xf]  ;;  %v304_v38 = vld [vmem:[%s9118_s12 + $0x250] sm:$0xf]  ;;  %301 = vst [vmem:[%s9122_s13 + $0x8c] sm:$0xf] %v300_v36 }
  0x2d   : > { %303 = vst [vmem:[%s9122_s13 + $0x90] sm:$0xf] %v302_v37  ;;  %305 = vst [vmem:[%s9122_s13 + $0x94] sm:$0xf] %v304_v38  ;;  %v306_v39 = vld [vmem:[%s9118_s12 + $0x260] sm:$0xf] }
  0x2e   : > { %v308_v40 = vld [vmem:[%s9118_s12 + $0x270] sm:$0xf]  ;;  %v310_v41 = vld [vmem:[%s9118_s12 + $0x280] sm:$0xf]  ;;  %307 = vst [vmem:[%s9122_s13 + $0x98] sm:$0xf] %v306_v39 }
  0x2f   : > { %309 = vst [vmem:[%s9122_s13 + $0x9c] sm:$0xf] %v308_v40  ;;  %311 = vst [vmem:[%s9122_s13 + $0xa0] sm:$0xf] %v310_v41  ;;  %v312_v42 = vld [vmem:[%s9118_s12 + $0x290] sm:$0xf] }
  0x30   : > { %v314_v43 = vld [vmem:[%s9118_s12 + $0x2a0] sm:$0xf]  ;;  %v316_v44 = vld [vmem:[%s9118_s12 + $0x2b0] sm:$0xf]  ;;  %313 = vst [vmem:[%s9122_s13 + $0xa4] sm:$0xf] %v312_v42 }
  0x31   : > { %315 = vst [vmem:[%s9122_s13 + $0xa8] sm:$0xf] %v314_v43  ;;  %317 = vst [vmem:[%s9122_s13 + $0xac] sm:$0xf] %v316_v44  ;;  %v318_v45 = vld [vmem:[%s9118_s12 + $0x2c0] sm:$0xf] }
  0x32   : > { %v320_v46 = vld [vmem:[%s9118_s12 + $0x2d0] sm:$0xf]  ;;  %v322_v47 = vld [vmem:[%s9118_s12 + $0x2e0] sm:$0xf]  ;;  %319 = vst [vmem:[%s9122_s13 + $0xb0] sm:$0xf] %v318_v45 }
  0x33   : > { %321 = vst [vmem:[%s9122_s13 + $0xb4] sm:$0xf] %v320_v46  ;;  %323 = vst [vmem:[%s9122_s13 + $0xb8] sm:$0xf] %v322_v47  ;;  %v324_v48 = vld [vmem:[%s9118_s12 + $0x2f0] sm:$0xf] }
  0x34   : > { %v326_v49 = vld [vmem:[%s9118_s12 + $0x300] sm:$0xf]  ;;  %v328_v50 = vld [vmem:[%s9118_s12 + $0x310] sm:$0xf]  ;;  %325 = vst [vmem:[%s9122_s13 + $0xbc] sm:$0xf] %v324_v48 }
  0x35   : > { %327 = vst [vmem:[%s9122_s13 + $0xc0] sm:$0xf] %v326_v49  ;;  %329 = vst [vmem:[%s9122_s13 + $0xc4] sm:$0xf] %v328_v50  ;;  %v330_v51 = vld [vmem:[%s9118_s12 + $0x320] sm:$0xf] }
  0x36   : > { %v332_v52 = vld [vmem:[%s9118_s12 + $0x330] sm:$0xf]  ;;  %v334_v53 = vld [vmem:[%s9118_s12 + $0x340] sm:$0xf]  ;;  %331 = vst [vmem:[%s9122_s13 + $0xc8] sm:$0xf] %v330_v51 }
  0x37   : > { %333 = vst [vmem:[%s9122_s13 + $0xcc] sm:$0xf] %v332_v52  ;;  %335 = vst [vmem:[%s9122_s13 + $0xd0] sm:$0xf] %v334_v53  ;;  %v336_v54 = vld [vmem:[%s9118_s12 + $0x350] sm:$0xf] }
  0x38   : > { %v338_v55 = vld [vmem:[%s9118_s12 + $0x360] sm:$0xf]  ;;  %v340_v56 = vld [vmem:[%s9118_s12 + $0x370] sm:$0xf]  ;;  %337 = vst [vmem:[%s9122_s13 + $0xd4] sm:$0xf] %v336_v54 }
  0x39   : > { %339 = vst [vmem:[%s9122_s13 + $0xd8] sm:$0xf] %v338_v55  ;;  %341 = vst [vmem:[%s9122_s13 + $0xdc] sm:$0xf] %v340_v56  ;;  %v342_v57 = vld [vmem:[%s9118_s12 + $0x380] sm:$0xf] }
  0x3a   : > { %v344_v58 = vld [vmem:[%s9118_s12 + $0x390] sm:$0xf]  ;;  %v346_v59 = vld [vmem:[%s9118_s12 + $0x3a0] sm:$0xf]  ;;  %343 = vst [vmem:[%s9122_s13 + $0xe0] sm:$0xf] %v342_v57 }
  0x3b   : > { %345 = vst [vmem:[%s9122_s13 + $0xe4] sm:$0xf] %v344_v58  ;;  %347 = vst [vmem:[%s9122_s13 + $0xe8] sm:$0xf] %v346_v59  ;;  %v348_v60 = vld [vmem:[%s9118_s12 + $0x3b0] sm:$0xf] }
  0x3c   : > { %v350_v61 = vld [vmem:[%s9118_s12 + $0x3c0] sm:$0xf]  ;;  %v352_v62 = vld [vmem:[%s9118_s12 + $0x3d0] sm:$0xf]  ;;  %349 = vst [vmem:[%s9122_s13 + $0xec] sm:$0xf] %v348_v60 }
  0x3d   : > { %351 = vst [vmem:[%s9122_s13 + $0xf0] sm:$0xf] %v350_v61  ;;  %353 = vst [vmem:[%s9122_s13 + $0xf4] sm:$0xf] %v352_v62  ;;  %v354_v63 = vld [vmem:[%s9118_s12 + $0x3e0] sm:$0xf] }
  0x3e   : > { %v356_v0 = vld [vmem:[%s9118_s12 + $0x3f0] sm:$0xf]  ;;  %v358_v1 = vld [vmem:[%s9118_s12 + $0x400] sm:$0xf]  ;;  %355 = vst [vmem:[%s9122_s13 + $0xf8] sm:$0xf] %v354_v63 }
  0x3f   : > { %357 = vst [vmem:[%s9122_s13 + $0xfc] sm:$0xf] %v356_v0  ;;  %359 = vst [vmem:[%s9122_s13 + $0x100] sm:$0xf] %v358_v1  ;;  %v360_v2 = vld [vmem:[%s9118_s12 + $0x410] sm:$0xf] }
  0x40   : > { %v362_v3 = vld [vmem:[%s9118_s12 + $0x420] sm:$0xf]  ;;  %v364_v4 = vld [vmem:[%s9118_s12 + $0x430] sm:$0xf]  ;;  %361 = vst [vmem:[%s9122_s13 + $0x104] sm:$0xf] %v360_v2 }
  0x41   : > { %363 = vst [vmem:[%s9122_s13 + $0x108] sm:$0xf] %v362_v3  ;;  %365 = vst [vmem:[%s9122_s13 + $0x10c] sm:$0xf] %v364_v4  ;;  %v366_v5 = vld [vmem:[%s9118_s12 + $0x440] sm:$0xf] }
  0x42   : > { %v368_v6 = vld [vmem:[%s9118_s12 + $0x450] sm:$0xf]  ;;  %v370_v7 = vld [vmem:[%s9118_s12 + $0x460] sm:$0xf]  ;;  %367 = vst [vmem:[%s9122_s13 + $0x110] sm:$0xf] %v366_v5 }
  0x43   : > { %369 = vst [vmem:[%s9122_s13 + $0x114] sm:$0xf] %v368_v6  ;;  %371 = vst [vmem:[%s9122_s13 + $0x118] sm:$0xf] %v370_v7  ;;  %v372_v8 = vld [vmem:[%s9118_s12 + $0x470] sm:$0xf] }
  0x44   : > { %v374_v9 = vld [vmem:[%s9118_s12 + $0x480] sm:$0xf]  ;;  %v376_v10 = vld [vmem:[%s9118_s12 + $0x490] sm:$0xf]  ;;  %373 = vst [vmem:[%s9122_s13 + $0x11c] sm:$0xf] %v372_v8 }
  0x45   : > { %375 = vst [vmem:[%s9122_s13 + $0x120] sm:$0xf] %v374_v9  ;;  %377 = vst [vmem:[%s9122_s13 + $0x124] sm:$0xf] %v376_v10  ;;  %v378_v11 = vld [vmem:[%s9118_s12 + $0x4a0] sm:$0xf] }
  0x46   : > { %v380_v12 = vld [vmem:[%s9118_s12 + $0x4b0] sm:$0xf]  ;;  %v382_v13 = vld [vmem:[%s9118_s12 + $0x4c0] sm:$0xf]  ;;  %379 = vst [vmem:[%s9122_s13 + $0x128] sm:$0xf] %v378_v11 }
  0x47   : > { %381 = vst [vmem:[%s9122_s13 + $0x12c] sm:$0xf] %v380_v12  ;;  %383 = vst [vmem:[%s9122_s13 + $0x130] sm:$0xf] %v382_v13  ;;  %v384_v14 = vld [vmem:[%s9118_s12 + $0x4d0] sm:$0xf] }
  0x48   : > { %v386_v15 = vld [vmem:[%s9118_s12 + $0x4e0] sm:$0xf]  ;;  %v388_v16 = vld [vmem:[%s9118_s12 + $0x4f0] sm:$0xf]  ;;  %385 = vst [vmem:[%s9122_s13 + $0x134] sm:$0xf] %v384_v14 }
  0x49   : > { %387 = vst [vmem:[%s9122_s13 + $0x138] sm:$0xf] %v386_v15  ;;  %389 = vst [vmem:[%s9122_s13 + $0x13c] sm:$0xf] %v388_v16  ;;  %v390_v17 = vld [vmem:[%s9118_s12 + $0x500] sm:$0xf] }
  0x4a   : > { %v392_v18 = vld [vmem:[%s9118_s12 + $0x510] sm:$0xf]  ;;  %v394_v19 = vld [vmem:[%s9118_s12 + $0x520] sm:$0xf]  ;;  %391 = vst [vmem:[%s9122_s13 + $0x140] sm:$0xf] %v390_v17 }
  0x4b   : > { %393 = vst [vmem:[%s9122_s13 + $0x144] sm:$0xf] %v392_v18  ;;  %395 = vst [vmem:[%s9122_s13 + $0x148] sm:$0xf] %v394_v19  ;;  %v396_v20 = vld [vmem:[%s9118_s12 + $0x530] sm:$0xf] }
  0x4c   : > { %v398_v21 = vld [vmem:[%s9118_s12 + $0x540] sm:$0xf]  ;;  %v400_v22 = vld [vmem:[%s9118_s12 + $0x550] sm:$0xf]  ;;  %397 = vst [vmem:[%s9122_s13 + $0x14c] sm:$0xf] %v396_v20 }
  0x4d   : > { %399 = vst [vmem:[%s9122_s13 + $0x150] sm:$0xf] %v398_v21  ;;  %401 = vst [vmem:[%s9122_s13 + $0x154] sm:$0xf] %v400_v22  ;;  %v402_v23 = vld [vmem:[%s9118_s12 + $0x560] sm:$0xf] }
  0x4e   : > { %v404_v24 = vld [vmem:[%s9118_s12 + $0x570] sm:$0xf]  ;;  %v406_v25 = vld [vmem:[%s9118_s12 + $0x580] sm:$0xf]  ;;  %403 = vst [vmem:[%s9122_s13 + $0x158] sm:$0xf] %v402_v23 }
  0x4f   : > { %405 = vst [vmem:[%s9122_s13 + $0x15c] sm:$0xf] %v404_v24  ;;  %407 = vst [vmem:[%s9122_s13 + $0x160] sm:$0xf] %v406_v25  ;;  %v408_v26 = vld [vmem:[%s9118_s12 + $0x590] sm:$0xf] }
  0x50   : > { %v410_v27 = vld [vmem:[%s9118_s12 + $0x5a0] sm:$0xf]  ;;  %v412_v28 = vld [vmem:[%s9118_s12 + $0x5b0] sm:$0xf]  ;;  %409 = vst [vmem:[%s9122_s13 + $0x164] sm:$0xf] %v408_v26 }
  0x51   : > { %411 = vst [vmem:[%s9122_s13 + $0x168] sm:$0xf] %v410_v27  ;;  %413 = vst [vmem:[%s9122_s13 + $0x16c] sm:$0xf] %v412_v28  ;;  %v414_v29 = vld [vmem:[%s9118_s12 + $0x5c0] sm:$0xf] }
  0x52   : > { %v416_v30 = vld [vmem:[%s9118_s12 + $0x5d0] sm:$0xf]  ;;  %v418_v31 = vld [vmem:[%s9118_s12 + $0x5e0] sm:$0xf]  ;;  %415 = vst [vmem:[%s9122_s13 + $0x170] sm:$0xf] %v414_v29 }
  0x53   : > { %417 = vst [vmem:[%s9122_s13 + $0x174] sm:$0xf] %v416_v30  ;;  %419 = vst [vmem:[%s9122_s13 + $0x178] sm:$0xf] %v418_v31  ;;  %v420_v32 = vld [vmem:[%s9118_s12 + $0x5f0] sm:$0xf] }
  0x54   : > { %v422_v33 = vld [vmem:[%s9118_s12 + $0x600] sm:$0xf]  ;;  %v424_v34 = vld [vmem:[%s9118_s12 + $0x610] sm:$0xf]  ;;  %421 = vst [vmem:[%s9122_s13 + $0x17c] sm:$0xf] %v420_v32 }
  0x55   : > { %423 = vst [vmem:[%s9122_s13 + $0x180] sm:$0xf] %v422_v33  ;;  %425 = vst [vmem:[%s9122_s13 + $0x184] sm:$0xf] %v424_v34  ;;  %v426_v35 = vld [vmem:[%s9118_s12 + $0x620] sm:$0xf] }
  0x56   : > { %v428_v36 = vld [vmem:[%s9118_s12 + $0x630] sm:$0xf]  ;;  %v430_v37 = vld [vmem:[%s9118_s12 + $0x640] sm:$0xf]  ;;  %427 = vst [vmem:[%s9122_s13 + $0x188] sm:$0xf] %v426_v35 }
  0x57   : > { %429 = vst [vmem:[%s9122_s13 + $0x18c] sm:$0xf] %v428_v36  ;;  %431 = vst [vmem:[%s9122_s13 + $0x190] sm:$0xf] %v430_v37  ;;  %v432_v38 = vld [vmem:[%s9118_s12 + $0x650] sm:$0xf] }
  0x58   : > { %v434_v39 = vld [vmem:[%s9118_s12 + $0x660] sm:$0xf]  ;;  %v436_v40 = vld [vmem:[%s9118_s12 + $0x670] sm:$0xf]  ;;  %433 = vst [vmem:[%s9122_s13 + $0x194] sm:$0xf] %v432_v38 }
  0x59   : > { %435 = vst [vmem:[%s9122_s13 + $0x198] sm:$0xf] %v434_v39  ;;  %437 = vst [vmem:[%s9122_s13 + $0x19c] sm:$0xf] %v436_v40  ;;  %v438_v41 = vld [vmem:[%s9118_s12 + $0x680] sm:$0xf] }
  0x5a   : > { %v440_v42 = vld [vmem:[%s9118_s12 + $0x690] sm:$0xf]  ;;  %v442_v43 = vld [vmem:[%s9118_s12 + $0x6a0] sm:$0xf]  ;;  %439 = vst [vmem:[%s9122_s13 + $0x1a0] sm:$0xf] %v438_v41 }
  0x5b   : > { %441 = vst [vmem:[%s9122_s13 + $0x1a4] sm:$0xf] %v440_v42  ;;  %443 = vst [vmem:[%s9122_s13 + $0x1a8] sm:$0xf] %v442_v43  ;;  %v444_v44 = vld [vmem:[%s9118_s12 + $0x6b0] sm:$0xf] }
  0x5c   : > { %v446_v45 = vld [vmem:[%s9118_s12 + $0x6c0] sm:$0xf]  ;;  %v448_v46 = vld [vmem:[%s9118_s12 + $0x6d0] sm:$0xf]  ;;  %445 = vst [vmem:[%s9122_s13 + $0x1ac] sm:$0xf] %v444_v44 }
  0x5d   : > { %447 = vst [vmem:[%s9122_s13 + $0x1b0] sm:$0xf] %v446_v45  ;;  %449 = vst [vmem:[%s9122_s13 + $0x1b4] sm:$0xf] %v448_v46  ;;  %v450_v47 = vld [vmem:[%s9118_s12 + $0x6e0] sm:$0xf] }
  0x5e   : > { %v452_v48 = vld [vmem:[%s9118_s12 + $0x6f0] sm:$0xf]  ;;  %v454_v49 = vld [vmem:[%s9118_s12 + $0x700] sm:$0xf]  ;;  %451 = vst [vmem:[%s9122_s13 + $0x1b8] sm:$0xf] %v450_v47 }
  0x5f   : > { %453 = vst [vmem:[%s9122_s13 + $0x1bc] sm:$0xf] %v452_v48  ;;  %455 = vst [vmem:[%s9122_s13 + $0x1c0] sm:$0xf] %v454_v49  ;;  %v456_v50 = vld [vmem:[%s9118_s12 + $0x710] sm:$0xf] }
  0x60   : > { %v458_v51 = vld [vmem:[%s9118_s12 + $0x720] sm:$0xf]  ;;  %v460_v52 = vld [vmem:[%s9118_s12 + $0x730] sm:$0xf]  ;;  %457 = vst [vmem:[%s9122_s13 + $0x1c4] sm:$0xf] %v456_v50 }
  0x61   : > { %459 = vst [vmem:[%s9122_s13 + $0x1c8] sm:$0xf] %v458_v51  ;;  %461 = vst [vmem:[%s9122_s13 + $0x1cc] sm:$0xf] %v460_v52  ;;  %v462_v53 = vld [vmem:[%s9118_s12 + $0x740] sm:$0xf] }
  0x62   : > { %v464_v54 = vld [vmem:[%s9118_s12 + $0x750] sm:$0xf]  ;;  %v466_v55 = vld [vmem:[%s9118_s12 + $0x760] sm:$0xf]  ;;  %463 = vst [vmem:[%s9122_s13 + $0x1d0] sm:$0xf] %v462_v53 }
  0x63   : > { %465 = vst [vmem:[%s9122_s13 + $0x1d4] sm:$0xf] %v464_v54  ;;  %467 = vst [vmem:[%s9122_s13 + $0x1d8] sm:$0xf] %v466_v55  ;;  %v468_v56 = vld [vmem:[%s9118_s12 + $0x770] sm:$0xf] }
  0x64   : > { %v470_v57 = vld [vmem:[%s9118_s12 + $0x780] sm:$0xf]  ;;  %v472_v58 = vld [vmem:[%s9118_s12 + $0x790] sm:$0xf]  ;;  %469 = vst [vmem:[%s9122_s13 + $0x1dc] sm:$0xf] %v468_v56 }
  0x65   : > { %471 = vst [vmem:[%s9122_s13 + $0x1e0] sm:$0xf] %v470_v57  ;;  %473 = vst [vmem:[%s9122_s13 + $0x1e4] sm:$0xf] %v472_v58  ;;  %v474_v59 = vld [vmem:[%s9118_s12 + $0x7a0] sm:$0xf] }
  0x66   : > { %v476_v60 = vld [vmem:[%s9118_s12 + $0x7b0] sm:$0xf]  ;;  %v478_v61 = vld [vmem:[%s9118_s12 + $0x7c0] sm:$0xf]  ;;  %475 = vst [vmem:[%s9122_s13 + $0x1e8] sm:$0xf] %v474_v59 }
  0x67   : > { %477 = vst [vmem:[%s9122_s13 + $0x1ec] sm:$0xf] %v476_v60  ;;  %479 = vst [vmem:[%s9122_s13 + $0x1f0] sm:$0xf] %v478_v61  ;;  %v480_v62 = vld [vmem:[%s9118_s12 + $0x7d0] sm:$0xf] }
  0x68   : > { %v482_v63 = vld [vmem:[%s9118_s12 + $0x7e0] sm:$0xf]  ;;  %v484_v0 = vld [vmem:[%s9118_s12 + $0x7f0] sm:$0xf]  ;;  %481 = vst [vmem:[%s9122_s13 + $0x1f4] sm:$0xf] %v480_v62 }
  0x69   : > { %483 = vst [vmem:[%s9122_s13 + $0x1f8] sm:$0xf] %v482_v63  ;;  %485 = vst [vmem:[%s9122_s13 + $0x1fc] sm:$0xf] %v484_v0  ;;  %v486_v1 = vld [vmem:[%s9118_s12 + $0x800] sm:$0xf] }
  0x6a   : > { %v488_v2 = vld [vmem:[%s9118_s12 + $0x810] sm:$0xf]  ;;  %v490_v3 = vld [vmem:[%s9118_s12 + $0x820] sm:$0xf]  ;;  %487 = vst [vmem:[%s9122_s13 + $0x200] sm:$0xf] %v486_v1 }
  0x6b   : > { %489 = vst [vmem:[%s9122_s13 + $0x204] sm:$0xf] %v488_v2  ;;  %491 = vst [vmem:[%s9122_s13 + $0x208] sm:$0xf] %v490_v3  ;;  %v492_v4 = vld [vmem:[%s9118_s12 + $0x830] sm:$0xf] }
  0x6c   : > { %v494_v5 = vld [vmem:[%s9118_s12 + $0x840] sm:$0xf]  ;;  %v496_v6 = vld [vmem:[%s9118_s12 + $0x850] sm:$0xf]  ;;  %493 = vst [vmem:[%s9122_s13 + $0x20c] sm:$0xf] %v492_v4 }
  0x6d   : > { %495 = vst [vmem:[%s9122_s13 + $0x210] sm:$0xf] %v494_v5  ;;  %497 = vst [vmem:[%s9122_s13 + $0x214] sm:$0xf] %v496_v6  ;;  %v498_v7 = vld [vmem:[%s9118_s12 + $0x860] sm:$0xf] }
  0x6e   : > { %v500_v8 = vld [vmem:[%s9118_s12 + $0x870] sm:$0xf]  ;;  %v502_v9 = vld [vmem:[%s9118_s12 + $0x880] sm:$0xf]  ;;  %499 = vst [vmem:[%s9122_s13 + $0x218] sm:$0xf] %v498_v7 }
  0x6f   : > { %501 = vst [vmem:[%s9122_s13 + $0x21c] sm:$0xf] %v500_v8  ;;  %503 = vst [vmem:[%s9122_s13 + $0x220] sm:$0xf] %v502_v9  ;;  %v504_v10 = vld [vmem:[%s9118_s12 + $0x890] sm:$0xf] }
  0x70   : > { %v506_v11 = vld [vmem:[%s9118_s12 + $0x8a0] sm:$0xf]  ;;  %v508_v12 = vld [vmem:[%s9118_s12 + $0x8b0] sm:$0xf]  ;;  %505 = vst [vmem:[%s9122_s13 + $0x224] sm:$0xf] %v504_v10 }
  0x71   : > { %507 = vst [vmem:[%s9122_s13 + $0x228] sm:$0xf] %v506_v11  ;;  %509 = vst [vmem:[%s9122_s13 + $0x22c] sm:$0xf] %v508_v12  ;;  %v510_v13 = vld [vmem:[%s9118_s12 + $0x8c0] sm:$0xf] }
  0x72   : > { %v512_v14 = vld [vmem:[%s9118_s12 + $0x8d0] sm:$0xf]  ;;  %v514_v15 = vld [vmem:[%s9118_s12 + $0x8e0] sm:$0xf]  ;;  %511 = vst [vmem:[%s9122_s13 + $0x230] sm:$0xf] %v510_v13 }
  0x73   : > { %513 = vst [vmem:[%s9122_s13 + $0x234] sm:$0xf] %v512_v14  ;;  %515 = vst [vmem:[%s9122_s13 + $0x238] sm:$0xf] %v514_v15  ;;  %v516_v16 = vld [vmem:[%s9118_s12 + $0x8f0] sm:$0xf] }
  0x74   : > { %v518_v17 = vld [vmem:[%s9118_s12 + $0x900] sm:$0xf]  ;;  %v520_v18 = vld [vmem:[%s9118_s12 + $0x910] sm:$0xf]  ;;  %517 = vst [vmem:[%s9122_s13 + $0x23c] sm:$0xf] %v516_v16 }
  0x75   : > { %519 = vst [vmem:[%s9122_s13 + $0x240] sm:$0xf] %v518_v17  ;;  %521 = vst [vmem:[%s9122_s13 + $0x244] sm:$0xf] %v520_v18  ;;  %v522_v19 = vld [vmem:[%s9118_s12 + $0x920] sm:$0xf] }
  0x76   : > { %v524_v20 = vld [vmem:[%s9118_s12 + $0x930] sm:$0xf]  ;;  %v526_v21 = vld [vmem:[%s9118_s12 + $0x940] sm:$0xf]  ;;  %523 = vst [vmem:[%s9122_s13 + $0x248] sm:$0xf] %v522_v19 }
  0x77   : > { %525 = vst [vmem:[%s9122_s13 + $0x24c] sm:$0xf] %v524_v20  ;;  %527 = vst [vmem:[%s9122_s13 + $0x250] sm:$0xf] %v526_v21  ;;  %v528_v22 = vld [vmem:[%s9118_s12 + $0x950] sm:$0xf] }
  0x78   : > { %v530_v23 = vld [vmem:[%s9118_s12 + $0x960] sm:$0xf]  ;;  %v532_v24 = vld [vmem:[%s9118_s12 + $0x970] sm:$0xf]  ;;  %529 = vst [vmem:[%s9122_s13 + $0x254] sm:$0xf] %v528_v22 }
  0x79   : > { %531 = vst [vmem:[%s9122_s13 + $0x258] sm:$0xf] %v530_v23  ;;  %533 = vst [vmem:[%s9122_s13 + $0x25c] sm:$0xf] %v532_v24  ;;  %v534_v25 = vld [vmem:[%s9118_s12 + $0x980] sm:$0xf] }
  0x7a   : > { %v536_v26 = vld [vmem:[%s9118_s12 + $0x990] sm:$0xf]  ;;  %v538_v27 = vld [vmem:[%s9118_s12 + $0x9a0] sm:$0xf]  ;;  %535 = vst [vmem:[%s9122_s13 + $0x260] sm:$0xf] %v534_v25 }
  0x7b   : > { %537 = vst [vmem:[%s9122_s13 + $0x264] sm:$0xf] %v536_v26  ;;  %539 = vst [vmem:[%s9122_s13 + $0x268] sm:$0xf] %v538_v27  ;;  %v540_v28 = vld [vmem:[%s9118_s12 + $0x9b0] sm:$0xf] }
  0x7c   : > { %v542_v29 = vld [vmem:[%s9118_s12 + $0x9c0] sm:$0xf]  ;;  %v544_v30 = vld [vmem:[%s9118_s12 + $0x9d0] sm:$0xf]  ;;  %541 = vst [vmem:[%s9122_s13 + $0x26c] sm:$0xf] %v540_v28 }
  0x7d   : > { %543 = vst [vmem:[%s9122_s13 + $0x270] sm:$0xf] %v542_v29  ;;  %545 = vst [vmem:[%s9122_s13 + $0x274] sm:$0xf] %v544_v30  ;;  %v546_v31 = vld [vmem:[%s9118_s12 + $0x9e0] sm:$0xf] }
  0x7e   : > { %v548_v32 = vld [vmem:[%s9118_s12 + $0x9f0] sm:$0xf]  ;;  %v550_v33 = vld [vmem:[%s9118_s12 + $0xa00] sm:$0xf]  ;;  %547 = vst [vmem:[%s9122_s13 + $0x278] sm:$0xf] %v546_v31 }
  0x7f   : > { %549 = vst [vmem:[%s9122_s13 + $0x27c] sm:$0xf] %v548_v32  ;;  %551 = vst [vmem:[%s9122_s13 + $0x280] sm:$0xf] %v550_v33  ;;  %v552_v34 = vld [vmem:[%s9118_s12 + $0xa10] sm:$0xf] }
  0x80   : > { %v554_v35 = vld [vmem:[%s9118_s12 + $0xa20] sm:$0xf]  ;;  %v556_v36 = vld [vmem:[%s9118_s12 + $0xa30] sm:$0xf]  ;;  %553 = vst [vmem:[%s9122_s13 + $0x284] sm:$0xf] %v552_v34 }
  0x81   : > { %555 = vst [vmem:[%s9122_s13 + $0x288] sm:$0xf] %v554_v35  ;;  %557 = vst [vmem:[%s9122_s13 + $0x28c] sm:$0xf] %v556_v36  ;;  %v558_v37 = vld [vmem:[%s9118_s12 + $0xa40] sm:$0xf] }
  0x82   : > { %v560_v38 = vld [vmem:[%s9118_s12 + $0xa50] sm:$0xf]  ;;  %v562_v39 = vld [vmem:[%s9118_s12 + $0xa60] sm:$0xf]  ;;  %559 = vst [vmem:[%s9122_s13 + $0x290] sm:$0xf] %v558_v37 }
  0x83   : > { %561 = vst [vmem:[%s9122_s13 + $0x294] sm:$0xf] %v560_v38  ;;  %563 = vst [vmem:[%s9122_s13 + $0x298] sm:$0xf] %v562_v39  ;;  %v564_v40 = vld [vmem:[%s9118_s12 + $0xa70] sm:$0xf] }
  0x84   : > { %v566_v41 = vld [vmem:[%s9118_s12 + $0xa80] sm:$0xf]  ;;  %v568_v42 = vld [vmem:[%s9118_s12 + $0xa90] sm:$0xf]  ;;  %565 = vst [vmem:[%s9122_s13 + $0x29c] sm:$0xf] %v564_v40 }
  0x85   : > { %567 = vst [vmem:[%s9122_s13 + $0x2a0] sm:$0xf] %v566_v41  ;;  %569 = vst [vmem:[%s9122_s13 + $0x2a4] sm:$0xf] %v568_v42  ;;  %v570_v43 = vld [vmem:[%s9118_s12 + $0xaa0] sm:$0xf] }
  0x86   : > { %v572_v44 = vld [vmem:[%s9118_s12 + $0xab0] sm:$0xf]  ;;  %v574_v45 = vld [vmem:[%s9118_s12 + $0xac0] sm:$0xf]  ;;  %571 = vst [vmem:[%s9122_s13 + $0x2a8] sm:$0xf] %v570_v43 }
  0x87   : > { %573 = vst [vmem:[%s9122_s13 + $0x2ac] sm:$0xf] %v572_v44  ;;  %575 = vst [vmem:[%s9122_s13 + $0x2b0] sm:$0xf] %v574_v45  ;;  %v576_v46 = vld [vmem:[%s9118_s12 + $0xad0] sm:$0xf] }
  0x88   : > { %v578_v47 = vld [vmem:[%s9118_s12 + $0xae0] sm:$0xf]  ;;  %v580_v48 = vld [vmem:[%s9118_s12 + $0xaf0] sm:$0xf]  ;;  %577 = vst [vmem:[%s9122_s13 + $0x2b4] sm:$0xf] %v576_v46 }
  0x89   : > { %579 = vst [vmem:[%s9122_s13 + $0x2b8] sm:$0xf] %v578_v47  ;;  %581 = vst [vmem:[%s9122_s13 + $0x2bc] sm:$0xf] %v580_v48  ;;  %v582_v49 = vld [vmem:[%s9118_s12 + $0xb00] sm:$0xf] }
  0x8a   : > { %v584_v50 = vld [vmem:[%s9118_s12 + $0xb10] sm:$0xf]  ;;  %v586_v51 = vld [vmem:[%s9118_s12 + $0xb20] sm:$0xf]  ;;  %583 = vst [vmem:[%s9122_s13 + $0x2c0] sm:$0xf] %v582_v49 }
  0x8b   : > { %585 = vst [vmem:[%s9122_s13 + $0x2c4] sm:$0xf] %v584_v50  ;;  %587 = vst [vmem:[%s9122_s13 + $0x2c8] sm:$0xf] %v586_v51  ;;  %v588_v52 = vld [vmem:[%s9118_s12 + $0xb30] sm:$0xf] }
  0x8c   : > { %v590_v53 = vld [vmem:[%s9118_s12 + $0xb40] sm:$0xf]  ;;  %v592_v54 = vld [vmem:[%s9118_s12 + $0xb50] sm:$0xf]  ;;  %589 = vst [vmem:[%s9122_s13 + $0x2cc] sm:$0xf] %v588_v52 }
  0x8d   : > { %591 = vst [vmem:[%s9122_s13 + $0x2d0] sm:$0xf] %v590_v53  ;;  %593 = vst [vmem:[%s9122_s13 + $0x2d4] sm:$0xf] %v592_v54  ;;  %v594_v55 = vld [vmem:[%s9118_s12 + $0xb60] sm:$0xf] }
  0x8e   : > { %v596_v56 = vld [vmem:[%s9118_s12 + $0xb70] sm:$0xf]  ;;  %v598_v57 = vld [vmem:[%s9118_s12 + $0xb80] sm:$0xf]  ;;  %595 = vst [vmem:[%s9122_s13 + $0x2d8] sm:$0xf] %v594_v55 }
  0x8f   : > { %597 = vst [vmem:[%s9122_s13 + $0x2dc] sm:$0xf] %v596_v56  ;;  %599 = vst [vmem:[%s9122_s13 + $0x2e0] sm:$0xf] %v598_v57  ;;  %v600_v58 = vld [vmem:[%s9118_s12 + $0xb90] sm:$0xf] }
  0x90   : > { %v602_v59 = vld [vmem:[%s9118_s12 + $0xba0] sm:$0xf]  ;;  %v604_v60 = vld [vmem:[%s9118_s12 + $0xbb0] sm:$0xf]  ;;  %601 = vst [vmem:[%s9122_s13 + $0x2e4] sm:$0xf] %v600_v58 }
  0x91   : > { %603 = vst [vmem:[%s9122_s13 + $0x2e8] sm:$0xf] %v602_v59  ;;  %605 = vst [vmem:[%s9122_s13 + $0x2ec] sm:$0xf] %v604_v60  ;;  %v606_v61 = vld [vmem:[%s9118_s12 + $0xbc0] sm:$0xf] }
  0x92   : > { %v608_v62 = vld [vmem:[%s9118_s12 + $0xbd0] sm:$0xf]  ;;  %v610_v63 = vld [vmem:[%s9118_s12 + $0xbe0] sm:$0xf]  ;;  %607 = vst [vmem:[%s9122_s13 + $0x2f0] sm:$0xf] %v606_v61 }
  0x93   : > { %609 = vst [vmem:[%s9122_s13 + $0x2f4] sm:$0xf] %v608_v62  ;;  %611 = vst [vmem:[%s9122_s13 + $0x2f8] sm:$0xf] %v610_v63  ;;  %v612_v0 = vld [vmem:[%s9118_s12 + $0xbf0] sm:$0xf] }
  0x94   : > { %v614_v1 = vld [vmem:[%s9118_s12 + $0xc00] sm:$0xf]  ;;  %v616_v2 = vld [vmem:[%s9118_s12 + $0xc10] sm:$0xf]  ;;  %613 = vst [vmem:[%s9122_s13 + $0x2fc] sm:$0xf] %v612_v0 }
  0x95   : > { %615 = vst [vmem:[%s9122_s13 + $0x300] sm:$0xf] %v614_v1  ;;  %617 = vst [vmem:[%s9122_s13 + $0x304] sm:$0xf] %v616_v2  ;;  %v618_v3 = vld [vmem:[%s9118_s12 + $0xc20] sm:$0xf] }
  0x96   : > { %v620_v4 = vld [vmem:[%s9118_s12 + $0xc30] sm:$0xf]  ;;  %v622_v5 = vld [vmem:[%s9118_s12 + $0xc40] sm:$0xf]  ;;  %619 = vst [vmem:[%s9122_s13 + $0x308] sm:$0xf] %v618_v3 }
  0x97   : > { %621 = vst [vmem:[%s9122_s13 + $0x30c] sm:$0xf] %v620_v4  ;;  %623 = vst [vmem:[%s9122_s13 + $0x310] sm:$0xf] %v622_v5  ;;  %v624_v6 = vld [vmem:[%s9118_s12 + $0xc50] sm:$0xf] }
  0x98   : > { %v626_v7 = vld [vmem:[%s9118_s12 + $0xc60] sm:$0xf]  ;;  %v628_v8 = vld [vmem:[%s9118_s12 + $0xc70] sm:$0xf]  ;;  %625 = vst [vmem:[%s9122_s13 + $0x314] sm:$0xf] %v624_v6 }
  0x99   : > { %627 = vst [vmem:[%s9122_s13 + $0x318] sm:$0xf] %v626_v7  ;;  %629 = vst [vmem:[%s9122_s13 + $0x31c] sm:$0xf] %v628_v8  ;;  %v630_v9 = vld [vmem:[%s9118_s12 + $0xc80] sm:$0xf] }
  0x9a   : > { %v632_v10 = vld [vmem:[%s9118_s12 + $0xc90] sm:$0xf]  ;;  %v634_v11 = vld [vmem:[%s9118_s12 + $0xca0] sm:$0xf]  ;;  %631 = vst [vmem:[%s9122_s13 + $0x320] sm:$0xf] %v630_v9 }
  0x9b   : > { %633 = vst [vmem:[%s9122_s13 + $0x324] sm:$0xf] %v632_v10  ;;  %635 = vst [vmem:[%s9122_s13 + $0x328] sm:$0xf] %v634_v11  ;;  %v636_v12 = vld [vmem:[%s9118_s12 + $0xcb0] sm:$0xf] }
  0x9c   : > { %v638_v13 = vld [vmem:[%s9118_s12 + $0xcc0] sm:$0xf]  ;;  %v640_v14 = vld [vmem:[%s9118_s12 + $0xcd0] sm:$0xf]  ;;  %637 = vst [vmem:[%s9122_s13 + $0x32c] sm:$0xf] %v636_v12 }
  0x9d   : > { %639 = vst [vmem:[%s9122_s13 + $0x330] sm:$0xf] %v638_v13  ;;  %641 = vst [vmem:[%s9122_s13 + $0x334] sm:$0xf] %v640_v14  ;;  %v642_v15 = vld [vmem:[%s9118_s12 + $0xce0] sm:$0xf] }
  0x9e   : > { %v644_v16 = vld [vmem:[%s9118_s12 + $0xcf0] sm:$0xf]  ;;  %v646_v17 = vld [vmem:[%s9118_s12 + $0xd00] sm:$0xf]  ;;  %643 = vst [vmem:[%s9122_s13 + $0x338] sm:$0xf] %v642_v15 }
  0x9f   : > { %645 = vst [vmem:[%s9122_s13 + $0x33c] sm:$0xf] %v644_v16  ;;  %647 = vst [vmem:[%s9122_s13 + $0x340] sm:$0xf] %v646_v17  ;;  %v648_v18 = vld [vmem:[%s9118_s12 + $0xd10] sm:$0xf] }
  0xa0   : > { %v650_v19 = vld [vmem:[%s9118_s12 + $0xd20] sm:$0xf]  ;;  %v652_v20 = vld [vmem:[%s9118_s12 + $0xd30] sm:$0xf]  ;;  %649 = vst [vmem:[%s9122_s13 + $0x344] sm:$0xf] %v648_v18 }
  0xa1   : > { %651 = vst [vmem:[%s9122_s13 + $0x348] sm:$0xf] %v650_v19  ;;  %653 = vst [vmem:[%s9122_s13 + $0x34c] sm:$0xf] %v652_v20  ;;  %v654_v21 = vld [vmem:[%s9118_s12 + $0xd40] sm:$0xf] }
  0xa2   : > { %v656_v22 = vld [vmem:[%s9118_s12 + $0xd50] sm:$0xf]  ;;  %v658_v23 = vld [vmem:[%s9118_s12 + $0xd60] sm:$0xf]  ;;  %655 = vst [vmem:[%s9122_s13 + $0x350] sm:$0xf] %v654_v21 }
  0xa3   : > { %657 = vst [vmem:[%s9122_s13 + $0x354] sm:$0xf] %v656_v22  ;;  %659 = vst [vmem:[%s9122_s13 + $0x358] sm:$0xf] %v658_v23  ;;  %v660_v24 = vld [vmem:[%s9118_s12 + $0xd70] sm:$0xf] }
  0xa4   : > { %v662_v25 = vld [vmem:[%s9118_s12 + $0xd80] sm:$0xf]  ;;  %v664_v26 = vld [vmem:[%s9118_s12 + $0xd90] sm:$0xf]  ;;  %661 = vst [vmem:[%s9122_s13 + $0x35c] sm:$0xf] %v660_v24 }
  0xa5   : > { %663 = vst [vmem:[%s9122_s13 + $0x360] sm:$0xf] %v662_v25  ;;  %665 = vst [vmem:[%s9122_s13 + $0x364] sm:$0xf] %v664_v26  ;;  %v666_v27 = vld [vmem:[%s9118_s12 + $0xda0] sm:$0xf] }
  0xa6   : > { %v668_v28 = vld [vmem:[%s9118_s12 + $0xdb0] sm:$0xf]  ;;  %v670_v29 = vld [vmem:[%s9118_s12 + $0xdc0] sm:$0xf]  ;;  %667 = vst [vmem:[%s9122_s13 + $0x368] sm:$0xf] %v666_v27 }
  0xa7   : > { %669 = vst [vmem:[%s9122_s13 + $0x36c] sm:$0xf] %v668_v28  ;;  %671 = vst [vmem:[%s9122_s13 + $0x370] sm:$0xf] %v670_v29  ;;  %v672_v30 = vld [vmem:[%s9118_s12 + $0xdd0] sm:$0xf] }
  0xa8   : > { %v674_v31 = vld [vmem:[%s9118_s12 + $0xde0] sm:$0xf]  ;;  %v676_v32 = vld [vmem:[%s9118_s12 + $0xdf0] sm:$0xf]  ;;  %673 = vst [vmem:[%s9122_s13 + $0x374] sm:$0xf] %v672_v30 }
  0xa9   : > { %675 = vst [vmem:[%s9122_s13 + $0x378] sm:$0xf] %v674_v31  ;;  %677 = vst [vmem:[%s9122_s13 + $0x37c] sm:$0xf] %v676_v32  ;;  %v678_v33 = vld [vmem:[%s9118_s12 + $0xe00] sm:$0xf] }
  0xaa   : > { %v680_v34 = vld [vmem:[%s9118_s12 + $0xe10] sm:$0xf]  ;;  %v682_v35 = vld [vmem:[%s9118_s12 + $0xe20] sm:$0xf]  ;;  %679 = vst [vmem:[%s9122_s13 + $0x380] sm:$0xf] %v678_v33 }
  0xab   : > { %681 = vst [vmem:[%s9122_s13 + $0x384] sm:$0xf] %v680_v34  ;;  %683 = vst [vmem:[%s9122_s13 + $0x388] sm:$0xf] %v682_v35  ;;  %v684_v36 = vld [vmem:[%s9118_s12 + $0xe30] sm:$0xf] }
  0xac   : > { %v686_v37 = vld [vmem:[%s9118_s12 + $0xe40] sm:$0xf]  ;;  %v688_v38 = vld [vmem:[%s9118_s12 + $0xe50] sm:$0xf]  ;;  %685 = vst [vmem:[%s9122_s13 + $0x38c] sm:$0xf] %v684_v36 }
  0xad   : > { %687 = vst [vmem:[%s9122_s13 + $0x390] sm:$0xf] %v686_v37  ;;  %689 = vst [vmem:[%s9122_s13 + $0x394] sm:$0xf] %v688_v38  ;;  %v690_v39 = vld [vmem:[%s9118_s12 + $0xe60] sm:$0xf] }
  0xae   : > { %v692_v40 = vld [vmem:[%s9118_s12 + $0xe70] sm:$0xf]  ;;  %v694_v41 = vld [vmem:[%s9118_s12 + $0xe80] sm:$0xf]  ;;  %691 = vst [vmem:[%s9122_s13 + $0x398] sm:$0xf] %v690_v39 }
  0xaf   : > { %693 = vst [vmem:[%s9122_s13 + $0x39c] sm:$0xf] %v692_v40  ;;  %695 = vst [vmem:[%s9122_s13 + $0x3a0] sm:$0xf] %v694_v41  ;;  %v696_v42 = vld [vmem:[%s9118_s12 + $0xe90] sm:$0xf] }
  0xb0   : > { %v698_v43 = vld [vmem:[%s9118_s12 + $0xea0] sm:$0xf]  ;;  %v700_v44 = vld [vmem:[%s9118_s12 + $0xeb0] sm:$0xf]  ;;  %697 = vst [vmem:[%s9122_s13 + $0x3a4] sm:$0xf] %v696_v42 }
  0xb1   : > { %699 = vst [vmem:[%s9122_s13 + $0x3a8] sm:$0xf] %v698_v43  ;;  %701 = vst [vmem:[%s9122_s13 + $0x3ac] sm:$0xf] %v700_v44  ;;  %v702_v45 = vld [vmem:[%s9118_s12 + $0xec0] sm:$0xf] }
  0xb2   : > { %v704_v46 = vld [vmem:[%s9118_s12 + $0xed0] sm:$0xf]  ;;  %v706_v47 = vld [vmem:[%s9118_s12 + $0xee0] sm:$0xf]  ;;  %703 = vst [vmem:[%s9122_s13 + $0x3b0] sm:$0xf] %v702_v45 }
  0xb3   : > { %705 = vst [vmem:[%s9122_s13 + $0x3b4] sm:$0xf] %v704_v46  ;;  %707 = vst [vmem:[%s9122_s13 + $0x3b8] sm:$0xf] %v706_v47  ;;  %v708_v48 = vld [vmem:[%s9118_s12 + $0xef0] sm:$0xf] }
  0xb4   : > { %v710_v49 = vld [vmem:[%s9118_s12 + $0xf00] sm:$0xf]  ;;  %v712_v50 = vld [vmem:[%s9118_s12 + $0xf10] sm:$0xf]  ;;  %709 = vst [vmem:[%s9122_s13 + $0x3bc] sm:$0xf] %v708_v48 }
  0xb5   : > { %711 = vst [vmem:[%s9122_s13 + $0x3c0] sm:$0xf] %v710_v49  ;;  %713 = vst [vmem:[%s9122_s13 + $0x3c4] sm:$0xf] %v712_v50  ;;  %v714_v51 = vld [vmem:[%s9118_s12 + $0xf20] sm:$0xf] }
  0xb6   : > { %v716_v52 = vld [vmem:[%s9118_s12 + $0xf30] sm:$0xf]  ;;  %v718_v53 = vld [vmem:[%s9118_s12 + $0xf40] sm:$0xf]  ;;  %715 = vst [vmem:[%s9122_s13 + $0x3c8] sm:$0xf] %v714_v51 }
  0xb7   : > { %717 = vst [vmem:[%s9122_s13 + $0x3cc] sm:$0xf] %v716_v52  ;;  %719 = vst [vmem:[%s9122_s13 + $0x3d0] sm:$0xf] %v718_v53  ;;  %v720_v54 = vld [vmem:[%s9118_s12 + $0xf50] sm:$0xf] }
  0xb8   : > { %v722_v55 = vld [vmem:[%s9118_s12 + $0xf60] sm:$0xf]  ;;  %v724_v56 = vld [vmem:[%s9118_s12 + $0xf70] sm:$0xf]  ;;  %721 = vst [vmem:[%s9122_s13 + $0x3d4] sm:$0xf] %v720_v54 }
  0xb9   : > { %723 = vst [vmem:[%s9122_s13 + $0x3d8] sm:$0xf] %v722_v55  ;;  %725 = vst [vmem:[%s9122_s13 + $0x3dc] sm:$0xf] %v724_v56  ;;  %v726_v57 = vld [vmem:[%s9118_s12 + $0xf80] sm:$0xf] }
  0xba   : > { %v728_v58 = vld [vmem:[%s9118_s12 + $0xf90] sm:$0xf]  ;;  %v730_v59 = vld [vmem:[%s9118_s12 + $0xfa0] sm:$0xf]  ;;  %727 = vst [vmem:[%s9122_s13 + $0x3e0] sm:$0xf] %v726_v57 }
  0xbb   : > { %729 = vst [vmem:[%s9122_s13 + $0x3e4] sm:$0xf] %v728_v58  ;;  %731 = vst [vmem:[%s9122_s13 + $0x3e8] sm:$0xf] %v730_v59  ;;  %v732_v60 = vld [vmem:[%s9118_s12 + $0xfb0] sm:$0xf] }
  0xbc   : > { %v734_v61 = vld [vmem:[%s9118_s12 + $0xfc0] sm:$0xf]  ;;  %v736_v62 = vld [vmem:[%s9118_s12 + $0xfd0] sm:$0xf]  ;;  %733 = vst [vmem:[%s9122_s13 + $0x3ec] sm:$0xf] %v732_v60 }
  0xbd   : > { %735 = vst [vmem:[%s9122_s13 + $0x3f0] sm:$0xf] %v734_v61  ;;  %737 = vst [vmem:[%s9122_s13 + $0x3f4] sm:$0xf] %v736_v62  ;;  %v738_v63 = vld [vmem:[%s9118_s12 + $0xfe0] sm:$0xf] }
  0xbe   : > { %v740_v0 = vld [vmem:[%s9118_s12 + $0xff0] sm:$0xf]  ;;  %v742_v1 = vld [vmem:[%s9118_s12 + $0x1000] sm:$0xf]  ;;  %739 = vst [vmem:[%s9122_s13 + $0x3f8] sm:$0xf] %v738_v63 }
  0xbf   : > { %741 = vst [vmem:[%s9122_s13 + $0x3fc] sm:$0xf] %v740_v0  ;;  %743 = vst [vmem:[%s9122_s13 + $0x400] sm:$0xf] %v742_v1  ;;  %v744_v2 = vld [vmem:[%s9118_s12 + $0x1010] sm:$0xf] }
  0xc0   : > { %v746_v3 = vld [vmem:[%s9118_s12 + $0x1020] sm:$0xf]  ;;  %v748_v4 = vld [vmem:[%s9118_s12 + $0x1030] sm:$0xf]  ;;  %745 = vst [vmem:[%s9122_s13 + $0x404] sm:$0xf] %v744_v2 }
  0xc1   : > { %747 = vst [vmem:[%s9122_s13 + $0x408] sm:$0xf] %v746_v3  ;;  %749 = vst [vmem:[%s9122_s13 + $0x40c] sm:$0xf] %v748_v4  ;;  %v750_v5 = vld [vmem:[%s9118_s12 + $0x1040] sm:$0xf] }
  0xc2   : > { %v752_v6 = vld [vmem:[%s9118_s12 + $0x1050] sm:$0xf]  ;;  %v754_v7 = vld [vmem:[%s9118_s12 + $0x1060] sm:$0xf]  ;;  %751 = vst [vmem:[%s9122_s13 + $0x410] sm:$0xf] %v750_v5 }
  0xc3   : > { %753 = vst [vmem:[%s9122_s13 + $0x414] sm:$0xf] %v752_v6  ;;  %755 = vst [vmem:[%s9122_s13 + $0x418] sm:$0xf] %v754_v7  ;;  %v756_v8 = vld [vmem:[%s9118_s12 + $0x1070] sm:$0xf] }
  0xc4   : > { %v758_v9 = vld [vmem:[%s9118_s12 + $0x1080] sm:$0xf]  ;;  %v760_v10 = vld [vmem:[%s9118_s12 + $0x1090] sm:$0xf]  ;;  %757 = vst [vmem:[%s9122_s13 + $0x41c] sm:$0xf] %v756_v8 }
  0xc5   : > { %759 = vst [vmem:[%s9122_s13 + $0x420] sm:$0xf] %v758_v9  ;;  %761 = vst [vmem:[%s9122_s13 + $0x424] sm:$0xf] %v760_v10  ;;  %v762_v11 = vld [vmem:[%s9118_s12 + $0x10a0] sm:$0xf] }
  0xc6   : > { %v764_v12 = vld [vmem:[%s9118_s12 + $0x10b0] sm:$0xf]  ;;  %v766_v13 = vld [vmem:[%s9118_s12 + $0x10c0] sm:$0xf]  ;;  %763 = vst [vmem:[%s9122_s13 + $0x428] sm:$0xf] %v762_v11 }
  0xc7   : > { %765 = vst [vmem:[%s9122_s13 + $0x42c] sm:$0xf] %v764_v12  ;;  %767 = vst [vmem:[%s9122_s13 + $0x430] sm:$0xf] %v766_v13  ;;  %v768_v14 = vld [vmem:[%s9118_s12 + $0x10d0] sm:$0xf] }
  0xc8   : > { %v770_v15 = vld [vmem:[%s9118_s12 + $0x10e0] sm:$0xf]  ;;  %v772_v16 = vld [vmem:[%s9118_s12 + $0x10f0] sm:$0xf]  ;;  %769 = vst [vmem:[%s9122_s13 + $0x434] sm:$0xf] %v768_v14 }
  0xc9   : > { %771 = vst [vmem:[%s9122_s13 + $0x438] sm:$0xf] %v770_v15  ;;  %773 = vst [vmem:[%s9122_s13 + $0x43c] sm:$0xf] %v772_v16  ;;  %v774_v17 = vld [vmem:[%s9118_s12 + $0x1100] sm:$0xf] }
  0xca   : > { %v776_v18 = vld [vmem:[%s9118_s12 + $0x1110] sm:$0xf]  ;;  %v778_v19 = vld [vmem:[%s9118_s12 + $0x1120] sm:$0xf]  ;;  %775 = vst [vmem:[%s9122_s13 + $0x440] sm:$0xf] %v774_v17 }
  0xcb   : > { %777 = vst [vmem:[%s9122_s13 + $0x444] sm:$0xf] %v776_v18  ;;  %779 = vst [vmem:[%s9122_s13 + $0x448] sm:$0xf] %v778_v19  ;;  %v780_v20 = vld [vmem:[%s9118_s12 + $0x1130] sm:$0xf] }
  0xcc   : > { %v782_v21 = vld [vmem:[%s9118_s12 + $0x1140] sm:$0xf]  ;;  %v784_v22 = vld [vmem:[%s9118_s12 + $0x1150] sm:$0xf]  ;;  %781 = vst [vmem:[%s9122_s13 + $0x44c] sm:$0xf] %v780_v20 }
  0xcd   : > { %783 = vst [vmem:[%s9122_s13 + $0x450] sm:$0xf] %v782_v21  ;;  %785 = vst [vmem:[%s9122_s13 + $0x454] sm:$0xf] %v784_v22  ;;  %v786_v23 = vld [vmem:[%s9118_s12 + $0x1160] sm:$0xf] }
  0xce   : > { %v788_v24 = vld [vmem:[%s9118_s12 + $0x1170] sm:$0xf]  ;;  %v790_v25 = vld [vmem:[%s9118_s12 + $0x1180] sm:$0xf]  ;;  %787 = vst [vmem:[%s9122_s13 + $0x458] sm:$0xf] %v786_v23 }
  0xcf   : > { %789 = vst [vmem:[%s9122_s13 + $0x45c] sm:$0xf] %v788_v24  ;;  %791 = vst [vmem:[%s9122_s13 + $0x460] sm:$0xf] %v790_v25  ;;  %v792_v26 = vld [vmem:[%s9118_s12 + $0x1190] sm:$0xf] }
  0xd0   : > { %v794_v27 = vld [vmem:[%s9118_s12 + $0x11a0] sm:$0xf]  ;;  %v796_v28 = vld [vmem:[%s9118_s12 + $0x11b0] sm:$0xf]  ;;  %793 = vst [vmem:[%s9122_s13 + $0x464] sm:$0xf] %v792_v26 }
  0xd1   : > { %795 = vst [vmem:[%s9122_s13 + $0x468] sm:$0xf] %v794_v27  ;;  %797 = vst [vmem:[%s9122_s13 + $0x46c] sm:$0xf] %v796_v28  ;;  %v798_v29 = vld [vmem:[%s9118_s12 + $0x11c0] sm:$0xf] }
  0xd2   : > { %v800_v30 = vld [vmem:[%s9118_s12 + $0x11d0] sm:$0xf]  ;;  %v802_v31 = vld [vmem:[%s9118_s12 + $0x11e0] sm:$0xf]  ;;  %799 = vst [vmem:[%s9122_s13 + $0x470] sm:$0xf] %v798_v29 }
  0xd3   : > { %801 = vst [vmem:[%s9122_s13 + $0x474] sm:$0xf] %v800_v30  ;;  %803 = vst [vmem:[%s9122_s13 + $0x478] sm:$0xf] %v802_v31  ;;  %v804_v32 = vld [vmem:[%s9118_s12 + $0x11f0] sm:$0xf] }
  0xd4   : > { %v806_v33 = vld [vmem:[%s9118_s12 + $0x1200] sm:$0xf]  ;;  %v808_v34 = vld [vmem:[%s9118_s12 + $0x1210] sm:$0xf]  ;;  %805 = vst [vmem:[%s9122_s13 + $0x47c] sm:$0xf] %v804_v32 }
  0xd5   : > { %807 = vst [vmem:[%s9122_s13 + $0x480] sm:$0xf] %v806_v33  ;;  %809 = vst [vmem:[%s9122_s13 + $0x484] sm:$0xf] %v808_v34  ;;  %v810_v35 = vld [vmem:[%s9118_s12 + $0x1220] sm:$0xf] }
  0xd6   : > { %v812_v36 = vld [vmem:[%s9118_s12 + $0x1230] sm:$0xf]  ;;  %v814_v37 = vld [vmem:[%s9118_s12 + $0x1240] sm:$0xf]  ;;  %811 = vst [vmem:[%s9122_s13 + $0x488] sm:$0xf] %v810_v35 }
  0xd7   : > { %813 = vst [vmem:[%s9122_s13 + $0x48c] sm:$0xf] %v812_v36  ;;  %815 = vst [vmem:[%s9122_s13 + $0x490] sm:$0xf] %v814_v37  ;;  %v816_v38 = vld [vmem:[%s9118_s12 + $0x1250] sm:$0xf] }
  0xd8   : > { %v818_v39 = vld [vmem:[%s9118_s12 + $0x1260] sm:$0xf]  ;;  %v820_v40 = vld [vmem:[%s9118_s12 + $0x1270] sm:$0xf]  ;;  %817 = vst [vmem:[%s9122_s13 + $0x494] sm:$0xf] %v816_v38 }
  0xd9   : > { %819 = vst [vmem:[%s9122_s13 + $0x498] sm:$0xf] %v818_v39  ;;  %821 = vst [vmem:[%s9122_s13 + $0x49c] sm:$0xf] %v820_v40  ;;  %v822_v41 = vld [vmem:[%s9118_s12 + $0x1280] sm:$0xf] }
  0xda   : > { %v824_v42 = vld [vmem:[%s9118_s12 + $0x1290] sm:$0xf]  ;;  %v826_v43 = vld [vmem:[%s9118_s12 + $0x12a0] sm:$0xf]  ;;  %823 = vst [vmem:[%s9122_s13 + $0x4a0] sm:$0xf] %v822_v41 }
  0xdb   : > { %825 = vst [vmem:[%s9122_s13 + $0x4a4] sm:$0xf] %v824_v42  ;;  %827 = vst [vmem:[%s9122_s13 + $0x4a8] sm:$0xf] %v826_v43  ;;  %v828_v44 = vld [vmem:[%s9118_s12 + $0x12b0] sm:$0xf] }
  0xdc   : > { %v830_v45 = vld [vmem:[%s9118_s12 + $0x12c0] sm:$0xf]  ;;  %v832_v46 = vld [vmem:[%s9118_s12 + $0x12d0] sm:$0xf]  ;;  %829 = vst [vmem:[%s9122_s13 + $0x4ac] sm:$0xf] %v828_v44 }
  0xdd   : > { %831 = vst [vmem:[%s9122_s13 + $0x4b0] sm:$0xf] %v830_v45  ;;  %833 = vst [vmem:[%s9122_s13 + $0x4b4] sm:$0xf] %v832_v46  ;;  %v834_v47 = vld [vmem:[%s9118_s12 + $0x12e0] sm:$0xf] }
  0xde   : > { %v836_v48 = vld [vmem:[%s9118_s12 + $0x12f0] sm:$0xf]  ;;  %v838_v49 = vld [vmem:[%s9118_s12 + $0x1300] sm:$0xf]  ;;  %835 = vst [vmem:[%s9122_s13 + $0x4b8] sm:$0xf] %v834_v47 }
  0xdf   : > { %837 = vst [vmem:[%s9122_s13 + $0x4bc] sm:$0xf] %v836_v48  ;;  %839 = vst [vmem:[%s9122_s13 + $0x4c0] sm:$0xf] %v838_v49  ;;  %v840_v50 = vld [vmem:[%s9118_s12 + $0x1310] sm:$0xf] }
  0xe0   : > { %v842_v51 = vld [vmem:[%s9118_s12 + $0x1320] sm:$0xf]  ;;  %v844_v52 = vld [vmem:[%s9118_s12 + $0x1330] sm:$0xf]  ;;  %841 = vst [vmem:[%s9122_s13 + $0x4c4] sm:$0xf] %v840_v50 }
  0xe1   : > { %843 = vst [vmem:[%s9122_s13 + $0x4c8] sm:$0xf] %v842_v51  ;;  %845 = vst [vmem:[%s9122_s13 + $0x4cc] sm:$0xf] %v844_v52  ;;  %v846_v53 = vld [vmem:[%s9118_s12 + $0x1340] sm:$0xf] }
  0xe2   : > { %v848_v54 = vld [vmem:[%s9118_s12 + $0x1350] sm:$0xf]  ;;  %v850_v55 = vld [vmem:[%s9118_s12 + $0x1360] sm:$0xf]  ;;  %847 = vst [vmem:[%s9122_s13 + $0x4d0] sm:$0xf] %v846_v53 }
  0xe3   : > { %849 = vst [vmem:[%s9122_s13 + $0x4d4] sm:$0xf] %v848_v54  ;;  %851 = vst [vmem:[%s9122_s13 + $0x4d8] sm:$0xf] %v850_v55  ;;  %v852_v56 = vld [vmem:[%s9118_s12 + $0x1370] sm:$0xf] }
  0xe4   : > { %v854_v57 = vld [vmem:[%s9118_s12 + $0x1380] sm:$0xf]  ;;  %v856_v58 = vld [vmem:[%s9118_s12 + $0x1390] sm:$0xf]  ;;  %853 = vst [vmem:[%s9122_s13 + $0x4dc] sm:$0xf] %v852_v56 }
  0xe5   : > { %855 = vst [vmem:[%s9122_s13 + $0x4e0] sm:$0xf] %v854_v57  ;;  %857 = vst [vmem:[%s9122_s13 + $0x4e4] sm:$0xf] %v856_v58  ;;  %v858_v59 = vld [vmem:[%s9118_s12 + $0x13a0] sm:$0xf] }
  0xe6   : > { %v860_v60 = vld [vmem:[%s9118_s12 + $0x13b0] sm:$0xf]  ;;  %v862_v61 = vld [vmem:[%s9118_s12 + $0x13c0] sm:$0xf]  ;;  %859 = vst [vmem:[%s9122_s13 + $0x4e8] sm:$0xf] %v858_v59 }
  0xe7   : > { %861 = vst [vmem:[%s9122_s13 + $0x4ec] sm:$0xf] %v860_v60  ;;  %863 = vst [vmem:[%s9122_s13 + $0x4f0] sm:$0xf] %v862_v61  ;;  %v864_v62 = vld [vmem:[%s9118_s12 + $0x13d0] sm:$0xf] }
  0xe8   : > { %v866_v63 = vld [vmem:[%s9118_s12 + $0x13e0] sm:$0xf]  ;;  %v868_v0 = vld [vmem:[%s9118_s12 + $0x13f0] sm:$0xf]  ;;  %865 = vst [vmem:[%s9122_s13 + $0x4f4] sm:$0xf] %v864_v62 }
  0xe9   : > { %867 = vst [vmem:[%s9122_s13 + $0x4f8] sm:$0xf] %v866_v63  ;;  %869 = vst [vmem:[%s9122_s13 + $0x4fc] sm:$0xf] %v868_v0  ;;  %v870_v1 = vld [vmem:[%s9118_s12 + $0x1400] sm:$0xf] }
  0xea   : > { %v872_v2 = vld [vmem:[%s9118_s12 + $0x1410] sm:$0xf]  ;;  %v874_v3 = vld [vmem:[%s9118_s12 + $0x1420] sm:$0xf]  ;;  %871 = vst [vmem:[%s9122_s13 + $0x500] sm:$0xf] %v870_v1 }
  0xeb   : > { %873 = vst [vmem:[%s9122_s13 + $0x504] sm:$0xf] %v872_v2  ;;  %875 = vst [vmem:[%s9122_s13 + $0x508] sm:$0xf] %v874_v3  ;;  %v876_v4 = vld [vmem:[%s9118_s12 + $0x1430] sm:$0xf] }
  0xec   : > { %v878_v5 = vld [vmem:[%s9118_s12 + $0x1440] sm:$0xf]  ;;  %v880_v6 = vld [vmem:[%s9118_s12 + $0x1450] sm:$0xf]  ;;  %877 = vst [vmem:[%s9122_s13 + $0x50c] sm:$0xf] %v876_v4 }
  0xed   : > { %879 = vst [vmem:[%s9122_s13 + $0x510] sm:$0xf] %v878_v5  ;;  %881 = vst [vmem:[%s9122_s13 + $0x514] sm:$0xf] %v880_v6  ;;  %v882_v7 = vld [vmem:[%s9118_s12 + $0x1460] sm:$0xf] }
  0xee   : > { %v884_v8 = vld [vmem:[%s9118_s12 + $0x1470] sm:$0xf]  ;;  %v886_v9 = vld [vmem:[%s9118_s12 + $0x1480] sm:$0xf]  ;;  %883 = vst [vmem:[%s9122_s13 + $0x518] sm:$0xf] %v882_v7 }
  0xef   : > { %885 = vst [vmem:[%s9122_s13 + $0x51c] sm:$0xf] %v884_v8  ;;  %887 = vst [vmem:[%s9122_s13 + $0x520] sm:$0xf] %v886_v9  ;;  %v888_v10 = vld [vmem:[%s9118_s12 + $0x1490] sm:$0xf] }
  0xf0   : > { %v890_v11 = vld [vmem:[%s9118_s12 + $0x14a0] sm:$0xf]  ;;  %v892_v12 = vld [vmem:[%s9118_s12 + $0x14b0] sm:$0xf]  ;;  %889 = vst [vmem:[%s9122_s13 + $0x524] sm:$0xf] %v888_v10 }
  0xf1   : > { %891 = vst [vmem:[%s9122_s13 + $0x528] sm:$0xf] %v890_v11  ;;  %893 = vst [vmem:[%s9122_s13 + $0x52c] sm:$0xf] %v892_v12  ;;  %v894_v13 = vld [vmem:[%s9118_s12 + $0x14c0] sm:$0xf] }
  0xf2   : > { %v896_v14 = vld [vmem:[%s9118_s12 + $0x14d0] sm:$0xf]  ;;  %v898_v15 = vld [vmem:[%s9118_s12 + $0x14e0] sm:$0xf]  ;;  %895 = vst [vmem:[%s9122_s13 + $0x530] sm:$0xf] %v894_v13 }
  0xf3   : > { %897 = vst [vmem:[%s9122_s13 + $0x534] sm:$0xf] %v896_v14  ;;  %899 = vst [vmem:[%s9122_s13 + $0x538] sm:$0xf] %v898_v15  ;;  %v900_v16 = vld [vmem:[%s9118_s12 + $0x14f0] sm:$0xf] }
  0xf4   : > { %v902_v17 = vld [vmem:[%s9118_s12 + $0x1500] sm:$0xf]  ;;  %v904_v18 = vld [vmem:[%s9118_s12 + $0x1510] sm:$0xf]  ;;  %901 = vst [vmem:[%s9122_s13 + $0x53c] sm:$0xf] %v900_v16 }
  0xf5   : > { %903 = vst [vmem:[%s9122_s13 + $0x540] sm:$0xf] %v902_v17  ;;  %905 = vst [vmem:[%s9122_s13 + $0x544] sm:$0xf] %v904_v18  ;;  %v906_v19 = vld [vmem:[%s9118_s12 + $0x1520] sm:$0xf] }
  0xf6   : > { %v908_v20 = vld [vmem:[%s9118_s12 + $0x1530] sm:$0xf]  ;;  %v910_v21 = vld [vmem:[%s9118_s12 + $0x1540] sm:$0xf]  ;;  %907 = vst [vmem:[%s9122_s13 + $0x548] sm:$0xf] %v906_v19 }
  0xf7   : > { %909 = vst [vmem:[%s9122_s13 + $0x54c] sm:$0xf] %v908_v20  ;;  %911 = vst [vmem:[%s9122_s13 + $0x550] sm:$0xf] %v910_v21  ;;  %v912_v22 = vld [vmem:[%s9118_s12 + $0x1550] sm:$0xf] }
  0xf8   : > { %v914_v23 = vld [vmem:[%s9118_s12 + $0x1560] sm:$0xf]  ;;  %v916_v24 = vld [vmem:[%s9118_s12 + $0x1570] sm:$0xf]  ;;  %913 = vst [vmem:[%s9122_s13 + $0x554] sm:$0xf] %v912_v22 }
  0xf9   : > { %915 = vst [vmem:[%s9122_s13 + $0x558] sm:$0xf] %v914_v23  ;;  %917 = vst [vmem:[%s9122_s13 + $0x55c] sm:$0xf] %v916_v24  ;;  %v918_v25 = vld [vmem:[%s9118_s12 + $0x1580] sm:$0xf] }
  0xfa   : > { %v920_v26 = vld [vmem:[%s9118_s12 + $0x1590] sm:$0xf]  ;;  %v922_v27 = vld [vmem:[%s9118_s12 + $0x15a0] sm:$0xf]  ;;  %919 = vst [vmem:[%s9122_s13 + $0x560] sm:$0xf] %v918_v25 }
  0xfb   : > { %921 = vst [vmem:[%s9122_s13 + $0x564] sm:$0xf] %v920_v26  ;;  %923 = vst [vmem:[%s9122_s13 + $0x568] sm:$0xf] %v922_v27  ;;  %v924_v28 = vld [vmem:[%s9118_s12 + $0x15b0] sm:$0xf] }
  0xfc   : > { %v926_v29 = vld [vmem:[%s9118_s12 + $0x15c0] sm:$0xf]  ;;  %v928_v30 = vld [vmem:[%s9118_s12 + $0x15d0] sm:$0xf]  ;;  %925 = vst [vmem:[%s9122_s13 + $0x56c] sm:$0xf] %v924_v28 }
  0xfd   : > { %927 = vst [vmem:[%s9122_s13 + $0x570] sm:$0xf] %v926_v29  ;;  %929 = vst [vmem:[%s9122_s13 + $0x574] sm:$0xf] %v928_v30  ;;  %v930_v31 = vld [vmem:[%s9118_s12 + $0x15e0] sm:$0xf] }
  0xfe   : > { %v932_v32 = vld [vmem:[%s9118_s12 + $0x15f0] sm:$0xf]  ;;  %v934_v33 = vld [vmem:[%s9118_s12 + $0x1600] sm:$0xf]  ;;  %931 = vst [vmem:[%s9122_s13 + $0x578] sm:$0xf] %v930_v31 }
  0xff   : > { %933 = vst [vmem:[%s9122_s13 + $0x57c] sm:$0xf] %v932_v32  ;;  %935 = vst [vmem:[%s9122_s13 + $0x580] sm:$0xf] %v934_v33  ;;  %v936_v34 = vld [vmem:[%s9118_s12 + $0x1610] sm:$0xf] }
 0x100   : > { %v938_v35 = vld [vmem:[%s9118_s12 + $0x1620] sm:$0xf]  ;;  %v940_v36 = vld [vmem:[%s9118_s12 + $0x1630] sm:$0xf]  ;;  %937 = vst [vmem:[%s9122_s13 + $0x584] sm:$0xf] %v936_v34 }
 0x101   : > { %939 = vst [vmem:[%s9122_s13 + $0x588] sm:$0xf] %v938_v35  ;;  %941 = vst [vmem:[%s9122_s13 + $0x58c] sm:$0xf] %v940_v36  ;;  %v942_v37 = vld [vmem:[%s9118_s12 + $0x1640] sm:$0xf] }
 0x102   : > { %v944_v38 = vld [vmem:[%s9118_s12 + $0x1650] sm:$0xf]  ;;  %v946_v39 = vld [vmem:[%s9118_s12 + $0x1660] sm:$0xf]  ;;  %943 = vst [vmem:[%s9122_s13 + $0x590] sm:$0xf] %v942_v37 }
 0x103   : > { %945 = vst [vmem:[%s9122_s13 + $0x594] sm:$0xf] %v944_v38  ;;  %947 = vst [vmem:[%s9122_s13 + $0x598] sm:$0xf] %v946_v39  ;;  %v948_v40 = vld [vmem:[%s9118_s12 + $0x1670] sm:$0xf] }
 0x104   : > { %v950_v41 = vld [vmem:[%s9118_s12 + $0x1680] sm:$0xf]  ;;  %v952_v42 = vld [vmem:[%s9118_s12 + $0x1690] sm:$0xf]  ;;  %949 = vst [vmem:[%s9122_s13 + $0x59c] sm:$0xf] %v948_v40 }
 0x105   : > { %951 = vst [vmem:[%s9122_s13 + $0x5a0] sm:$0xf] %v950_v41  ;;  %953 = vst [vmem:[%s9122_s13 + $0x5a4] sm:$0xf] %v952_v42  ;;  %v954_v43 = vld [vmem:[%s9118_s12 + $0x16a0] sm:$0xf] }
 0x106   : > { %v956_v44 = vld [vmem:[%s9118_s12 + $0x16b0] sm:$0xf]  ;;  %v958_v45 = vld [vmem:[%s9118_s12 + $0x16c0] sm:$0xf]  ;;  %955 = vst [vmem:[%s9122_s13 + $0x5a8] sm:$0xf] %v954_v43 }
 0x107   : > { %957 = vst [vmem:[%s9122_s13 + $0x5ac] sm:$0xf] %v956_v44  ;;  %959 = vst [vmem:[%s9122_s13 + $0x5b0] sm:$0xf] %v958_v45  ;;  %v960_v46 = vld [vmem:[%s9118_s12 + $0x16d0] sm:$0xf] }
 0x108   : > { %v962_v47 = vld [vmem:[%s9118_s12 + $0x16e0] sm:$0xf]  ;;  %v964_v48 = vld [vmem:[%s9118_s12 + $0x16f0] sm:$0xf]  ;;  %961 = vst [vmem:[%s9122_s13 + $0x5b4] sm:$0xf] %v960_v46 }
 0x109   : > { %963 = vst [vmem:[%s9122_s13 + $0x5b8] sm:$0xf] %v962_v47  ;;  %965 = vst [vmem:[%s9122_s13 + $0x5bc] sm:$0xf] %v964_v48  ;;  %v966_v49 = vld [vmem:[%s9118_s12 + $0x1700] sm:$0xf] }
 0x10a   : > { %v968_v50 = vld [vmem:[%s9118_s12 + $0x1710] sm:$0xf]  ;;  %v970_v51 = vld [vmem:[%s9118_s12 + $0x1720] sm:$0xf]  ;;  %967 = vst [vmem:[%s9122_s13 + $0x5c0] sm:$0xf] %v966_v49 }
 0x10b   : > { %969 = vst [vmem:[%s9122_s13 + $0x5c4] sm:$0xf] %v968_v50  ;;  %971 = vst [vmem:[%s9122_s13 + $0x5c8] sm:$0xf] %v970_v51  ;;  %v972_v52 = vld [vmem:[%s9118_s12 + $0x1730] sm:$0xf] }
 0x10c   : > { %v974_v53 = vld [vmem:[%s9118_s12 + $0x1740] sm:$0xf]  ;;  %v976_v54 = vld [vmem:[%s9118_s12 + $0x1750] sm:$0xf]  ;;  %973 = vst [vmem:[%s9122_s13 + $0x5cc] sm:$0xf] %v972_v52 }
 0x10d   : > { %975 = vst [vmem:[%s9122_s13 + $0x5d0] sm:$0xf] %v974_v53  ;;  %977 = vst [vmem:[%s9122_s13 + $0x5d4] sm:$0xf] %v976_v54  ;;  %v978_v55 = vld [vmem:[%s9118_s12 + $0x1760] sm:$0xf] }
 0x10e   : > { %v980_v56 = vld [vmem:[%s9118_s12 + $0x1770] sm:$0xf]  ;;  %v982_v57 = vld [vmem:[%s9118_s12 + $0x1780] sm:$0xf]  ;;  %979 = vst [vmem:[%s9122_s13 + $0x5d8] sm:$0xf] %v978_v55 }
 0x10f   : > { %981 = vst [vmem:[%s9122_s13 + $0x5dc] sm:$0xf] %v980_v56  ;;  %983 = vst [vmem:[%s9122_s13 + $0x5e0] sm:$0xf] %v982_v57  ;;  %v984_v58 = vld [vmem:[%s9118_s12 + $0x1790] sm:$0xf] }
 0x110   : > { %v986_v59 = vld [vmem:[%s9118_s12 + $0x17a0] sm:$0xf]  ;;  %v988_v60 = vld [vmem:[%s9118_s12 + $0x17b0] sm:$0xf]  ;;  %985 = vst [vmem:[%s9122_s13 + $0x5e4] sm:$0xf] %v984_v58 }
 0x111   : > { %987 = vst [vmem:[%s9122_s13 + $0x5e8] sm:$0xf] %v986_v59  ;;  %989 = vst [vmem:[%s9122_s13 + $0x5ec] sm:$0xf] %v988_v60  ;;  %v990_v61 = vld [vmem:[%s9118_s12 + $0x17c0] sm:$0xf] }
 0x112   : > { %v992_v62 = vld [vmem:[%s9118_s12 + $0x17d0] sm:$0xf]  ;;  %v994_v63 = vld [vmem:[%s9118_s12 + $0x17e0] sm:$0xf]  ;;  %991 = vst [vmem:[%s9122_s13 + $0x5f0] sm:$0xf] %v990_v61 }
 0x113   : > { %993 = vst [vmem:[%s9122_s13 + $0x5f4] sm:$0xf] %v992_v62  ;;  %995 = vst [vmem:[%s9122_s13 + $0x5f8] sm:$0xf] %v994_v63  ;;  %v996_v0 = vld [vmem:[%s9118_s12 + $0x17f0] sm:$0xf] }
 0x114   : > { %v998_v1 = vld [vmem:[%s9118_s12 + $0x1800] sm:$0xf]  ;;  %v1000_v2 = vld [vmem:[%s9118_s12 + $0x1810] sm:$0xf]  ;;  %997 = vst [vmem:[%s9122_s13 + $0x5fc] sm:$0xf] %v996_v0 }
 0x115   : > { %999 = vst [vmem:[%s9122_s13 + $0x600] sm:$0xf] %v998_v1  ;;  %1001 = vst [vmem:[%s9122_s13 + $0x604] sm:$0xf] %v1000_v2  ;;  %v1002_v3 = vld [vmem:[%s9118_s12 + $0x1820] sm:$0xf] }
 0x116   : > { %v1004_v4 = vld [vmem:[%s9118_s12 + $0x1830] sm:$0xf]  ;;  %v1006_v5 = vld [vmem:[%s9118_s12 + $0x1840] sm:$0xf]  ;;  %1003 = vst [vmem:[%s9122_s13 + $0x608] sm:$0xf] %v1002_v3 }
 0x117   : > { %1005 = vst [vmem:[%s9122_s13 + $0x60c] sm:$0xf] %v1004_v4  ;;  %1007 = vst [vmem:[%s9122_s13 + $0x610] sm:$0xf] %v1006_v5  ;;  %v1008_v6 = vld [vmem:[%s9118_s12 + $0x1850] sm:$0xf] }
 0x118   : > { %v1010_v7 = vld [vmem:[%s9118_s12 + $0x1860] sm:$0xf]  ;;  %v1012_v8 = vld [vmem:[%s9118_s12 + $0x1870] sm:$0xf]  ;;  %1009 = vst [vmem:[%s9122_s13 + $0x614] sm:$0xf] %v1008_v6 }
 0x119   : > { %1011 = vst [vmem:[%s9122_s13 + $0x618] sm:$0xf] %v1010_v7  ;;  %1013 = vst [vmem:[%s9122_s13 + $0x61c] sm:$0xf] %v1012_v8  ;;  %v1014_v9 = vld [vmem:[%s9118_s12 + $0x1880] sm:$0xf] }
 0x11a   : > { %v1016_v10 = vld [vmem:[%s9118_s12 + $0x1890] sm:$0xf]  ;;  %v1018_v11 = vld [vmem:[%s9118_s12 + $0x18a0] sm:$0xf]  ;;  %1015 = vst [vmem:[%s9122_s13 + $0x620] sm:$0xf] %v1014_v9 }
 0x11b   : > { %1017 = vst [vmem:[%s9122_s13 + $0x624] sm:$0xf] %v1016_v10  ;;  %1019 = vst [vmem:[%s9122_s13 + $0x628] sm:$0xf] %v1018_v11  ;;  %v1020_v12 = vld [vmem:[%s9118_s12 + $0x18b0] sm:$0xf] }
 0x11c   : > { %v1022_v13 = vld [vmem:[%s9118_s12 + $0x18c0] sm:$0xf]  ;;  %v1024_v14 = vld [vmem:[%s9118_s12 + $0x18d0] sm:$0xf]  ;;  %1021 = vst [vmem:[%s9122_s13 + $0x62c] sm:$0xf] %v1020_v12 }
 0x11d   : > { %1023 = vst [vmem:[%s9122_s13 + $0x630] sm:$0xf] %v1022_v13  ;;  %1025 = vst [vmem:[%s9122_s13 + $0x634] sm:$0xf] %v1024_v14  ;;  %v1026_v15 = vld [vmem:[%s9118_s12 + $0x18e0] sm:$0xf] }
 0x11e   : > { %v1028_v16 = vld [vmem:[%s9118_s12 + $0x18f0] sm:$0xf]  ;;  %v1030_v17 = vld [vmem:[%s9118_s12 + $0x1900] sm:$0xf]  ;;  %1027 = vst [vmem:[%s9122_s13 + $0x638] sm:$0xf] %v1026_v15 }
 0x11f   : > { %1029 = vst [vmem:[%s9122_s13 + $0x63c] sm:$0xf] %v1028_v16  ;;  %1031 = vst [vmem:[%s9122_s13 + $0x640] sm:$0xf] %v1030_v17  ;;  %v1032_v18 = vld [vmem:[%s9118_s12 + $0x1910] sm:$0xf] }
 0x120   : > { %v1034_v19 = vld [vmem:[%s9118_s12 + $0x1920] sm:$0xf]  ;;  %v1036_v20 = vld [vmem:[%s9118_s12 + $0x1930] sm:$0xf]  ;;  %1033 = vst [vmem:[%s9122_s13 + $0x644] sm:$0xf] %v1032_v18 }
 0x121   : > { %1035 = vst [vmem:[%s9122_s13 + $0x648] sm:$0xf] %v1034_v19  ;;  %1037 = vst [vmem:[%s9122_s13 + $0x64c] sm:$0xf] %v1036_v20  ;;  %v1038_v21 = vld [vmem:[%s9118_s12 + $0x1940] sm:$0xf] }
 0x122   : > { %v1040_v22 = vld [vmem:[%s9118_s12 + $0x1950] sm:$0xf]  ;;  %v1042_v23 = vld [vmem:[%s9118_s12 + $0x1960] sm:$0xf]  ;;  %1039 = vst [vmem:[%s9122_s13 + $0x650] sm:$0xf] %v1038_v21 }
 0x123   : > { %1041 = vst [vmem:[%s9122_s13 + $0x654] sm:$0xf] %v1040_v22  ;;  %1043 = vst [vmem:[%s9122_s13 + $0x658] sm:$0xf] %v1042_v23  ;;  %v1044_v24 = vld [vmem:[%s9118_s12 + $0x1970] sm:$0xf] }
 0x124   : > { %v1046_v25 = vld [vmem:[%s9118_s12 + $0x1980] sm:$0xf]  ;;  %v1048_v26 = vld [vmem:[%s9118_s12 + $0x1990] sm:$0xf]  ;;  %1045 = vst [vmem:[%s9122_s13 + $0x65c] sm:$0xf] %v1044_v24 }
 0x125   : > { %1047 = vst [vmem:[%s9122_s13 + $0x660] sm:$0xf] %v1046_v25  ;;  %1049 = vst [vmem:[%s9122_s13 + $0x664] sm:$0xf] %v1048_v26  ;;  %v1050_v27 = vld [vmem:[%s9118_s12 + $0x19a0] sm:$0xf] }
 0x126   : > { %v1052_v28 = vld [vmem:[%s9118_s12 + $0x19b0] sm:$0xf]  ;;  %v1054_v29 = vld [vmem:[%s9118_s12 + $0x19c0] sm:$0xf]  ;;  %1051 = vst [vmem:[%s9122_s13 + $0x668] sm:$0xf] %v1050_v27 }
 0x127   : > { %1053 = vst [vmem:[%s9122_s13 + $0x66c] sm:$0xf] %v1052_v28  ;;  %1055 = vst [vmem:[%s9122_s13 + $0x670] sm:$0xf] %v1054_v29  ;;  %v1056_v30 = vld [vmem:[%s9118_s12 + $0x19d0] sm:$0xf] }
 0x128   : > { %v1058_v31 = vld [vmem:[%s9118_s12 + $0x19e0] sm:$0xf]  ;;  %v1060_v32 = vld [vmem:[%s9118_s12 + $0x19f0] sm:$0xf]  ;;  %1057 = vst [vmem:[%s9122_s13 + $0x674] sm:$0xf] %v1056_v30 }
 0x129   : > { %1059 = vst [vmem:[%s9122_s13 + $0x678] sm:$0xf] %v1058_v31  ;;  %1061 = vst [vmem:[%s9122_s13 + $0x67c] sm:$0xf] %v1060_v32  ;;  %v1062_v33 = vld [vmem:[%s9118_s12 + $0x1a00] sm:$0xf] }
 0x12a   : > { %v1064_v34 = vld [vmem:[%s9118_s12 + $0x1a10] sm:$0xf]  ;;  %v1066_v35 = vld [vmem:[%s9118_s12 + $0x1a20] sm:$0xf]  ;;  %1063 = vst [vmem:[%s9122_s13 + $0x680] sm:$0xf] %v1062_v33 }
 0x12b   : > { %1065 = vst [vmem:[%s9122_s13 + $0x684] sm:$0xf] %v1064_v34  ;;  %1067 = vst [vmem:[%s9122_s13 + $0x688] sm:$0xf] %v1066_v35  ;;  %v1068_v36 = vld [vmem:[%s9118_s12 + $0x1a30] sm:$0xf] }
 0x12c   : > { %v1070_v37 = vld [vmem:[%s9118_s12 + $0x1a40] sm:$0xf]  ;;  %v1072_v38 = vld [vmem:[%s9118_s12 + $0x1a50] sm:$0xf]  ;;  %1069 = vst [vmem:[%s9122_s13 + $0x68c] sm:$0xf] %v1068_v36 }
 0x12d   : > { %1071 = vst [vmem:[%s9122_s13 + $0x690] sm:$0xf] %v1070_v37  ;;  %1073 = vst [vmem:[%s9122_s13 + $0x694] sm:$0xf] %v1072_v38  ;;  %v1074_v39 = vld [vmem:[%s9118_s12 + $0x1a60] sm:$0xf] }
 0x12e   : > { %v1076_v40 = vld [vmem:[%s9118_s12 + $0x1a70] sm:$0xf]  ;;  %v1078_v41 = vld [vmem:[%s9118_s12 + $0x1a80] sm:$0xf]  ;;  %1075 = vst [vmem:[%s9122_s13 + $0x698] sm:$0xf] %v1074_v39 }
 0x12f   : > { %1077 = vst [vmem:[%s9122_s13 + $0x69c] sm:$0xf] %v1076_v40  ;;  %1079 = vst [vmem:[%s9122_s13 + $0x6a0] sm:$0xf] %v1078_v41  ;;  %v1080_v42 = vld [vmem:[%s9118_s12 + $0x1a90] sm:$0xf] }
 0x130   : > { %v1082_v43 = vld [vmem:[%s9118_s12 + $0x1aa0] sm:$0xf]  ;;  %v1084_v44 = vld [vmem:[%s9118_s12 + $0x1ab0] sm:$0xf]  ;;  %1081 = vst [vmem:[%s9122_s13 + $0x6a4] sm:$0xf] %v1080_v42 }
 0x131   : > { %1083 = vst [vmem:[%s9122_s13 + $0x6a8] sm:$0xf] %v1082_v43  ;;  %1085 = vst [vmem:[%s9122_s13 + $0x6ac] sm:$0xf] %v1084_v44  ;;  %v1086_v45 = vld [vmem:[%s9118_s12 + $0x1ac0] sm:$0xf] }
 0x132   : > { %v1088_v46 = vld [vmem:[%s9118_s12 + $0x1ad0] sm:$0xf]  ;;  %v1090_v47 = vld [vmem:[%s9118_s12 + $0x1ae0] sm:$0xf]  ;;  %1087 = vst [vmem:[%s9122_s13 + $0x6b0] sm:$0xf] %v1086_v45 }
 0x133   : > { %1089 = vst [vmem:[%s9122_s13 + $0x6b4] sm:$0xf] %v1088_v46  ;;  %1091 = vst [vmem:[%s9122_s13 + $0x6b8] sm:$0xf] %v1090_v47  ;;  %v1092_v48 = vld [vmem:[%s9118_s12 + $0x1af0] sm:$0xf] }
 0x134   : > { %v1094_v49 = vld [vmem:[%s9118_s12 + $0x1b00] sm:$0xf]  ;;  %v1096_v50 = vld [vmem:[%s9118_s12 + $0x1b10] sm:$0xf]  ;;  %1093 = vst [vmem:[%s9122_s13 + $0x6bc] sm:$0xf] %v1092_v48 }
 0x135   : > { %1095 = vst [vmem:[%s9122_s13 + $0x6c0] sm:$0xf] %v1094_v49  ;;  %1097 = vst [vmem:[%s9122_s13 + $0x6c4] sm:$0xf] %v1096_v50  ;;  %v1098_v51 = vld [vmem:[%s9118_s12 + $0x1b20] sm:$0xf] }
 0x136   : > { %v1100_v52 = vld [vmem:[%s9118_s12 + $0x1b30] sm:$0xf]  ;;  %v1102_v53 = vld [vmem:[%s9118_s12 + $0x1b40] sm:$0xf]  ;;  %1099 = vst [vmem:[%s9122_s13 + $0x6c8] sm:$0xf] %v1098_v51 }
 0x137   : > { %1101 = vst [vmem:[%s9122_s13 + $0x6cc] sm:$0xf] %v1100_v52  ;;  %1103 = vst [vmem:[%s9122_s13 + $0x6d0] sm:$0xf] %v1102_v53  ;;  %v1104_v54 = vld [vmem:[%s9118_s12 + $0x1b50] sm:$0xf] }
 0x138   : > { %v1106_v55 = vld [vmem:[%s9118_s12 + $0x1b60] sm:$0xf]  ;;  %v1108_v56 = vld [vmem:[%s9118_s12 + $0x1b70] sm:$0xf]  ;;  %1105 = vst [vmem:[%s9122_s13 + $0x6d4] sm:$0xf] %v1104_v54 }
 0x139   : > { %1107 = vst [vmem:[%s9122_s13 + $0x6d8] sm:$0xf] %v1106_v55  ;;  %1109 = vst [vmem:[%s9122_s13 + $0x6dc] sm:$0xf] %v1108_v56  ;;  %v1110_v57 = vld [vmem:[%s9118_s12 + $0x1b80] sm:$0xf] }
 0x13a   : > { %v1112_v58 = vld [vmem:[%s9118_s12 + $0x1b90] sm:$0xf]  ;;  %v1114_v59 = vld [vmem:[%s9118_s12 + $0x1ba0] sm:$0xf]  ;;  %1111 = vst [vmem:[%s9122_s13 + $0x6e0] sm:$0xf] %v1110_v57 }
 0x13b   : > { %1113 = vst [vmem:[%s9122_s13 + $0x6e4] sm:$0xf] %v1112_v58  ;;  %1115 = vst [vmem:[%s9122_s13 + $0x6e8] sm:$0xf] %v1114_v59  ;;  %v1116_v60 = vld [vmem:[%s9118_s12 + $0x1bb0] sm:$0xf] }
 0x13c   : > { %v1118_v61 = vld [vmem:[%s9118_s12 + $0x1bc0] sm:$0xf]  ;;  %v1120_v62 = vld [vmem:[%s9118_s12 + $0x1bd0] sm:$0xf]  ;;  %1117 = vst [vmem:[%s9122_s13 + $0x6ec] sm:$0xf] %v1116_v60 }
 0x13d   : > { %1119 = vst [vmem:[%s9122_s13 + $0x6f0] sm:$0xf] %v1118_v61  ;;  %1121 = vst [vmem:[%s9122_s13 + $0x6f4] sm:$0xf] %v1120_v62  ;;  %v1122_v63 = vld [vmem:[%s9118_s12 + $0x1be0] sm:$0xf] }
 0x13e   : > { %v1124_v0 = vld [vmem:[%s9118_s12 + $0x1bf0] sm:$0xf]  ;;  %v1126_v1 = vld [vmem:[%s9118_s12 + $0x1c00] sm:$0xf]  ;;  %1123 = vst [vmem:[%s9122_s13 + $0x6f8] sm:$0xf] %v1122_v63 }
 0x13f   : > { %1125 = vst [vmem:[%s9122_s13 + $0x6fc] sm:$0xf] %v1124_v0  ;;  %1127 = vst [vmem:[%s9122_s13 + $0x700] sm:$0xf] %v1126_v1  ;;  %v1128_v2 = vld [vmem:[%s9118_s12 + $0x1c10] sm:$0xf] }
 0x140   : > { %v1130_v3 = vld [vmem:[%s9118_s12 + $0x1c20] sm:$0xf]  ;;  %v1132_v4 = vld [vmem:[%s9118_s12 + $0x1c30] sm:$0xf]  ;;  %1129 = vst [vmem:[%s9122_s13 + $0x704] sm:$0xf] %v1128_v2 }
 0x141   : > { %1131 = vst [vmem:[%s9122_s13 + $0x708] sm:$0xf] %v1130_v3  ;;  %1133 = vst [vmem:[%s9122_s13 + $0x70c] sm:$0xf] %v1132_v4  ;;  %v1134_v5 = vld [vmem:[%s9118_s12 + $0x1c40] sm:$0xf] }
 0x142   : > { %v1136_v6 = vld [vmem:[%s9118_s12 + $0x1c50] sm:$0xf]  ;;  %v1138_v7 = vld [vmem:[%s9118_s12 + $0x1c60] sm:$0xf]  ;;  %1135 = vst [vmem:[%s9122_s13 + $0x710] sm:$0xf] %v1134_v5 }
 0x143   : > { %1137 = vst [vmem:[%s9122_s13 + $0x714] sm:$0xf] %v1136_v6  ;;  %1139 = vst [vmem:[%s9122_s13 + $0x718] sm:$0xf] %v1138_v7  ;;  %v1140_v8 = vld [vmem:[%s9118_s12 + $0x1c70] sm:$0xf] }
 0x144   : > { %v1142_v9 = vld [vmem:[%s9118_s12 + $0x1c80] sm:$0xf]  ;;  %v1144_v10 = vld [vmem:[%s9118_s12 + $0x1c90] sm:$0xf]  ;;  %1141 = vst [vmem:[%s9122_s13 + $0x71c] sm:$0xf] %v1140_v8 }
 0x145   : > { %1143 = vst [vmem:[%s9122_s13 + $0x720] sm:$0xf] %v1142_v9  ;;  %1145 = vst [vmem:[%s9122_s13 + $0x724] sm:$0xf] %v1144_v10  ;;  %v1146_v11 = vld [vmem:[%s9118_s12 + $0x1ca0] sm:$0xf] }
 0x146   : > { %v1148_v12 = vld [vmem:[%s9118_s12 + $0x1cb0] sm:$0xf]  ;;  %v1150_v13 = vld [vmem:[%s9118_s12 + $0x1cc0] sm:$0xf]  ;;  %1147 = vst [vmem:[%s9122_s13 + $0x728] sm:$0xf] %v1146_v11 }
 0x147   : > { %1149 = vst [vmem:[%s9122_s13 + $0x72c] sm:$0xf] %v1148_v12  ;;  %1151 = vst [vmem:[%s9122_s13 + $0x730] sm:$0xf] %v1150_v13  ;;  %v1152_v14 = vld [vmem:[%s9118_s12 + $0x1cd0] sm:$0xf] }
 0x148   : > { %v1154_v15 = vld [vmem:[%s9118_s12 + $0x1ce0] sm:$0xf]  ;;  %v1156_v16 = vld [vmem:[%s9118_s12 + $0x1cf0] sm:$0xf]  ;;  %1153 = vst [vmem:[%s9122_s13 + $0x734] sm:$0xf] %v1152_v14 }
 0x149   : > { %1155 = vst [vmem:[%s9122_s13 + $0x738] sm:$0xf] %v1154_v15  ;;  %1157 = vst [vmem:[%s9122_s13 + $0x73c] sm:$0xf] %v1156_v16  ;;  %v1158_v17 = vld [vmem:[%s9118_s12 + $0x1d00] sm:$0xf] }
 0x14a   : > { %v1160_v18 = vld [vmem:[%s9118_s12 + $0x1d10] sm:$0xf]  ;;  %v1162_v19 = vld [vmem:[%s9118_s12 + $0x1d20] sm:$0xf]  ;;  %1159 = vst [vmem:[%s9122_s13 + $0x740] sm:$0xf] %v1158_v17 }
 0x14b   : > { %1161 = vst [vmem:[%s9122_s13 + $0x744] sm:$0xf] %v1160_v18  ;;  %1163 = vst [vmem:[%s9122_s13 + $0x748] sm:$0xf] %v1162_v19  ;;  %v1164_v20 = vld [vmem:[%s9118_s12 + $0x1d30] sm:$0xf] }
 0x14c   : > { %v1166_v21 = vld [vmem:[%s9118_s12 + $0x1d40] sm:$0xf]  ;;  %v1168_v22 = vld [vmem:[%s9118_s12 + $0x1d50] sm:$0xf]  ;;  %1165 = vst [vmem:[%s9122_s13 + $0x74c] sm:$0xf] %v1164_v20 }
 0x14d   : > { %1167 = vst [vmem:[%s9122_s13 + $0x750] sm:$0xf] %v1166_v21  ;;  %1169 = vst [vmem:[%s9122_s13 + $0x754] sm:$0xf] %v1168_v22  ;;  %v1170_v23 = vld [vmem:[%s9118_s12 + $0x1d60] sm:$0xf] }
 0x14e   : > { %v1172_v24 = vld [vmem:[%s9118_s12 + $0x1d70] sm:$0xf]  ;;  %v1174_v25 = vld [vmem:[%s9118_s12 + $0x1d80] sm:$0xf]  ;;  %1171 = vst [vmem:[%s9122_s13 + $0x758] sm:$0xf] %v1170_v23 }
 0x14f   : > { %1173 = vst [vmem:[%s9122_s13 + $0x75c] sm:$0xf] %v1172_v24  ;;  %1175 = vst [vmem:[%s9122_s13 + $0x760] sm:$0xf] %v1174_v25  ;;  %v1176_v26 = vld [vmem:[%s9118_s12 + $0x1d90] sm:$0xf] }
 0x150   : > { %v1178_v27 = vld [vmem:[%s9118_s12 + $0x1da0] sm:$0xf]  ;;  %v1180_v28 = vld [vmem:[%s9118_s12 + $0x1db0] sm:$0xf]  ;;  %1177 = vst [vmem:[%s9122_s13 + $0x764] sm:$0xf] %v1176_v26 }
 0x151   : > { %1179 = vst [vmem:[%s9122_s13 + $0x768] sm:$0xf] %v1178_v27  ;;  %1181 = vst [vmem:[%s9122_s13 + $0x76c] sm:$0xf] %v1180_v28  ;;  %v1182_v29 = vld [vmem:[%s9118_s12 + $0x1dc0] sm:$0xf] }
 0x152   : > { %v1184_v30 = vld [vmem:[%s9118_s12 + $0x1dd0] sm:$0xf]  ;;  %v1186_v31 = vld [vmem:[%s9118_s12 + $0x1de0] sm:$0xf]  ;;  %1183 = vst [vmem:[%s9122_s13 + $0x770] sm:$0xf] %v1182_v29 }
 0x153   : > { %1185 = vst [vmem:[%s9122_s13 + $0x774] sm:$0xf] %v1184_v30  ;;  %1187 = vst [vmem:[%s9122_s13 + $0x778] sm:$0xf] %v1186_v31  ;;  %v1188_v32 = vld [vmem:[%s9118_s12 + $0x1df0] sm:$0xf] }
 0x154   : > { %v1190_v33 = vld [vmem:[%s9118_s12 + $0x1e00] sm:$0xf]  ;;  %v1192_v34 = vld [vmem:[%s9118_s12 + $0x1e10] sm:$0xf]  ;;  %1189 = vst [vmem:[%s9122_s13 + $0x77c] sm:$0xf] %v1188_v32 }
 0x155   : > { %1191 = vst [vmem:[%s9122_s13 + $0x780] sm:$0xf] %v1190_v33  ;;  %1193 = vst [vmem:[%s9122_s13 + $0x784] sm:$0xf] %v1192_v34  ;;  %v1194_v35 = vld [vmem:[%s9118_s12 + $0x1e20] sm:$0xf] }
 0x156   : > { %v1196_v36 = vld [vmem:[%s9118_s12 + $0x1e30] sm:$0xf]  ;;  %v1198_v37 = vld [vmem:[%s9118_s12 + $0x1e40] sm:$0xf]  ;;  %1195 = vst [vmem:[%s9122_s13 + $0x788] sm:$0xf] %v1194_v35 }
 0x157   : > { %1197 = vst [vmem:[%s9122_s13 + $0x78c] sm:$0xf] %v1196_v36  ;;  %1199 = vst [vmem:[%s9122_s13 + $0x790] sm:$0xf] %v1198_v37  ;;  %v1200_v38 = vld [vmem:[%s9118_s12 + $0x1e50] sm:$0xf] }
 0x158   : > { %v1202_v39 = vld [vmem:[%s9118_s12 + $0x1e60] sm:$0xf]  ;;  %v1204_v40 = vld [vmem:[%s9118_s12 + $0x1e70] sm:$0xf]  ;;  %1201 = vst [vmem:[%s9122_s13 + $0x794] sm:$0xf] %v1200_v38 }
 0x159   : > { %1203 = vst [vmem:[%s9122_s13 + $0x798] sm:$0xf] %v1202_v39  ;;  %1205 = vst [vmem:[%s9122_s13 + $0x79c] sm:$0xf] %v1204_v40  ;;  %v1206_v41 = vld [vmem:[%s9118_s12 + $0x1e80] sm:$0xf] }
 0x15a   : > { %v1208_v42 = vld [vmem:[%s9118_s12 + $0x1e90] sm:$0xf]  ;;  %v1210_v43 = vld [vmem:[%s9118_s12 + $0x1ea0] sm:$0xf]  ;;  %1207 = vst [vmem:[%s9122_s13 + $0x7a0] sm:$0xf] %v1206_v41 }
 0x15b   : > { %1209 = vst [vmem:[%s9122_s13 + $0x7a4] sm:$0xf] %v1208_v42  ;;  %1211 = vst [vmem:[%s9122_s13 + $0x7a8] sm:$0xf] %v1210_v43  ;;  %v1212_v44 = vld [vmem:[%s9118_s12 + $0x1eb0] sm:$0xf] }
 0x15c   : > { %v1214_v45 = vld [vmem:[%s9118_s12 + $0x1ec0] sm:$0xf]  ;;  %v1216_v46 = vld [vmem:[%s9118_s12 + $0x1ed0] sm:$0xf]  ;;  %1213 = vst [vmem:[%s9122_s13 + $0x7ac] sm:$0xf] %v1212_v44 }
 0x15d   : > { %1215 = vst [vmem:[%s9122_s13 + $0x7b0] sm:$0xf] %v1214_v45  ;;  %1217 = vst [vmem:[%s9122_s13 + $0x7b4] sm:$0xf] %v1216_v46  ;;  %v1218_v47 = vld [vmem:[%s9118_s12 + $0x1ee0] sm:$0xf] }
 0x15e   : > { %v1220_v48 = vld [vmem:[%s9118_s12 + $0x1ef0] sm:$0xf]  ;;  %v1222_v49 = vld [vmem:[%s9118_s12 + $0x1f00] sm:$0xf]  ;;  %1219 = vst [vmem:[%s9122_s13 + $0x7b8] sm:$0xf] %v1218_v47 }
 0x15f   : > { %1221 = vst [vmem:[%s9122_s13 + $0x7bc] sm:$0xf] %v1220_v48  ;;  %1223 = vst [vmem:[%s9122_s13 + $0x7c0] sm:$0xf] %v1222_v49  ;;  %v1224_v50 = vld [vmem:[%s9118_s12 + $0x1f10] sm:$0xf] }
 0x160   : > { %v1226_v51 = vld [vmem:[%s9118_s12 + $0x1f20] sm:$0xf]  ;;  %v1228_v52 = vld [vmem:[%s9118_s12 + $0x1f30] sm:$0xf]  ;;  %1225 = vst [vmem:[%s9122_s13 + $0x7c4] sm:$0xf] %v1224_v50 }
 0x161   : > { %1227 = vst [vmem:[%s9122_s13 + $0x7c8] sm:$0xf] %v1226_v51  ;;  %1229 = vst [vmem:[%s9122_s13 + $0x7cc] sm:$0xf] %v1228_v52  ;;  %v1230_v53 = vld [vmem:[%s9118_s12 + $0x1f40] sm:$0xf] }
 0x162   : > { %v1232_v54 = vld [vmem:[%s9118_s12 + $0x1f50] sm:$0xf]  ;;  %v1234_v55 = vld [vmem:[%s9118_s12 + $0x1f60] sm:$0xf]  ;;  %1231 = vst [vmem:[%s9122_s13 + $0x7d0] sm:$0xf] %v1230_v53 }
 0x163   : > { %1233 = vst [vmem:[%s9122_s13 + $0x7d4] sm:$0xf] %v1232_v54  ;;  %1235 = vst [vmem:[%s9122_s13 + $0x7d8] sm:$0xf] %v1234_v55  ;;  %v1236_v56 = vld [vmem:[%s9118_s12 + $0x1f70] sm:$0xf] }
 0x164   : > { %v1238_v57 = vld [vmem:[%s9118_s12 + $0x1f80] sm:$0xf]  ;;  %v1240_v58 = vld [vmem:[%s9118_s12 + $0x1f90] sm:$0xf]  ;;  %1237 = vst [vmem:[%s9122_s13 + $0x7dc] sm:$0xf] %v1236_v56 }
 0x165   : > { %1239 = vst [vmem:[%s9122_s13 + $0x7e0] sm:$0xf] %v1238_v57  ;;  %1241 = vst [vmem:[%s9122_s13 + $0x7e4] sm:$0xf] %v1240_v58  ;;  %v1242_v59 = vld [vmem:[%s9118_s12 + $0x1fa0] sm:$0xf] }
 0x166   : > { %v1244_v60 = vld [vmem:[%s9118_s12 + $0x1fb0] sm:$0xf]  ;;  %v1246_v61 = vld [vmem:[%s9118_s12 + $0x1fc0] sm:$0xf]  ;;  %1243 = vst [vmem:[%s9122_s13 + $0x7e8] sm:$0xf] %v1242_v59 }
 0x167   : > { %1245 = vst [vmem:[%s9122_s13 + $0x7ec] sm:$0xf] %v1244_v60  ;;  %1247 = vst [vmem:[%s9122_s13 + $0x7f0] sm:$0xf] %v1246_v61  ;;  %v1248_v62 = vld [vmem:[%s9118_s12 + $0x1fd0] sm:$0xf] }
 0x168   : > { %v1250_v63 = vld [vmem:[%s9118_s12 + $0x1fe0] sm:$0xf]  ;;  %v1252_v0 = vld [vmem:[%s9118_s12 + $0x1ff0] sm:$0xf]  ;;  %1249 = vst [vmem:[%s9122_s13 + $0x7f4] sm:$0xf] %v1248_v62 }
 0x169   : > { %1251 = vst [vmem:[%s9122_s13 + $0x7f8] sm:$0xf] %v1250_v63  ;;  %1253 = vst [vmem:[%s9122_s13 + $0x7fc] sm:$0xf] %v1252_v0 }
 0x16a PF: > { %4390 = sbr.rel (!%p9106_p3) target bundleno = 370 (0x172), region = 88  ;;  %s4392_s14 = sand.u32 (%p9106_p3), 1, %s9031_s24  }
 0x16b   : > { %s7945_s15 = sshll.u32 (%p9106_p3), %s9035_s25, 3  ;;  %s7944_s16 = sshll.u32 (%p9106_p3), %s4392_s14, 5 }
 0x16c   : > { %s4396_s19 = scalar_lea.vmem (%p9106_p3), %s10676_s4, %s7945_s15  ;;  %s4394_s20 = scalar_lea.vmem (%p9106_p3), [#allocation5], %s7944_s16 }
 0x16d   : > { %v4430_v1 = vld [vmem:[%s4396_s19] sm:$0xff] (%p9106_p3) }
 0x16e   : > { %v4432_v2 = vld [vmem:[%s4396_s19 + $0x20] sm:$0xff] (%p9106_p3)  ;;  %4431 = vst [vmem:[%s4394_s20] sm:$0xff] (%p9106_p3), %v4430_v1 }
 0x16f   : > { %v4434_v3 = vld [vmem:[%s4396_s19 + $0x40] sm:$0xff] (%p9106_p3)  ;;  %4433 = vst [vmem:[%s4394_s20 + $0x8] sm:$0xff] (%p9106_p3), %v4432_v2 }
 0x170   : > { %4435 = vst [vmem:[%s4394_s20 + $0x10] sm:$0xff] (%p9106_p3), %v4434_v3  ;;  %v4436_v4 = vld [vmem:[%s4396_s19 + $0x60] sm:$0xff] (%p9106_p3) }
 0x171   : > { %4437 = vst [vmem:[%s4394_s20 + $0x18] sm:$0xff] %v4436_v4 }
 0x172 PF: > { %p7946_p5 = scmp.ge.s32.totalorder %s9035_s25, 1  ;;  %p4442_p6 = scmp.lt.s32.totalorder %s9035_s25, 5 }
 0x174   : > { %p4443_p7 = pnand %p7946_p5, %p4442_p6 }
 0x175   : > { %s4449_s21 = sand.u32 (!%p4443_p7), 1, %s9027_s23   ;;  %v10159_v5 = vld [vmem:[%s10672_s0] sm:$0xff] (!%p4443_p7)  ;;  %v10169_v7 = vld [vmem:[%s10672_s0 + $0x8] sm:$0xff] (!%p4443_p7)  ;;  %p4490_p8 = scmp.lt.s32.totalorder (!%p4443_p7), %s9092_s5, 3 }
 0x176   : > { %4446 = sbr.rel (%p4443_p7) target bundleno = 1133 (0x46d), region = 126  ;;  %v10164_v6 = vld [vmem:[%s10672_s0 + $0x80] sm:$0xff] (!%p4443_p7)  ;;  %s7947_s25 = sshll.u32 (!%p4443_p7), %s4449_s21, 11  ;;  %v10178_v9 = vld [vmem:[%s10672_s0 + $0x88] sm:$0xff] (!%p4443_p7) }
 0x177   : > { %v7950_v8 = vcombine.high (!%p4443_p7), %v10159_v5, %v10164_v6  ;;  %v7952_v10 = vcombine.high (!%p4443_p7), %v10169_v7, %v10178_v9  ;;  %s10182_s11 = scalar_lea.vmem (!%p4443_p7), [#allocation4], %s7947_s25  ;;  %v4529_v40 = vld [vmem:[%s10672_s0 + $0x100] sm:$0xff] (!%p4443_p7)  ;;  %v4530_v43 = vld [vmem:[%s10672_s0 + $0x108] sm:$0xff] (!%p4443_p7)  ;;  %v7949_v47 = vcombine.low (!%p4443_p7), %v10159_v5, %v10164_v6  ;;  %v7951_v48 = vcombine.low (!%p4443_p7), %v10169_v7, %v10178_v9  ;;  %s7948_s12 = sshll.u32 (!%p4443_p7), %s4449_s21, 5 }
 0x178   : > { %v8747_v11 = vld [vmem:[%s10182_s11 + $0x40] sm:$0xff] (!%p4443_p7)   ;;  %v8751_v15 = vld [vmem:[%s10182_s11 + $0x48] sm:$0xff] (!%p4443_p7)   ;;  %v8755_v19 = vld [vmem:[%s10182_s11 + $0x50] sm:$0xff] (!%p4443_p7)   ;;  %s4458_s13 = scalar_lea.vmem (!%p4443_p7), [#allocation5], %s7948_s12  ;;  %p8270_p9 = scmp.ne.s32.totalorder (!%p4443_p7), %s9092_s5, 0 }
 0x179   : > { %6961 = vmatprep.mubr.bf16.mxu0 (!%p4443_p7), %v7950_v8  ;;  %v8748_v12 = vld [vmem:[%s10182_s11 + $0xc0] sm:$0xff] (!%p4443_p7)   ;;  %7010 = vmatprep.mubr.bf16.mxu1 (!%p4443_p7), %v7952_v10  ;;  %v8752_v16 = vld [vmem:[%s10182_s11 + $0xc8] sm:$0xff] (!%p4443_p7)   ;;  %v8756_v20 = vld [vmem:[%s10182_s11 + $0xd0] sm:$0xff] (!%p4443_p7)  }
 0x17a   : > { %8274 = vmatprep.subr.bf16.mxu0 (!%p4443_p7), %v8747_v11  ;;  %v8749_v13 = vld [vmem:[%s10182_s11] sm:$0xff] (!%p4443_p7)   ;;  %8302 = vmatprep.subr.bf16.mxu1 (!%p4443_p7), %v8748_v12  ;;  %v8753_v17 = vld [vmem:[%s10182_s11 + $0x8] sm:$0xff] (!%p4443_p7)   ;;  %v8757_v21 = vld [vmem:[%s10182_s11 + $0x10] sm:$0xff] (!%p4443_p7)  }
 0x17b   : > { %v8750_v14 = vld [vmem:[%s10182_s11 + $0x80] sm:$0xff] (!%p4443_p7)   ;;  %8275 = vmatpush3.bf16.msra.mxu0 (!%p4443_p7), %v8749_v13  ;;  %v8754_v18 = vld [vmem:[%s10182_s11 + $0x88] sm:$0xff] (!%p4443_p7)   ;;  %v8758_v22 = vld [vmem:[%s10182_s11 + $0x90] sm:$0xff] (!%p4443_p7)  }
 0x17c   : > { %8303 = vmatpush3.bf16.msra.mxu1 (!%p4443_p7), %v8750_v14  ;;  %8276 = vmatprep.subr.bf16.mxu0 (!%p4443_p7), %v8751_v15  ;;  %v8759_v23 = vld [vmem:[%s10182_s11 + $0x58] sm:$0xff] (!%p4443_p7)   ;;  %v8763_v27 = vld [vmem:[%s10182_s11 + $0x60] sm:$0xff] (!%p4443_p7)   ;;  %v8767_v31 = vld [vmem:[%s10182_s11 + $0x68] sm:$0xff] (!%p4443_p7)  }
 0x17d   : > { %8304 = vmatprep.subr.bf16.mxu1 %v8752_v16  ;;  %v8760_v24 = vld [vmem:[%s10182_s11 + $0xd8] sm:$0xff]   ;;  %v8764_v28 = vld [vmem:[%s10182_s11 + $0xe0] sm:$0xff]   ;;  %v8768_v32 = vld [vmem:[%s10182_s11 + $0xe8] sm:$0xff]   ;;  %s4491_s28 = scalar_select %p4490_p8, %s9092_s5, 3 }
 0x17e   : > { %v8761_v25 = vld [vmem:[%s10182_s11 + $0x18] sm:$0xff]   ;;  %v8765_v29 = vld [vmem:[%s10182_s11 + $0x20] sm:$0xff]   ;;  %v8769_v33 = vld [vmem:[%s10182_s11 + $0x28] sm:$0xff]   ;;  %vm7798_vm4 = vcmask (!%p8270_p9), 7168  }
 0x17f   : > { %8277 = vmatpush3.bf16.msra.mxu0 %v8753_v17  ;;  %v8762_v26 = vld [vmem:[%s10182_s11 + $0x98] sm:$0xff]   ;;  %v8766_v30 = vld [vmem:[%s10182_s11 + $0xa0] sm:$0xff]   ;;  %v8770_v34 = vld [vmem:[%s10182_s11 + $0xa8] sm:$0xff]   ;;  %s4492_s8 = scalar_lea.vmem %s10674_s2, %s4491_s28  ;;  %s4495_s10 = scalar_lea.vmem %s10675_s3, %s4491_s28 }
 0x180   : > { %8305 = vmatpush3.bf16.msra.mxu1 %v8754_v18  ;;  %8278 = vmatprep.subr.bf16.mxu0 %v8755_v19  ;;  %v8771_v35 = vld [vmem:[%s10182_s11 + $0x70] sm:$0xff]   ;;  %v8775_v39 = vld [vmem:[%s10182_s11 + $0x78] sm:$0xff]   ;;  %v4546_v44 = vld [vmem:[%s10672_s0 + $0x188] sm:$0xff] }
 0x181   : > { %8306 = vmatprep.subr.bf16.mxu1 %v8756_v20  ;;  %v8772_v36 = vld [vmem:[%s10182_s11 + $0xf0] sm:$0xff]   ;;  %v4545_v41 = vld [vmem:[%s10672_s0 + $0x180] sm:$0xff]  ;;  %v7984_v53 = vcombine.high %v4530_v43, %v4546_v44  ;;  %v8783_v55 = vld [vmem:[%s10182_s11 + $0x148] sm:$0xff]   ;;  %v7983_v61 = vcombine.low %v4530_v43, %v4546_v44 }
 0x182   : > { %v8773_v37 = vld [vmem:[%s10182_s11 + $0x30] sm:$0xff]   ;;  %v8776_v42 = vld [vmem:[%s10182_s11 + $0xf8] sm:$0xff]   ;;  %v8779_v49 = vld [vmem:[%s10182_s11 + $0x140] sm:$0xff]   ;;  %v7982_v51 = vcombine.high %v4529_v40, %v4545_v41  ;;  %v7981_v59 = vcombine.low %v4529_v40, %v4545_v41 }
 0x183   : > { %8279 = vmatpush3.bf16.msra.mxu0 %v8757_v21  ;;  %v8774_v38 = vld [vmem:[%s10182_s11 + $0xb0] sm:$0xff]   ;;  %v8777_v45 = vld [vmem:[%s10182_s11 + $0x38] sm:$0xff]   ;;  %v8780_v50 = vld [vmem:[%s10182_s11 + $0x1c0] sm:$0xff]  }
 0x184   : > { %8307 = vmatpush3.bf16.msra.mxu1 %v8758_v22  ;;  %8280 = vmatprep.subr.bf16.mxu0 %v8759_v23  ;;  %v8778_v46 = vld [vmem:[%s10182_s11 + $0xb8] sm:$0xff]   ;;  %v8781_v52 = vld [vmem:[%s10182_s11 + $0x100] sm:$0xff]   ;;  %v8784_v56 = vld [vmem:[%s10182_s11 + $0x1c8] sm:$0xff]  }
 0x185   : > { %8308 = vmatprep.subr.bf16.mxu1 %v8760_v24  ;;  %v8782_v54 = vld [vmem:[%s10182_s11 + $0x180] sm:$0xff]   ;;  %v8785_v57 = vld [vmem:[%s10182_s11 + $0x108] sm:$0xff]   ;;  %v8787_v60 = vld [vmem:[%s10182_s11 + $0x150] sm:$0xff]  }
 0x186   : > { %v8786_v58 = vld [vmem:[%s10182_s11 + $0x188] sm:$0xff]   ;;  %v8788_v62 = vld [vmem:[%s10182_s11 + $0x1d0] sm:$0xff]   ;;  %v8791_v1 = vld [vmem:[%s10182_s11 + $0x158] sm:$0xff]  }
 0x187   : > { %8281 = vmatpush3.bf16.msra.mxu0 %v8761_v25  ;;  %v8789_v63 = vld [vmem:[%s10182_s11 + $0x110] sm:$0xff]   ;;  %v8792_v2 = vld [vmem:[%s10182_s11 + $0x1d8] sm:$0xff]   ;;  %v8795_v5 = vld [vmem:[%s10182_s11 + $0x160] sm:$0xff]  }
 0x188   : > { %8309 = vmatpush3.bf16.msra.mxu1 %v8762_v26  ;;  %8282 = vmatprep.subr.bf16.mxu0 %v8763_v27  ;;  %v8790_v0 = vld [vmem:[%s10182_s11 + $0x190] sm:$0xff]   ;;  %v8793_v3 = vld [vmem:[%s10182_s11 + $0x118] sm:$0xff]   ;;  %v8796_v6 = vld [vmem:[%s10182_s11 + $0x1e0] sm:$0xff]  }
 0x189   : > { %8310 = vmatprep.subr.bf16.mxu1 %v8764_v28  ;;  %v8794_v4 = vld [vmem:[%s10182_s11 + $0x198] sm:$0xff]   ;;  %v8797_v7 = vld [vmem:[%s10182_s11 + $0x120] sm:$0xff]   ;;  %v8799_v9 = vld [vmem:[%s10182_s11 + $0x168] sm:$0xff]  }
 0x18a   : > { %v8798_v8 = vld [vmem:[%s10182_s11 + $0x1a0] sm:$0xff]   ;;  %v8800_v10 = vld [vmem:[%s10182_s11 + $0x1e8] sm:$0xff]   ;;  %v8803_v13 = vld [vmem:[%s10182_s11 + $0x170] sm:$0xff]  }
 0x18b   : > { %8283 = vmatpush3.bf16.msra.mxu0 %v8765_v29  ;;  %v8801_v11 = vld [vmem:[%s10182_s11 + $0x128] sm:$0xff]   ;;  %v8804_v14 = vld [vmem:[%s10182_s11 + $0x1f0] sm:$0xff]   ;;  %v8807_v17 = vld [vmem:[%s10182_s11 + $0x178] sm:$0xff]  }
 0x18c   : > { %8311 = vmatpush3.bf16.msra.mxu1 %v8766_v30  ;;  %8284 = vmatprep.subr.bf16.mxu0 %v8767_v31  ;;  %v8802_v12 = vld [vmem:[%s10182_s11 + $0x1a8] sm:$0xff]   ;;  %v8805_v15 = vld [vmem:[%s10182_s11 + $0x130] sm:$0xff]   ;;  %v8808_v19 = vld [vmem:[%s10182_s11 + $0x1f8] sm:$0xff]  }
 0x18d   : > { %8312 = vmatprep.subr.bf16.mxu1 %v8768_v32  ;;  %v8806_v16 = vld [vmem:[%s10182_s11 + $0x1b0] sm:$0xff]   ;;  %v8809_v20 = vld [vmem:[%s10182_s11 + $0x138] sm:$0xff]   ;;  %v8811_v29 = vld [vmem:[%s10182_s11 + $0x240] sm:$0xff]  }
 0x18e   : > { %v4499_v18 = vld [vmem:[%s10672_s0 + $0x10] sm:$0xff]  ;;  %v8810_v21 = vld [vmem:[%s10182_s11 + $0x1b8] sm:$0xff]   ;;  %v8812_v30 = vld [vmem:[%s10182_s11 + $0x2c0] sm:$0xff]  }
 0x18f   : > { %8285 = vmatpush3.bf16.msra.mxu0 %v8769_v33  ;;  %v4515_v22 = vld [vmem:[%s10672_s0 + $0x90] sm:$0xff]  ;;  %v4500_v23 = vld [vmem:[%s10672_s0 + $0x18] sm:$0xff]  ;;  %v8813_v31 = vld [vmem:[%s10182_s11 + $0x200] sm:$0xff]  }
 0x190   : > { %8313 = vmatpush3.bf16.msra.mxu1 %v8770_v34  ;;  %8286 = vmatprep.subr.bf16.mxu0 %v8771_v35  ;;  %v4516_v24 = vld [vmem:[%s10672_s0 + $0x98] sm:$0xff]  ;;  %v7953_v25 = vcombine.low %v4499_v18, %v4515_v22  ;;  %v7954_v26 = vcombine.high %v4499_v18, %v4515_v22  ;;  %v8814_v32 = vld [vmem:[%s10182_s11 + $0x280] sm:$0xff]   ;;  %v8815_v33 = vld [vmem:[%s10182_s11 + $0x248] sm:$0xff]  }
 0x191   : > { %8314 = vmatprep.subr.bf16.mxu1 %v8772_v36  ;;  %v7955_v27 = vcombine.low %v4500_v23, %v4516_v24  ;;  %v7956_v28 = vcombine.high %v4500_v23, %v4516_v24  ;;  %v8816_v34 = vld [vmem:[%s10182_s11 + $0x2c8] sm:$0xff]   ;;  %v8819_v41 = vld [vmem:[%s10182_s11 + $0x250] sm:$0xff]   ;;  %v4549_v22 = vld [vmem:[%s10672_s0 + $0x1a0] sm:$0xff] }
 0x192   : > { %v8817_v35 = vld [vmem:[%s10182_s11 + $0x208] sm:$0xff]   ;;  %v4532_v43 = vld [vmem:[%s10672_s0 + $0x118] sm:$0xff] }
 0x193   : > { %8287 = vmatpush3.bf16.msra.mxu0 %v8773_v37  ;;  %v8818_v36 = vld [vmem:[%s10182_s11 + $0x288] sm:$0xff]   ;;  %v4548_v44 = vld [vmem:[%s10672_s0 + $0x198] sm:$0xff] }
 0x194   : > { %8315 = vmatpush3.bf16.msra.mxu1 %v8774_v38  ;;  %8288 = vmatprep.subr.bf16.mxu0 %v8775_v39  ;;  %v4531_v37 = vld [vmem:[%s10672_s0 + $0x110] sm:$0xff] }
 0x195   : > { %8316 = vmatprep.subr.bf16.mxu1 %v8776_v42  ;;  %v4547_v38 = vld [vmem:[%s10672_s0 + $0x190] sm:$0xff] }
 0x196   : > { %v7986_v39 = vcombine.high %v4531_v37, %v4547_v38  ;;  %v7985_v40 = vcombine.low %v4531_v37, %v4547_v38  ;;  %v8820_v42 = vld [vmem:[%s10182_s11 + $0x2d0] sm:$0xff]   ;;  %v8848_v18 = vld [vmem:[%s10182_s11 + $0x3c8] sm:$0xff]   ;;  %v8859_v37 = vld [vmem:[%s10182_s11 + $0x360] sm:$0xff]  }
 0x197   : > { %8289 = vmatpush3.bf16.msra.mxu0 %v8777_v45  ;;  %v7988_v45 = vcombine.high %v4532_v43, %v4548_v44  ;;  %v8860_v38 = vld [vmem:[%s10182_s11 + $0x3e0] sm:$0xff]  }
 0x198   : > { %8317 = vmatpush3.bf16.msra.mxu1 %v8778_v46  ;;  %8330 = vmatprep.subr.bf16.mxu0 %v8779_v49  ;;  %v8821_v46 = vld [vmem:[%s10182_s11 + $0x210] sm:$0xff]   ;;  %v8823_v49 = vld [vmem:[%s10182_s11 + $0x258] sm:$0xff]  }
 0x199   : > { %8358 = vmatprep.subr.bf16.mxu1 %v8780_v50  ;;  %v8824_v50 = vld [vmem:[%s10182_s11 + $0x2d8] sm:$0xff]  }
 0x19a   : > { %6962 = vmatmul.mubr.bf16.vlgmr.msra.gmra.mrb[0].mxu0 %v7949_v47  ;;  %v7987_v47 = vcombine.low %v4532_v43, %v4548_v44  ;;  %v8865_v43 = vld [vmem:[%s10182_s11 + $0x328] sm:$0xff]  }
 0x19b   : > { %7011 = vmatmul.mubr.bf16.vlgmr.msra.gmra.mrb[0].mxu1 %v7951_v48  ;;  %8331 = vmatpush3.bf16.msra.mxu0 %v8781_v52  ;;  %v8822_v48 = vld [vmem:[%s10182_s11 + $0x290] sm:$0xff]   ;;  %v8826_v52 = vld [vmem:[%s10182_s11 + $0x298] sm:$0xff]   ;;  %v8866_v44 = vld [vmem:[%s10182_s11 + $0x3a8] sm:$0xff]  }
 0x19c   : > { %8359 = vmatpush3.bf16.msra.mxu1 %v8782_v54  ;;  %6969 = vmatprep.mubr.bf16.mxu0 %v7982_v51  ;;  %v8825_v51 = vld [vmem:[%s10182_s11 + $0x218] sm:$0xff]   ;;  %v8828_v54 = vld [vmem:[%s10182_s11 + $0x2e0] sm:$0xff]  }
 0x19d   : > { %8332 = vmatprep.subr.bf16.mxu0 %v8783_v55  ;;  %7018 = vmatprep.mubr.bf16.mxu1 %v7984_v53  ;;  %v8827_v53 = vld [vmem:[%s10182_s11 + $0x260] sm:$0xff]  }
 0x19e   : > { %8360 = vmatprep.subr.bf16.mxu1 %v8784_v56  ;;  %v8829_v55 = vld [vmem:[%s10182_s11 + $0x220] sm:$0xff]  }
 0x19f   : > { %8333 = vmatpush3.bf16.msra.mxu0 %v8785_v57  ;;  %v8830_v56 = vld [vmem:[%s10182_s11 + $0x2a0] sm:$0xff]   ;;  %v8831_v57 = vld [vmem:[%s10182_s11 + $0x268] sm:$0xff]  }
 0x1a0   : > { %8361 = vmatpush3.bf16.msra.mxu1 %v8786_v58  ;;  %8334 = vmatprep.subr.bf16.mxu0 %v8787_v60  ;;  %v8832_v58 = vld [vmem:[%s10182_s11 + $0x2e8] sm:$0xff]  }
 0x1a1   : > { %8362 = vmatprep.subr.bf16.mxu1 %v8788_v62  ;;  %v8834_v60 = vld [vmem:[%s10182_s11 + $0x2a8] sm:$0xff]   ;;  %v8836_v62 = vld [vmem:[%s10182_s11 + $0x2f0] sm:$0xff]  }
 0x1a2   : > { %6970 = vmatmul.mubr.bf16.gmra.mrb[4].mxu0 %v7981_v59  ;;  %v8833_v59 = vld [vmem:[%s10182_s11 + $0x228] sm:$0xff]  }
 0x1a3   : > { %8335 = vmatpush3.bf16.msra.mxu0 %v8789_v63  ;;  %7019 = vmatmul.mubr.bf16.gmra.mrb[4].mxu1 %v7983_v61  ;;  %v8835_v61 = vld [vmem:[%s10182_s11 + $0x270] sm:$0xff]  }
 0x1a4   : > { %8363 = vmatpush3.bf16.msra.mxu1 %v8790_v0  ;;  %8336 = vmatprep.subr.bf16.mxu0 %v8791_v1  ;;  %v8837_v63 = vld [vmem:[%s10182_s11 + $0x230] sm:$0xff]   ;;  %v8839_v1 = vld [vmem:[%s10182_s11 + $0x278] sm:$0xff]  }
 0x1a5   : > { %8364 = vmatprep.subr.bf16.mxu1 %v8792_v2  ;;  %7059 = vmatprep.mubr.bf16.mxu0 %v7954_v26  ;;  %v8838_v0 = vld [vmem:[%s10182_s11 + $0x2b0] sm:$0xff]   ;;  %v8840_v2 = vld [vmem:[%s10182_s11 + $0x2f8] sm:$0xff]  }
 0x1a6   : > { %7108 = vmatprep.mubr.bf16.mxu1 %v7956_v28  ;;  %v8852_v26 = vld [vmem:[%s10182_s11 + $0x3d0] sm:$0xff]   ;;  %v4550_v28 = vld [vmem:[%s10672_s0 + $0x1a8] sm:$0xff] }
 0x1a7   : > { %8337 = vmatpush3.bf16.msra.mxu0 %v8793_v3  ;;  %v8841_v3 = vld [vmem:[%s10182_s11 + $0x238] sm:$0xff]  }
 0x1a8   : > { %8365 = vmatpush3.bf16.msra.mxu1 %v8794_v4  ;;  %8338 = vmatprep.subr.bf16.mxu0 %v8795_v5  ;;  %v8842_v4 = vld [vmem:[%s10182_s11 + $0x2b8] sm:$0xff]  }
 0x1a9   : > { %8366 = vmatprep.subr.bf16.mxu1 %v8796_v6  ;;  %v4501_v5 = vld [vmem:[%s10672_s0 + $0x20] sm:$0xff] }
 0x1aa   : > { %v4517_v6 = vld [vmem:[%s10672_s0 + $0xa0] sm:$0xff] }
 0x1ab   : > { %8339 = vmatpush3.bf16.msra.mxu0 %v8797_v7  ;;  %v7957_v7 = vcombine.low %v4501_v5, %v4517_v6 }
 0x1ac   : > { %8367 = vmatpush3.bf16.msra.mxu1 %v8798_v8  ;;  %8340 = vmatprep.subr.bf16.mxu0 %v8799_v9  ;;  %v7958_v8 = vcombine.high %v4501_v5, %v4517_v6  ;;  %v4502_v9 = vld [vmem:[%s10672_s0 + $0x28] sm:$0xff]  ;;  %v4535_v5 = vld [vmem:[%s10672_s0 + $0x130] sm:$0xff] }
 0x1ad   : > { %8368 = vmatprep.subr.bf16.mxu1 %v8800_v10  ;;  %v4518_v10 = vld [vmem:[%s10672_s0 + $0xa8] sm:$0xff]  ;;  %v4551_v6 = vld [vmem:[%s10672_s0 + $0x1b0] sm:$0xff] }
 0x1af   : > { %8341 = vmatpush3.bf16.msra.mxu0 %v8801_v11  ;;  %v7959_v11 = vcombine.low %v4502_v9, %v4518_v10 }
 0x1b0   : > { %8369 = vmatpush3.bf16.msra.mxu1 %v8802_v12  ;;  %8342 = vmatprep.subr.bf16.mxu0 %v8803_v13  ;;  %v7960_v12 = vcombine.high %v4502_v9, %v4518_v10  ;;  %v8843_v13 = vld [vmem:[%s10182_s11 + $0x340] sm:$0xff]   ;;  %v8883_v9 = vld [vmem:[%s10182_s11 + $0x450] sm:$0xff]  }
 0x1b1   : > { %8370 = vmatprep.subr.bf16.mxu1 %v8804_v14  ;;  %v8844_v14 = vld [vmem:[%s10182_s11 + $0x3c0] sm:$0xff]   ;;  %v8884_v10 = vld [vmem:[%s10182_s11 + $0x4d0] sm:$0xff]  }
 0x1b3   : > { %8343 = vmatpush3.bf16.msra.mxu0 %v8805_v15  ;;  %v8845_v15 = vld [vmem:[%s10182_s11 + $0x300] sm:$0xff]  }
 0x1b4   : > { %8371 = vmatpush3.bf16.msra.mxu1 %v8806_v16  ;;  %8344 = vmatprep.subr.bf16.mxu0 %v8807_v17  ;;  %v8846_v16 = vld [vmem:[%s10182_s11 + $0x380] sm:$0xff]   ;;  %v8847_v17 = vld [vmem:[%s10182_s11 + $0x348] sm:$0xff]  }
 0x1b5   : > { %8372 = vmatprep.subr.bf16.mxu1 %v8808_v19  ;;  %v8849_v19 = vld [vmem:[%s10182_s11 + $0x308] sm:$0xff]  }
 0x1b7   : > { %8345 = vmatpush3.bf16.msra.mxu0 %v8809_v20  ;;  %v8850_v20 = vld [vmem:[%s10182_s11 + $0x388] sm:$0xff]  }
 0x1b8   : > { %8373 = vmatpush3.bf16.msra.mxu1 %v8810_v21  ;;  %8386 = vmatprep.subr.bf16.mxu0 %v8811_v29  ;;  %v4533_v21 = vld [vmem:[%s10672_s0 + $0x120] sm:$0xff] }
 0x1b9   : > { %8414 = vmatprep.subr.bf16.mxu1 %v8812_v30  ;;  %v7990_v23 = vcombine.high %v4533_v21, %v4549_v22  ;;  %v7989_v24 = vcombine.low %v4533_v21, %v4549_v22  ;;  %v8853_v30 = vld [vmem:[%s10182_s11 + $0x310] sm:$0xff]   ;;  %v8891_v21 = vld [vmem:[%s10182_s11 + $0x460] sm:$0xff]  }
 0x1ba   : > { %7060 = vmatmul.mubr.bf16.vlgmr.msra.gmra.mrb[8].mxu0 %v7953_v25  ;;  %v8851_v25 = vld [vmem:[%s10182_s11 + $0x350] sm:$0xff]   ;;  %v8892_v22 = vld [vmem:[%s10182_s11 + $0x4e0] sm:$0xff]  }
 0x1bb   : > { %7109 = vmatmul.mubr.bf16.vlgmr.msra.gmra.mrb[8].mxu1 %v7955_v27  ;;  %8387 = vmatpush3.bf16.msra.mxu0 %v8813_v31  ;;  %v4534_v27 = vld [vmem:[%s10672_s0 + $0x128] sm:$0xff] }
 0x1bc   : > { %8415 = vmatpush3.bf16.msra.mxu1 %v8814_v32  ;;  %8388 = vmatprep.subr.bf16.mxu0 %v8815_v33  ;;  %v7992_v29 = vcombine.high %v4534_v27, %v4550_v28  ;;  %v7991_v31 = vcombine.low %v4534_v27, %v4550_v28  ;;  %v8854_v32 = vld [vmem:[%s10182_s11 + $0x390] sm:$0xff]   ;;  %v8855_v33 = vld [vmem:[%s10182_s11 + $0x358] sm:$0xff]   ;;  %v8897_v27 = vld [vmem:[%s10182_s11 + $0x428] sm:$0xff]  }
 0x1bd   : > { %8416 = vmatprep.subr.bf16.mxu1 %v8816_v34  ;;  %7067 = vmatprep.mubr.bf16.mxu0 %v7986_v39  ;;  %v8856_v34 = vld [vmem:[%s10182_s11 + $0x3d8] sm:$0xff]   ;;  %v8861_v39 = vld [vmem:[%s10182_s11 + $0x320] sm:$0xff]   ;;  %v8898_v28 = vld [vmem:[%s10182_s11 + $0x4a8] sm:$0xff]  }
 0x1be   : > { %7116 = vmatprep.mubr.bf16.mxu1 %v7988_v45  ;;  %v8867_v45 = vld [vmem:[%s10182_s11 + $0x370] sm:$0xff]  }
 0x1bf   : > { %8389 = vmatpush3.bf16.msra.mxu0 %v8817_v35  ;;  %v8857_v35 = vld [vmem:[%s10182_s11 + $0x318] sm:$0xff]  }
 0x1c0   : > { %8417 = vmatpush3.bf16.msra.mxu1 %v8818_v36  ;;  %8390 = vmatprep.subr.bf16.mxu0 %v8819_v41  ;;  %v8858_v36 = vld [vmem:[%s10182_s11 + $0x398] sm:$0xff]   ;;  %v8863_v41 = vld [vmem:[%s10182_s11 + $0x368] sm:$0xff]  }
 0x1c1   : > { %8418 = vmatprep.subr.bf16.mxu1 %v8820_v42  ;;  %v8864_v42 = vld [vmem:[%s10182_s11 + $0x3e8] sm:$0xff]  }
 0x1c2   : > { %7068 = vmatmul.mubr.bf16.gmra.mrb[12].mxu0 %v7985_v40  ;;  %v8862_v40 = vld [vmem:[%s10182_s11 + $0x3a0] sm:$0xff]  }
 0x1c3   : > { %8391 = vmatpush3.bf16.msra.mxu0 %v8821_v46  ;;  %7117 = vmatmul.mubr.bf16.gmra.mrb[12].mxu1 %v7987_v47  ;;  %v8868_v46 = vld [vmem:[%s10182_s11 + $0x3f0] sm:$0xff]  }
 0x1c4   : > { %8419 = vmatpush3.bf16.msra.mxu1 %v8822_v48  ;;  %8392 = vmatprep.subr.bf16.mxu0 %v8823_v49  ;;  %v8869_v47 = vld [vmem:[%s10182_s11 + $0x330] sm:$0xff]   ;;  %v8871_v49 = vld [vmem:[%s10182_s11 + $0x378] sm:$0xff]  }
 0x1c5   : > { %8420 = vmatprep.subr.bf16.mxu1 %v8824_v50  ;;  %7157 = vmatprep.mubr.bf16.mxu0 %v7958_v8  ;;  %v8870_v48 = vld [vmem:[%s10182_s11 + $0x3b0] sm:$0xff]   ;;  %v8872_v50 = vld [vmem:[%s10182_s11 + $0x3f8] sm:$0xff]   ;;  %v7993_v8 = vcombine.low %v4535_v5, %v4551_v6 }
 0x1c6   : > { %7206 = vmatprep.mubr.bf16.mxu1 %v7960_v12  ;;  %v4552_v12 = vld [vmem:[%s10672_s0 + $0x1b8] sm:$0xff] }
 0x1c7   : > { %8393 = vmatpush3.bf16.msra.mxu0 %v8825_v51  ;;  %v8873_v51 = vld [vmem:[%s10182_s11 + $0x338] sm:$0xff]  }
 0x1c8   : > { %8421 = vmatpush3.bf16.msra.mxu1 %v8826_v52  ;;  %8394 = vmatprep.subr.bf16.mxu0 %v8827_v53  ;;  %v8874_v52 = vld [vmem:[%s10182_s11 + $0x3b8] sm:$0xff]   ;;  %v4503_v53 = vld [vmem:[%s10672_s0 + $0x30] sm:$0xff] }
 0x1c9   : > { %8422 = vmatprep.subr.bf16.mxu1 %v8828_v54  ;;  %v4519_v54 = vld [vmem:[%s10672_s0 + $0xb0] sm:$0xff] }
 0x1cb   : > { %8395 = vmatpush3.bf16.msra.mxu0 %v8829_v55  ;;  %v4504_v55 = vld [vmem:[%s10672_s0 + $0x38] sm:$0xff] }
 0x1cc   : > { %8423 = vmatpush3.bf16.msra.mxu1 %v8830_v56  ;;  %8396 = vmatprep.subr.bf16.mxu0 %v8831_v57  ;;  %v7961_v56 = vcombine.low %v4503_v53, %v4519_v54  ;;  %v7962_v57 = vcombine.high %v4503_v53, %v4519_v54  ;;  %v4537_v53 = vld [vmem:[%s10672_s0 + $0x140] sm:$0xff] }
 0x1cd   : > { %8424 = vmatprep.subr.bf16.mxu1 %v8832_v58  ;;  %v4520_v58 = vld [vmem:[%s10672_s0 + $0xb8] sm:$0xff]  ;;  %v4553_v54 = vld [vmem:[%s10672_s0 + $0x1c0] sm:$0xff] }
 0x1cf   : > { %8397 = vmatpush3.bf16.msra.mxu0 %v8833_v59  ;;  %v7963_v59 = vcombine.low %v4504_v55, %v4520_v58 }
 0x1d0   : > { %8425 = vmatpush3.bf16.msra.mxu1 %v8834_v60  ;;  %8398 = vmatprep.subr.bf16.mxu0 %v8835_v61  ;;  %v7964_v60 = vcombine.high %v4504_v55, %v4520_v58  ;;  %v8875_v61 = vld [vmem:[%s10182_s11 + $0x440] sm:$0xff]   ;;  %v7998_v55 = vcombine.high %v4537_v53, %v4553_v54  ;;  %v8916_v58 = vld [vmem:[%s10182_s11 + $0x5d0] sm:$0xff]  }
 0x1d1   : > { %8426 = vmatprep.subr.bf16.mxu1 %v8836_v62  ;;  %v8876_v62 = vld [vmem:[%s10182_s11 + $0x4c0] sm:$0xff]  }
 0x1d3   : > { %8399 = vmatpush3.bf16.msra.mxu0 %v8837_v63  ;;  %v8877_v63 = vld [vmem:[%s10182_s11 + $0x400] sm:$0xff]  }
 0x1d4   : > { %8427 = vmatpush3.bf16.msra.mxu1 %v8838_v0  ;;  %8400 = vmatprep.subr.bf16.mxu0 %v8839_v1  ;;  %v8878_v0 = vld [vmem:[%s10182_s11 + $0x480] sm:$0xff]   ;;  %v8879_v1 = vld [vmem:[%s10182_s11 + $0x448] sm:$0xff]  }
 0x1d5   : > { %8428 = vmatprep.subr.bf16.mxu1 %v8840_v2  ;;  %v8880_v2 = vld [vmem:[%s10182_s11 + $0x4c8] sm:$0xff]  }
 0x1d7   : > { %8401 = vmatpush3.bf16.msra.mxu0 %v8841_v3  ;;  %v8881_v3 = vld [vmem:[%s10182_s11 + $0x408] sm:$0xff]  }
 0x1d8   : > { %8429 = vmatpush3.bf16.msra.mxu1 %v8842_v4  ;;  %8442 = vmatprep.subr.bf16.mxu0 %v8843_v13  ;;  %v8882_v4 = vld [vmem:[%s10182_s11 + $0x488] sm:$0xff]  }
 0x1d9   : > { %8470 = vmatprep.subr.bf16.mxu1 %v8844_v14  ;;  %v8885_v14 = vld [vmem:[%s10182_s11 + $0x410] sm:$0xff]  }
 0x1da   : > { %7158 = vmatmul.mubr.bf16.vlgmr.msra.gmra.mrb[16].mxu0 %v7957_v7  ;;  %v7994_v7 = vcombine.high %v4535_v5, %v4551_v6  ;;  %v8923_v5 = vld [vmem:[%s10182_s11 + $0x560] sm:$0xff]  }
 0x1db   : > { %7207 = vmatmul.mubr.bf16.vlgmr.msra.gmra.mrb[16].mxu1 %v7959_v11  ;;  %8443 = vmatpush3.bf16.msra.mxu0 %v8845_v15  ;;  %v4536_v11 = vld [vmem:[%s10672_s0 + $0x138] sm:$0xff]  ;;  %v8924_v6 = vld [vmem:[%s10182_s11 + $0x5e0] sm:$0xff]  }
 0x1dc   : > { %8471 = vmatpush3.bf16.msra.mxu1 %v8846_v16  ;;  %8444 = vmatprep.subr.bf16.mxu0 %v8847_v17  ;;  %v7996_v13 = vcombine.high %v4536_v11, %v4552_v12  ;;  %v7995_v15 = vcombine.low %v4536_v11, %v4552_v12  ;;  %v8886_v16 = vld [vmem:[%s10182_s11 + $0x490] sm:$0xff]   ;;  %v8887_v17 = vld [vmem:[%s10182_s11 + $0x458] sm:$0xff]   ;;  %v8929_v11 = vld [vmem:[%s10182_s11 + $0x528] sm:$0xff]  }
 0x1dd   : > { %8472 = vmatprep.subr.bf16.mxu1 %v8848_v18  ;;  %7165 = vmatprep.mubr.bf16.mxu0 %v7990_v23  ;;  %v8888_v18 = vld [vmem:[%s10182_s11 + $0x4d8] sm:$0xff]   ;;  %v8893_v23 = vld [vmem:[%s10182_s11 + $0x420] sm:$0xff]   ;;  %v8930_v12 = vld [vmem:[%s10182_s11 + $0x5a8] sm:$0xff]  }
 0x1de   : > { %7214 = vmatprep.mubr.bf16.mxu1 %v7992_v29  ;;  %v8899_v29 = vld [vmem:[%s10182_s11 + $0x470] sm:$0xff]  }
 0x1df   : > { %8445 = vmatpush3.bf16.msra.mxu0 %v8849_v19  ;;  %v8889_v19 = vld [vmem:[%s10182_s11 + $0x418] sm:$0xff]  }
 0x1e0   : > { %8473 = vmatpush3.bf16.msra.mxu1 %v8850_v20  ;;  %8446 = vmatprep.subr.bf16.mxu0 %v8851_v25  ;;  %v8890_v20 = vld [vmem:[%s10182_s11 + $0x498] sm:$0xff]   ;;  %v8895_v25 = vld [vmem:[%s10182_s11 + $0x468] sm:$0xff]  }
 0x1e1   : > { %8474 = vmatprep.subr.bf16.mxu1 %v8852_v26  ;;  %v8896_v26 = vld [vmem:[%s10182_s11 + $0x4e8] sm:$0xff]  }
 0x1e2   : > { %7166 = vmatmul.mubr.bf16.gmra.mrb[20].mxu0 %v7989_v24  ;;  %v8894_v24 = vld [vmem:[%s10182_s11 + $0x4a0] sm:$0xff]  }
 0x1e3   : > { %8447 = vmatpush3.bf16.msra.mxu0 %v8853_v30  ;;  %7215 = vmatmul.mubr.bf16.gmra.mrb[20].mxu1 %v7991_v31  ;;  %v8900_v30 = vld [vmem:[%s10182_s11 + $0x4f0] sm:$0xff]  }
 0x1e4   : > { %8475 = vmatpush3.bf16.msra.mxu1 %v8854_v32  ;;  %8448 = vmatprep.subr.bf16.mxu0 %v8855_v33  ;;  %v8901_v31 = vld [vmem:[%s10182_s11 + $0x430] sm:$0xff]   ;;  %v8903_v33 = vld [vmem:[%s10182_s11 + $0x478] sm:$0xff]  }
 0x1e5   : > { %8476 = vmatprep.subr.bf16.mxu1 %v8856_v34  ;;  %7255 = vmatprep.mubr.bf16.mxu0 %v7962_v57  ;;  %v8902_v32 = vld [vmem:[%s10182_s11 + $0x4b0] sm:$0xff]   ;;  %v8904_v34 = vld [vmem:[%s10182_s11 + $0x4f8] sm:$0xff]  }
 0x1e6   : > { %7304 = vmatprep.mubr.bf16.mxu1 %v7964_v60  ;;  %v8915_v57 = vld [vmem:[%s10182_s11 + $0x550] sm:$0xff]   ;;  %v4554_v60 = vld [vmem:[%s10672_s0 + $0x1c8] sm:$0xff] }
 0x1e7   : > { %8449 = vmatpush3.bf16.msra.mxu0 %v8857_v35  ;;  %v8905_v35 = vld [vmem:[%s10182_s11 + $0x438] sm:$0xff]  }
 0x1e8   : > { %8477 = vmatpush3.bf16.msra.mxu1 %v8858_v36  ;;  %8450 = vmatprep.subr.bf16.mxu0 %v8859_v37  ;;  %v8906_v36 = vld [vmem:[%s10182_s11 + $0x4b8] sm:$0xff]  }
 0x1e9   : > { %8478 = vmatprep.subr.bf16.mxu1 %v8860_v38  ;;  %v4505_v37 = vld [vmem:[%s10672_s0 + $0x40] sm:$0xff] }
 0x1ea   : > { %v4521_v38 = vld [vmem:[%s10672_s0 + $0xc0] sm:$0xff] }
 0x1eb   : > { %8451 = vmatpush3.bf16.msra.mxu0 %v8861_v39  ;;  %v4506_v39 = vld [vmem:[%s10672_s0 + $0x48] sm:$0xff] }
 0x1ec   : > { %8479 = vmatpush3.bf16.msra.mxu1 %v8862_v40  ;;  %8452 = vmatprep.subr.bf16.mxu0 %v8863_v41  ;;  %v4522_v40 = vld [vmem:[%s10672_s0 + $0xc8] sm:$0xff]  ;;  %v7965_v41 = vcombine.low %v4505_v37, %v4521_v38 }
 0x1ed   : > { %8480 = vmatprep.subr.bf16.mxu1 %v8864_v42  ;;  %v7966_v42 = vcombine.high %v4505_v37, %v4521_v38  ;;  %v4539_v37 = vld [vmem:[%s10672_s0 + $0x150] sm:$0xff] }
 0x1ee   : > { %v4555_v38 = vld [vmem:[%s10672_s0 + $0x1d0] sm:$0xff] }
 0x1ef   : > { %8453 = vmatpush3.bf16.msra.mxu0 %v8865_v43  ;;  %v7967_v43 = vcombine.low %v4506_v39, %v4522_v40 }
 0x1f0   : > { %8481 = vmatpush3.bf16.msra.mxu1 %v8866_v44  ;;  %8454 = vmatprep.subr.bf16.mxu0 %v8867_v45  ;;  %v7968_v44 = vcombine.high %v4506_v39, %v4522_v40  ;;  %v8907_v45 = vld [vmem:[%s10182_s11 + $0x540] sm:$0xff]   ;;  %v8002_v39 = vcombine.high %v4539_v37, %v4555_v38  ;;  %v8001_v40 = vcombine.low %v4539_v37, %v4555_v38 }
 0x1f1   : > { %8482 = vmatprep.subr.bf16.mxu1 %v8868_v46  ;;  %v8908_v46 = vld [vmem:[%s10182_s11 + $0x5c0] sm:$0xff]  }
 0x1f3   : > { %8455 = vmatpush3.bf16.msra.mxu0 %v8869_v47  ;;  %v8909_v47 = vld [vmem:[%s10182_s11 + $0x500] sm:$0xff]  }
 0x1f4   : > { %8483 = vmatpush3.bf16.msra.mxu1 %v8870_v48  ;;  %8456 = vmatprep.subr.bf16.mxu0 %v8871_v49  ;;  %v8910_v48 = vld [vmem:[%s10182_s11 + $0x580] sm:$0xff]   ;;  %v8911_v49 = vld [vmem:[%s10182_s11 + $0x548] sm:$0xff]  }
 0x1f5   : > { %8484 = vmatprep.subr.bf16.mxu1 %v8872_v50  ;;  %v8912_v50 = vld [vmem:[%s10182_s11 + $0x5c8] sm:$0xff]  }
 0x1f7   : > { %8457 = vmatpush3.bf16.msra.mxu0 %v8873_v51  ;;  %v8913_v51 = vld [vmem:[%s10182_s11 + $0x508] sm:$0xff]  }
 0x1f8   : > { %8485 = vmatpush3.bf16.msra.mxu1 %v8874_v52  ;;  %8498 = vmatprep.subr.bf16.mxu0 %v8875_v61  ;;  %v8914_v52 = vld [vmem:[%s10182_s11 + $0x588] sm:$0xff]  }
 0x1f9   : > { %8526 = vmatprep.subr.bf16.mxu1 %v8876_v62  ;;  %v8917_v62 = vld [vmem:[%s10182_s11 + $0x510] sm:$0xff]  }
 0x1fa   : > { %7256 = vmatmul.mubr.bf16.vlgmr.msra.gmra.mrb[24].mxu0 %v7961_v56  ;;  %v7997_v56 = vcombine.low %v4537_v53, %v4553_v54  ;;  %v8955_v53 = vld [vmem:[%s10182_s11 + $0x660] sm:$0xff]  }
 0x1fb   : > { %7305 = vmatmul.mubr.bf16.vlgmr.msra.gmra.mrb[24].mxu1 %v7963_v59  ;;  %8499 = vmatpush3.bf16.msra.mxu0 %v8877_v63  ;;  %v4538_v59 = vld [vmem:[%s10672_s0 + $0x148] sm:$0xff] }
 0x1fc   : > { %8527 = vmatpush3.bf16.msra.mxu1 %v8878_v0  ;;  %8500 = vmatprep.subr.bf16.mxu0 %v8879_v1  ;;  %v8000_v61 = vcombine.high %v4538_v59, %v4554_v60  ;;  %v7999_v63 = vcombine.low %v4538_v59, %v4554_v60  ;;  %v8918_v0 = vld [vmem:[%s10182_s11 + $0x590] sm:$0xff]   ;;  %v8919_v1 = vld [vmem:[%s10182_s11 + $0x558] sm:$0xff]   ;;  %v8956_v54 = vld [vmem:[%s10182_s11 + $0x6e0] sm:$0xff]  }
 0x1fd   : > { %8528 = vmatprep.subr.bf16.mxu1 %v8880_v2  ;;  %7263 = vmatprep.mubr.bf16.mxu0 %v7994_v7  ;;  %v8920_v2 = vld [vmem:[%s10182_s11 + $0x5d8] sm:$0xff]   ;;  %v8925_v7 = vld [vmem:[%s10182_s11 + $0x520] sm:$0xff]   ;;  %v8961_v59 = vld [vmem:[%s10182_s11 + $0x628] sm:$0xff]  }
 0x1fe   : > { %7312 = vmatprep.mubr.bf16.mxu1 %v7996_v13  ;;  %v8931_v13 = vld [vmem:[%s10182_s11 + $0x570] sm:$0xff]   ;;  %v8962_v60 = vld [vmem:[%s10182_s11 + $0x6a8] sm:$0xff]  }
 0x1ff   : > { %8501 = vmatpush3.bf16.msra.mxu0 %v8881_v3  ;;  %v8921_v3 = vld [vmem:[%s10182_s11 + $0x518] sm:$0xff]  }
 0x200   : > { %8529 = vmatpush3.bf16.msra.mxu1 %v8882_v4  ;;  %8502 = vmatprep.subr.bf16.mxu0 %v8883_v9  ;;  %v8922_v4 = vld [vmem:[%s10182_s11 + $0x598] sm:$0xff]   ;;  %v8927_v9 = vld [vmem:[%s10182_s11 + $0x568] sm:$0xff]  }
 0x201   : > { %8530 = vmatprep.subr.bf16.mxu1 %v8884_v10  ;;  %v8928_v10 = vld [vmem:[%s10182_s11 + $0x5e8] sm:$0xff]  }
 0x202   : > { %7264 = vmatmul.mubr.bf16.gmra.mrb[28].mxu0 %v7993_v8  ;;  %v8926_v8 = vld [vmem:[%s10182_s11 + $0x5a0] sm:$0xff]  }
 0x203   : > { %8503 = vmatpush3.bf16.msra.mxu0 %v8885_v14  ;;  %7313 = vmatmul.mubr.bf16.gmra.mrb[28].mxu1 %v7995_v15  ;;  %v8932_v14 = vld [vmem:[%s10182_s11 + $0x5f0] sm:$0xff]  }
 0x204   : > { %8531 = vmatpush3.bf16.msra.mxu1 %v8886_v16  ;;  %8504 = vmatprep.subr.bf16.mxu0 %v8887_v17  ;;  %v8933_v15 = vld [vmem:[%s10182_s11 + $0x530] sm:$0xff]   ;;  %v8935_v17 = vld [vmem:[%s10182_s11 + $0x578] sm:$0xff]  }
 0x205   : > { %8532 = vmatprep.subr.bf16.mxu1 %v8888_v18  ;;  %7353 = vmatprep.mubr.bf16.mxu0 %v7966_v42  ;;  %v8934_v16 = vld [vmem:[%s10182_s11 + $0x5b0] sm:$0xff]   ;;  %v8936_v18 = vld [vmem:[%s10182_s11 + $0x5f8] sm:$0xff]  }
 0x206   : > { %7402 = vmatprep.mubr.bf16.mxu1 %v7968_v44  ;;  %v8948_v42 = vld [vmem:[%s10182_s11 + $0x6d0] sm:$0xff]  }
 0x207   : > { %8505 = vmatpush3.bf16.msra.mxu0 %v8889_v19  ;;  %v8937_v19 = vld [vmem:[%s10182_s11 + $0x538] sm:$0xff]  }
 0x208   : > { %8533 = vmatpush3.bf16.msra.mxu1 %v8890_v20  ;;  %8506 = vmatprep.subr.bf16.mxu0 %v8891_v21  ;;  %v8938_v20 = vld [vmem:[%s10182_s11 + $0x5b8] sm:$0xff]   ;;  %v4507_v21 = vld [vmem:[%s10672_s0 + $0x50] sm:$0xff] }
 0x209   : > { %8534 = vmatprep.subr.bf16.mxu1 %v8892_v22  ;;  %v4523_v22 = vld [vmem:[%s10672_s0 + $0xd0] sm:$0xff]  ;;  %v4556_v44 = vld [vmem:[%s10672_s0 + $0x1d8] sm:$0xff] }
 0x20b   : > { %8507 = vmatpush3.bf16.msra.mxu0 %v8893_v23  ;;  %v7969_v23 = vcombine.low %v4507_v21, %v4523_v22 }
 0x20c   : > { %8535 = vmatpush3.bf16.msra.mxu1 %v8894_v24  ;;  %8508 = vmatprep.subr.bf16.mxu0 %v8895_v25  ;;  %v7970_v24 = vcombine.high %v4507_v21, %v4523_v22  ;;  %v4508_v25 = vld [vmem:[%s10672_s0 + $0x58] sm:$0xff]  ;;  %v4541_v21 = vld [vmem:[%s10672_s0 + $0x160] sm:$0xff] }
 0x20d   : > { %8536 = vmatprep.subr.bf16.mxu1 %v8896_v26  ;;  %v4524_v26 = vld [vmem:[%s10672_s0 + $0xd8] sm:$0xff]  ;;  %v4557_v22 = vld [vmem:[%s10672_s0 + $0x1e0] sm:$0xff] }
 0x20f   : > { %8509 = vmatpush3.bf16.msra.mxu0 %v8897_v27  ;;  %v7971_v27 = vcombine.low %v4508_v25, %v4524_v26 }
 0x210   : > { %8537 = vmatpush3.bf16.msra.mxu1 %v8898_v28  ;;  %8510 = vmatprep.subr.bf16.mxu0 %v8899_v29  ;;  %v7972_v28 = vcombine.high %v4508_v25, %v4524_v26  ;;  %v8939_v29 = vld [vmem:[%s10182_s11 + $0x640] sm:$0xff]   ;;  %v8005_v25 = vcombine.low %v4541_v21, %v4557_v22  ;;  %v8979_v26 = vld [vmem:[%s10182_s11 + $0x750] sm:$0xff]  }
 0x211   : > { %8538 = vmatprep.subr.bf16.mxu1 %v8900_v30  ;;  %v8940_v30 = vld [vmem:[%s10182_s11 + $0x6c0] sm:$0xff]  }
 0x213   : > { %8511 = vmatpush3.bf16.msra.mxu0 %v8901_v31  ;;  %v8941_v31 = vld [vmem:[%s10182_s11 + $0x600] sm:$0xff]  }
 0x214   : > { %8539 = vmatpush3.bf16.msra.mxu1 %v8902_v32  ;;  %8512 = vmatprep.subr.bf16.mxu0 %v8903_v33  ;;  %v8942_v32 = vld [vmem:[%s10182_s11 + $0x680] sm:$0xff]   ;;  %v8943_v33 = vld [vmem:[%s10182_s11 + $0x648] sm:$0xff]  }
 0x215   : > { %8540 = vmatprep.subr.bf16.mxu1 %v8904_v34  ;;  %v8944_v34 = vld [vmem:[%s10182_s11 + $0x6c8] sm:$0xff]  }
 0x217   : > { %8513 = vmatpush3.bf16.msra.mxu0 %v8905_v35  ;;  %v8945_v35 = vld [vmem:[%s10182_s11 + $0x608] sm:$0xff]  }
 0x218   : > { %8541 = vmatpush3.bf16.msra.mxu1 %v8906_v36  ;;  %8554 = vmatprep.subr.bf16.mxu0 %v8907_v45  ;;  %v8946_v36 = vld [vmem:[%s10182_s11 + $0x688] sm:$0xff]  }
 0x219   : > { %8582 = vmatprep.subr.bf16.mxu1 %v8908_v46  ;;  %v8949_v46 = vld [vmem:[%s10182_s11 + $0x610] sm:$0xff]  }
 0x21a   : > { %7354 = vmatmul.mubr.bf16.vlgmr.msra.gmra.mrb[32].mxu0 %v7965_v41  ;;  %v8947_v41 = vld [vmem:[%s10182_s11 + $0x650] sm:$0xff]  }
 0x21b   : > { %7403 = vmatmul.mubr.bf16.vlgmr.msra.gmra.mrb[32].mxu1 %v7967_v43  ;;  %8555 = vmatpush3.bf16.msra.mxu0 %v8909_v47  ;;  %v4540_v43 = vld [vmem:[%s10672_s0 + $0x158] sm:$0xff] }
 0x21c   : > { %8583 = vmatpush3.bf16.msra.mxu1 %v8910_v48  ;;  %8556 = vmatprep.subr.bf16.mxu0 %v8911_v49  ;;  %v8004_v45 = vcombine.high %v4540_v43, %v4556_v44  ;;  %v8003_v47 = vcombine.low %v4540_v43, %v4556_v44  ;;  %v8950_v48 = vld [vmem:[%s10182_s11 + $0x690] sm:$0xff]   ;;  %v8951_v49 = vld [vmem:[%s10182_s11 + $0x658] sm:$0xff]  }
 0x21d   : > { %8584 = vmatprep.subr.bf16.mxu1 %v8912_v50  ;;  %7361 = vmatprep.mubr.bf16.mxu0 %v7998_v55  ;;  %v8952_v50 = vld [vmem:[%s10182_s11 + $0x6d8] sm:$0xff]   ;;  %v8957_v55 = vld [vmem:[%s10182_s11 + $0x620] sm:$0xff]  }
 0x21e   : > { %7410 = vmatprep.mubr.bf16.mxu1 %v8000_v61  ;;  %v8963_v61 = vld [vmem:[%s10182_s11 + $0x670] sm:$0xff]  }
 0x21f   : > { %8557 = vmatpush3.bf16.msra.mxu0 %v8913_v51  ;;  %v8953_v51 = vld [vmem:[%s10182_s11 + $0x618] sm:$0xff]  }
 0x220   : > { %8585 = vmatpush3.bf16.msra.mxu1 %v8914_v52  ;;  %8558 = vmatprep.subr.bf16.mxu0 %v8915_v57  ;;  %v8954_v52 = vld [vmem:[%s10182_s11 + $0x698] sm:$0xff]   ;;  %v8959_v57 = vld [vmem:[%s10182_s11 + $0x668] sm:$0xff]  }
 0x221   : > { %8586 = vmatprep.subr.bf16.mxu1 %v8916_v58  ;;  %v8960_v58 = vld [vmem:[%s10182_s11 + $0x6e8] sm:$0xff]  }
 0x222   : > { %7362 = vmatmul.mubr.bf16.gmra.mrb[36].mxu0 %v7997_v56  ;;  %v8958_v56 = vld [vmem:[%s10182_s11 + $0x6a0] sm:$0xff]  }
 0x223   : > { %8559 = vmatpush3.bf16.msra.mxu0 %v8917_v62  ;;  %7411 = vmatmul.mubr.bf16.gmra.mrb[36].mxu1 %v7999_v63  ;;  %v8964_v62 = vld [vmem:[%s10182_s11 + $0x6f0] sm:$0xff]  }
 0x224   : > { %8587 = vmatpush3.bf16.msra.mxu1 %v8918_v0  ;;  %8560 = vmatprep.subr.bf16.mxu0 %v8919_v1  ;;  %v8965_v63 = vld [vmem:[%s10182_s11 + $0x630] sm:$0xff]   ;;  %v8967_v1 = vld [vmem:[%s10182_s11 + $0x678] sm:$0xff]  }
 0x225   : > { %8588 = vmatprep.subr.bf16.mxu1 %v8920_v2  ;;  %7451 = vmatprep.mubr.bf16.mxu0 %v7970_v24  ;;  %v8966_v0 = vld [vmem:[%s10182_s11 + $0x6b0] sm:$0xff]   ;;  %v8968_v2 = vld [vmem:[%s10182_s11 + $0x6f8] sm:$0xff]   ;;  %v8006_v24 = vcombine.high %v4541_v21, %v4557_v22 }
 0x226   : > { %7500 = vmatprep.mubr.bf16.mxu1 %v7972_v28  ;;  %v8980_v28 = vld [vmem:[%s10182_s11 + $0x7d0] sm:$0xff]  }
 0x227   : > { %8561 = vmatpush3.bf16.msra.mxu0 %v8921_v3  ;;  %v8969_v3 = vld [vmem:[%s10182_s11 + $0x638] sm:$0xff]  }
 0x228   : > { %8589 = vmatpush3.bf16.msra.mxu1 %v8922_v4  ;;  %8562 = vmatprep.subr.bf16.mxu0 %v8923_v5  ;;  %v8970_v4 = vld [vmem:[%s10182_s11 + $0x6b8] sm:$0xff]  }
 0x229   : > { %8590 = vmatprep.subr.bf16.mxu1 %v8924_v6  ;;  %v4509_v5 = vld [vmem:[%s10672_s0 + $0x60] sm:$0xff] }
 0x22a   : > { %v4525_v6 = vld [vmem:[%s10672_s0 + $0xe0] sm:$0xff] }
 0x22b   : > { %8563 = vmatpush3.bf16.msra.mxu0 %v8925_v7  ;;  %v4510_v7 = vld [vmem:[%s10672_s0 + $0x68] sm:$0xff] }
 0x22c   : > { %8591 = vmatpush3.bf16.msra.mxu1 %v8926_v8  ;;  %8564 = vmatprep.subr.bf16.mxu0 %v8927_v9  ;;  %v7973_v8 = vcombine.low %v4509_v5, %v4525_v6  ;;  %v7974_v9 = vcombine.high %v4509_v5, %v4525_v6  ;;  %v8993_v5 = vld [vmem:[%s10182_s11 + $0x728] sm:$0xff]  }
 0x22d   : > { %8592 = vmatprep.subr.bf16.mxu1 %v8928_v10  ;;  %v4526_v10 = vld [vmem:[%s10672_s0 + $0xe8] sm:$0xff] }
 0x22f   : > { %8565 = vmatpush3.bf16.msra.mxu0 %v8929_v11  ;;  %v7975_v11 = vcombine.low %v4510_v7, %v4526_v10 }
 0x230   : > { %8593 = vmatpush3.bf16.msra.mxu1 %v8930_v12  ;;  %8566 = vmatprep.subr.bf16.mxu0 %v8931_v13  ;;  %v7976_v12 = vcombine.high %v4510_v7, %v4526_v10  ;;  %v8971_v13 = vld [vmem:[%s10182_s11 + $0x740] sm:$0xff]   ;;  %v8994_v7 = vld [vmem:[%s10182_s11 + $0x7a8] sm:$0xff]   ;;  %v8996_v10 = vld [vmem:[%s10182_s11 + $0x7f0] sm:$0xff]  }
 0x231   : > { %8594 = vmatprep.subr.bf16.mxu1 %v8932_v14  ;;  %v8972_v14 = vld [vmem:[%s10182_s11 + $0x7c0] sm:$0xff]  }
 0x233   : > { %8567 = vmatpush3.bf16.msra.mxu0 %v8933_v15  ;;  %v8973_v15 = vld [vmem:[%s10182_s11 + $0x700] sm:$0xff]  }
 0x234   : > { %8595 = vmatpush3.bf16.msra.mxu1 %v8934_v16  ;;  %8568 = vmatprep.subr.bf16.mxu0 %v8935_v17  ;;  %v8974_v16 = vld [vmem:[%s10182_s11 + $0x780] sm:$0xff]   ;;  %v8975_v17 = vld [vmem:[%s10182_s11 + $0x748] sm:$0xff]  }
 0x235   : > { %8596 = vmatprep.subr.bf16.mxu1 %v8936_v18  ;;  %v8976_v18 = vld [vmem:[%s10182_s11 + $0x7c8] sm:$0xff]  }
 0x237   : > { %8569 = vmatpush3.bf16.msra.mxu0 %v8937_v19  ;;  %v8977_v19 = vld [vmem:[%s10182_s11 + $0x708] sm:$0xff]  }
 0x238   : > { %8597 = vmatpush3.bf16.msra.mxu1 %v8938_v20  ;;  %8610 = vmatprep.subr.bf16.mxu0 %v8939_v29  ;;  %v8978_v20 = vld [vmem:[%s10182_s11 + $0x788] sm:$0xff]  }
 0x239   : > { %8638 = vmatprep.subr.bf16.mxu1 %v8940_v30  ;;  %v4542_v30 = vld [vmem:[%s10672_s0 + $0x168] sm:$0xff] }
 0x23a   : > { %7452 = vmatmul.mubr.bf16.vlgmr.msra.gmra.mrb[40].mxu0 %v7969_v23 }
 0x23b   : > { %7501 = vmatmul.mubr.bf16.vlgmr.msra.gmra.mrb[40].mxu1 %v7971_v27  ;;  %8611 = vmatpush3.bf16.msra.mxu0 %v8941_v31  ;;  %v4558_v31 = vld [vmem:[%s10672_s0 + $0x1e8] sm:$0xff] }
 0x23c   : > { %8639 = vmatpush3.bf16.msra.mxu1 %v8942_v32  ;;  %8612 = vmatprep.subr.bf16.mxu0 %v8943_v33  ;;  %v8007_v37 = vcombine.low %v4542_v30, %v4558_v31 }
 0x23d   : > { %8640 = vmatprep.subr.bf16.mxu1 %v8944_v34  ;;  %7459 = vmatprep.mubr.bf16.mxu0 %v8002_v39 }
 0x23e   : > { %7508 = vmatprep.mubr.bf16.mxu1 %v8004_v45 }
 0x23f   : > { %8613 = vmatpush3.bf16.msra.mxu0 %v8945_v35  ;;  %v8008_v35 = vcombine.high %v4542_v30, %v4558_v31 }
 0x240   : > { %8641 = vmatpush3.bf16.msra.mxu1 %v8946_v36  ;;  %8614 = vmatprep.subr.bf16.mxu0 %v8947_v41  ;;  %v8981_v36 = vld [vmem:[%s10182_s11 + $0x710] sm:$0xff]  }
 0x241   : > { %8642 = vmatprep.subr.bf16.mxu1 %v8948_v42  ;;  %v8983_v42 = vld [vmem:[%s10182_s11 + $0x758] sm:$0xff]  }
 0x242   : > { %7460 = vmatmul.mubr.bf16.gmra.mrb[44].mxu0 %v8001_v40  ;;  %v8982_v40 = vld [vmem:[%s10182_s11 + $0x790] sm:$0xff]  }
 0x243   : > { %8615 = vmatpush3.bf16.msra.mxu0 %v8949_v46  ;;  %7509 = vmatmul.mubr.bf16.gmra.mrb[44].mxu1 %v8003_v47  ;;  %v8984_v46 = vld [vmem:[%s10182_s11 + $0x7d8] sm:$0xff]  }
 0x244   : > { %8643 = vmatpush3.bf16.msra.mxu1 %v8950_v48  ;;  %8616 = vmatprep.subr.bf16.mxu0 %v8951_v49  ;;  %v8985_v48 = vld [vmem:[%s10182_s11 + $0x718] sm:$0xff]  }
 0x245   : > { %8644 = vmatprep.subr.bf16.mxu1 %v8952_v50  ;;  %7549 = vmatprep.mubr.bf16.mxu0 %v7974_v9  ;;  %v8986_v50 = vld [vmem:[%s10182_s11 + $0x798] sm:$0xff]  }
 0x246   : > { %7598 = vmatprep.mubr.bf16.mxu1 %v7976_v12  ;;  %v8998_v12 = vld [vmem:[%s10182_s11 + $0x7b0] sm:$0xff]  }
 0x247   : > { %8617 = vmatpush3.bf16.msra.mxu0 %v8953_v51 }
 0x248   : > { %8645 = vmatpush3.bf16.msra.mxu1 %v8954_v52  ;;  %8618 = vmatprep.subr.bf16.mxu0 %v8955_v53  ;;  %v8987_v53 = vld [vmem:[%s10182_s11 + $0x760] sm:$0xff]  }
 0x249   : > { %8646 = vmatprep.subr.bf16.mxu1 %v8956_v54 }
 0x24b   : > { %8619 = vmatpush3.bf16.msra.mxu0 %v8957_v55  ;;  %v8988_v55 = vld [vmem:[%s10182_s11 + $0x7e0] sm:$0xff]  }
 0x24c   : > { %8647 = vmatpush3.bf16.msra.mxu1 %v8958_v56  ;;  %8620 = vmatprep.subr.bf16.mxu0 %v8959_v57 }
 0x24d   : > { %8648 = vmatprep.subr.bf16.mxu1 %v8960_v58  ;;  %v8989_v58 = vld [vmem:[%s10182_s11 + $0x720] sm:$0xff]  }
 0x24f   : > { %8621 = vmatpush3.bf16.msra.mxu0 %v8961_v59 }
 0x250   : > { %8649 = vmatpush3.bf16.msra.mxu1 %v8962_v60  ;;  %8622 = vmatprep.subr.bf16.mxu0 %v8963_v61  ;;  %v8990_v61 = vld [vmem:[%s10182_s11 + $0x7a0] sm:$0xff]  }
 0x251   : > { %8650 = vmatprep.subr.bf16.mxu1 %v8964_v62 }
 0x253   : > { %8623 = vmatpush3.bf16.msra.mxu0 %v8965_v63  ;;  %v8991_v63 = vld [vmem:[%s10182_s11 + $0x768] sm:$0xff]  }
 0x254   : > { %8651 = vmatpush3.bf16.msra.mxu1 %v8966_v0  ;;  %8624 = vmatprep.subr.bf16.mxu0 %v8967_v1 }
 0x255   : > { %8652 = vmatprep.subr.bf16.mxu1 %v8968_v2  ;;  %v8992_v2 = vld [vmem:[%s10182_s11 + $0x7e8] sm:$0xff]  }
 0x257   : > { %8625 = vmatpush3.bf16.msra.mxu0 %v8969_v3 }
 0x258   : > { %8653 = vmatpush3.bf16.msra.mxu1 %v8970_v4  ;;  %8666 = vmatprep.subr.bf16.mxu0 %v8971_v13  ;;  %v8999_v13 = vld [vmem:[%s10182_s11 + $0x778] sm:$0xff]  }
 0x259   : > { %8694 = vmatprep.subr.bf16.mxu1 %v8972_v14  ;;  %v9000_v14 = vld [vmem:[%s10182_s11 + $0x7f8] sm:$0xff]  }
 0x25a   : > { %7550 = vmatmul.mubr.bf16.vlgmr.msra.gmra.mrb[48].mxu0 %v7973_v8  ;;  %v8995_v8 = vld [vmem:[%s10182_s11 + $0x770] sm:$0xff]  }
 0x25b   : > { %7599 = vmatmul.mubr.bf16.vlgmr.msra.gmra.mrb[48].mxu1 %v7975_v11  ;;  %8667 = vmatpush3.bf16.msra.mxu0 %v8973_v15  ;;  %v8997_v11 = vld [vmem:[%s10182_s11 + $0x730] sm:$0xff]   ;;  %v9001_v15 = vld [vmem:[%s10182_s11 + $0x738] sm:$0xff]  }
 0x25c   : > { %8695 = vmatpush3.bf16.msra.mxu1 %v8974_v16  ;;  %8668 = vmatprep.subr.bf16.mxu0 %v8975_v17  ;;  %v9002_v16 = vld [vmem:[%s10182_s11 + $0x7b8] sm:$0xff]   ;;  %v4511_v17 = vld [vmem:[%s10672_s0 + $0x70] sm:$0xff] }
 0x25d   : > { %8696 = vmatprep.subr.bf16.mxu1 %v8976_v18  ;;  %7557 = vmatprep.mubr.bf16.mxu0 %v8006_v24  ;;  %v4527_v18 = vld [vmem:[%s10672_s0 + $0xf0] sm:$0xff] }
 0x25e   : > { %7606 = vmatprep.mubr.bf16.mxu1 %v8008_v35  ;;  %v7977_v21 = vcombine.low %v4511_v17, %v4527_v18  ;;  %v7978_v22 = vcombine.high %v4511_v17, %v4527_v18 }
 0x25f   : > { %8669 = vmatpush3.bf16.msra.mxu0 %v8977_v19  ;;  %v4512_v19 = vld [vmem:[%s10672_s0 + $0x78] sm:$0xff] }
 0x260   : > { %8697 = vmatpush3.bf16.msra.mxu1 %v8978_v20  ;;  %8670 = vmatprep.subr.bf16.mxu0 %v8979_v26  ;;  %v4528_v20 = vld [vmem:[%s10672_s0 + $0xf8] sm:$0xff]  ;;  %v4559_v26 = vld [vmem:[%s10672_s0 + $0x1f0] sm:$0xff] }
 0x261   : > { %8698 = vmatprep.subr.bf16.mxu1 %v8980_v28  ;;  %v7980_v24 = vcombine.high %v4512_v19, %v4528_v20 }
 0x262   : > { %7558 = vmatmul.mubr.bf16.gmra.mrb[52].mxu0 %v8005_v25  ;;  %v4543_v25 = vld [vmem:[%s10672_s0 + $0x170] sm:$0xff] }
 0x263   : > { %8671 = vmatpush3.bf16.msra.mxu0 %v8981_v36  ;;  %7607 = vmatmul.mubr.bf16.gmra.mrb[52].mxu1 %v8007_v37  ;;  %v8010_v28 = vcombine.high %v4543_v25, %v4559_v26 }
 0x264   : > { %8699 = vmatpush3.bf16.msra.mxu1 %v8982_v40  ;;  %8672 = vmatprep.subr.bf16.mxu0 %v8983_v42 }
 0x265   : > { %8700 = vmatprep.subr.bf16.mxu1 %v8984_v46  ;;  %7647 = vmatprep.mubr.bf16.mxu0 %v7978_v22 }
 0x266   : > { %7696 = vmatprep.mubr.bf16.mxu1 %v7980_v24 }
 0x267   : > { %8673 = vmatpush3.bf16.msra.mxu0 %v8985_v48 }
 0x268   : > { %8701 = vmatpush3.bf16.msra.mxu1 %v8986_v50  ;;  %8674 = vmatprep.subr.bf16.mxu0 %v8987_v53 }
 0x269   : > { %8702 = vmatprep.subr.bf16.mxu1 %v8988_v55 }
 0x26b   : > { %8675 = vmatpush3.bf16.msra.mxu0 %v8989_v58 }
 0x26c   : > { %8703 = vmatpush3.bf16.msra.mxu1 %v8990_v61  ;;  %8676 = vmatprep.subr.bf16.mxu0 %v8991_v63 }
 0x26d   : > { %v8290_v23 = vpop.f32.mrb[0].mxu0  ;;  %8704 = vmatprep.subr.bf16.mxu1 %v8992_v2 }
 0x26e   : > { %v8318_v27 = vpop.f32.mrb[0].mxu1  ;;  %v8291_v29 = vpop.f32.mrb[1].mxu0 }
 0x26f   : > { %v8292_v32 = vadd.f32 %v8291_v29, %v8290_v23  ;;  %v8319_v33 = vpop.f32.mrb[1].mxu1  ;;  %v8293_v34 = vpop.f32.mrb[2].mxu0  ;;  %8677 = vmatpush3.bf16.msra.mxu0 %v8993_v5  ;;  %v7979_v23 = vcombine.low %v4512_v19, %v4528_v20  ;;  %v4560_v29 = vld [vmem:[%s10672_s0 + $0x1f8] sm:$0xff] }
 0x270   : > { %v8320_v38 = vadd.f32 %v8319_v33, %v8318_v27  ;;  %v8321_v39 = vpop.f32.mrb[2].mxu1  ;;  %v8294_v41 = vpop.f32.mrb[3].mxu0  ;;  %8705 = vmatpush3.bf16.msra.mxu1 %v8994_v7  ;;  %8678 = vmatprep.subr.bf16.mxu0 %v8995_v8  ;;  %v4544_v27 = vld [vmem:[%s10672_s0 + $0x178] sm:$0xff]  ;;  %v8009_v33 = vcombine.low %v4543_v25, %v4559_v26 }
 0x271   : > { %v8295_v44 = vadd.f32 %v8294_v41, %v8293_v34  ;;  %v8322_v45 = vpop.f32.mrb[3].mxu1  ;;  %8706 = vmatprep.subr.bf16.mxu1 %v8996_v10  ;;  %v8012_v30 = vcombine.high %v4544_v27, %v4560_v29  ;;  %v8011_v34 = vcombine.low %v4544_v27, %v4560_v29 }
 0x272   : > { %v10581_v43 = vadd.f32 %v8320_v38, %v8292_v32  ;;  %v8323_v47 = vadd.f32 %v8322_v45, %v8321_v39 }
 0x273   : > { %8679 = vmatpush3.bf16.msra.mxu0 %v8997_v11 }
 0x274   : > { %v10586_v51 = vadd.f32 %v8323_v47, %v8295_v44  ;;  %8707 = vmatpush3.bf16.msra.mxu1 %v8998_v12  ;;  %8680 = vmatprep.subr.bf16.mxu0 %v8999_v13 }
 0x275   : > { %v8296_v49 = vpop.f32.mrb[4].mxu0  ;;  %8708 = vmatprep.subr.bf16.mxu1 %v9000_v14 }
 0x276   : > { %v8324_v52 = vpop.f32.mrb[4].mxu1  ;;  %v8297_v54 = vpop.f32.mrb[5].mxu0 }
 0x277   : > { %v8298_v56 = vadd.f32 %v8297_v54, %v8296_v49  ;;  %v8325_v57 = vpop.f32.mrb[5].mxu1  ;;  %v8299_v60 = vpop.f32.mrb[6].mxu0  ;;  %8681 = vmatpush3.bf16.msra.mxu0 %v9001_v15 }
 0x278   : > { %v8326_v59 = vadd.f32 %v8325_v57, %v8324_v52  ;;  %v8327_v62 = vpop.f32.mrb[6].mxu1  ;;  %v8300_v1 = vpop.f32.mrb[7].mxu0  ;;  %8709 = vmatpush3.bf16.msra.mxu1 %v9002_v16 }
 0x279   : > { %v8301_v3 = vadd.f32 %v8300_v1, %v8299_v60  ;;  %v8328_v4 = vpop.f32.mrb[7].mxu1 }
 0x27a   : > { %v10593_v0 = vadd.f32 %v8326_v59, %v8298_v56  ;;  %v8329_v6 = vadd.f32 %v8328_v4, %v8327_v62  ;;  %7648 = vmatmul.mubr.bf16.vlgmr.msra.gmra.mrb[56].mxu0 %v7977_v21 }
 0x27b   : > { %7697 = vmatmul.mubr.bf16.vlgmr.msra.gmra.mrb[56].mxu1 %v7979_v23  ;;  %7655 = vmatprep.mubr.bf16.mxu0 %v8010_v28 }
 0x27c   : > { %v10599_v9 = vadd.f32 %v8329_v6, %v8301_v3  ;;  %7704 = vmatprep.mubr.bf16.mxu1 %v8012_v30 }
 0x282   : > { %7656 = vmatmul.mubr.bf16.gmra.mrb[60].mxu0 %v8009_v33 }
 0x283   : > { %7705 = vmatmul.mubr.bf16.gmra.mrb[60].mxu1 %v8011_v34 }
 0x28d   : > { %v8346_v31 = vpop.f32.mrb[8].mxu0 }
 0x28e   : > { %v8374_v32 = vpop.f32.mrb[8].mxu1  ;;  %v8347_v35 = vpop.f32.mrb[9].mxu0 }
 0x28f   : > { %v8375_v36 = vpop.f32.mrb[9].mxu1  ;;  %v8348_v37 = vadd.f32 %v8347_v35, %v8346_v31  ;;  %v8349_v39 = vpop.f32.mrb[10].mxu0 }
 0x290   : > { %v8376_v38 = vadd.f32 %v8375_v36, %v8374_v32  ;;  %v8377_v40 = vpop.f32.mrb[10].mxu1  ;;  %v8350_v41 = vpop.f32.mrb[11].mxu0 }
 0x291   : > { %v8378_v42 = vpop.f32.mrb[11].mxu1  ;;  %v7062_v44 = vadd.f32 %v8348_v37, %v10581_v43  ;;  %v8351_v45 = vadd.f32 %v8350_v41, %v8349_v39 }
 0x292   : > { %v8379_v46 = vadd.f32 %v8378_v42, %v8377_v40 }
 0x293   : > { %v7111_v47 = vadd.f32 %v8376_v38, %v7062_v44  ;;  %v7065_v48 = vadd.f32 %v8351_v45, %v10586_v51 }
 0x295   : > { %v7114_v49 = vadd.f32 %v8379_v46, %v7065_v48  ;;  %v8352_v50 = vpop.f32.mrb[12].mxu0 }
 0x296   : > { %v8353_v52 = vpop.f32.mrb[13].mxu0  ;;  %v8380_v57 = vpop.f32.mrb[12].mxu1 }
 0x297   : > { %v8354_v53 = vadd.f32 %v8353_v52, %v8352_v50  ;;  %v8355_v54 = vpop.f32.mrb[14].mxu0  ;;  %v8381_v59 = vpop.f32.mrb[13].mxu1 }
 0x298   : > { %v8356_v55 = vpop.f32.mrb[15].mxu0  ;;  %v8382_v60 = vadd.f32 %v8381_v59, %v8380_v57  ;;  %v8383_v61 = vpop.f32.mrb[14].mxu1 }
 0x299   : > { %v7070_v56 = vadd.f32 %v8354_v53, %v10593_v0  ;;  %v8357_v58 = vadd.f32 %v8356_v55, %v8355_v54  ;;  %v8384_v62 = vpop.f32.mrb[15].mxu1 }
 0x29a   : > { %v8385_v1 = vadd.f32 %v8384_v62, %v8383_v61 }
 0x29b   : > { %v7073_v43 = vadd.f32 %v8357_v58, %v10599_v9  ;;  %v7119_v63 = vadd.f32 %v8382_v60, %v7070_v56 }
 0x29d   : > { %v7122_v2 = vadd.f32 %v8385_v1, %v7073_v43 }
 0x2ad   : > { %v8402_v51 = vpop.f32.mrb[16].mxu0 }
 0x2ae   : > { %v8430_v3 = vpop.f32.mrb[16].mxu1  ;;  %v8403_v4 = vpop.f32.mrb[17].mxu0 }
 0x2af   : > { %v8404_v5 = vadd.f32 %v8403_v4, %v8402_v51  ;;  %v8431_v6 = vpop.f32.mrb[17].mxu1  ;;  %v8405_v7 = vpop.f32.mrb[18].mxu0 }
 0x2b0   : > { %v8432_v8 = vadd.f32 %v8431_v6, %v8430_v3  ;;  %v8433_v10 = vpop.f32.mrb[18].mxu1  ;;  %v8406_v0 = vpop.f32.mrb[19].mxu0 }
 0x2b1   : > { %v7160_v11 = vadd.f32 %v8404_v5, %v7111_v47  ;;  %v8407_v12 = vadd.f32 %v8406_v0, %v8405_v7  ;;  %v8434_v13 = vpop.f32.mrb[19].mxu1 }
 0x2b2   : > { %v8435_v14 = vadd.f32 %v8434_v13, %v8433_v10 }
 0x2b3   : > { %v7209_v9 = vadd.f32 %v8432_v8, %v7160_v11  ;;  %v7163_v15 = vadd.f32 %v8407_v12, %v7114_v49 }
 0x2b5   : > { %v7212_v16 = vadd.f32 %v8435_v14, %v7163_v15  ;;  %v8408_v17 = vpop.f32.mrb[20].mxu0 }
 0x2b6   : > { %v8409_v18 = vpop.f32.mrb[21].mxu0  ;;  %v8436_v21 = vpop.f32.mrb[20].mxu1 }
 0x2b7   : > { %v8410_v19 = vadd.f32 %v8409_v18, %v8408_v17  ;;  %v8411_v20 = vpop.f32.mrb[22].mxu0  ;;  %v8437_v25 = vpop.f32.mrb[21].mxu1 }
 0x2b8   : > { %v8412_v22 = vpop.f32.mrb[23].mxu0  ;;  %v8438_v26 = vadd.f32 %v8437_v25, %v8436_v21  ;;  %v8439_v27 = vpop.f32.mrb[22].mxu1 }
 0x2b9   : > { %v7168_v23 = vadd.f32 %v8410_v19, %v7119_v63  ;;  %v8413_v24 = vadd.f32 %v8412_v22, %v8411_v20  ;;  %v8440_v29 = vpop.f32.mrb[23].mxu1 }
 0x2ba   : > { %v8441_v31 = vadd.f32 %v8440_v29, %v8439_v27 }
 0x2bb   : > { %v7171_v28 = vadd.f32 %v8413_v24, %v7122_v2  ;;  %v7217_v30 = vadd.f32 %v8438_v26, %v7168_v23 }
 0x2bd   : > { %v7220_v32 = vadd.f32 %v8441_v31, %v7171_v28 }
 0x2cd   : > { %v8458_v33 = vpop.f32.mrb[24].mxu0 }
 0x2ce   : > { %v8486_v34 = vpop.f32.mrb[24].mxu1  ;;  %v8459_v35 = vpop.f32.mrb[25].mxu0 }
 0x2cf   : > { %v8460_v36 = vadd.f32 %v8459_v35, %v8458_v33  ;;  %v8487_v37 = vpop.f32.mrb[25].mxu1  ;;  %v8461_v38 = vpop.f32.mrb[26].mxu0 }
 0x2d0   : > { %v8488_v39 = vadd.f32 %v8487_v37, %v8486_v34  ;;  %v8489_v40 = vpop.f32.mrb[26].mxu1  ;;  %v8462_v41 = vpop.f32.mrb[27].mxu0 }
 0x2d1   : > { %v7258_v42 = vadd.f32 %v8460_v36, %v7209_v9  ;;  %v8463_v44 = vadd.f32 %v8462_v41, %v8461_v38  ;;  %v8490_v45 = vpop.f32.mrb[27].mxu1 }
 0x2d2   : > { %v8491_v46 = vadd.f32 %v8490_v45, %v8489_v40 }
 0x2d3   : > { %v7307_v47 = vadd.f32 %v8488_v39, %v7258_v42  ;;  %v7261_v48 = vadd.f32 %v8463_v44, %v7212_v16 }
 0x2d5   : > { %v7310_v49 = vadd.f32 %v8491_v46, %v7261_v48  ;;  %v8464_v50 = vpop.f32.mrb[28].mxu0 }
 0x2d6   : > { %v8465_v52 = vpop.f32.mrb[29].mxu0  ;;  %v8492_v57 = vpop.f32.mrb[28].mxu1 }
 0x2d7   : > { %v8466_v53 = vadd.f32 %v8465_v52, %v8464_v50  ;;  %v8467_v54 = vpop.f32.mrb[30].mxu0  ;;  %v8493_v59 = vpop.f32.mrb[29].mxu1 }
 0x2d8   : > { %v8468_v55 = vpop.f32.mrb[31].mxu0  ;;  %v8494_v60 = vadd.f32 %v8493_v59, %v8492_v57  ;;  %v8495_v61 = vpop.f32.mrb[30].mxu1 }
 0x2d9   : > { %v7266_v56 = vadd.f32 %v8466_v53, %v7217_v30  ;;  %v8469_v58 = vadd.f32 %v8468_v55, %v8467_v54  ;;  %v8496_v62 = vpop.f32.mrb[31].mxu1 }
 0x2da   : > { %v8497_v1 = vadd.f32 %v8496_v62, %v8495_v61 }
 0x2db   : > { %v7269_v43 = vadd.f32 %v8469_v58, %v7220_v32  ;;  %v7315_v63 = vadd.f32 %v8494_v60, %v7266_v56 }
 0x2dd   : > { %v7318_v2 = vadd.f32 %v8497_v1, %v7269_v43 }
 0x2ed   : > { %v8514_v51 = vpop.f32.mrb[32].mxu0 }
 0x2ee   : > { %v8542_v3 = vpop.f32.mrb[32].mxu1  ;;  %v8515_v4 = vpop.f32.mrb[33].mxu0 }
 0x2ef   : > { %v8543_v5 = vpop.f32.mrb[33].mxu1  ;;  %v8516_v6 = vadd.f32 %v8515_v4, %v8514_v51  ;;  %v8517_v8 = vpop.f32.mrb[34].mxu0 }
 0x2f0   : > { %v8544_v7 = vadd.f32 %v8543_v5, %v8542_v3  ;;  %v8545_v10 = vpop.f32.mrb[34].mxu1  ;;  %v8518_v0 = vpop.f32.mrb[35].mxu0 }
 0x2f1   : > { %v8546_v11 = vpop.f32.mrb[35].mxu1  ;;  %v7356_v12 = vadd.f32 %v8516_v6, %v7307_v47  ;;  %v8519_v13 = vadd.f32 %v8518_v0, %v8517_v8 }
 0x2f2   : > { %v8547_v14 = vadd.f32 %v8546_v11, %v8545_v10 }
 0x2f3   : > { %v7405_v9 = vadd.f32 %v8544_v7, %v7356_v12  ;;  %v7359_v15 = vadd.f32 %v8519_v13, %v7310_v49 }
 0x2f5   : > { %v7408_v16 = vadd.f32 %v8547_v14, %v7359_v15  ;;  %v8520_v17 = vpop.f32.mrb[36].mxu0 }
 0x2f6   : > { %v8521_v18 = vpop.f32.mrb[37].mxu0  ;;  %v8548_v23 = vpop.f32.mrb[36].mxu1 }
 0x2f7   : > { %v8522_v19 = vadd.f32 %v8521_v18, %v8520_v17  ;;  %v8523_v20 = vpop.f32.mrb[38].mxu0  ;;  %v8549_v25 = vpop.f32.mrb[37].mxu1 }
 0x2f8   : > { %v8524_v21 = vpop.f32.mrb[39].mxu0  ;;  %v8550_v27 = vadd.f32 %v8549_v25, %v8548_v23  ;;  %v8551_v28 = vpop.f32.mrb[38].mxu1 }
 0x2f9   : > { %v7364_v22 = vadd.f32 %v8522_v19, %v7315_v63  ;;  %v8525_v24 = vadd.f32 %v8524_v21, %v8523_v20  ;;  %v8552_v29 = vpop.f32.mrb[39].mxu1 }
 0x2fa   : > { %v8553_v31 = vadd.f32 %v8552_v29, %v8551_v28 }
 0x2fb   : > { %v7367_v26 = vadd.f32 %v8525_v24, %v7318_v2  ;;  %v7413_v30 = vadd.f32 %v8550_v27, %v7364_v22 }
 0x2fd   : > { %v7416_v32 = vadd.f32 %v8553_v31, %v7367_v26 }
 0x30d   : > { %v8570_v33 = vpop.f32.mrb[40].mxu0 }
 0x30e   : > { %v8598_v34 = vpop.f32.mrb[40].mxu1  ;;  %v8571_v35 = vpop.f32.mrb[41].mxu0 }
 0x30f   : > { %v8572_v36 = vadd.f32 %v8571_v35, %v8570_v33  ;;  %v8599_v37 = vpop.f32.mrb[41].mxu1  ;;  %v8573_v38 = vpop.f32.mrb[42].mxu0 }
 0x310   : > { %v8600_v39 = vadd.f32 %v8599_v37, %v8598_v34  ;;  %v8601_v40 = vpop.f32.mrb[42].mxu1  ;;  %v8574_v41 = vpop.f32.mrb[43].mxu0 }
 0x311   : > { %v7454_v42 = vadd.f32 %v8572_v36, %v7405_v9  ;;  %v8575_v44 = vadd.f32 %v8574_v41, %v8573_v38  ;;  %v8602_v45 = vpop.f32.mrb[43].mxu1 }
 0x312   : > { %v8603_v46 = vadd.f32 %v8602_v45, %v8601_v40 }
 0x313   : > { %v7503_v47 = vadd.f32 %v8600_v39, %v7454_v42  ;;  %v7457_v48 = vadd.f32 %v8575_v44, %v7408_v16 }
 0x315   : > { %v7506_v49 = vadd.f32 %v8603_v46, %v7457_v48  ;;  %v8576_v50 = vpop.f32.mrb[44].mxu0 }
 0x316   : > { %v8577_v52 = vpop.f32.mrb[45].mxu0  ;;  %v8604_v55 = vpop.f32.mrb[44].mxu1 }
 0x317   : > { %v8578_v53 = vadd.f32 %v8577_v52, %v8576_v50  ;;  %v8579_v54 = vpop.f32.mrb[46].mxu0  ;;  %v8605_v59 = vpop.f32.mrb[45].mxu1 }
 0x318   : > { %v8580_v56 = vpop.f32.mrb[47].mxu0  ;;  %v8606_v43 = vadd.f32 %v8605_v59, %v8604_v55  ;;  %v8607_v60 = vpop.f32.mrb[46].mxu1 }
 0x319   : > { %v7462_v57 = vadd.f32 %v8578_v53, %v7413_v30  ;;  %v8581_v58 = vadd.f32 %v8580_v56, %v8579_v54  ;;  %v8608_v62 = vpop.f32.mrb[47].mxu1 }
 0x31a   : > { %v8609_v1 = vadd.f32 %v8608_v62, %v8607_v60 }
 0x31b   : > { %v7465_v61 = vadd.f32 %v8581_v58, %v7416_v32  ;;  %v7511_v63 = vadd.f32 %v8606_v43, %v7462_v57 }
 0x31d   : > { %v7514_v2 = vadd.f32 %v8609_v1, %v7465_v61 }
 0x32d   : > { %v8626_v51 = vpop.f32.mrb[48].mxu0 }
 0x32e   : > { %v8654_v3 = vpop.f32.mrb[48].mxu1  ;;  %v8627_v4 = vpop.f32.mrb[49].mxu0 }
 0x32f   : > { %v8628_v5 = vadd.f32 %v8627_v4, %v8626_v51  ;;  %v8655_v6 = vpop.f32.mrb[49].mxu1  ;;  %v8629_v7 = vpop.f32.mrb[50].mxu0 }
 0x330   : > { %v8656_v8 = vadd.f32 %v8655_v6, %v8654_v3  ;;  %v8657_v10 = vpop.f32.mrb[50].mxu1  ;;  %v8630_v0 = vpop.f32.mrb[51].mxu0 }
 0x331   : > { %v7552_v11 = vadd.f32 %v8628_v5, %v7503_v47  ;;  %v8631_v12 = vadd.f32 %v8630_v0, %v8629_v7  ;;  %v8658_v13 = vpop.f32.mrb[51].mxu1 }
 0x332   : > { %v8659_v14 = vadd.f32 %v8658_v13, %v8657_v10 }
 0x333   : > { %v7601_v9 = vadd.f32 %v8656_v8, %v7552_v11  ;;  %v7555_v15 = vadd.f32 %v8631_v12, %v7506_v49 }
 0x335   : > { %v7604_v16 = vadd.f32 %v8659_v14, %v7555_v15  ;;  %v8632_v17 = vpop.f32.mrb[52].mxu0 }
 0x336   : > { %v8633_v18 = vpop.f32.mrb[53].mxu0  ;;  %v8660_v23 = vpop.f32.mrb[52].mxu1 }
 0x337   : > { %v8634_v19 = vadd.f32 %v8633_v18, %v8632_v17  ;;  %v8635_v20 = vpop.f32.mrb[54].mxu0  ;;  %v8661_v25 = vpop.f32.mrb[53].mxu1 }
 0x338   : > { %v8636_v21 = vpop.f32.mrb[55].mxu0  ;;  %v8662_v27 = vadd.f32 %v8661_v25, %v8660_v23  ;;  %v8663_v28 = vpop.f32.mrb[54].mxu1 }
 0x339   : > { %v7560_v22 = vadd.f32 %v8634_v19, %v7511_v63  ;;  %v8637_v24 = vadd.f32 %v8636_v21, %v8635_v20  ;;  %v8664_v29 = vpop.f32.mrb[55].mxu1 }
 0x33a   : > { %v8665_v31 = vadd.f32 %v8664_v29, %v8663_v28 }
 0x33b   : > { %v7563_v26 = vadd.f32 %v8637_v24, %v7514_v2  ;;  %v7609_v30 = vadd.f32 %v8662_v27, %v7560_v22 }
 0x33d   : > { %v7612_v32 = vadd.f32 %v8665_v31, %v7563_v26 }
 0x34d   : > { %v8682_v33 = vpop.f32.mrb[56].mxu0 }
 0x34e   : > { %v8710_v34 = vpop.f32.mrb[56].mxu1  ;;  %v8683_v35 = vpop.f32.mrb[57].mxu0 }
 0x34f   : > { %v8711_v36 = vpop.f32.mrb[57].mxu1  ;;  %v8684_v37 = vadd.f32 %v8683_v35, %v8682_v33  ;;  %v8685_v39 = vpop.f32.mrb[58].mxu0 }
 0x350   : > { %v8712_v38 = vadd.f32 %v8711_v36, %v8710_v34  ;;  %v8713_v40 = vpop.f32.mrb[58].mxu1  ;;  %v8686_v41 = vpop.f32.mrb[59].mxu0 }
 0x351   : > { %v8714_v42 = vpop.f32.mrb[59].mxu1  ;;  %v7650_v44 = vadd.f32 %v8684_v37, %v7601_v9  ;;  %v8687_v45 = vadd.f32 %v8686_v41, %v8685_v39  ;;  %v8269_v37 = vld [vmem:[%s4495_s10] ss:$0 sm:$0xff] }
 0x352   : > { %v8715_v46 = vadd.f32 %v8714_v42, %v8713_v40 }
 0x353   : > { %v7699_v47 = vadd.f32 %v8712_v38, %v7650_v44  ;;  %v7653_v48 = vadd.f32 %v8687_v45, %v7604_v16 }
 0x355   : > { %v7702_v49 = vadd.f32 %v8715_v46, %v7653_v48  ;;  %v8688_v50 = vpop.f32.mrb[60].mxu0  ;;  %v7778_v48 = vld [vmem:[%s4458_s13] sm:$0xff] }
 0x356   : > { %v8716_v52 = vpop.f32.mrb[60].mxu1  ;;  %v8689_v53 = vpop.f32.mrb[61].mxu0 }
 0x357   : > { %v8717_v54 = vpop.f32.mrb[61].mxu1  ;;  %v7713_v55 = vadd.f32 %v7702_v49, %v7699_v47  ;;  %v8690_v56 = vadd.f32 %v8689_v53, %v8688_v50  ;;  %v8691_v58 = vpop.f32.mrb[62].mxu0 }
 0x358   : > { %v8718_v57 = vadd.f32 %v8717_v54, %v8716_v52  ;;  %v8719_v59 = vpop.f32.mrb[62].mxu1  ;;  %v8692_v43 = vpop.f32.mrb[63].mxu0 }
 0x359   : > { %v8720_v60 = vpop.f32.mrb[63].mxu1  ;;  %v7658_v61 = vadd.f32 %v8690_v56, %v7609_v30  ;;  %v8693_v62 = vadd.f32 %v8692_v43, %v8691_v58  ;;  %v7746_v30 = vlaneseq }
 0x35a   : > { %v8721_v63 = vadd.f32 %v8720_v60, %v8719_v59  ;;  %v7781_v59 = vld [vmem:[%s4458_s13 + $0x18] sm:$0xff]  ;;  %v7779_v60 = vld [vmem:[%s4458_s13 + $0x8] sm:$0xff] }
 0x35b   : > { %v7707_v1 = vadd.f32 %v8718_v57, %v7658_v61  ;;  %v7661_v2 = vadd.f32 %v8693_v62, %v7612_v32  ;;  %v7747_v31 = vshrl.u32 %v7746_v30, 7  ;;  %v7741_v32 = vld [vmem:[%s4492_s8] sm:$0x1] }
 0x35d   : > { %v7714_v51 = vadd.f32 %v7713_v55, %v7707_v1  ;;  %v7710_v3 = vadd.f32 %v8721_v63, %v7661_v2  ;;  %v7748_v33 = vsub.s32 0, %v7747_v31 }
 0x35f   : > { %v7715_v4 = vadd.f32 %v7714_v51, %v7710_v3 }
 0x361   : > { %v7716_v5 = vrot.slane %v7715_v4, 4 }
 0x363   : > { %v7717_v6 = vadd.f32 %v7716_v5, %v7715_v4 }
 0x365   : > { %v7718_v7 = vrot.slane %v7717_v6, 2 }
 0x367   : > { %v7719_v8 = vadd.f32 %v7718_v7, %v7717_v6 }
 0x369   : > { %v7720_v10 = vrot.slane %v7719_v8, 1 }
 0x36b   : > { %v7721_v0 = vadd.f32 %v7720_v10, %v7719_v8 }
 0x36d   : > { %v7722_v11 = vmul.f32 0.03125, %v7721_v0 }
 0x36f   : > { %v7723_v12 = vsub.f32 %v7699_v47, %v7722_v11  ;;  %v7724_v13 = vsub.f32 %v7702_v49, %v7722_v11  ;;  %v7725_v14 = vsub.f32 %v7707_v1, %v7722_v11  ;;  %v7726_v9 = vsub.f32 %v7710_v3, %v7722_v11  ;;  %v7780_v47 = vld [vmem:[%s4458_s13 + $0x10] sm:$0xff] }
 0x370   : > { %v9037_v3 = vmov (!%p8270_p9), 0.0  }
 0x371   : > { %v7727_v15 = vmul.f32 %v7723_v12, %v7723_v12  ;;  %v7728_v16 = vmul.f32 %v7724_v13, %v7724_v13  ;;  %v7729_v17 = vmul.f32 %v7725_v14, %v7725_v14  ;;  %v7730_v19 = vmul.f32 %v7726_v9, %v7726_v9  ;;  %7799 = vst.msk [vmem:[#allocation2] sm:$0xff] (!%p8270_p9), %vm7798_vm4, %v9037_v3 }
 0x372   : > { %7800 = vst.msk [vmem:[#allocation2 + $0x8] sm:$0xff] (!%p8270_p9), %vm7798_vm4, %v9037_v3  ;;  %7801 = vst.msk [vmem:[#allocation2 + $0x10] sm:$0xff] (!%p8270_p9), %vm7798_vm4, %v9037_v3 }
 0x373   : > { %v7731_v18 = vadd.f32 %v7728_v16, %v7727_v15  ;;  %7802 = vst.msk [vmem:[#allocation2 + $0x18] sm:$0xff] (!%p8270_p9), %vm7798_vm4, %v9037_v3 }
 0x375   : > { %v7732_v20 = vadd.f32 %v7731_v18, %v7729_v17 }
 0x377   : > { %v7733_v21 = vadd.f32 %v7732_v20, %v7730_v19 }
 0x379   : > { %v7734_v22 = vrot.slane %v7733_v21, 4 }
 0x37b   : > { %v7735_v23 = vadd.f32 %v7734_v22, %v7733_v21 }
 0x37d   : > { %v7736_v24 = vrot.slane %v7735_v23, 2 }
 0x37f   : > { %v7737_v25 = vadd.f32 %v7736_v24, %v7735_v23 }
 0x381   : > { %v7738_v26 = vrot.slane %v7737_v25, 1 }
 0x383   : > { %v7739_v27 = vadd.f32 %v7738_v26, %v7737_v25 }
 0x385   : > { %v7740_v28 = vmul.f32 0.03125, %v7739_v27 }
 0x387   : > { %v7742_v29 = vadd.f32 1e-05, %v7740_v28 }
 0x389   : > { %9003 = vrsqrt.f32 %v7742_v29 }
 0x393   : > { %v9004_v34 = vpop.eup %9003 }
 0x394   : > { %v7744_v35 = vmul.f32 %v9004_v34, %v7741_v32 }
 0x396   : > { %v7749_v36 = vrot.slane %v7744_v35, %v7748_v33 }
 0x398   : > { %v7754_v38 = vmul.f32 %v7749_v36, %v7726_v9  ;;  %v7753_v39 = vmul.f32 %v7749_v36, %v7725_v14  ;;  %v7751_v40 = vmul.f32 %v7749_v36, %v7723_v12  ;;  %v7752_v41 = vmul.f32 %v7749_v36, %v7724_v13 }
 0x39a   : > { %v7764_v42 = vadd.f32 %v8269_v37, %v7753_v39  ;;  %v7762_v44 = vadd.f32 %v8269_v37, %v7751_v40  ;;  %v7765_v45 = vadd.f32 %v8269_v37, %v7754_v38  ;;  %v7763_v46 = vadd.f32 %v8269_v37, %v7752_v41 }
 0x39c   : > { %vm7768_vm0 = vcmp.gt.f32.partialorder %v7764_v42, 0.0  ;;  %v7772_v49 = vmul.f32 0.2, %v7764_v42  ;;  %vm7766_vm1 = vcmp.gt.f32.partialorder %v7762_v44, 0.0  ;;  %v7770_v50 = vmul.f32 0.2, %v7762_v44 }
 0x39d   : > { %vm7769_vm2 = vcmp.gt.f32.partialorder %v7765_v45, 0.0  ;;  %v7773_v52 = vmul.f32 0.2, %v7765_v45  ;;  %vm7767_vm3 = vcmp.gt.f32.partialorder %v7763_v46, 0.0  ;;  %v7771_v53 = vmul.f32 0.2, %v7763_v46 }
 0x39e   : > { %v7776_v54 = vsel %vm7768_vm0, %v7764_v42, %v7772_v49  ;;  %v7774_v55 = vsel %vm7766_vm1, %v7762_v44, %v7770_v50 }
 0x39f   : > { %v7784_v56 = vmul.f32 %v7780_v47, %v7776_v54  ;;  %v7782_v57 = vmul.f32 %v7778_v48, %v7774_v55  ;;  %v7777_v58 = vsel %vm7769_vm2, %v7765_v45, %v7773_v52  ;;  %v7775_v43 = vsel %vm7767_vm3, %v7763_v46, %v7771_v53 }
 0x3a0   : > { %v7785_v61 = vmul.f32 %v7781_v59, %v7777_v58  ;;  %v7783_v62 = vmul.f32 %v7779_v60, %v7775_v43 }
 0x3a1   : > { %7790 = vadd.xlane.f32.xlu1 %v7784_v56  ;;  %7786 = vadd.xlane.f32.xlu0 %v7782_v57 }
 0x3a5   : > { %7792 = vadd.xlane.f32.xlu1 %v7785_v61  ;;  %7788 = vadd.xlane.f32.xlu0 %v7783_v62 }
 0x42c   : > { %7797 = sbr.rel (%p8270_p9) target bundleno = 1075 (0x433), region = 138 }
 0x42e   : > { %v7791_v63 = vpop.xlane.xlu1 %7790  ;;  %v7787_v1 = vpop.xlane.xlu0 %7786 }
 0x432   : > { %v7793_v2 = vpop.xlane.xlu1 %7792  ;;  %v7789_v51 = vpop.xlane.xlu0 %7788 }
 0x433 PF: > { %v7803_v4 = vld [vmem:[#allocation2] sm:$0xff]  ;;  %vm7811_vm5 = vcmask 7168   ;;  %v7804_v5 = vld [vmem:[#allocation2 + $0x8] sm:$0xff]  ;;  %v7805_v6 = vld [vmem:[#allocation2 + $0x10] sm:$0xff]  ;;  %p8271_p10 = scmp.ne.s32.totalorder %s9092_s5, 3 }
 0x434   : > { %v7807_v7 = vadd.f32 %v7803_v4, %v7787_v1  ;;  %v7808_v8 = vadd.f32 %v7804_v5, %v7789_v51  ;;  %v7809_v10 = vadd.f32 %v7805_v6, %v7791_v63  ;;  %v7806_v0 = vld [vmem:[#allocation2 + $0x18] sm:$0xff]  ;;  %v7831_v30 = vld [vmem:[#allocation3] sm:$0x1] (!%p8271_p10)  ;;  %vm7839_vm6 = vcmask (!%p8271_p10), 0  }
 0x435   : > { %v7810_v11 = vadd.f32 %v7806_v0, %v7793_v2  ;;  %7819 = sbr.rel (%p8271_p10) target bundleno = 1133 (0x46d), region = 142  ;;  %v7852_v33 = vld [vmem:[#allocation3] sm:$0x1] (!%p8271_p10) }
 0x436   : > { %7812 = vst.msk [vmem:[#allocation2] sm:$0xff] %vm7811_vm5, %v7807_v7  ;;  %7813 = vst.msk [vmem:[#allocation2 + $0x8] sm:$0xff] %vm7811_vm5, %v7808_v8 }
 0x437   : > { %7814 = vst.msk [vmem:[#allocation2 + $0x10] sm:$0xff] %vm7811_vm5, %v7809_v10  ;;  %7815 = vst.msk [vmem:[#allocation2 + $0x18] sm:$0xff] %vm7811_vm5, %v7810_v11 }
 0x43d   : > { %v7820_v12 = vld [vmem:[#allocation2] sm:$0xff]  ;;  %v7821_v13 = vld [vmem:[#allocation2 + $0x8] sm:$0xff] }
 0x43e   : > { %v7822_v14 = vsel %vm7811_vm5, %v7820_v12, 0.0  ;;  %v7823_v9 = vsel %vm7811_vm5, %v7821_v13, 0.0  ;;  %v7841_v15 = vld [vmem:[#allocation2 + $0x10] sm:$0xff]  ;;  %v7842_v16 = vld [vmem:[#allocation2 + $0x18] sm:$0xff] }
 0x43f   : > { %v7824_v17 = vadd.f32 %v7823_v9, %v7822_v14  ;;  %v7843_v18 = vsel %vm7811_vm5, %v7841_v15, 0.0  ;;  %v7844_v19 = vsel %vm7811_vm5, %v7842_v16, 0.0 }
 0x440   : > { %v7845_v20 = vadd.f32 %v7844_v19, %v7843_v18 }
 0x441   : > { %v7825_v21 = vrot.slane %v7824_v17, 4 }
 0x442   : > { %v7846_v22 = vrot.slane %v7845_v20, 4 }
 0x443   : > { %v7826_v23 = vadd.f32 %v7825_v21, %v7824_v17 }
 0x444   : > { %v7847_v24 = vadd.f32 %v7846_v22, %v7845_v20 }
 0x445   : > { %v7827_v25 = vrot.slane %v7826_v23, 2 }
 0x446   : > { %v7848_v26 = vrot.slane %v7847_v24, 2 }
 0x447   : > { %v7828_v27 = vadd.f32 %v7827_v25, %v7826_v23 }
 0x448   : > { %v7849_v28 = vadd.f32 %v7848_v26, %v7847_v24 }
 0x449   : > { %v7829_v29 = vrot.slane %v7828_v27, 1 }
 0x44a   : > { %v7850_v31 = vrot.slane %v7849_v28, 1 }
 0x44b   : > { %v7830_v32 = vadd.f32 %v7829_v29, %v7828_v27 }
 0x44c   : > { %v7851_v34 = vadd.f32 %v7850_v31, %v7849_v28 }
 0x44d   : > { %v7832_v35 = vadd.f32 %v7831_v30, %v7830_v32 }
 0x44e   : > { %v7853_v36 = vadd.f32 %v7852_v33, %v7851_v34 }
 0x44f   : > { %v7833_v37 = vsub.f32 0.0, %v7832_v35 }
 0x450   : > { %v7854_v38 = vsub.f32 0.0, %v7853_v36 }
 0x451   : > { %v7834_v39 = vmul.f32 1.442695, %v7833_v37 }
 0x452   : > { %v7855_v40 = vmul.f32 1.442695, %v7854_v38 }
 0x453   : > { %9005 = vpow2.f32 %v7834_v39 }
 0x454   : > { %9007 = vpow2.f32 %v7855_v40 }
 0x45d   : > { %v9006_v41 = vpop.eup %9005 }
 0x45e   : > { %v9008_v42 = vpop.eup %9007  ;;  %v7836_v44 = vadd.f32 1.0, %v9006_v41 }
 0x45f   : > { %v7857_v45 = vadd.f32 1.0, %v9008_v42 }
 0x460   : > { %9009 = vrcp.f32 %v7836_v44 }
 0x461   : > { %9011 = vrcp.f32 %v7857_v45 }
 0x46a   : > { %v9010_v46 = vpop.eup %9009 }
 0x46b   : > { %v9012_v47 = vpop.eup %9011  ;;  %7840 = vst.msk [vmem:[%s10678_s6] sm:$0x1] %vm7839_vm6, %v9010_v46 }
 0x46c   : > { %7860 = vst.msk [vmem:[%s10678_s6 + $0x1] sm:$0x1] %vm7839_vm6, %v9012_v47 }
 0x46d PF: > { %p15_p11 = scmp.ge.s32.totalorder %s9095_s26, 6   ;;  %s10680_s23 = smov %s9031_s24 }
 0x46e   : > { %s10681_s24 = smov %s9104_s29  ;;  %s10682_s25 = smov %s9095_s26 }
 0x46f   :  { %17 = sbr.rel (!%p15_p11) target bundleno = 5 (0x5), region = 191 }

</bundles_post_ra>
